<compile_context>
chip_gen: v7x
topology: tpu7x:2x2x1
jax: 0.10.0
libtpu: 0.0.40
codegen_flags: <defaults>
</compile_context>

<pallas_src>
import functools

import jax
import jax.numpy as jnp
from jax.experimental import pallas as pl
from jax.experimental.pallas import tpu as pltpu


# --------------------------- hardware-aware config ---------------------------

@functools.lru_cache(maxsize=None)
def _vmem_limit_bytes():
    """<= 3/4 of physical VMEM; valid on v7x (64 MiB) and v5e/v6e (128 MiB)."""
    cap = 0
    try:
        cap = int(getattr(pltpu.get_tpu_info(), "vmem_capacity_bytes", 0))
    except Exception:
        cap = 0
    if cap <= 0:
        cap = 64 * 1024 * 1024          # conservative fallback (v7x-sized)
    return int(cap * 3 // 4)


def _compiler_params(semantics):
    return pltpu.CompilerParams(
        dimension_semantics=semantics,
        vmem_limit_bytes=_vmem_limit_bytes(),
    )


def _pick_tile(dim, preferred):
    for t in preferred:
        if t <= dim and dim % t == 0:
            return t
    return dim


# ------------------------------- fc layer ------------------------------------

def _fc_kernel(z_ref, w_ref, b_ref, o_ref):
    acc = jnp.dot(z_ref[...], w_ref[...], preferred_element_type=jnp.float32)
    o_ref[...] = (acc + b_ref[...]).astype(o_ref.dtype)


def fc_forward(z, w, b, c1):
    """z: (N, latent) -> (N, 4*4*c1) bf16, columns permuted to (y, x, c) order."""
    n, latent = z.shape
    out_dim = w.shape[1]
    hw = 4
    assert out_dim == c1 * hw * hw

    # permute columns (c, y, x) -> (y, x, c) so the output reshapes to NHWC for free
    w_hwc = (w.reshape(latent, c1, hw, hw).transpose(0, 2, 3, 1)
             .reshape(latent, out_dim).astype(jnp.bfloat16))
    b_hwc = (b.reshape(c1, hw, hw).transpose(1, 2, 0)
             .reshape(1, out_dim).astype(jnp.float32))
    z16 = z.astype(jnp.bfloat16)

    tn = _pick_tile(out_dim, (512, 256, 128))
    return pl.pallas_call(
        _fc_kernel,
        out_shape=jax.ShapeDtypeStruct((n, out_dim), jnp.bfloat16),
        grid=(out_dim // tn,),
        in_specs=[
            pl.BlockSpec((n, latent), lambda j: (0, 0)),
            pl.BlockSpec((latent, tn), lambda j: (0, j)),
            pl.BlockSpec((1, tn), lambda j: (0, j)),
        ],
        out_specs=pl.BlockSpec((n, tn), lambda j: (0, j)),
        compiler_params=_compiler_params(("parallel",)),
    )(z16, w_hwc, b_hwc)


# --------------------- sub-pixel transposed-conv layer ------------------------

def _deconv_phase_kernel(x_ref, w_ref, b_ref, o_ref, *, phase_taps, th, wq, tc, act):
    # x_ref: (1, T, th, Wq, Cin)  bf16   (T pre-shifted copies of the input tile)
    # w_ref: (k*k, Cin, tc)       bf16
    # b_ref: (1, tc)              f32
    # o_ref: (1, th, 4, Wq, tc)   phase index = 2*ry + rx
    cin = x_ref.shape[-1]
    bias = b_ref[...]
    for ph, taps in enumerate(phase_taps):
        acc = jnp.zeros((th * wq, tc), jnp.float32)
        for t, widx in taps:                         # static python ints
            xt = x_ref[0, t]                         # (th, Wq, Cin): major-dim index
            acc = acc + jnp.dot(xt.reshape(th * wq, cin), w_ref[widx],
                                preferred_element_type=jnp.float32)
        acc = acc + bias
        if act == "relu":
            acc = jnp.maximum(acc, 0.0)
        else:                                        # "sigmoid"
            acc = jax.nn.sigmoid(acc)
        o_ref[0, :, ph, :, :] = acc.reshape(th, wq, tc).astype(o_ref.dtype)


def conv_transpose_act(x, w_t, b, *, padding, act, out_dtype=jnp.bfloat16,
                       output_padding=1):
    """Sub-pixel (stride-2) ConvTranspose2d + activation.

    x: (N, H, W, Cin) NHWC.  w_t: PyTorch weight (Cin, Cout, kH, kW).
    Returns (N, 2H, 2W, Cout) NHWC.
    """
    stride = 2
    n, hq, wq, cin = x.shape
    cin_w, cout, kh, kw = w_t.shape
    assert cin_w == cin and kh == kw
    k, p = kh, padding
    # output = stride * input exactly (true for all CelebADecoder layers)
    assert 2 * (hq - 1) - 2 * p + k + output_padding == 2 * hq

    # 1-D taps per output phase r: (shift d, kernel index kk), with i = q + d.
    def taps_1d(r):
        return [((r + p - kk) // stride, kk)
                for kk in range(k) if (r + p - kk) % stride == 0]

    row_taps = [taps_1d(r) for r in range(stride)]
    d_vals = sorted({d for taps in row_taps for d, _ in taps})
    nd = len(d_vals)
    pad_lo, pad_hi = max(0, -d_vals[0]), max(0, d_vals[-1])

    # Shifted input copies stacked on a leading (major) axis.  The activations
    # here are tiny (<= 32x32 spatial), so the T<=9 duplication is cheap and it
    # buys zero in-kernel relayouts + halo-free row tiling.
    xp = jnp.pad(x.astype(jnp.bfloat16),
                 ((0, 0), (pad_lo, pad_hi), (pad_lo, pad_hi), (0, 0)))
    shifts = [xp[:, pad_lo + dy: pad_lo + dy + hq,
                 pad_lo + dx: pad_lo + dx + wq, :]
              for dy in d_vals for dx in d_vals]
    x_stack = jnp.stack(shifts, axis=1)              # (N, T, Hq, Wq, Cin)
    t_count = nd * nd

    # static per-phase tap plan: (shift-stack index, flat weight-tap index)
    phase_taps = []
    for ry in range(stride):
        for rx in range(stride):
            phase_taps.append(tuple(
                (d_vals.index(dy) * nd + d_vals.index(dx), ky * k + kx)
                for dy, ky in row_taps[ry] for dx, kx in row_taps[rx]))
    phase_taps = tuple(phase_taps)

    # w_all[ky*k+kx] = W_t[:, :, ky, kx]  -> (Cin, Cout) matmul operand
    w_all = (w_t.transpose(2, 3, 0, 1).reshape(k * k, cin, cout)
             .astype(jnp.bfloat16))
    b2 = b.reshape(1, cout).astype(jnp.float32)

    th = _pick_tile(hq, (8, 4, 2))                   # output-row tile
    tc = _pick_tile(cout, (128,))                    # Cout tile (128 at prod sizes)
    nh, nc = hq // th, cout // tc

    kernel = functools.partial(_deconv_phase_kernel, phase_taps=phase_taps,
                               th=th, wq=wq, tc=tc, act=act)

    out5 = pl.pallas_call(
        kernel,
        out_shape=jax.ShapeDtypeStruct((n, hq, 4, wq, cout), out_dtype),
        grid=(nc, n, nh),                            # cout outermost: weight tile stays resident
        in_specs=[
            pl.BlockSpec((1, t_count, th, wq, cin),
                         lambda co, nb, hi: (nb, 0, hi, 0, 0)),
            pl.BlockSpec((k * k, cin, tc),
                         lambda co, nb, hi: (0, 0, co)),
            pl.BlockSpec((1, tc),
                         lambda co, nb, hi: (0, co)),
        ],
        out_specs=pl.BlockSpec((1, th, 4, wq, tc),
                               lambda co, nb, hi: (nb, hi, 0, 0, co)),
        compiler_params=_compiler_params(("parallel", "parallel", "parallel")),
    )(x_stack, w_all, b2)

    # pixel shuffle: (N, Hq, [ry,rx], Wq, C) -> (N, 2Hq, 2Wq, C).  Cheap XLA
    # shuffle over a compact activation.
    out = (out5.reshape(n, hq, 2, 2, wq, cout)
           .transpose(0, 1, 2, 4, 3, 5)
           .reshape(n, 2 * hq, 2 * wq, cout))
    return out


# ------------------------------ full decoder ---------------------------------

def celeba_decoder(z, params):
    """Pallas forward pass. z: (N, latent). Returns NCHW (N, 3, 16*4, 16*4)."""
    c1 = params["deconv1_w"].shape[0]
    x = fc_forward(z, params["fc_w"], params["fc_b"], c1)       # (N, 16*c1) bf16
    x = x.reshape(z.shape[0], 4, 4, c1)                         # NHWC (free reshape)
    x = conv_transpose_act(x, params["deconv1_w"], params["deconv1_b"],
                           padding=2, act="relu")
    x = conv_transpose_act(x, params["deconv2_w"], params["deconv2_b"],
                           padding=2, act="relu")
    x = conv_transpose_act(x, params["deconv3_w"], params["deconv3_b"],
                           padding=1, act="relu")
    x = conv_transpose_act(x, params["deconv4_w"], params["deconv4_b"],
                           padding=1, act="sigmoid", out_dtype=jnp.float32)
    # TODO(synk): compute the last (Cout=3) layer channels-first so its stores
    # are lane-dense and the NCHW result comes straight out of the kernel.
    return x.transpose(0, 3, 1, 2)                              # NHWC -> NCHW (tiny)


# ------------------------- pure-JAX reference (NCHW) -------------------------

def _conv_transpose_ref(x, w_t, b, stride, padding, output_padding):
    cin, cout, kh, kw = w_t.shape
    w_conv = jnp.flip(w_t, axis=(2, 3)).transpose(1, 0, 2, 3)   # OIHW
    pad_lo = kh - 1 - padding
    pad_hi = kh - 1 - padding + output_padding
    out = jax.lax.conv_general_dilated(
        x, w_conv, window_strides=(1, 1),
        padding=[(pad_lo, pad_hi), (pad_lo, pad_hi)],
        lhs_dilation=(stride, stride),
        dimension_numbers=("NCHW", "OIHW", "NCHW"),
        precision=jax.lax.Precision.HIGHEST)
    return out + b[None, :, None, None]


def decoder_ref(z, params):
    x = z @ params["fc_w"] + params["fc_b"]
    n = x.shape[0]
    c1 = params["deconv1_w"].shape[0]
    x = x.reshape(n, c1, 4, 4)
    x = jax.nn.relu(_conv_transpose_ref(x, params["deconv1_w"], params["deconv1_b"], 2, 2, 1))
    x = jax.nn.relu(_conv_transpose_ref(x, params["deconv2_w"], params["deconv2_b"], 2, 2, 1))
    x = jax.nn.relu(_conv_transpose_ref(x, params["deconv3_w"], params["deconv3_b"], 2, 1, 1))
    x = jax.nn.sigmoid(_conv_transpose_ref(x, params["deconv4_w"], params["deconv4_b"], 2, 1, 1))
    return x


# ------------------------------- params init ---------------------------------

def init_params(key, latent_dim, c1, c2, c3, c4, c_out):
    ks = jax.random.split(key, 10)

    def lin_w(k, fi, fo):
        return jax.random.normal(k, (fi, fo), jnp.float32) / jnp.sqrt(fi)

    def deconv_w(k, cin, cout, kh, kw):
        return jax.random.normal(k, (cin, cout, kh, kw), jnp.float32) / jnp.sqrt(cin * kh * kw)

    return {
        "fc_w": lin_w(ks[0], latent_dim, c1 * 4 * 4),
        "fc_b": 0.01 * jax.random.normal(ks[1], (c1 * 4 * 4,), jnp.float32),
        "deconv1_w": deconv_w(ks[2], c1, c2, 5, 5),
        "deconv1_b": 0.01 * jax.random.normal(ks[3], (c2,), jnp.float32),
        "deconv2_w": deconv_w(ks[4], c2, c3, 5, 5),
        "deconv2_b": 0.01 * jax.random.normal(ks[5], (c3,), jnp.float32),
        "deconv3_w": deconv_w(ks[6], c3, c4, 3, 3),
        "deconv3_b": 0.01 * jax.random.normal(ks[7], (c4,), jnp.float32),
        "deconv4_w": deconv_w(ks[8], c4, c_out, 3, 3),
        "deconv4_b": 0.01 * jax.random.normal(ks[9], (c_out,), jnp.float32),
    }


if __name__ == "__main__":
    # Small shapes with the same structure as CelebADecoder
    # (channels scaled down 16x: 2048->128, 1024->64, 512->32, 256->16, latent 1024->64).
    latent_dim = 64
    c1, c2, c3, c4, c_out = 128, 64, 32, 16, 3
    batch = 2

    key = jax.random.PRNGKey(0)
    pkey, zkey = jax.random.split(key)
    params = init_params(pkey, latent_dim, c1, c2, c3, c4, c_out)
    z = jax.random.normal(zkey, (batch, latent_dim), jnp.float32)

    out = jax.block_until_ready(jax.jit(celeba_decoder)(z, params))
    assert out.shape == (batch, c_out, 64, 64), out.shape

    ref = jax.block_until_ready(jax.jit(decoder_ref)(z, params))
    max_err = float(jnp.max(jnp.abs(out - ref)))
    # bf16 matmuls with f32 accumulation vs. an f32 reference -> loose tolerance.
    if max_err < 4e-2:
        print("KERNEL_OK")
    else:
        raise SystemExit(f"mismatch vs reference: max abs err = {max_err}")
</pallas_src>

<mosaic_0001>
module attributes {stable_mosaic.version = 11 : i64} {
  func.func @_fc_kernel(%arg0: i32, %arg1: memref<2x64xbf16, #tpu.memory_space<vmem>>, %arg2: memref<64x512xbf16, #tpu.memory_space<vmem>>, %arg3: memref<1x512xf32, #tpu.memory_space<vmem>>, %arg4: memref<2x512xbf16, #tpu.memory_space<vmem>>) attributes {dimension_semantics = [#tpu.dimension_semantics<parallel>], iteration_bounds = array<i64: 4>, scalar_prefetch = 0 : i64, scratch_operands = 0 : i64, tpu.core_type = #tpu.core_type<tc>, window_params = [{pipeline_mode = #tpu.pipeline_mode<synchronous>, transform_indices = @transform_0, window_bounds = array<i64: 2, 64>}, {transform_indices = @transform_1, window_bounds = array<i64: 64, 512>}, {transform_indices = @transform_2, window_bounds = array<i64: 1, 512>}, {transform_indices = @transform_3, window_bounds = array<i64: 2, 512>}]} {
    %c0 = arith.constant 0 : index
    %c0_0 = arith.constant 0 : index
    %0 = vector.load %arg1[%c0, %c0_0] : memref<2x64xbf16, #tpu.memory_space<vmem>>, vector<2x64xbf16>
    %c0_1 = arith.constant 0 : index
    %c0_2 = arith.constant 0 : index
    %1 = vector.load %arg2[%c0_1, %c0_2] : memref<64x512xbf16, #tpu.memory_space<vmem>>, vector<64x512xbf16>
    %cst = arith.constant dense<0.000000e+00> : vector<2x512xf32>
    %2 = tpu.matmul %0, %1, %cst {dimension_numbers = #tpu.dot_dimension_numbers<[1], [0], [0], [1], [0, 0, 1, 1], [], []>} : vector<2x64xbf16>, vector<64x512xbf16>, vector<2x512xf32> -> vector<2x512xf32>
    %c0_3 = arith.constant 0 : index
    %c0_4 = arith.constant 0 : index
    %3 = vector.load %arg3[%c0_3, %c0_4] : memref<1x512xf32, #tpu.memory_space<vmem>>, vector<1x512xf32>
    %4 = vector.broadcast %3 : vector<1x512xf32> to vector<2x512xf32>
    %5 = arith.addf %2, %4 : vector<2x512xf32>
    %6 = arith.truncf %5 : vector<2x512xf32> to vector<2x512xbf16>
    %c0_5 = arith.constant 0 : index
    %c0_6 = arith.constant 0 : index
    %7 = vector.load %arg4[%c0_5, %c0_6] : memref<2x512xbf16, #tpu.memory_space<vmem>>, vector<2x512xbf16>
    tpu.vector_store %arg4[%c0_5, %c0_6], %6 {strides = array<i32>} : memref<2x512xbf16, #tpu.memory_space<vmem>>, vector<2x512xbf16>,
    return
  }
  func.func @transform_0(%arg0: i32) -> (i32, i32) {
    %c0_i32 = arith.constant 0 : i32
    %c0_i32_0 = arith.constant 0 : i32
    %c0_i32_1 = arith.constant 0 : i32
    return %c0_i32, %c0_i32_0 : i32, i32
  }
  func.func @transform_1(%arg0: i32) -> (i32, i32) {
    %c0_i32 = arith.constant 0 : i32
    %c0_i32_0 = arith.constant 0 : i32
    return %c0_i32, %arg0 : i32, i32
  }
  func.func @transform_2(%arg0: i32) -> (i32, i32) {
    %c0_i32 = arith.constant 0 : i32
    %c0_i32_0 = arith.constant 0 : i32
    return %c0_i32, %arg0 : i32, i32
  }
  func.func @transform_3(%arg0: i32) -> (i32, i32) {
    %c0_i32 = arith.constant 0 : i32
    %c0_i32_0 = arith.constant 0 : i32
    return %c0_i32, %arg0 : i32, i32
  }
}

module attributes {stable_mosaic.version = 11 : i64} {
  func.func @_deconv_phase_kernel(%arg0: i32, %arg1: i32, %arg2: i32, %arg3: memref<1x9x4x4x128xbf16, #tpu.memory_space<vmem>>, %arg4: memref<25x128x64xbf16, #tpu.memory_space<vmem>>, %arg5: memref<1x64xf32, #tpu.memory_space<vmem>>, %arg6: memref<1x4x4x4x64xbf16, #tpu.memory_space<vmem>>) attributes {dimension_semantics = [#tpu.dimension_semantics<parallel>, #tpu.dimension_semantics<parallel>, #tpu.dimension_semantics<parallel>], iteration_bounds = array<i64: 1, 2, 1>, scalar_prefetch = 0 : i64, scratch_operands = 0 : i64, tpu.core_type = #tpu.core_type<tc>, window_params = [{transform_indices = @transform_0, window_bounds = array<i64: 1, 9, 4, 4, 128>}, {transform_indices = @transform_1, window_bounds = array<i64: 25, 128, 64>}, {transform_indices = @transform_2, window_bounds = array<i64: 1, 64>}, {transform_indices = @transform_3, window_bounds = array<i64: 1, 4, 4, 4, 64>}]} {
    %c0 = arith.constant 0 : index
    %c0_0 = arith.constant 0 : index
    %0 = vector.load %arg5[%c0, %c0_0] : memref<1x64xf32, #tpu.memory_space<vmem>>, vector<1x64xf32>
    %cst = arith.constant 0.000000e+00 : f32
    %1 = vector.broadcast %cst : f32 to vector<16x64xf32>
    %c0_1 = arith.constant 0 : index
    %c8 = arith.constant 8 : index
    %c0_2 = arith.constant 0 : index
    %c0_3 = arith.constant 0 : index
    %c0_4 = arith.constant 0 : index
    %2 = vector.load %arg3[%c0_1, %c8, %c0_2, %c0_3, %c0_4] : memref<1x9x4x4x128xbf16, #tpu.memory_space<vmem>>, vector<1x1x4x4x128xbf16>
    %3 = vector.shape_cast %2 : vector<1x1x4x4x128xbf16> to vector<4x4x128xbf16>
    %4 = vector.shape_cast %3 : vector<4x4x128xbf16> to vector<16x128xbf16>
    %c0_5 = arith.constant 0 : index
    %c0_6 = arith.constant 0 : index
    %c0_7 = arith.constant 0 : index
    %5 = vector.load %arg4[%c0_5, %c0_6, %c0_7] : memref<25x128x64xbf16, #tpu.memory_space<vmem>>, vector<1x128x64xbf16>
    %6 = vector.shape_cast %5 : vector<1x128x64xbf16> to vector<128x64xbf16>
    %cst_8 = arith.constant dense<0.000000e+00> : vector<16x64xf32>
    %7 = tpu.matmul %4, %6, %cst_8 {dimension_numbers = #tpu.dot_dimension_numbers<[1], [0], [0], [1], [0, 0, 1, 1], [], []>} : vector<16x128xbf16>, vector<128x64xbf16>, vector<16x64xf32> -> vector<16x64xf32>
    %8 = arith.addf %1, %7 : vector<16x64xf32>
    %c0_9 = arith.constant 0 : index
    %c7 = arith.constant 7 : index
    %c0_10 = arith.constant 0 : index
    %c0_11 = arith.constant 0 : index
    %c0_12 = arith.constant 0 : index
    %9 = vector.load %arg3[%c0_9, %c7, %c0_10, %c0_11, %c0_12] : memref<1x9x4x4x128xbf16, #tpu.memory_space<vmem>>, vector<1x1x4x4x128xbf16>
    %10 = vector.shape_cast %9 : vector<1x1x4x4x128xbf16> to vector<4x4x128xbf16>
    %11 = vector.shape_cast %10 : vector<4x4x128xbf16> to vector<16x128xbf16>
    %c2 = arith.constant 2 : index
    %c0_13 = arith.constant 0 : index
    %c0_14 = arith.constant 0 : index
    %12 = vector.load %arg4[%c2, %c0_13, %c0_14] : memref<25x128x64xbf16, #tpu.memory_space<vmem>>, vector<1x128x64xbf16>
    %13 = vector.shape_cast %12 : vector<1x128x64xbf16> to vector<128x64xbf16>
    %cst_15 = arith.constant dense<0.000000e+00> : vector<16x64xf32>
    %14 = tpu.matmul %11, %13, %cst_15 {dimension_numbers = #tpu.dot_dimension_numbers<[1], [0], [0], [1], [0, 0, 1, 1], [], []>} : vector<16x128xbf16>, vector<128x64xbf16>, vector<16x64xf32> -> vector<16x64xf32>
    %15 = arith.addf %8, %14 : vector<16x64xf32>
    %c0_16 = arith.constant 0 : index
    %c6 = arith.constant 6 : index
    %c0_17 = arith.constant 0 : index
    %c0_18 = arith.constant 0 : index
    %c0_19 = arith.constant 0 : index
    %16 = vector.load %arg3[%c0_16, %c6, %c0_17, %c0_18, %c0_19] : memref<1x9x4x4x128xbf16, #tpu.memory_space<vmem>>, vector<1x1x4x4x128xbf16>
    %17 = vector.shape_cast %16 : vector<1x1x4x4x128xbf16> to vector<4x4x128xbf16>
    %18 = vector.shape_cast %17 : vector<4x4x128xbf16> to vector<16x128xbf16>
    %c4 = arith.constant 4 : index
    %c0_20 = arith.constant 0 : index
    %c0_21 = arith.constant 0 : index
    %19 = vector.load %arg4[%c4, %c0_20, %c0_21] : memref<25x128x64xbf16, #tpu.memory_space<vmem>>, vector<1x128x64xbf16>
    %20 = vector.shape_cast %19 : vector<1x128x64xbf16> to vector<128x64xbf16>
    %cst_22 = arith.constant dense<0.000000e+00> : vector<16x64xf32>
    %21 = tpu.matmul %18, %20, %cst_22 {dimension_numbers = #tpu.dot_dimension_numbers<[1], [0], [0], [1], [0, 0, 1, 1], [], []>} : vector<16x128xbf16>, vector<128x64xbf16>, vector<16x64xf32> -> vector<16x64xf32>
    %22 = arith.addf %15, %21 : vector<16x64xf32>
    %c0_23 = arith.constant 0 : index
    %c5 = arith.constant 5 : index
    %c0_24 = arith.constant 0 : index
    %c0_25 = arith.constant 0 : index
    %c0_26 = arith.constant 0 : index
    %23 = vector.load %arg3[%c0_23, %c5, %c0_24, %c0_25, %c0_26] : memref<1x9x4x4x128xbf16, #tpu.memory_space<vmem>>, vector<1x1x4x4x128xbf16>
    %24 = vector.shape_cast %23 : vector<1x1x4x4x128xbf16> to vector<4x4x128xbf16>
    %25 = vector.shape_cast %24 : vector<4x4x128xbf16> to vector<16x128xbf16>
    %c10 = arith.constant 10 : index
    %c0_27 = arith.constant 0 : index
    %c0_28 = arith.constant 0 : index
    %26 = vector.load %arg4[%c10, %c0_27, %c0_28] : memref<25x128x64xbf16, #tpu.memory_space<vmem>>, vector<1x128x64xbf16>
    %27 = vector.shape_cast %26 : vector<1x128x64xbf16> to vector<128x64xbf16>
    %cst_29 = arith.constant dense<0.000000e+00> : vector<16x64xf32>
    %28 = tpu.matmul %25, %27, %cst_29 {dimension_numbers = #tpu.dot_dimension_numbers<[1], [0], [0], [1], [0, 0, 1, 1], [], []>} : vector<16x128xbf16>, vector<128x64xbf16>, vector<16x64xf32> -> vector<16x64xf32>
    %29 = arith.addf %22, %28 : vector<16x64xf32>
    %c0_30 = arith.constant 0 : index
    %c4_31 = arith.constant 4 : index
    %c0_32 = arith.constant 0 : index
    %c0_33 = arith.constant 0 : index
    %c0_34 = arith.constant 0 : index
    %30 = vector.load %arg3[%c0_30, %c4_31, %c0_32, %c0_33, %c0_34] : memref<1x9x4x4x128xbf16, #tpu.memory_space<vmem>>, vector<1x1x4x4x128xbf16>
    %31 = vector.shape_cast %30 : vector<1x1x4x4x128xbf16> to vector<4x4x128xbf16>
    %32 = vector.shape_cast %31 : vector<4x4x128xbf16> to vector<16x128xbf16>
    %c12 = arith.constant 12 : index
    %c0_35 = arith.constant 0 : index
    %c0_36 = arith.constant 0 : index
    %33 = vector.load %arg4[%c12, %c0_35, %c0_36] : memref<25x128x64xbf16, #tpu.memory_space<vmem>>, vector<1x128x64xbf16>
    %34 = vector.shape_cast %33 : vector<1x128x64xbf16> to vector<128x64xbf16>
    %cst_37 = arith.constant dense<0.000000e+00> : vector<16x64xf32>
    %35 = tpu.matmul %32, %34, %cst_37 {dimension_numbers = #tpu.dot_dimension_numbers<[1], [0], [0], [1], [0, 0, 1, 1], [], []>} : vector<16x128xbf16>, vector<128x64xbf16>, vector<16x64xf32> -> vector<16x64xf32>
    %36 = arith.addf %29, %35 : vector<16x64xf32>
    %c0_38 = arith.constant 0 : index
    %c3 = arith.constant 3 : index
    %c0_39 = arith.constant 0 : index
    %c0_40 = arith.constant 0 : index
    %c0_41 = arith.constant 0 : index
    %37 = vector.load %arg3[%c0_38, %c3, %c0_39, %c0_40, %c0_41] : memref<1x9x4x4x128xbf16, #tpu.memory_space<vmem>>, vector<1x1x4x4x128xbf16>
    %38 = vector.shape_cast %37 : vector<1x1x4x4x128xbf16> to vector<4x4x128xbf16>
    %39 = vector.shape_cast %38 : vector<4x4x128xbf16> to vector<16x128xbf16>
    %c14 = arith.constant 14 : index
    %c0_42 = arith.constant 0 : index
    %c0_43 = arith.constant 0 : index
    %40 = vector.load %arg4[%c14, %c0_42, %c0_43] : memref<25x128x64xbf16, #tpu.memory_space<vmem>>, vector<1x128x64xbf16>
    %41 = vector.shape_cast %40 : vector<1x128x64xbf16> to vector<128x64xbf16>
    %cst_44 = arith.constant dense<0.000000e+00> : vector<16x64xf32>
    %42 = tpu.matmul %39, %41, %cst_44 {dimension_numbers = #tpu.dot_dimension_numbers<[1], [0], [0], [1], [0, 0, 1, 1], [], []>} : vector<16x128xbf16>, vector<128x64xbf16>, vector<16x64xf32> -> vector<16x64xf32>
    %43 = arith.addf %36, %42 : vector<16x64xf32>
    %c0_45 = arith.constant 0 : index
    %c2_46 = arith.constant 2 : index
    %c0_47 = arith.constant 0 : index
    %c0_48 = arith.constant 0 : index
    %c0_49 = arith.constant 0 : index
    %44 = vector.load %arg3[%c0_45, %c2_46, %c0_47, %c0_48, %c0_49] : memref<1x9x4x4x128xbf16, #tpu.memory_space<vmem>>, vector<1x1x4x4x128xbf16>
    %45 = vector.shape_cast %44 : vector<1x1x4x4x128xbf16> to vector<4x4x128xbf16>
    %46 = vector.shape_cast %45 : vector<4x4x128xbf16> to vector<16x128xbf16>
    %c20 = arith.constant 20 : index
    %c0_50 = arith.constant 0 : index
    %c0_51 = arith.constant 0 : index
    %47 = vector.load %arg4[%c20, %c0_50, %c0_51] : memref<25x128x64xbf16, #tpu.memory_space<vmem>>, vector<1x128x64xbf16>
    %48 = vector.shape_cast %47 : vector<1x128x64xbf16> to vector<128x64xbf16>
    %cst_52 = arith.constant dense<0.000000e+00> : vector<16x64xf32>
    %49 = tpu.matmul %46, %48, %cst_52 {dimension_numbers = #tpu.dot_dimension_numbers<[1], [0], [0], [1], [0, 0, 1, 1], [], []>} : vector<16x128xbf16>, vector<128x64xbf16>, vector<16x64xf32> -> vector<16x64xf32>
    %50 = arith.addf %43, %49 : vector<16x64xf32>
    %c0_53 = arith.constant 0 : index
    %c1 = arith.constant 1 : index
    %c0_54 = arith.constant 0 : index
    %c0_55 = arith.constant 0 : index
    %c0_56 = arith.constant 0 : index
    %51 = vector.load %arg3[%c0_53, %c1, %c0_54, %c0_55, %c0_56] : memref<1x9x4x4x128xbf16, #tpu.memory_space<vmem>>, vector<1x1x4x4x128xbf16>
    %52 = vector.shape_cast %51 : vector<1x1x4x4x128xbf16> to vector<4x4x128xbf16>
    %53 = vector.shape_cast %52 : vector<4x4x128xbf16> to vector<16x128xbf16>
    %c22 = arith.constant 22 : index
    %c0_57 = arith.constant 0 : index
    %c0_58 = arith.constant 0 : index
    %54 = vector.load %arg4[%c22, %c0_57, %c0_58] : memref<25x128x64xbf16, #tpu.memory_space<vmem>>, vector<1x128x64xbf16>
    %55 = vector.shape_cast %54 : vector<1x128x64xbf16> to vector<128x64xbf16>
    %cst_59 = arith.constant dense<0.000000e+00> : vector<16x64xf32>
    %56 = tpu.matmul %53, %55, %cst_59 {dimension_numbers = #tpu.dot_dimension_numbers<[1], [0], [0], [1], [0, 0, 1, 1], [], []>} : vector<16x128xbf16>, vector<128x64xbf16>, vector<16x64xf32> -> vector<16x64xf32>
    %57 = arith.addf %50, %56 : vector<16x64xf32>
    %c0_60 = arith.constant 0 : index
    %c0_61 = arith.constant 0 : index
    %c0_62 = arith.constant 0 : index
    %c0_63 = arith.constant 0 : index
    %c0_64 = arith.constant 0 : index
    %58 = vector.load %arg3[%c0_60, %c0_61, %c0_62, %c0_63, %c0_64] : memref<1x9x4x4x128xbf16, #tpu.memory_space<vmem>>, vector<1x1x4x4x128xbf16>
    %59 = vector.shape_cast %58 : vector<1x1x4x4x128xbf16> to vector<4x4x128xbf16>
    %60 = vector.shape_cast %59 : vector<4x4x128xbf16> to vector<16x128xbf16>
    %c24 = arith.constant 24 : index
    %c0_65 = arith.constant 0 : index
    %c0_66 = arith.constant 0 : index
    %61 = vector.load %arg4[%c24, %c0_65, %c0_66] : memref<25x128x64xbf16, #tpu.memory_space<vmem>>, vector<1x128x64xbf16>
    %62 = vector.shape_cast %61 : vector<1x128x64xbf16> to vector<128x64xbf16>
    %cst_67 = arith.constant dense<0.000000e+00> : vector<16x64xf32>
    %63 = tpu.matmul %60, %62, %cst_67 {dimension_numbers = #tpu.dot_dimension_numbers<[1], [0], [0], [1], [0, 0, 1, 1], [], []>} : vector<16x128xbf16>, vector<128x64xbf16>, vector<16x64xf32> -> vector<16x64xf32>
    %64 = arith.addf %57, %63 : vector<16x64xf32>
    %65 = vector.broadcast %0 : vector<1x64xf32> to vector<16x64xf32>
    %66 = arith.addf %64, %65 : vector<16x64xf32>
    %cst_68 = arith.constant 0.000000e+00 : f32
    %67 = vector.broadcast %cst_68 : f32 to vector<16x64xf32>
    %68 = arith.maximumf %66, %67 : vector<16x64xf32>
    %69 = vector.shape_cast %68 : vector<16x64xf32> to vector<4x4x64xf32>
    %70 = arith.truncf %69 : vector<4x4x64xf32> to vector<4x4x64xbf16>
    %c0_69 = arith.constant 0 : index
    %c0_70 = arith.constant 0 : index
    %c0_71 = arith.constant 0 : index
    %c0_72 = arith.constant 0 : index
    %c0_73 = arith.constant 0 : index
    %71 = vector.load %arg6[%c0_69, %c0_70, %c0_71, %c0_72, %c0_73] : memref<1x4x4x4x64xbf16, #tpu.memory_space<vmem>>, vector<1x4x1x4x64xbf16>
    %72 = vector.shape_cast %71 : vector<1x4x1x4x64xbf16> to vector<4x4x64xbf16>
    %73 = vector.shape_cast %70 : vector<4x4x64xbf16> to vector<1x4x1x4x64xbf16>
    tpu.vector_store %arg6[%c0_69, %c0_70, %c0_71, %c0_72, %c0_73], %73 {strides = array<i32>} : memref<1x4x4x4x64xbf16, #tpu.memory_space<vmem>>, vector<1x4x1x4x64xbf16>,
    %cst_74 = arith.constant 0.000000e+00 : f32
    %74 = vector.broadcast %cst_74 : f32 to vector<16x64xf32>
    %c0_75 = arith.constant 0 : index
    %c8_76 = arith.constant 8 : index
    %c0_77 = arith.constant 0 : index
    %c0_78 = arith.constant 0 : index
    %c0_79 = arith.constant 0 : index
    %75 = vector.load %arg3[%c0_75, %c8_76, %c0_77, %c0_78, %c0_79] : memref<1x9x4x4x128xbf16, #tpu.memory_space<vmem>>, vector<1x1x4x4x128xbf16>
    %76 = vector.shape_cast %75 : vector<1x1x4x4x128xbf16> to vector<4x4x128xbf16>
    %77 = vector.shape_cast %76 : vector<4x4x128xbf16> to vector<16x128xbf16>
    %c1_80 = arith.constant 1 : index
    %c0_81 = arith.constant 0 : index
    %c0_82 = arith.constant 0 : index
    %78 = vector.load %arg4[%c1_80, %c0_81, %c0_82] : memref<25x128x64xbf16, #tpu.memory_space<vmem>>, vector<1x128x64xbf16>
    %79 = vector.shape_cast %78 : vector<1x128x64xbf16> to vector<128x64xbf16>
    %cst_83 = arith.constant dense<0.000000e+00> : vector<16x64xf32>
    %80 = tpu.matmul %77, %79, %cst_83 {dimension_numbers = #tpu.dot_dimension_numbers<[1], [0], [0], [1], [0, 0, 1, 1], [], []>} : vector<16x128xbf16>, vector<128x64xbf16>, vector<16x64xf32> -> vector<16x64xf32>
    %81 = arith.addf %74, %80 : vector<16x64xf32>
    %c0_84 = arith.constant 0 : index
    %c7_85 = arith.constant 7 : index
    %c0_86 = arith.constant 0 : index
    %c0_87 = arith.constant 0 : index
    %c0_88 = arith.constant 0 : index
    %82 = vector.load %arg3[%c0_84, %c7_85, %c0_86, %c0_87, %c0_88] : memref<1x9x4x4x128xbf16, #tpu.memory_space<vmem>>, vector<1x1x4x4x128xbf16>
    %83 = vector.shape_cast %82 : vector<1x1x4x4x128xbf16> to vector<4x4x128xbf16>
    %84 = vector.shape_cast %83 : vector<4x4x128xbf16> to vector<16x128xbf16>
    %c3_89 = arith.constant 3 : index
    %c0_90 = arith.constant 0 : index
    %c0_91 = arith.constant 0 : index
    %85 = vector.load %arg4[%c3_89, %c0_90, %c0_91] : memref<25x128x64xbf16, #tpu.memory_space<vmem>>, vector<1x128x64xbf16>
    %86 = vector.shape_cast %85 : vector<1x128x64xbf16> to vector<128x64xbf16>
    %cst_92 = arith.constant dense<0.000000e+00> : vector<16x64xf32>
    %87 = tpu.matmul %84, %86, %cst_92 {dimension_numbers = #tpu.dot_dimension_numbers<[1], [0], [0], [1], [0, 0, 1, 1], [], []>} : vector<16x128xbf16>, vector<128x64xbf16>, vector<16x64xf32> -> vector<16x64xf32>
    %88 = arith.addf %81, %87 : vector<16x64xf32>
    %c0_93 = arith.constant 0 : index
    %c5_94 = arith.constant 5 : index
    %c0_95 = arith.constant 0 : index
    %c0_96 = arith.constant 0 : index
    %c0_97 = arith.constant 0 : index
    %89 = vector.load %arg3[%c0_93, %c5_94, %c0_95, %c0_96, %c0_97] : memref<1x9x4x4x128xbf16, #tpu.memory_space<vmem>>, vector<1x1x4x4x128xbf16>
    %90 = vector.shape_cast %89 : vector<1x1x4x4x128xbf16> to vector<4x4x128xbf16>
    %91 = vector.shape_cast %90 : vector<4x4x128xbf16> to vector<16x128xbf16>
    %c11 = arith.constant 11 : index
    %c0_98 = arith.constant 0 : index
    %c0_99 = arith.constant 0 : index
    %92 = vector.load %arg4[%c11, %c0_98, %c0_99] : memref<25x128x64xbf16, #tpu.memory_space<vmem>>, vector<1x128x64xbf16>
    %93 = vector.shape_cast %92 : vector<1x128x64xbf16> to vector<128x64xbf16>
    %cst_100 = arith.constant dense<0.000000e+00> : vector<16x64xf32>
    %94 = tpu.matmul %91, %93, %cst_100 {dimension_numbers = #tpu.dot_dimension_numbers<[1], [0], [0], [1], [0, 0, 1, 1], [], []>} : vector<16x128xbf16>, vector<128x64xbf16>, vector<16x64xf32> -> vector<16x64xf32>
    %95 = arith.addf %88, %94 : vector<16x64xf32>
    %c0_101 = arith.constant 0 : index
    %c4_102 = arith.constant 4 : index
    %c0_103 = arith.constant 0 : index
    %c0_104 = arith.constant 0 : index
    %c0_105 = arith.constant 0 : index
    %96 = vector.load %arg3[%c0_101, %c4_102, %c0_103, %c0_104, %c0_105] : memref<1x9x4x4x128xbf16, #tpu.memory_space<vmem>>, vector<1x1x4x4x128xbf16>
    %97 = vector.shape_cast %96 : vector<1x1x4x4x128xbf16> to vector<4x4x128xbf16>
    %98 = vector.shape_cast %97 : vector<4x4x128xbf16> to vector<16x128xbf16>
    %c13 = arith.constant 13 : index
    %c0_106 = arith.constant 0 : index
    %c0_107 = arith.constant 0 : index
    %99 = vector.load %arg4[%c13, %c0_106, %c0_107] : memref<25x128x64xbf16, #tpu.memory_space<vmem>>, vector<1x128x64xbf16>
    %100 = vector.shape_cast %99 : vector<1x128x64xbf16> to vector<128x64xbf16>
    %cst_108 = arith.constant dense<0.000000e+00> : vector<16x64xf32>
    %101 = tpu.matmul %98, %100, %cst_108 {dimension_numbers = #tpu.dot_dimension_numbers<[1], [0], [0], [1], [0, 0, 1, 1], [], []>} : vector<16x128xbf16>, vector<128x64xbf16>, vector<16x64xf32> -> vector<16x64xf32>
    %102 = arith.addf %95, %101 : vector<16x64xf32>
    %c0_109 = arith.constant 0 : index
    %c2_110 = arith.constant 2 : index
    %c0_111 = arith.constant 0 : index
    %c0_112 = arith.constant 0 : index
    %c0_113 = arith.constant 0 : index
    %103 = vector.load %arg3[%c0_109, %c2_110, %c0_111, %c0_112, %c0_113] : memref<1x9x4x4x128xbf16, #tpu.memory_space<vmem>>, vector<1x1x4x4x128xbf16>
    %104 = vector.shape_cast %103 : vector<1x1x4x4x128xbf16> to vector<4x4x128xbf16>
    %105 = vector.shape_cast %104 : vector<4x4x128xbf16> to vector<16x128xbf16>
    %c21 = arith.constant 21 : index
    %c0_114 = arith.constant 0 : index
    %c0_115 = arith.constant 0 : index
    %106 = vector.load %arg4[%c21, %c0_114, %c0_115] : memref<25x128x64xbf16, #tpu.memory_space<vmem>>, vector<1x128x64xbf16>
    %107 = vector.shape_cast %106 : vector<1x128x64xbf16> to vector<128x64xbf16>
    %cst_116 = arith.constant dense<0.000000e+00> : vector<16x64xf32>
    %108 = tpu.matmul %105, %107, %cst_116 {dimension_numbers = #tpu.dot_dimension_numbers<[1], [0], [0], [1], [0, 0, 1, 1], [], []>} : vector<16x128xbf16>, vector<128x64xbf16>, vector<16x64xf32> -> vector<16x64xf32>
    %109 = arith.addf %102, %108 : vector<16x64xf32>
    %c0_117 = arith.constant 0 : index
    %c1_118 = arith.constant 1 : index
    %c0_119 = arith.constant 0 : index
    %c0_120 = arith.constant 0 : index
    %c0_121 = arith.constant 0 : index
    %110 = vector.load %arg3[%c0_117, %c1_118, %c0_119, %c0_120, %c0_121] : memref<1x9x4x4x128xbf16, #tpu.memory_space<vmem>>, vector<1x1x4x4x128xbf16>
    %111 = vector.shape_cast %110 : vector<1x1x4x4x128xbf16> to vector<4x4x128xbf16>
    %112 = vector.shape_cast %111 : vector<4x4x128xbf16> to vector<16x128xbf16>
    %c23 = arith.constant 23 : index
    %c0_122 = arith.constant 0 : index
    %c0_123 = arith.constant 0 : index
    %113 = vector.load %arg4[%c23, %c0_122, %c0_123] : memref<25x128x64xbf16, #tpu.memory_space<vmem>>, vector<1x128x64xbf16>
    %114 = vector.shape_cast %113 : vector<1x128x64xbf16> to vector<128x64xbf16>
    %cst_124 = arith.constant dense<0.000000e+00> : vector<16x64xf32>
    %115 = tpu.matmul %112, %114, %cst_124 {dimension_numbers = #tpu.dot_dimension_numbers<[1], [0], [0], [1], [0, 0, 1, 1], [], []>} : vector<16x128xbf16>, vector<128x64xbf16>, vector<16x64xf32> -> vector<16x64xf32>
    %116 = arith.addf %109, %115 : vector<16x64xf32>
    %117 = vector.broadcast %0 : vector<1x64xf32> to vector<16x64xf32>
    %118 = arith.addf %116, %117 : vector<16x64xf32>
    %cst_125 = arith.constant 0.000000e+00 : f32
    %119 = vector.broadcast %cst_125 : f32 to vector<16x64xf32>
    %120 = arith.maximumf %118, %119 : vector<16x64xf32>
    %121 = vector.shape_cast %120 : vector<16x64xf32> to vector<4x4x64xf32>
    %122 = arith.truncf %121 : vector<4x4x64xf32> to vector<4x4x64xbf16>
    %c0_126 = arith.constant 0 : index
    %c0_127 = arith.constant 0 : index
    %c1_128 = arith.constant 1 : index
    %c0_129 = arith.constant 0 : index
    %c0_130 = arith.constant 0 : index
    %123 = vector.load %arg6[%c0_126, %c0_127, %c1_128, %c0_129, %c0_130] : memref<1x4x4x4x64xbf16, #tpu.memory_space<vmem>>, vector<1x4x1x4x64xbf16>
    %124 = vector.shape_cast %123 : vector<1x4x1x4x64xbf16> to vector<4x4x64xbf16>
    %125 = vector.shape_cast %122 : vector<4x4x64xbf16> to vector<1x4x1x4x64xbf16>
    tpu.vector_store %arg6[%c0_126, %c0_127, %c1_128, %c0_129, %c0_130], %125 {strides = array<i32>} : memref<1x4x4x4x64xbf16, #tpu.memory_space<vmem>>, vector<1x4x1x4x64xbf16>,
    %cst_131 = arith.constant 0.000000e+00 : f32
    %126 = vector.broadcast %cst_131 : f32 to vector<16x64xf32>
    %c0_132 = arith.constant 0 : index
    %c8_133 = arith.constant 8 : index
    %c0_134 = arith.constant 0 : index
    %c0_135 = arith.constant 0 : index
    %c0_136 = arith.constant 0 : index
    %127 = vector.load %arg3[%c0_132, %c8_133, %c0_134, %c0_135, %c0_136] : memref<1x9x4x4x128xbf16, #tpu.memory_space<vmem>>, vector<1x1x4x4x128xbf16>
    %128 = vector.shape_cast %127 : vector<1x1x4x4x128xbf16> to vector<4x4x128xbf16>
    %129 = vector.shape_cast %128 : vector<4x4x128xbf16> to vector<16x128xbf16>
    %c5_137 = arith.constant 5 : index
    %c0_138 = arith.constant 0 : index
    %c0_139 = arith.constant 0 : index
    %130 = vector.load %arg4[%c5_137, %c0_138, %c0_139] : memref<25x128x64xbf16, #tpu.memory_space<vmem>>, vector<1x128x64xbf16>
    %131 = vector.shape_cast %130 : vector<1x128x64xbf16> to vector<128x64xbf16>
    %cst_140 = arith.constant dense<0.000000e+00> : vector<16x64xf32>
    %132 = tpu.matmul %129, %131, %cst_140 {dimension_numbers = #tpu.dot_dimension_numbers<[1], [0], [0], [1], [0, 0, 1, 1], [], []>} : vector<16x128xbf16>, vector<128x64xbf16>, vector<16x64xf32> -> vector<16x64xf32>
    %133 = arith.addf %126, %132 : vector<16x64xf32>
    %c0_141 = arith.constant 0 : index
    %c7_142 = arith.constant 7 : index
    %c0_143 = arith.constant 0 : index
    %c0_144 = arith.constant 0 : index
    %c0_145 = arith.constant 0 : index
    %134 = vector.load %arg3[%c0_141, %c7_142, %c0_143, %c0_144, %c0_145] : memref<1x9x4x4x128xbf16, #tpu.memory_space<vmem>>, vector<1x1x4x4x128xbf16>
    %135 = vector.shape_cast %134 : vector<1x1x4x4x128xbf16> to vector<4x4x128xbf16>
    %136 = vector.shape_cast %135 : vector<4x4x128xbf16> to vector<16x128xbf16>
    %c7_146 = arith.constant 7 : index
    %c0_147 = arith.constant 0 : index
    %c0_148 = arith.constant 0 : index
    %137 = vector.load %arg4[%c7_146, %c0_147, %c0_148] : memref<25x128x64xbf16, #tpu.memory_space<vmem>>, vector<1x128x64xbf16>
    %138 = vector.shape_cast %137 : vector<1x128x64xbf16> to vector<128x64xbf16>
    %cst_149 = arith.constant dense<0.000000e+00> : vector<16x64xf32>
    %139 = tpu.matmul %136, %138, %cst_149 {dimension_numbers = #tpu.dot_dimension_numbers<[1], [0], [0], [1], [0, 0, 1, 1], [], []>} : vector<16x128xbf16>, vector<128x64xbf16>, vector<16x64xf32> -> vector<16x64xf32>
    %140 = arith.addf %133, %139 : vector<16x64xf32>
    %c0_150 = arith.constant 0 : index
    %c6_151 = arith.constant 6 : index
    %c0_152 = arith.constant 0 : index
    %c0_153 = arith.constant 0 : index
    %c0_154 = arith.constant 0 : index
    %141 = vector.load %arg3[%c0_150, %c6_151, %c0_152, %c0_153, %c0_154] : memref<1x9x4x4x128xbf16, #tpu.memory_space<vmem>>, vector<1x1x4x4x128xbf16>
    %142 = vector.shape_cast %141 : vector<1x1x4x4x128xbf16> to vector<4x4x128xbf16>
    %143 = vector.shape_cast %142 : vector<4x4x128xbf16> to vector<16x128xbf16>
    %c9 = arith.constant 9 : index
    %c0_155 = arith.constant 0 : index
    %c0_156 = arith.constant 0 : index
    %144 = vector.load %arg4[%c9, %c0_155, %c0_156] : memref<25x128x64xbf16, #tpu.memory_space<vmem>>, vector<1x128x64xbf16>
    %145 = vector.shape_cast %144 : vector<1x128x64xbf16> to vector<128x64xbf16>
    %cst_157 = arith.constant dense<0.000000e+00> : vector<16x64xf32>
    %146 = tpu.matmul %143, %145, %cst_157 {dimension_numbers = #tpu.dot_dimension_numbers<[1], [0], [0], [1], [0, 0, 1, 1], [], []>} : vector<16x128xbf16>, vector<128x64xbf16>, vector<16x64xf32> -> vector<16x64xf32>
    %147 = arith.addf %140, %146 : vector<16x64xf32>
    %c0_158 = arith.constant 0 : index
    %c5_159 = arith.constant 5 : index
    %c0_160 = arith.constant 0 : index
    %c0_161 = arith.constant 0 : index
    %c0_162 = arith.constant 0 : index
    %148 = vector.load %arg3[%c0_158, %c5_159, %c0_160, %c0_161, %c0_162] : memref<1x9x4x4x128xbf16, #tpu.memory_space<vmem>>, vector<1x1x4x4x128xbf16>
    %149 = vector.shape_cast %148 : vector<1x1x4x4x128xbf16> to vector<4x4x128xbf16>
    %150 = vector.shape_cast %149 : vector<4x4x128xbf16> to vector<16x128xbf16>
    %c15 = arith.constant 15 : index
    %c0_163 = arith.constant 0 : index
    %c0_164 = arith.constant 0 : index
    %151 = vector.load %arg4[%c15, %c0_163, %c0_164] : memref<25x128x64xbf16, #tpu.memory_space<vmem>>, vector<1x128x64xbf16>
    %152 = vector.shape_cast %151 : vector<1x128x64xbf16> to vector<128x64xbf16>
    %cst_165 = arith.constant dense<0.000000e+00> : vector<16x64xf32>
    %153 = tpu.matmul %150, %152, %cst_165 {dimension_numbers = #tpu.dot_dimension_numbers<[1], [0], [0], [1], [0, 0, 1, 1], [], []>} : vector<16x128xbf16>, vector<128x64xbf16>, vector<16x64xf32> -> vector<16x64xf32>
    %154 = arith.addf %147, %153 : vector<16x64xf32>
    %c0_166 = arith.constant 0 : index
    %c4_167 = arith.constant 4 : index
    %c0_168 = arith.constant 0 : index
    %c0_169 = arith.constant 0 : index
    %c0_170 = arith.constant 0 : index
    %155 = vector.load %arg3[%c0_166, %c4_167, %c0_168, %c0_169, %c0_170] : memref<1x9x4x4x128xbf16, #tpu.memory_space<vmem>>, vector<1x1x4x4x128xbf16>
    %156 = vector.shape_cast %155 : vector<1x1x4x4x128xbf16> to vector<4x4x128xbf16>
    %157 = vector.shape_cast %156 : vector<4x4x128xbf16> to vector<16x128xbf16>
    %c17 = arith.constant 17 : index
    %c0_171 = arith.constant 0 : index
    %c0_172 = arith.constant 0 : index
    %158 = vector.load %arg4[%c17, %c0_171, %c0_172] : memref<25x128x64xbf16, #tpu.memory_space<vmem>>, vector<1x128x64xbf16>
    %159 = vector.shape_cast %158 : vector<1x128x64xbf16> to vector<128x64xbf16>
    %cst_173 = arith.constant dense<0.000000e+00> : vector<16x64xf32>
    %160 = tpu.matmul %157, %159, %cst_173 {dimension_numbers = #tpu.dot_dimension_numbers<[1], [0], [0], [1], [0, 0, 1, 1], [], []>} : vector<16x128xbf16>, vector<128x64xbf16>, vector<16x64xf32> -> vector<16x64xf32>
    %161 = arith.addf %154, %160 : vector<16x64xf32>
    %c0_174 = arith.constant 0 : index
    %c3_175 = arith.constant 3 : index
    %c0_176 = arith.constant 0 : index
    %c0_177 = arith.constant 0 : index
    %c0_178 = arith.constant 0 : index
    %162 = vector.load %arg3[%c0_174, %c3_175, %c0_176, %c0_177, %c0_178] : memref<1x9x4x4x128xbf16, #tpu.memory_space<vmem>>, vector<1x1x4x4x128xbf16>
    %163 = vector.shape_cast %162 : vector<1x1x4x4x128xbf16> to vector<4x4x128xbf16>
    %164 = vector.shape_cast %163 : vector<4x4x128xbf16> to vector<16x128xbf16>
    %c19 = arith.constant 19 : index
    %c0_179 = arith.constant 0 : index
    %c0_180 = arith.constant 0 : index
    %165 = vector.load %arg4[%c19, %c0_179, %c0_180] : memref<25x128x64xbf16, #tpu.memory_space<vmem>>, vector<1x128x64xbf16>
    %166 = vector.shape_cast %165 : vector<1x128x64xbf16> to vector<128x64xbf16>
    %cst_181 = arith.constant dense<0.000000e+00> : vector<16x64xf32>
    %167 = tpu.matmul %164, %166, %cst_181 {dimension_numbers = #tpu.dot_dimension_numbers<[1], [0], [0], [1], [0, 0, 1, 1], [], []>} : vector<16x128xbf16>, vector<128x64xbf16>, vector<16x64xf32> -> vector<16x64xf32>
    %168 = arith.addf %161, %167 : vector<16x64xf32>
    %169 = vector.broadcast %0 : vector<1x64xf32> to vector<16x64xf32>
    %170 = arith.addf %168, %169 : vector<16x64xf32>
    %cst_182 = arith.constant 0.000000e+00 : f32
    %171 = vector.broadcast %cst_182 : f32 to vector<16x64xf32>
    %172 = arith.maximumf %170, %171 : vector<16x64xf32>
    %173 = vector.shape_cast %172 : vector<16x64xf32> to vector<4x4x64xf32>
    %174 = arith.truncf %173 : vector<4x4x64xf32> to vector<4x4x64xbf16>
    %c0_183 = arith.constant 0 : index
    %c0_184 = arith.constant 0 : index
    %c2_185 = arith.constant 2 : index
    %c0_186 = arith.constant 0 : index
    %c0_187 = arith.constant 0 : index
    %175 = vector.load %arg6[%c0_183, %c0_184, %c2_185, %c0_186, %c0_187] : memref<1x4x4x4x64xbf16, #tpu.memory_space<vmem>>, vector<1x4x1x4x64xbf16>
    %176 = vector.shape_cast %175 : vector<1x4x1x4x64xbf16> to vector<4x4x64xbf16>
    %177 = vector.shape_cast %174 : vector<4x4x64xbf16> to vector<1x4x1x4x64xbf16>
    tpu.vector_store %arg6[%c0_183, %c0_184, %c2_185, %c0_186, %c0_187], %177 {strides = array<i32>} : memref<1x4x4x4x64xbf16, #tpu.memory_space<vmem>>, vector<1x4x1x4x64xbf16>,
    %cst_188 = arith.constant 0.000000e+00 : f32
    %178 = vector.broadcast %cst_188 : f32 to vector<16x64xf32>
    %c0_189 = arith.constant 0 : index
    %c8_190 = arith.constant 8 : index
    %c0_191 = arith.constant 0 : index
    %c0_192 = arith.constant 0 : index
    %c0_193 = arith.constant 0 : index
    %179 = vector.load %arg3[%c0_189, %c8_190, %c0_191, %c0_192, %c0_193] : memref<1x9x4x4x128xbf16, #tpu.memory_space<vmem>>, vector<1x1x4x4x128xbf16>
    %180 = vector.shape_cast %179 : vector<1x1x4x4x128xbf16> to vector<4x4x128xbf16>
    %181 = vector.shape_cast %180 : vector<4x4x128xbf16> to vector<16x128xbf16>
    %c6_194 = arith.constant 6 : index
    %c0_195 = arith.constant 0 : index
    %c0_196 = arith.constant 0 : index
    %182 = vector.load %arg4[%c6_194, %c0_195, %c0_196] : memref<25x128x64xbf16, #tpu.memory_space<vmem>>, vector<1x128x64xbf16>
    %183 = vector.shape_cast %182 : vector<1x128x64xbf16> to vector<128x64xbf16>
    %cst_197 = arith.constant dense<0.000000e+00> : vector<16x64xf32>
    %184 = tpu.matmul %181, %183, %cst_197 {dimension_numbers = #tpu.dot_dimension_numbers<[1], [0], [0], [1], [0, 0, 1, 1], [], []>} : vector<16x128xbf16>, vector<128x64xbf16>, vector<16x64xf32> -> vector<16x64xf32>
    %185 = arith.addf %178, %184 : vector<16x64xf32>
    %c0_198 = arith.constant 0 : index
    %c7_199 = arith.constant 7 : index
    %c0_200 = arith.constant 0 : index
    %c0_201 = arith.constant 0 : index
    %c0_202 = arith.constant 0 : index
    %186 = vector.load %arg3[%c0_198, %c7_199, %c0_200, %c0_201, %c0_202] : memref<1x9x4x4x128xbf16, #tpu.memory_space<vmem>>, vector<1x1x4x4x128xbf16>
    %187 = vector.shape_cast %186 : vector<1x1x4x4x128xbf16> to vector<4x4x128xbf16>
    %188 = vector.shape_cast %187 : vector<4x4x128xbf16> to vector<16x128xbf16>
    %c8_203 = arith.constant 8 : index
    %c0_204 = arith.constant 0 : index
    %c0_205 = arith.constant 0 : index
    %189 = vector.load %arg4[%c8_203, %c0_204, %c0_205] : memref<25x128x64xbf16, #tpu.memory_space<vmem>>, vector<1x128x64xbf16>
    %190 = vector.shape_cast %189 : vector<1x128x64xbf16> to vector<128x64xbf16>
    %cst_206 = arith.constant dense<0.000000e+00> : vector<16x64xf32>
    %191 = tpu.matmul %188, %190, %cst_206 {dimension_numbers = #tpu.dot_dimension_numbers<[1], [0], [0], [1], [0, 0, 1, 1], [], []>} : vector<16x128xbf16>, vector<128x64xbf16>, vector<16x64xf32> -> vector<16x64xf32>
    %192 = arith.addf %185, %191 : vector<16x64xf32>
    %c0_207 = arith.constant 0 : index
    %c5_208 = arith.constant 5 : index
    %c0_209 = arith.constant 0 : index
    %c0_210 = arith.constant 0 : index
    %c0_211 = arith.constant 0 : index
    %193 = vector.load %arg3[%c0_207, %c5_208, %c0_209, %c0_210, %c0_211] : memref<1x9x4x4x128xbf16, #tpu.memory_space<vmem>>, vector<1x1x4x4x128xbf16>
    %194 = vector.shape_cast %193 : vector<1x1x4x4x128xbf16> to vector<4x4x128xbf16>
    %195 = vector.shape_cast %194 : vector<4x4x128xbf16> to vector<16x128xbf16>
    %c16 = arith.constant 16 : index
    %c0_212 = arith.constant 0 : index
    %c0_213 = arith.constant 0 : index
    %196 = vector.load %arg4[%c16, %c0_212, %c0_213] : memref<25x128x64xbf16, #tpu.memory_space<vmem>>, vector<1x128x64xbf16>
    %197 = vector.shape_cast %196 : vector<1x128x64xbf16> to vector<128x64xbf16>
    %cst_214 = arith.constant dense<0.000000e+00> : vector<16x64xf32>
    %198 = tpu.matmul %195, %197, %cst_214 {dimension_numbers = #tpu.dot_dimension_numbers<[1], [0], [0], [1], [0, 0, 1, 1], [], []>} : vector<16x128xbf16>, vector<128x64xbf16>, vector<16x64xf32> -> vector<16x64xf32>
    %199 = arith.addf %192, %198 : vector<16x64xf32>
    %c0_215 = arith.constant 0 : index
    %c4_216 = arith.constant 4 : index
    %c0_217 = arith.constant 0 : index
    %c0_218 = arith.constant 0 : index
    %c0_219 = arith.constant 0 : index
    %200 = vector.load %arg3[%c0_215, %c4_216, %c0_217, %c0_218, %c0_219] : memref<1x9x4x4x128xbf16, #tpu.memory_space<vmem>>, vector<1x1x4x4x128xbf16>
    %201 = vector.shape_cast %200 : vector<1x1x4x4x128xbf16> to vector<4x4x128xbf16>
    %202 = vector.shape_cast %201 : vector<4x4x128xbf16> to vector<16x128xbf16>
    %c18 = arith.constant 18 : index
    %c0_220 = arith.constant 0 : index
    %c0_221 = arith.constant 0 : index
    %203 = vector.load %arg4[%c18, %c0_220, %c0_221] : memref<25x128x64xbf16, #tpu.memory_space<vmem>>, vector<1x128x64xbf16>
    %204 = vector.shape_cast %203 : vector<1x128x64xbf16> to vector<128x64xbf16>
    %cst_222 = arith.constant dense<0.000000e+00> : vector<16x64xf32>
    %205 = tpu.matmul %202, %204, %cst_222 {dimension_numbers = #tpu.dot_dimension_numbers<[1], [0], [0], [1], [0, 0, 1, 1], [], []>} : vector<16x128xbf16>, vector<128x64xbf16>, vector<16x64xf32> -> vector<16x64xf32>
    %206 = arith.addf %199, %205 : vector<16x64xf32>
    %207 = vector.broadcast %0 : vector<1x64xf32> to vector<16x64xf32>
    %208 = arith.addf %206, %207 : vector<16x64xf32>
    %cst_223 = arith.constant 0.000000e+00 : f32
    %209 = vector.broadcast %cst_223 : f32 to vector<16x64xf32>
    %210 = arith.maximumf %208, %209 : vector<16x64xf32>
    %211 = vector.shape_cast %210 : vector<16x64xf32> to vector<4x4x64xf32>
    %212 = arith.truncf %211 : vector<4x4x64xf32> to vector<4x4x64xbf16>
    %c0_224 = arith.constant 0 : index
    %c0_225 = arith.constant 0 : index
    %c3_226 = arith.constant 3 : index
    %c0_227 = arith.constant 0 : index
    %c0_228 = arith.constant 0 : index
    %213 = vector.load %arg6[%c0_224, %c0_225, %c3_226, %c0_227, %c0_228] : memref<1x4x4x4x64xbf16, #tpu.memory_space<vmem>>, vector<1x4x1x4x64xbf16>
    %214 = vector.shape_cast %213 : vector<1x4x1x4x64xbf16> to vector<4x4x64xbf16>
    %215 = vector.shape_cast %212 : vector<4x4x64xbf16> to vector<1x4x1x4x64xbf16>
    tpu.vector_store %arg6[%c0_224, %c0_225, %c3_226, %c0_227, %c0_228], %215 {strides = array<i32>} : memref<1x4x4x4x64xbf16, #tpu.memory_space<vmem>>, vector<1x4x1x4x64xbf16>,
    return
  }
  func.func @transform_0(%arg0: i32, %arg1: i32, %arg2: i32) -> (i32, i32, i32, i32, i32) {
    %c0_i32 = arith.constant 0 : i32
    %c0_i32_0 = arith.constant 0 : i32
    %c0_i32_1 = arith.constant 0 : i32
    %c0_i32_2 = arith.constant 0 : i32
    return %arg1, %c0_i32, %arg2, %c0_i32_0, %c0_i32_1 : i32, i32, i32, i32, i32
  }
  func.func @transform_1(%arg0: i32, %arg1: i32, %arg2: i32) -> (i32, i32, i32) {
    %c0_i32 = arith.constant 0 : i32
    %c0_i32_0 = arith.constant 0 : i32
    %c0_i32_1 = arith.constant 0 : i32
    return %c0_i32, %c0_i32_0, %arg0 : i32, i32, i32
  }
  func.func @transform_2(%arg0: i32, %arg1: i32, %arg2: i32) -> (i32, i32) {
    %c0_i32 = arith.constant 0 : i32
    %c0_i32_0 = arith.constant 0 : i32
    return %c0_i32, %arg0 : i32, i32
  }
  func.func @transform_3(%arg0: i32, %arg1: i32, %arg2: i32) -> (i32, i32, i32, i32, i32) {
    %c0_i32 = arith.constant 0 : i32
    %c0_i32_0 = arith.constant 0 : i32
    %c0_i32_1 = arith.constant 0 : i32
    return %arg1, %arg2, %c0_i32, %c0_i32_0, %arg0 : i32, i32, i32, i32, i32
  }
}

module attributes {stable_mosaic.version = 11 : i64} {
  func.func @_deconv_phase_kernel(%arg0: i32, %arg1: i32, %arg2: i32, %arg3: memref<1x9x8x8x64xbf16, #tpu.memory_space<vmem>>, %arg4: memref<25x64x32xbf16, #tpu.memory_space<vmem>>, %arg5: memref<1x32xf32, #tpu.memory_space<vmem>>, %arg6: memref<1x8x4x8x32xbf16, #tpu.memory_space<vmem>>) attributes {dimension_semantics = [#tpu.dimension_semantics<parallel>, #tpu.dimension_semantics<parallel>, #tpu.dimension_semantics<parallel>], iteration_bounds = array<i64: 1, 2, 1>, scalar_prefetch = 0 : i64, scratch_operands = 0 : i64, tpu.core_type = #tpu.core_type<tc>, window_params = [{transform_indices = @transform_0, window_bounds = array<i64: 1, 9, 8, 8, 64>}, {transform_indices = @transform_1, window_bounds = array<i64: 25, 64, 32>}, {transform_indices = @transform_2, window_bounds = array<i64: 1, 32>}, {transform_indices = @transform_3, window_bounds = array<i64: 1, 8, 4, 8, 32>}]} {
    %c0 = arith.constant 0 : index
    %c0_0 = arith.constant 0 : index
    %0 = vector.load %arg5[%c0, %c0_0] : memref<1x32xf32, #tpu.memory_space<vmem>>, vector<1x32xf32>
    %cst = arith.constant 0.000000e+00 : f32
    %1 = vector.broadcast %cst : f32 to vector<64x32xf32>
    %c0_1 = arith.constant 0 : index
    %c8 = arith.constant 8 : index
    %c0_2 = arith.constant 0 : index
    %c0_3 = arith.constant 0 : index
    %c0_4 = arith.constant 0 : index
    %2 = vector.load %arg3[%c0_1, %c8, %c0_2, %c0_3, %c0_4] : memref<1x9x8x8x64xbf16, #tpu.memory_space<vmem>>, vector<1x1x8x8x64xbf16>
    %3 = vector.shape_cast %2 : vector<1x1x8x8x64xbf16> to vector<8x8x64xbf16>
    %4 = vector.shape_cast %3 : vector<8x8x64xbf16> to vector<64x64xbf16>
    %c0_5 = arith.constant 0 : index
    %c0_6 = arith.constant 0 : index
    %c0_7 = arith.constant 0 : index
    %5 = vector.load %arg4[%c0_5, %c0_6, %c0_7] : memref<25x64x32xbf16, #tpu.memory_space<vmem>>, vector<1x64x32xbf16>
    %6 = vector.shape_cast %5 : vector<1x64x32xbf16> to vector<64x32xbf16>
    %cst_8 = arith.constant dense<0.000000e+00> : vector<64x32xf32>
    %7 = tpu.matmul %4, %6, %cst_8 {dimension_numbers = #tpu.dot_dimension_numbers<[1], [0], [0], [1], [0, 0, 1, 1], [], []>} : vector<64x64xbf16>, vector<64x32xbf16>, vector<64x32xf32> -> vector<64x32xf32>
    %8 = arith.addf %1, %7 : vector<64x32xf32>
    %c0_9 = arith.constant 0 : index
    %c7 = arith.constant 7 : index
    %c0_10 = arith.constant 0 : index
    %c0_11 = arith.constant 0 : index
    %c0_12 = arith.constant 0 : index
    %9 = vector.load %arg3[%c0_9, %c7, %c0_10, %c0_11, %c0_12] : memref<1x9x8x8x64xbf16, #tpu.memory_space<vmem>>, vector<1x1x8x8x64xbf16>
    %10 = vector.shape_cast %9 : vector<1x1x8x8x64xbf16> to vector<8x8x64xbf16>
    %11 = vector.shape_cast %10 : vector<8x8x64xbf16> to vector<64x64xbf16>
    %c2 = arith.constant 2 : index
    %c0_13 = arith.constant 0 : index
    %c0_14 = arith.constant 0 : index
    %12 = vector.load %arg4[%c2, %c0_13, %c0_14] : memref<25x64x32xbf16, #tpu.memory_space<vmem>>, vector<1x64x32xbf16>
    %13 = vector.shape_cast %12 : vector<1x64x32xbf16> to vector<64x32xbf16>
    %cst_15 = arith.constant dense<0.000000e+00> : vector<64x32xf32>
    %14 = tpu.matmul %11, %13, %cst_15 {dimension_numbers = #tpu.dot_dimension_numbers<[1], [0], [0], [1], [0, 0, 1, 1], [], []>} : vector<64x64xbf16>, vector<64x32xbf16>, vector<64x32xf32> -> vector<64x32xf32>
    %15 = arith.addf %8, %14 : vector<64x32xf32>
    %c0_16 = arith.constant 0 : index
    %c6 = arith.constant 6 : index
    %c0_17 = arith.constant 0 : index
    %c0_18 = arith.constant 0 : index
    %c0_19 = arith.constant 0 : index
    %16 = vector.load %arg3[%c0_16, %c6, %c0_17, %c0_18, %c0_19] : memref<1x9x8x8x64xbf16, #tpu.memory_space<vmem>>, vector<1x1x8x8x64xbf16>
    %17 = vector.shape_cast %16 : vector<1x1x8x8x64xbf16> to vector<8x8x64xbf16>
    %18 = vector.shape_cast %17 : vector<8x8x64xbf16> to vector<64x64xbf16>
    %c4 = arith.constant 4 : index
    %c0_20 = arith.constant 0 : index
    %c0_21 = arith.constant 0 : index
    %19 = vector.load %arg4[%c4, %c0_20, %c0_21] : memref<25x64x32xbf16, #tpu.memory_space<vmem>>, vector<1x64x32xbf16>
    %20 = vector.shape_cast %19 : vector<1x64x32xbf16> to vector<64x32xbf16>
    %cst_22 = arith.constant dense<0.000000e+00> : vector<64x32xf32>
    %21 = tpu.matmul %18, %20, %cst_22 {dimension_numbers = #tpu.dot_dimension_numbers<[1], [0], [0], [1], [0, 0, 1, 1], [], []>} : vector<64x64xbf16>, vector<64x32xbf16>, vector<64x32xf32> -> vector<64x32xf32>
    %22 = arith.addf %15, %21 : vector<64x32xf32>
    %c0_23 = arith.constant 0 : index
    %c5 = arith.constant 5 : index
    %c0_24 = arith.constant 0 : index
    %c0_25 = arith.constant 0 : index
    %c0_26 = arith.constant 0 : index
    %23 = vector.load %arg3[%c0_23, %c5, %c0_24, %c0_25, %c0_26] : memref<1x9x8x8x64xbf16, #tpu.memory_space<vmem>>, vector<1x1x8x8x64xbf16>
    %24 = vector.shape_cast %23 : vector<1x1x8x8x64xbf16> to vector<8x8x64xbf16>
    %25 = vector.shape_cast %24 : vector<8x8x64xbf16> to vector<64x64xbf16>
    %c10 = arith.constant 10 : index
    %c0_27 = arith.constant 0 : index
    %c0_28 = arith.constant 0 : index
    %26 = vector.load %arg4[%c10, %c0_27, %c0_28] : memref<25x64x32xbf16, #tpu.memory_space<vmem>>, vector<1x64x32xbf16>
    %27 = vector.shape_cast %26 : vector<1x64x32xbf16> to vector<64x32xbf16>
    %cst_29 = arith.constant dense<0.000000e+00> : vector<64x32xf32>
    %28 = tpu.matmul %25, %27, %cst_29 {dimension_numbers = #tpu.dot_dimension_numbers<[1], [0], [0], [1], [0, 0, 1, 1], [], []>} : vector<64x64xbf16>, vector<64x32xbf16>, vector<64x32xf32> -> vector<64x32xf32>
    %29 = arith.addf %22, %28 : vector<64x32xf32>
    %c0_30 = arith.constant 0 : index
    %c4_31 = arith.constant 4 : index
    %c0_32 = arith.constant 0 : index
    %c0_33 = arith.constant 0 : index
    %c0_34 = arith.constant 0 : index
    %30 = vector.load %arg3[%c0_30, %c4_31, %c0_32, %c0_33, %c0_34] : memref<1x9x8x8x64xbf16, #tpu.memory_space<vmem>>, vector<1x1x8x8x64xbf16>
    %31 = vector.shape_cast %30 : vector<1x1x8x8x64xbf16> to vector<8x8x64xbf16>
    %32 = vector.shape_cast %31 : vector<8x8x64xbf16> to vector<64x64xbf16>
    %c12 = arith.constant 12 : index
    %c0_35 = arith.constant 0 : index
    %c0_36 = arith.constant 0 : index
    %33 = vector.load %arg4[%c12, %c0_35, %c0_36] : memref<25x64x32xbf16, #tpu.memory_space<vmem>>, vector<1x64x32xbf16>
    %34 = vector.shape_cast %33 : vector<1x64x32xbf16> to vector<64x32xbf16>
    %cst_37 = arith.constant dense<0.000000e+00> : vector<64x32xf32>
    %35 = tpu.matmul %32, %34, %cst_37 {dimension_numbers = #tpu.dot_dimension_numbers<[1], [0], [0], [1], [0, 0, 1, 1], [], []>} : vector<64x64xbf16>, vector<64x32xbf16>, vector<64x32xf32> -> vector<64x32xf32>
    %36 = arith.addf %29, %35 : vector<64x32xf32>
    %c0_38 = arith.constant 0 : index
    %c3 = arith.constant 3 : index
    %c0_39 = arith.constant 0 : index
    %c0_40 = arith.constant 0 : index
    %c0_41 = arith.constant 0 : index
    %37 = vector.load %arg3[%c0_38, %c3, %c0_39, %c0_40, %c0_41] : memref<1x9x8x8x64xbf16, #tpu.memory_space<vmem>>, vector<1x1x8x8x64xbf16>
    %38 = vector.shape_cast %37 : vector<1x1x8x8x64xbf16> to vector<8x8x64xbf16>
    %39 = vector.shape_cast %38 : vector<8x8x64xbf16> to vector<64x64xbf16>
    %c14 = arith.constant 14 : index
    %c0_42 = arith.constant 0 : index
    %c0_43 = arith.constant 0 : index
    %40 = vector.load %arg4[%c14, %c0_42, %c0_43] : memref<25x64x32xbf16, #tpu.memory_space<vmem>>, vector<1x64x32xbf16>
    %41 = vector.shape_cast %40 : vector<1x64x32xbf16> to vector<64x32xbf16>
    %cst_44 = arith.constant dense<0.000000e+00> : vector<64x32xf32>
    %42 = tpu.matmul %39, %41, %cst_44 {dimension_numbers = #tpu.dot_dimension_numbers<[1], [0], [0], [1], [0, 0, 1, 1], [], []>} : vector<64x64xbf16>, vector<64x32xbf16>, vector<64x32xf32> -> vector<64x32xf32>
    %43 = arith.addf %36, %42 : vector<64x32xf32>
    %c0_45 = arith.constant 0 : index
    %c2_46 = arith.constant 2 : index
    %c0_47 = arith.constant 0 : index
    %c0_48 = arith.constant 0 : index
    %c0_49 = arith.constant 0 : index
    %44 = vector.load %arg3[%c0_45, %c2_46, %c0_47, %c0_48, %c0_49] : memref<1x9x8x8x64xbf16, #tpu.memory_space<vmem>>, vector<1x1x8x8x64xbf16>
    %45 = vector.shape_cast %44 : vector<1x1x8x8x64xbf16> to vector<8x8x64xbf16>
    %46 = vector.shape_cast %45 : vector<8x8x64xbf16> to vector<64x64xbf16>
    %c20 = arith.constant 20 : index
    %c0_50 = arith.constant 0 : index
    %c0_51 = arith.constant 0 : index
    %47 = vector.load %arg4[%c20, %c0_50, %c0_51] : memref<25x64x32xbf16, #tpu.memory_space<vmem>>, vector<1x64x32xbf16>
    %48 = vector.shape_cast %47 : vector<1x64x32xbf16> to vector<64x32xbf16>
    %cst_52 = arith.constant dense<0.000000e+00> : vector<64x32xf32>
    %49 = tpu.matmul %46, %48, %cst_52 {dimension_numbers = #tpu.dot_dimension_numbers<[1], [0], [0], [1], [0, 0, 1, 1], [], []>} : vector<64x64xbf16>, vector<64x32xbf16>, vector<64x32xf32> -> vector<64x32xf32>
    %50 = arith.addf %43, %49 : vector<64x32xf32>
    %c0_53 = arith.constant 0 : index
    %c1 = arith.constant 1 : index
    %c0_54 = arith.constant 0 : index
    %c0_55 = arith.constant 0 : index
    %c0_56 = arith.constant 0 : index
    %51 = vector.load %arg3[%c0_53, %c1, %c0_54, %c0_55, %c0_56] : memref<1x9x8x8x64xbf16, #tpu.memory_space<vmem>>, vector<1x1x8x8x64xbf16>
    %52 = vector.shape_cast %51 : vector<1x1x8x8x64xbf16> to vector<8x8x64xbf16>
    %53 = vector.shape_cast %52 : vector<8x8x64xbf16> to vector<64x64xbf16>
    %c22 = arith.constant 22 : index
    %c0_57 = arith.constant 0 : index
    %c0_58 = arith.constant 0 : index
    %54 = vector.load %arg4[%c22, %c0_57, %c0_58] : memref<25x64x32xbf16, #tpu.memory_space<vmem>>, vector<1x64x32xbf16>
    %55 = vector.shape_cast %54 : vector<1x64x32xbf16> to vector<64x32xbf16>
    %cst_59 = arith.constant dense<0.000000e+00> : vector<64x32xf32>
    %56 = tpu.matmul %53, %55, %cst_59 {dimension_numbers = #tpu.dot_dimension_numbers<[1], [0], [0], [1], [0, 0, 1, 1], [], []>} : vector<64x64xbf16>, vector<64x32xbf16>, vector<64x32xf32> -> vector<64x32xf32>
    %57 = arith.addf %50, %56 : vector<64x32xf32>
    %c0_60 = arith.constant 0 : index
    %c0_61 = arith.constant 0 : index
    %c0_62 = arith.constant 0 : index
    %c0_63 = arith.constant 0 : index
    %c0_64 = arith.constant 0 : index
    %58 = vector.load %arg3[%c0_60, %c0_61, %c0_62, %c0_63, %c0_64] : memref<1x9x8x8x64xbf16, #tpu.memory_space<vmem>>, vector<1x1x8x8x64xbf16>
    %59 = vector.shape_cast %58 : vector<1x1x8x8x64xbf16> to vector<8x8x64xbf16>
    %60 = vector.shape_cast %59 : vector<8x8x64xbf16> to vector<64x64xbf16>
    %c24 = arith.constant 24 : index
    %c0_65 = arith.constant 0 : index
    %c0_66 = arith.constant 0 : index
    %61 = vector.load %arg4[%c24, %c0_65, %c0_66] : memref<25x64x32xbf16, #tpu.memory_space<vmem>>, vector<1x64x32xbf16>
    %62 = vector.shape_cast %61 : vector<1x64x32xbf16> to vector<64x32xbf16>
    %cst_67 = arith.constant dense<0.000000e+00> : vector<64x32xf32>
    %63 = tpu.matmul %60, %62, %cst_67 {dimension_numbers = #tpu.dot_dimension_numbers<[1], [0], [0], [1], [0, 0, 1, 1], [], []>} : vector<64x64xbf16>, vector<64x32xbf16>, vector<64x32xf32> -> vector<64x32xf32>
    %64 = arith.addf %57, %63 : vector<64x32xf32>
    %65 = vector.broadcast %0 : vector<1x32xf32> to vector<64x32xf32>
    %66 = arith.addf %64, %65 : vector<64x32xf32>
    %cst_68 = arith.constant 0.000000e+00 : f32
    %67 = vector.broadcast %cst_68 : f32 to vector<64x32xf32>
    %68 = arith.maximumf %66, %67 : vector<64x32xf32>
    %69 = vector.shape_cast %68 : vector<64x32xf32> to vector<8x8x32xf32>
    %70 = arith.truncf %69 : vector<8x8x32xf32> to vector<8x8x32xbf16>
    %c0_69 = arith.constant 0 : index
    %c0_70 = arith.constant 0 : index
    %c0_71 = arith.constant 0 : index
    %c0_72 = arith.constant 0 : index
    %c0_73 = arith.constant 0 : index
    %71 = vector.load %arg6[%c0_69, %c0_70, %c0_71, %c0_72, %c0_73] : memref<1x8x4x8x32xbf16, #tpu.memory_space<vmem>>, vector<1x8x1x8x32xbf16>
    %72 = vector.shape_cast %71 : vector<1x8x1x8x32xbf16> to vector<8x8x32xbf16>
    %73 = vector.shape_cast %70 : vector<8x8x32xbf16> to vector<1x8x1x8x32xbf16>
    tpu.vector_store %arg6[%c0_69, %c0_70, %c0_71, %c0_72, %c0_73], %73 {strides = array<i32>} : memref<1x8x4x8x32xbf16, #tpu.memory_space<vmem>>, vector<1x8x1x8x32xbf16>,
    %cst_74 = arith.constant 0.000000e+00 : f32
    %74 = vector.broadcast %cst_74 : f32 to vector<64x32xf32>
    %c0_75 = arith.constant 0 : index
    %c8_76 = arith.constant 8 : index
    %c0_77 = arith.constant 0 : index
    %c0_78 = arith.constant 0 : index
    %c0_79 = arith.constant 0 : index
    %75 = vector.load %arg3[%c0_75, %c8_76, %c0_77, %c0_78, %c0_79] : memref<1x9x8x8x64xbf16, #tpu.memory_space<vmem>>, vector<1x1x8x8x64xbf16>
    %76 = vector.shape_cast %75 : vector<1x1x8x8x64xbf16> to vector<8x8x64xbf16>
    %77 = vector.shape_cast %76 : vector<8x8x64xbf16> to vector<64x64xbf16>
    %c1_80 = arith.constant 1 : index
    %c0_81 = arith.constant 0 : index
    %c0_82 = arith.constant 0 : index
    %78 = vector.load %arg4[%c1_80, %c0_81, %c0_82] : memref<25x64x32xbf16, #tpu.memory_space<vmem>>, vector<1x64x32xbf16>
    %79 = vector.shape_cast %78 : vector<1x64x32xbf16> to vector<64x32xbf16>
    %cst_83 = arith.constant dense<0.000000e+00> : vector<64x32xf32>
    %80 = tpu.matmul %77, %79, %cst_83 {dimension_numbers = #tpu.dot_dimension_numbers<[1], [0], [0], [1], [0, 0, 1, 1], [], []>} : vector<64x64xbf16>, vector<64x32xbf16>, vector<64x32xf32> -> vector<64x32xf32>
    %81 = arith.addf %74, %80 : vector<64x32xf32>
    %c0_84 = arith.constant 0 : index
    %c7_85 = arith.constant 7 : index
    %c0_86 = arith.constant 0 : index
    %c0_87 = arith.constant 0 : index
    %c0_88 = arith.constant 0 : index
    %82 = vector.load %arg3[%c0_84, %c7_85, %c0_86, %c0_87, %c0_88] : memref<1x9x8x8x64xbf16, #tpu.memory_space<vmem>>, vector<1x1x8x8x64xbf16>
    %83 = vector.shape_cast %82 : vector<1x1x8x8x64xbf16> to vector<8x8x64xbf16>
    %84 = vector.shape_cast %83 : vector<8x8x64xbf16> to vector<64x64xbf16>
    %c3_89 = arith.constant 3 : index
    %c0_90 = arith.constant 0 : index
    %c0_91 = arith.constant 0 : index
    %85 = vector.load %arg4[%c3_89, %c0_90, %c0_91] : memref<25x64x32xbf16, #tpu.memory_space<vmem>>, vector<1x64x32xbf16>
    %86 = vector.shape_cast %85 : vector<1x64x32xbf16> to vector<64x32xbf16>
    %cst_92 = arith.constant dense<0.000000e+00> : vector<64x32xf32>
    %87 = tpu.matmul %84, %86, %cst_92 {dimension_numbers = #tpu.dot_dimension_numbers<[1], [0], [0], [1], [0, 0, 1, 1], [], []>} : vector<64x64xbf16>, vector<64x32xbf16>, vector<64x32xf32> -> vector<64x32xf32>
    %88 = arith.addf %81, %87 : vector<64x32xf32>
    %c0_93 = arith.constant 0 : index
    %c5_94 = arith.constant 5 : index
    %c0_95 = arith.constant 0 : index
    %c0_96 = arith.constant 0 : index
    %c0_97 = arith.constant 0 : index
    %89 = vector.load %arg3[%c0_93, %c5_94, %c0_95, %c0_96, %c0_97] : memref<1x9x8x8x64xbf16, #tpu.memory_space<vmem>>, vector<1x1x8x8x64xbf16>
    %90 = vector.shape_cast %89 : vector<1x1x8x8x64xbf16> to vector<8x8x64xbf16>
    %91 = vector.shape_cast %90 : vector<8x8x64xbf16> to vector<64x64xbf16>
    %c11 = arith.constant 11 : index
    %c0_98 = arith.constant 0 : index
    %c0_99 = arith.constant 0 : index
    %92 = vector.load %arg4[%c11, %c0_98, %c0_99] : memref<25x64x32xbf16, #tpu.memory_space<vmem>>, vector<1x64x32xbf16>
    %93 = vector.shape_cast %92 : vector<1x64x32xbf16> to vector<64x32xbf16>
    %cst_100 = arith.constant dense<0.000000e+00> : vector<64x32xf32>
    %94 = tpu.matmul %91, %93, %cst_100 {dimension_numbers = #tpu.dot_dimension_numbers<[1], [0], [0], [1], [0, 0, 1, 1], [], []>} : vector<64x64xbf16>, vector<64x32xbf16>, vector<64x32xf32> -> vector<64x32xf32>
    %95 = arith.addf %88, %94 : vector<64x32xf32>
    %c0_101 = arith.constant 0 : index
    %c4_102 = arith.constant 4 : index
    %c0_103 = arith.constant 0 : index
    %c0_104 = arith.constant 0 : index
    %c0_105 = arith.constant 0 : index
    %96 = vector.load %arg3[%c0_101, %c4_102, %c0_103, %c0_104, %c0_105] : memref<1x9x8x8x64xbf16, #tpu.memory_space<vmem>>, vector<1x1x8x8x64xbf16>
    %97 = vector.shape_cast %96 : vector<1x1x8x8x64xbf16> to vector<8x8x64xbf16>
    %98 = vector.shape_cast %97 : vector<8x8x64xbf16> to vector<64x64xbf16>
    %c13 = arith.constant 13 : index
    %c0_106 = arith.constant 0 : index
    %c0_107 = arith.constant 0 : index
    %99 = vector.load %arg4[%c13, %c0_106, %c0_107] : memref<25x64x32xbf16, #tpu.memory_space<vmem>>, vector<1x64x32xbf16>
    %100 = vector.shape_cast %99 : vector<1x64x32xbf16> to vector<64x32xbf16>
    %cst_108 = arith.constant dense<0.000000e+00> : vector<64x32xf32>
    %101 = tpu.matmul %98, %100, %cst_108 {dimension_numbers = #tpu.dot_dimension_numbers<[1], [0], [0], [1], [0, 0, 1, 1], [], []>} : vector<64x64xbf16>, vector<64x32xbf16>, vector<64x32xf32> -> vector<64x32xf32>
    %102 = arith.addf %95, %101 : vector<64x32xf32>
    %c0_109 = arith.constant 0 : index
    %c2_110 = arith.constant 2 : index
    %c0_111 = arith.constant 0 : index
    %c0_112 = arith.constant 0 : index
    %c0_113 = arith.constant 0 : index
    %103 = vector.load %arg3[%c0_109, %c2_110, %c0_111, %c0_112, %c0_113] : memref<1x9x8x8x64xbf16, #tpu.memory_space<vmem>>, vector<1x1x8x8x64xbf16>
    %104 = vector.shape_cast %103 : vector<1x1x8x8x64xbf16> to vector<8x8x64xbf16>
    %105 = vector.shape_cast %104 : vector<8x8x64xbf16> to vector<64x64xbf16>
    %c21 = arith.constant 21 : index
    %c0_114 = arith.constant 0 : index
    %c0_115 = arith.constant 0 : index
    %106 = vector.load %arg4[%c21, %c0_114, %c0_115] : memref<25x64x32xbf16, #tpu.memory_space<vmem>>, vector<1x64x32xbf16>
    %107 = vector.shape_cast %106 : vector<1x64x32xbf16> to vector<64x32xbf16>
    %cst_116 = arith.constant dense<0.000000e+00> : vector<64x32xf32>
    %108 = tpu.matmul %105, %107, %cst_116 {dimension_numbers = #tpu.dot_dimension_numbers<[1], [0], [0], [1], [0, 0, 1, 1], [], []>} : vector<64x64xbf16>, vector<64x32xbf16>, vector<64x32xf32> -> vector<64x32xf32>
    %109 = arith.addf %102, %108 : vector<64x32xf32>
    %c0_117 = arith.constant 0 : index
    %c1_118 = arith.constant 1 : index
    %c0_119 = arith.constant 0 : index
    %c0_120 = arith.constant 0 : index
    %c0_121 = arith.constant 0 : index
    %110 = vector.load %arg3[%c0_117, %c1_118, %c0_119, %c0_120, %c0_121] : memref<1x9x8x8x64xbf16, #tpu.memory_space<vmem>>, vector<1x1x8x8x64xbf16>
    %111 = vector.shape_cast %110 : vector<1x1x8x8x64xbf16> to vector<8x8x64xbf16>
    %112 = vector.shape_cast %111 : vector<8x8x64xbf16> to vector<64x64xbf16>
    %c23 = arith.constant 23 : index
    %c0_122 = arith.constant 0 : index
    %c0_123 = arith.constant 0 : index
    %113 = vector.load %arg4[%c23, %c0_122, %c0_123] : memref<25x64x32xbf16, #tpu.memory_space<vmem>>, vector<1x64x32xbf16>
    %114 = vector.shape_cast %113 : vector<1x64x32xbf16> to vector<64x32xbf16>
    %cst_124 = arith.constant dense<0.000000e+00> : vector<64x32xf32>
    %115 = tpu.matmul %112, %114, %cst_124 {dimension_numbers = #tpu.dot_dimension_numbers<[1], [0], [0], [1], [0, 0, 1, 1], [], []>} : vector<64x64xbf16>, vector<64x32xbf16>, vector<64x32xf32> -> vector<64x32xf32>
    %116 = arith.addf %109, %115 : vector<64x32xf32>
    %117 = vector.broadcast %0 : vector<1x32xf32> to vector<64x32xf32>
    %118 = arith.addf %116, %117 : vector<64x32xf32>
    %cst_125 = arith.constant 0.000000e+00 : f32
    %119 = vector.broadcast %cst_125 : f32 to vector<64x32xf32>
    %120 = arith.maximumf %118, %119 : vector<64x32xf32>
    %121 = vector.shape_cast %120 : vector<64x32xf32> to vector<8x8x32xf32>
    %122 = arith.truncf %121 : vector<8x8x32xf32> to vector<8x8x32xbf16>
    %c0_126 = arith.constant 0 : index
    %c0_127 = arith.constant 0 : index
    %c1_128 = arith.constant 1 : index
    %c0_129 = arith.constant 0 : index
    %c0_130 = arith.constant 0 : index
    %123 = vector.load %arg6[%c0_126, %c0_127, %c1_128, %c0_129, %c0_130] : memref<1x8x4x8x32xbf16, #tpu.memory_space<vmem>>, vector<1x8x1x8x32xbf16>
    %124 = vector.shape_cast %123 : vector<1x8x1x8x32xbf16> to vector<8x8x32xbf16>
    %125 = vector.shape_cast %122 : vector<8x8x32xbf16> to vector<1x8x1x8x32xbf16>
    tpu.vector_store %arg6[%c0_126, %c0_127, %c1_128, %c0_129, %c0_130], %125 {strides = array<i32>} : memref<1x8x4x8x32xbf16, #tpu.memory_space<vmem>>, vector<1x8x1x8x32xbf16>,
    %cst_131 = arith.constant 0.000000e+00 : f32
    %126 = vector.broadcast %cst_131 : f32 to vector<64x32xf32>
    %c0_132 = arith.constant 0 : index
    %c8_133 = arith.constant 8 : index
    %c0_134 = arith.constant 0 : index
    %c0_135 = arith.constant 0 : index
    %c0_136 = arith.constant 0 : index
    %127 = vector.load %arg3[%c0_132, %c8_133, %c0_134, %c0_135, %c0_136] : memref<1x9x8x8x64xbf16, #tpu.memory_space<vmem>>, vector<1x1x8x8x64xbf16>
    %128 = vector.shape_cast %127 : vector<1x1x8x8x64xbf16> to vector<8x8x64xbf16>
    %129 = vector.shape_cast %128 : vector<8x8x64xbf16> to vector<64x64xbf16>
    %c5_137 = arith.constant 5 : index
    %c0_138 = arith.constant 0 : index
    %c0_139 = arith.constant 0 : index
    %130 = vector.load %arg4[%c5_137, %c0_138, %c0_139] : memref<25x64x32xbf16, #tpu.memory_space<vmem>>, vector<1x64x32xbf16>
    %131 = vector.shape_cast %130 : vector<1x64x32xbf16> to vector<64x32xbf16>
    %cst_140 = arith.constant dense<0.000000e+00> : vector<64x32xf32>
    %132 = tpu.matmul %129, %131, %cst_140 {dimension_numbers = #tpu.dot_dimension_numbers<[1], [0], [0], [1], [0, 0, 1, 1], [], []>} : vector<64x64xbf16>, vector<64x32xbf16>, vector<64x32xf32> -> vector<64x32xf32>
    %133 = arith.addf %126, %132 : vector<64x32xf32>
    %c0_141 = arith.constant 0 : index
    %c7_142 = arith.constant 7 : index
    %c0_143 = arith.constant 0 : index
    %c0_144 = arith.constant 0 : index
    %c0_145 = arith.constant 0 : index
    %134 = vector.load %arg3[%c0_141, %c7_142, %c0_143, %c0_144, %c0_145] : memref<1x9x8x8x64xbf16, #tpu.memory_space<vmem>>, vector<1x1x8x8x64xbf16>
    %135 = vector.shape_cast %134 : vector<1x1x8x8x64xbf16> to vector<8x8x64xbf16>
    %136 = vector.shape_cast %135 : vector<8x8x64xbf16> to vector<64x64xbf16>
    %c7_146 = arith.constant 7 : index
    %c0_147 = arith.constant 0 : index
    %c0_148 = arith.constant 0 : index
    %137 = vector.load %arg4[%c7_146, %c0_147, %c0_148] : memref<25x64x32xbf16, #tpu.memory_space<vmem>>, vector<1x64x32xbf16>
    %138 = vector.shape_cast %137 : vector<1x64x32xbf16> to vector<64x32xbf16>
    %cst_149 = arith.constant dense<0.000000e+00> : vector<64x32xf32>
    %139 = tpu.matmul %136, %138, %cst_149 {dimension_numbers = #tpu.dot_dimension_numbers<[1], [0], [0], [1], [0, 0, 1, 1], [], []>} : vector<64x64xbf16>, vector<64x32xbf16>, vector<64x32xf32> -> vector<64x32xf32>
    %140 = arith.addf %133, %139 : vector<64x32xf32>
    %c0_150 = arith.constant 0 : index
    %c6_151 = arith.constant 6 : index
    %c0_152 = arith.constant 0 : index
    %c0_153 = arith.constant 0 : index
    %c0_154 = arith.constant 0 : index
    %141 = vector.load %arg3[%c0_150, %c6_151, %c0_152, %c0_153, %c0_154] : memref<1x9x8x8x64xbf16, #tpu.memory_space<vmem>>, vector<1x1x8x8x64xbf16>
    %142 = vector.shape_cast %141 : vector<1x1x8x8x64xbf16> to vector<8x8x64xbf16>
    %143 = vector.shape_cast %142 : vector<8x8x64xbf16> to vector<64x64xbf16>
    %c9 = arith.constant 9 : index
    %c0_155 = arith.constant 0 : index
    %c0_156 = arith.constant 0 : index
    %144 = vector.load %arg4[%c9, %c0_155, %c0_156] : memref<25x64x32xbf16, #tpu.memory_space<vmem>>, vector<1x64x32xbf16>
    %145 = vector.shape_cast %144 : vector<1x64x32xbf16> to vector<64x32xbf16>
    %cst_157 = arith.constant dense<0.000000e+00> : vector<64x32xf32>
    %146 = tpu.matmul %143, %145, %cst_157 {dimension_numbers = #tpu.dot_dimension_numbers<[1], [0], [0], [1], [0, 0, 1, 1], [], []>} : vector<64x64xbf16>, vector<64x32xbf16>, vector<64x32xf32> -> vector<64x32xf32>
    %147 = arith.addf %140, %146 : vector<64x32xf32>
    %c0_158 = arith.constant 0 : index
    %c5_159 = arith.constant 5 : index
    %c0_160 = arith.constant 0 : index
    %c0_161 = arith.constant 0 : index
    %c0_162 = arith.constant 0 : index
    %148 = vector.load %arg3[%c0_158, %c5_159, %c0_160, %c0_161, %c0_162] : memref<1x9x8x8x64xbf16, #tpu.memory_space<vmem>>, vector<1x1x8x8x64xbf16>
    %149 = vector.shape_cast %148 : vector<1x1x8x8x64xbf16> to vector<8x8x64xbf16>
    %150 = vector.shape_cast %149 : vector<8x8x64xbf16> to vector<64x64xbf16>
    %c15 = arith.constant 15 : index
    %c0_163 = arith.constant 0 : index
    %c0_164 = arith.constant 0 : index
    %151 = vector.load %arg4[%c15, %c0_163, %c0_164] : memref<25x64x32xbf16, #tpu.memory_space<vmem>>, vector<1x64x32xbf16>
    %152 = vector.shape_cast %151 : vector<1x64x32xbf16> to vector<64x32xbf16>
    %cst_165 = arith.constant dense<0.000000e+00> : vector<64x32xf32>
    %153 = tpu.matmul %150, %152, %cst_165 {dimension_numbers = #tpu.dot_dimension_numbers<[1], [0], [0], [1], [0, 0, 1, 1], [], []>} : vector<64x64xbf16>, vector<64x32xbf16>, vector<64x32xf32> -> vector<64x32xf32>
    %154 = arith.addf %147, %153 : vector<64x32xf32>
    %c0_166 = arith.constant 0 : index
    %c4_167 = arith.constant 4 : index
    %c0_168 = arith.constant 0 : index
    %c0_169 = arith.constant 0 : index
    %c0_170 = arith.constant 0 : index
    %155 = vector.load %arg3[%c0_166, %c4_167, %c0_168, %c0_169, %c0_170] : memref<1x9x8x8x64xbf16, #tpu.memory_space<vmem>>, vector<1x1x8x8x64xbf16>
    %156 = vector.shape_cast %155 : vector<1x1x8x8x64xbf16> to vector<8x8x64xbf16>
    %157 = vector.shape_cast %156 : vector<8x8x64xbf16> to vector<64x64xbf16>
    %c17 = arith.constant 17 : index
    %c0_171 = arith.constant 0 : index
    %c0_172 = arith.constant 0 : index
    %158 = vector.load %arg4[%c17, %c0_171, %c0_172] : memref<25x64x32xbf16, #tpu.memory_space<vmem>>, vector<1x64x32xbf16>
    %159 = vector.shape_cast %158 : vector<1x64x32xbf16> to vector<64x32xbf16>
    %cst_173 = arith.constant dense<0.000000e+00> : vector<64x32xf32>
    %160 = tpu.matmul %157, %159, %cst_173 {dimension_numbers = #tpu.dot_dimension_numbers<[1], [0], [0], [1], [0, 0, 1, 1], [], []>} : vector<64x64xbf16>, vector<64x32xbf16>, vector<64x32xf32> -> vector<64x32xf32>
    %161 = arith.addf %154, %160 : vector<64x32xf32>
    %c0_174 = arith.constant 0 : index
    %c3_175 = arith.constant 3 : index
    %c0_176 = arith.constant 0 : index
    %c0_177 = arith.constant 0 : index
    %c0_178 = arith.constant 0 : index
    %162 = vector.load %arg3[%c0_174, %c3_175, %c0_176, %c0_177, %c0_178] : memref<1x9x8x8x64xbf16, #tpu.memory_space<vmem>>, vector<1x1x8x8x64xbf16>
    %163 = vector.shape_cast %162 : vector<1x1x8x8x64xbf16> to vector<8x8x64xbf16>
    %164 = vector.shape_cast %163 : vector<8x8x64xbf16> to vector<64x64xbf16>
    %c19 = arith.constant 19 : index
    %c0_179 = arith.constant 0 : index
    %c0_180 = arith.constant 0 : index
    %165 = vector.load %arg4[%c19, %c0_179, %c0_180] : memref<25x64x32xbf16, #tpu.memory_space<vmem>>, vector<1x64x32xbf16>
    %166 = vector.shape_cast %165 : vector<1x64x32xbf16> to vector<64x32xbf16>
    %cst_181 = arith.constant dense<0.000000e+00> : vector<64x32xf32>
    %167 = tpu.matmul %164, %166, %cst_181 {dimension_numbers = #tpu.dot_dimension_numbers<[1], [0], [0], [1], [0, 0, 1, 1], [], []>} : vector<64x64xbf16>, vector<64x32xbf16>, vector<64x32xf32> -> vector<64x32xf32>
    %168 = arith.addf %161, %167 : vector<64x32xf32>
    %169 = vector.broadcast %0 : vector<1x32xf32> to vector<64x32xf32>
    %170 = arith.addf %168, %169 : vector<64x32xf32>
    %cst_182 = arith.constant 0.000000e+00 : f32
    %171 = vector.broadcast %cst_182 : f32 to vector<64x32xf32>
    %172 = arith.maximumf %170, %171 : vector<64x32xf32>
    %173 = vector.shape_cast %172 : vector<64x32xf32> to vector<8x8x32xf32>
    %174 = arith.truncf %173 : vector<8x8x32xf32> to vector<8x8x32xbf16>
    %c0_183 = arith.constant 0 : index
    %c0_184 = arith.constant 0 : index
    %c2_185 = arith.constant 2 : index
    %c0_186 = arith.constant 0 : index
    %c0_187 = arith.constant 0 : index
    %175 = vector.load %arg6[%c0_183, %c0_184, %c2_185, %c0_186, %c0_187] : memref<1x8x4x8x32xbf16, #tpu.memory_space<vmem>>, vector<1x8x1x8x32xbf16>
    %176 = vector.shape_cast %175 : vector<1x8x1x8x32xbf16> to vector<8x8x32xbf16>
    %177 = vector.shape_cast %174 : vector<8x8x32xbf16> to vector<1x8x1x8x32xbf16>
    tpu.vector_store %arg6[%c0_183, %c0_184, %c2_185, %c0_186, %c0_187], %177 {strides = array<i32>} : memref<1x8x4x8x32xbf16, #tpu.memory_space<vmem>>, vector<1x8x1x8x32xbf16>,
    %cst_188 = arith.constant 0.000000e+00 : f32
    %178 = vector.broadcast %cst_188 : f32 to vector<64x32xf32>
    %c0_189 = arith.constant 0 : index
    %c8_190 = arith.constant 8 : index
    %c0_191 = arith.constant 0 : index
    %c0_192 = arith.constant 0 : index
    %c0_193 = arith.constant 0 : index
    %179 = vector.load %arg3[%c0_189, %c8_190, %c0_191, %c0_192, %c0_193] : memref<1x9x8x8x64xbf16, #tpu.memory_space<vmem>>, vector<1x1x8x8x64xbf16>
    %180 = vector.shape_cast %179 : vector<1x1x8x8x64xbf16> to vector<8x8x64xbf16>
    %181 = vector.shape_cast %180 : vector<8x8x64xbf16> to vector<64x64xbf16>
    %c6_194 = arith.constant 6 : index
    %c0_195 = arith.constant 0 : index
    %c0_196 = arith.constant 0 : index
    %182 = vector.load %arg4[%c6_194, %c0_195, %c0_196] : memref<25x64x32xbf16, #tpu.memory_space<vmem>>, vector<1x64x32xbf16>
    %183 = vector.shape_cast %182 : vector<1x64x32xbf16> to vector<64x32xbf16>
    %cst_197 = arith.constant dense<0.000000e+00> : vector<64x32xf32>
    %184 = tpu.matmul %181, %183, %cst_197 {dimension_numbers = #tpu.dot_dimension_numbers<[1], [0], [0], [1], [0, 0, 1, 1], [], []>} : vector<64x64xbf16>, vector<64x32xbf16>, vector<64x32xf32> -> vector<64x32xf32>
    %185 = arith.addf %178, %184 : vector<64x32xf32>
    %c0_198 = arith.constant 0 : index
    %c7_199 = arith.constant 7 : index
    %c0_200 = arith.constant 0 : index
    %c0_201 = arith.constant 0 : index
    %c0_202 = arith.constant 0 : index
    %186 = vector.load %arg3[%c0_198, %c7_199, %c0_200, %c0_201, %c0_202] : memref<1x9x8x8x64xbf16, #tpu.memory_space<vmem>>, vector<1x1x8x8x64xbf16>
    %187 = vector.shape_cast %186 : vector<1x1x8x8x64xbf16> to vector<8x8x64xbf16>
    %188 = vector.shape_cast %187 : vector<8x8x64xbf16> to vector<64x64xbf16>
    %c8_203 = arith.constant 8 : index
    %c0_204 = arith.constant 0 : index
    %c0_205 = arith.constant 0 : index
    %189 = vector.load %arg4[%c8_203, %c0_204, %c0_205] : memref<25x64x32xbf16, #tpu.memory_space<vmem>>, vector<1x64x32xbf16>
    %190 = vector.shape_cast %189 : vector<1x64x32xbf16> to vector<64x32xbf16>
    %cst_206 = arith.constant dense<0.000000e+00> : vector<64x32xf32>
    %191 = tpu.matmul %188, %190, %cst_206 {dimension_numbers = #tpu.dot_dimension_numbers<[1], [0], [0], [1], [0, 0, 1, 1], [], []>} : vector<64x64xbf16>, vector<64x32xbf16>, vector<64x32xf32> -> vector<64x32xf32>
    %192 = arith.addf %185, %191 : vector<64x32xf32>
    %c0_207 = arith.constant 0 : index
    %c5_208 = arith.constant 5 : index
    %c0_209 = arith.constant 0 : index
    %c0_210 = arith.constant 0 : index
    %c0_211 = arith.constant 0 : index
    %193 = vector.load %arg3[%c0_207, %c5_208, %c0_209, %c0_210, %c0_211] : memref<1x9x8x8x64xbf16, #tpu.memory_space<vmem>>, vector<1x1x8x8x64xbf16>
    %194 = vector.shape_cast %193 : vector<1x1x8x8x64xbf16> to vector<8x8x64xbf16>
    %195 = vector.shape_cast %194 : vector<8x8x64xbf16> to vector<64x64xbf16>
    %c16 = arith.constant 16 : index
    %c0_212 = arith.constant 0 : index
    %c0_213 = arith.constant 0 : index
    %196 = vector.load %arg4[%c16, %c0_212, %c0_213] : memref<25x64x32xbf16, #tpu.memory_space<vmem>>, vector<1x64x32xbf16>
    %197 = vector.shape_cast %196 : vector<1x64x32xbf16> to vector<64x32xbf16>
    %cst_214 = arith.constant dense<0.000000e+00> : vector<64x32xf32>
    %198 = tpu.matmul %195, %197, %cst_214 {dimension_numbers = #tpu.dot_dimension_numbers<[1], [0], [0], [1], [0, 0, 1, 1], [], []>} : vector<64x64xbf16>, vector<64x32xbf16>, vector<64x32xf32> -> vector<64x32xf32>
    %199 = arith.addf %192, %198 : vector<64x32xf32>
    %c0_215 = arith.constant 0 : index
    %c4_216 = arith.constant 4 : index
    %c0_217 = arith.constant 0 : index
    %c0_218 = arith.constant 0 : index
    %c0_219 = arith.constant 0 : index
    %200 = vector.load %arg3[%c0_215, %c4_216, %c0_217, %c0_218, %c0_219] : memref<1x9x8x8x64xbf16, #tpu.memory_space<vmem>>, vector<1x1x8x8x64xbf16>
    %201 = vector.shape_cast %200 : vector<1x1x8x8x64xbf16> to vector<8x8x64xbf16>
    %202 = vector.shape_cast %201 : vector<8x8x64xbf16> to vector<64x64xbf16>
    %c18 = arith.constant 18 : index
    %c0_220 = arith.constant 0 : index
    %c0_221 = arith.constant 0 : index
    %203 = vector.load %arg4[%c18, %c0_220, %c0_221] : memref<25x64x32xbf16, #tpu.memory_space<vmem>>, vector<1x64x32xbf16>
    %204 = vector.shape_cast %203 : vector<1x64x32xbf16> to vector<64x32xbf16>
    %cst_222 = arith.constant dense<0.000000e+00> : vector<64x32xf32>
    %205 = tpu.matmul %202, %204, %cst_222 {dimension_numbers = #tpu.dot_dimension_numbers<[1], [0], [0], [1], [0, 0, 1, 1], [], []>} : vector<64x64xbf16>, vector<64x32xbf16>, vector<64x32xf32> -> vector<64x32xf32>
    %206 = arith.addf %199, %205 : vector<64x32xf32>
    %207 = vector.broadcast %0 : vector<1x32xf32> to vector<64x32xf32>
    %208 = arith.addf %206, %207 : vector<64x32xf32>
    %cst_223 = arith.constant 0.000000e+00 : f32
    %209 = vector.broadcast %cst_223 : f32 to vector<64x32xf32>
    %210 = arith.maximumf %208, %209 : vector<64x32xf32>
    %211 = vector.shape_cast %210 : vector<64x32xf32> to vector<8x8x32xf32>
    %212 = arith.truncf %211 : vector<8x8x32xf32> to vector<8x8x32xbf16>
    %c0_224 = arith.constant 0 : index
    %c0_225 = arith.constant 0 : index
    %c3_226 = arith.constant 3 : index
    %c0_227 = arith.constant 0 : index
    %c0_228 = arith.constant 0 : index
    %213 = vector.load %arg6[%c0_224, %c0_225, %c3_226, %c0_227, %c0_228] : memref<1x8x4x8x32xbf16, #tpu.memory_space<vmem>>, vector<1x8x1x8x32xbf16>
    %214 = vector.shape_cast %213 : vector<1x8x1x8x32xbf16> to vector<8x8x32xbf16>
    %215 = vector.shape_cast %212 : vector<8x8x32xbf16> to vector<1x8x1x8x32xbf16>
    tpu.vector_store %arg6[%c0_224, %c0_225, %c3_226, %c0_227, %c0_228], %215 {strides = array<i32>} : memref<1x8x4x8x32xbf16, #tpu.memory_space<vmem>>, vector<1x8x1x8x32xbf16>,
    return
  }
  func.func @transform_0(%arg0: i32, %arg1: i32, %arg2: i32) -> (i32, i32, i32, i32, i32) {
    %c0_i32 = arith.constant 0 : i32
    %c0_i32_0 = arith.constant 0 : i32
    %c0_i32_1 = arith.constant 0 : i32
    %c0_i32_2 = arith.constant 0 : i32
    return %arg1, %c0_i32, %arg2, %c0_i32_0, %c0_i32_1 : i32, i32, i32, i32, i32
  }
  func.func @transform_1(%arg0: i32, %arg1: i32, %arg2: i32) -> (i32, i32, i32) {
    %c0_i32 = arith.constant 0 : i32
    %c0_i32_0 = arith.constant 0 : i32
    %c0_i32_1 = arith.constant 0 : i32
    return %c0_i32, %c0_i32_0, %arg0 : i32, i32, i32
  }
  func.func @transform_2(%arg0: i32, %arg1: i32, %arg2: i32) -> (i32, i32) {
    %c0_i32 = arith.constant 0 : i32
    %c0_i32_0 = arith.constant 0 : i32
    return %c0_i32, %arg0 : i32, i32
  }
  func.func @transform_3(%arg0: i32, %arg1: i32, %arg2: i32) -> (i32, i32, i32, i32, i32) {
    %c0_i32 = arith.constant 0 : i32
    %c0_i32_0 = arith.constant 0 : i32
    %c0_i32_1 = arith.constant 0 : i32
    return %arg1, %arg2, %c0_i32, %c0_i32_0, %arg0 : i32, i32, i32, i32, i32
  }
}

module attributes {stable_mosaic.version = 11 : i64} {
  func.func @_deconv_phase_kernel(%arg0: i32, %arg1: i32, %arg2: i32, %arg3: memref<1x4x8x16x32xbf16, #tpu.memory_space<vmem>>, %arg4: memref<9x32x16xbf16, #tpu.memory_space<vmem>>, %arg5: memref<1x16xf32, #tpu.memory_space<vmem>>, %arg6: memref<1x8x4x16x16xbf16, #tpu.memory_space<vmem>>) attributes {dimension_semantics = [#tpu.dimension_semantics<parallel>, #tpu.dimension_semantics<parallel>, #tpu.dimension_semantics<parallel>], iteration_bounds = array<i64: 1, 2, 2>, scalar_prefetch = 0 : i64, scratch_operands = 0 : i64, tpu.core_type = #tpu.core_type<tc>, window_params = [{transform_indices = @transform_0, window_bounds = array<i64: 1, 4, 8, 16, 32>}, {transform_indices = @transform_1, window_bounds = array<i64: 9, 32, 16>}, {transform_indices = @transform_2, window_bounds = array<i64: 1, 16>}, {transform_indices = @transform_3, window_bounds = array<i64: 1, 8, 4, 16, 16>}]} {
    %c0 = arith.constant 0 : index
    %c0_0 = arith.constant 0 : index
    %0 = vector.load %arg5[%c0, %c0_0] : memref<1x16xf32, #tpu.memory_space<vmem>>, vector<1x16xf32>
    %cst = arith.constant 0.000000e+00 : f32
    %1 = vector.broadcast %cst : f32 to vector<128x16xf32>
    %c0_1 = arith.constant 0 : index
    %c0_2 = arith.constant 0 : index
    %c0_3 = arith.constant 0 : index
    %c0_4 = arith.constant 0 : index
    %c0_5 = arith.constant 0 : index
    %2 = vector.load %arg3[%c0_1, %c0_2, %c0_3, %c0_4, %c0_5] : memref<1x4x8x16x32xbf16, #tpu.memory_space<vmem>>, vector<1x1x8x16x32xbf16>
    %3 = vector.shape_cast %2 : vector<1x1x8x16x32xbf16> to vector<8x16x32xbf16>
    %4 = vector.shape_cast %3 : vector<8x16x32xbf16> to vector<128x32xbf16>
    %c4 = arith.constant 4 : index
    %c0_6 = arith.constant 0 : index
    %c0_7 = arith.constant 0 : index
    %5 = vector.load %arg4[%c4, %c0_6, %c0_7] : memref<9x32x16xbf16, #tpu.memory_space<vmem>>, vector<1x32x16xbf16>
    %6 = vector.shape_cast %5 : vector<1x32x16xbf16> to vector<32x16xbf16>
    %cst_8 = arith.constant dense<0.000000e+00> : vector<128x16xf32>
    %7 = tpu.matmul %4, %6, %cst_8 {dimension_numbers = #tpu.dot_dimension_numbers<[1], [0], [0], [1], [0, 0, 1, 1], [], []>} : vector<128x32xbf16>, vector<32x16xbf16>, vector<128x16xf32> -> vector<128x16xf32>
    %8 = arith.addf %1, %7 : vector<128x16xf32>
    %9 = vector.broadcast %0 : vector<1x16xf32> to vector<128x16xf32>
    %10 = arith.addf %8, %9 : vector<128x16xf32>
    %cst_9 = arith.constant 0.000000e+00 : f32
    %11 = vector.broadcast %cst_9 : f32 to vector<128x16xf32>
    %12 = arith.maximumf %10, %11 : vector<128x16xf32>
    %13 = vector.shape_cast %12 : vector<128x16xf32> to vector<8x16x16xf32>
    %14 = arith.truncf %13 : vector<8x16x16xf32> to vector<8x16x16xbf16>
    %c0_10 = arith.constant 0 : index
    %c0_11 = arith.constant 0 : index
    %c0_12 = arith.constant 0 : index
    %c0_13 = arith.constant 0 : index
    %c0_14 = arith.constant 0 : index
    %15 = vector.load %arg6[%c0_10, %c0_11, %c0_12, %c0_13, %c0_14] : memref<1x8x4x16x16xbf16, #tpu.memory_space<vmem>>, vector<1x8x1x16x16xbf16>
    %16 = vector.shape_cast %15 : vector<1x8x1x16x16xbf16> to vector<8x16x16xbf16>
    %17 = vector.shape_cast %14 : vector<8x16x16xbf16> to vector<1x8x1x16x16xbf16>
    tpu.vector_store %arg6[%c0_10, %c0_11, %c0_12, %c0_13, %c0_14], %17 {strides = array<i32>} : memref<1x8x4x16x16xbf16, #tpu.memory_space<vmem>>, vector<1x8x1x16x16xbf16>,
    %cst_15 = arith.constant 0.000000e+00 : f32
    %18 = vector.broadcast %cst_15 : f32 to vector<128x16xf32>
    %c0_16 = arith.constant 0 : index
    %c1 = arith.constant 1 : index
    %c0_17 = arith.constant 0 : index
    %c0_18 = arith.constant 0 : index
    %c0_19 = arith.constant 0 : index
    %19 = vector.load %arg3[%c0_16, %c1, %c0_17, %c0_18, %c0_19] : memref<1x4x8x16x32xbf16, #tpu.memory_space<vmem>>, vector<1x1x8x16x32xbf16>
    %20 = vector.shape_cast %19 : vector<1x1x8x16x32xbf16> to vector<8x16x32xbf16>
    %21 = vector.shape_cast %20 : vector<8x16x32xbf16> to vector<128x32xbf16>
    %c3 = arith.constant 3 : index
    %c0_20 = arith.constant 0 : index
    %c0_21 = arith.constant 0 : index
    %22 = vector.load %arg4[%c3, %c0_20, %c0_21] : memref<9x32x16xbf16, #tpu.memory_space<vmem>>, vector<1x32x16xbf16>
    %23 = vector.shape_cast %22 : vector<1x32x16xbf16> to vector<32x16xbf16>
    %cst_22 = arith.constant dense<0.000000e+00> : vector<128x16xf32>
    %24 = tpu.matmul %21, %23, %cst_22 {dimension_numbers = #tpu.dot_dimension_numbers<[1], [0], [0], [1], [0, 0, 1, 1], [], []>} : vector<128x32xbf16>, vector<32x16xbf16>, vector<128x16xf32> -> vector<128x16xf32>
    %25 = arith.addf %18, %24 : vector<128x16xf32>
    %c0_23 = arith.constant 0 : index
    %c0_24 = arith.constant 0 : index
    %c0_25 = arith.constant 0 : index
    %c0_26 = arith.constant 0 : index
    %c0_27 = arith.constant 0 : index
    %26 = vector.load %arg3[%c0_23, %c0_24, %c0_25, %c0_26, %c0_27] : memref<1x4x8x16x32xbf16, #tpu.memory_space<vmem>>, vector<1x1x8x16x32xbf16>
    %27 = vector.shape_cast %26 : vector<1x1x8x16x32xbf16> to vector<8x16x32xbf16>
    %28 = vector.shape_cast %27 : vector<8x16x32xbf16> to vector<128x32xbf16>
    %c5 = arith.constant 5 : index
    %c0_28 = arith.constant 0 : index
    %c0_29 = arith.constant 0 : index
    %29 = vector.load %arg4[%c5, %c0_28, %c0_29] : memref<9x32x16xbf16, #tpu.memory_space<vmem>>, vector<1x32x16xbf16>
    %30 = vector.shape_cast %29 : vector<1x32x16xbf16> to vector<32x16xbf16>
    %cst_30 = arith.constant dense<0.000000e+00> : vector<128x16xf32>
    %31 = tpu.matmul %28, %30, %cst_30 {dimension_numbers = #tpu.dot_dimension_numbers<[1], [0], [0], [1], [0, 0, 1, 1], [], []>} : vector<128x32xbf16>, vector<32x16xbf16>, vector<128x16xf32> -> vector<128x16xf32>
    %32 = arith.addf %25, %31 : vector<128x16xf32>
    %33 = vector.broadcast %0 : vector<1x16xf32> to vector<128x16xf32>
    %34 = arith.addf %32, %33 : vector<128x16xf32>
    %cst_31 = arith.constant 0.000000e+00 : f32
    %35 = vector.broadcast %cst_31 : f32 to vector<128x16xf32>
    %36 = arith.maximumf %34, %35 : vector<128x16xf32>
    %37 = vector.shape_cast %36 : vector<128x16xf32> to vector<8x16x16xf32>
    %38 = arith.truncf %37 : vector<8x16x16xf32> to vector<8x16x16xbf16>
    %c0_32 = arith.constant 0 : index
    %c0_33 = arith.constant 0 : index
    %c1_34 = arith.constant 1 : index
    %c0_35 = arith.constant 0 : index
    %c0_36 = arith.constant 0 : index
    %39 = vector.load %arg6[%c0_32, %c0_33, %c1_34, %c0_35, %c0_36] : memref<1x8x4x16x16xbf16, #tpu.memory_space<vmem>>, vector<1x8x1x16x16xbf16>
    %40 = vector.shape_cast %39 : vector<1x8x1x16x16xbf16> to vector<8x16x16xbf16>
    %41 = vector.shape_cast %38 : vector<8x16x16xbf16> to vector<1x8x1x16x16xbf16>
    tpu.vector_store %arg6[%c0_32, %c0_33, %c1_34, %c0_35, %c0_36], %41 {strides = array<i32>} : memref<1x8x4x16x16xbf16, #tpu.memory_space<vmem>>, vector<1x8x1x16x16xbf16>,
    %cst_37 = arith.constant 0.000000e+00 : f32
    %42 = vector.broadcast %cst_37 : f32 to vector<128x16xf32>
    %c0_38 = arith.constant 0 : index
    %c2 = arith.constant 2 : index
    %c0_39 = arith.constant 0 : index
    %c0_40 = arith.constant 0 : index
    %c0_41 = arith.constant 0 : index
    %43 = vector.load %arg3[%c0_38, %c2, %c0_39, %c0_40, %c0_41] : memref<1x4x8x16x32xbf16, #tpu.memory_space<vmem>>, vector<1x1x8x16x32xbf16>
    %44 = vector.shape_cast %43 : vector<1x1x8x16x32xbf16> to vector<8x16x32xbf16>
    %45 = vector.shape_cast %44 : vector<8x16x32xbf16> to vector<128x32xbf16>
    %c1_42 = arith.constant 1 : index
    %c0_43 = arith.constant 0 : index
    %c0_44 = arith.constant 0 : index
    %46 = vector.load %arg4[%c1_42, %c0_43, %c0_44] : memref<9x32x16xbf16, #tpu.memory_space<vmem>>, vector<1x32x16xbf16>
    %47 = vector.shape_cast %46 : vector<1x32x16xbf16> to vector<32x16xbf16>
    %cst_45 = arith.constant dense<0.000000e+00> : vector<128x16xf32>
    %48 = tpu.matmul %45, %47, %cst_45 {dimension_numbers = #tpu.dot_dimension_numbers<[1], [0], [0], [1], [0, 0, 1, 1], [], []>} : vector<128x32xbf16>, vector<32x16xbf16>, vector<128x16xf32> -> vector<128x16xf32>
    %49 = arith.addf %42, %48 : vector<128x16xf32>
    %c0_46 = arith.constant 0 : index
    %c0_47 = arith.constant 0 : index
    %c0_48 = arith.constant 0 : index
    %c0_49 = arith.constant 0 : index
    %c0_50 = arith.constant 0 : index
    %50 = vector.load %arg3[%c0_46, %c0_47, %c0_48, %c0_49, %c0_50] : memref<1x4x8x16x32xbf16, #tpu.memory_space<vmem>>, vector<1x1x8x16x32xbf16>
    %51 = vector.shape_cast %50 : vector<1x1x8x16x32xbf16> to vector<8x16x32xbf16>
    %52 = vector.shape_cast %51 : vector<8x16x32xbf16> to vector<128x32xbf16>
    %c7 = arith.constant 7 : index
    %c0_51 = arith.constant 0 : index
    %c0_52 = arith.constant 0 : index
    %53 = vector.load %arg4[%c7, %c0_51, %c0_52] : memref<9x32x16xbf16, #tpu.memory_space<vmem>>, vector<1x32x16xbf16>
    %54 = vector.shape_cast %53 : vector<1x32x16xbf16> to vector<32x16xbf16>
    %cst_53 = arith.constant dense<0.000000e+00> : vector<128x16xf32>
    %55 = tpu.matmul %52, %54, %cst_53 {dimension_numbers = #tpu.dot_dimension_numbers<[1], [0], [0], [1], [0, 0, 1, 1], [], []>} : vector<128x32xbf16>, vector<32x16xbf16>, vector<128x16xf32> -> vector<128x16xf32>
    %56 = arith.addf %49, %55 : vector<128x16xf32>
    %57 = vector.broadcast %0 : vector<1x16xf32> to vector<128x16xf32>
    %58 = arith.addf %56, %57 : vector<128x16xf32>
    %cst_54 = arith.constant 0.000000e+00 : f32
    %59 = vector.broadcast %cst_54 : f32 to vector<128x16xf32>
    %60 = arith.maximumf %58, %59 : vector<128x16xf32>
    %61 = vector.shape_cast %60 : vector<128x16xf32> to vector<8x16x16xf32>
    %62 = arith.truncf %61 : vector<8x16x16xf32> to vector<8x16x16xbf16>
    %c0_55 = arith.constant 0 : index
    %c0_56 = arith.constant 0 : index
    %c2_57 = arith.constant 2 : index
    %c0_58 = arith.constant 0 : index
    %c0_59 = arith.constant 0 : index
    %63 = vector.load %arg6[%c0_55, %c0_56, %c2_57, %c0_58, %c0_59] : memref<1x8x4x16x16xbf16, #tpu.memory_space<vmem>>, vector<1x8x1x16x16xbf16>
    %64 = vector.shape_cast %63 : vector<1x8x1x16x16xbf16> to vector<8x16x16xbf16>
    %65 = vector.shape_cast %62 : vector<8x16x16xbf16> to vector<1x8x1x16x16xbf16>
    tpu.vector_store %arg6[%c0_55, %c0_56, %c2_57, %c0_58, %c0_59], %65 {strides = array<i32>} : memref<1x8x4x16x16xbf16, #tpu.memory_space<vmem>>, vector<1x8x1x16x16xbf16>,
    %cst_60 = arith.constant 0.000000e+00 : f32
    %66 = vector.broadcast %cst_60 : f32 to vector<128x16xf32>
    %c0_61 = arith.constant 0 : index
    %c3_62 = arith.constant 3 : index
    %c0_63 = arith.constant 0 : index
    %c0_64 = arith.constant 0 : index
    %c0_65 = arith.constant 0 : index
    %67 = vector.load %arg3[%c0_61, %c3_62, %c0_63, %c0_64, %c0_65] : memref<1x4x8x16x32xbf16, #tpu.memory_space<vmem>>, vector<1x1x8x16x32xbf16>
    %68 = vector.shape_cast %67 : vector<1x1x8x16x32xbf16> to vector<8x16x32xbf16>
    %69 = vector.shape_cast %68 : vector<8x16x32xbf16> to vector<128x32xbf16>
    %c0_66 = arith.constant 0 : index
    %c0_67 = arith.constant 0 : index
    %c0_68 = arith.constant 0 : index
    %70 = vector.load %arg4[%c0_66, %c0_67, %c0_68] : memref<9x32x16xbf16, #tpu.memory_space<vmem>>, vector<1x32x16xbf16>
    %71 = vector.shape_cast %70 : vector<1x32x16xbf16> to vector<32x16xbf16>
    %cst_69 = arith.constant dense<0.000000e+00> : vector<128x16xf32>
    %72 = tpu.matmul %69, %71, %cst_69 {dimension_numbers = #tpu.dot_dimension_numbers<[1], [0], [0], [1], [0, 0, 1, 1], [], []>} : vector<128x32xbf16>, vector<32x16xbf16>, vector<128x16xf32> -> vector<128x16xf32>
    %73 = arith.addf %66, %72 : vector<128x16xf32>
    %c0_70 = arith.constant 0 : index
    %c2_71 = arith.constant 2 : index
    %c0_72 = arith.constant 0 : index
    %c0_73 = arith.constant 0 : index
    %c0_74 = arith.constant 0 : index
    %74 = vector.load %arg3[%c0_70, %c2_71, %c0_72, %c0_73, %c0_74] : memref<1x4x8x16x32xbf16, #tpu.memory_space<vmem>>, vector<1x1x8x16x32xbf16>
    %75 = vector.shape_cast %74 : vector<1x1x8x16x32xbf16> to vector<8x16x32xbf16>
    %76 = vector.shape_cast %75 : vector<8x16x32xbf16> to vector<128x32xbf16>
    %c2_75 = arith.constant 2 : index
    %c0_76 = arith.constant 0 : index
    %c0_77 = arith.constant 0 : index
    %77 = vector.load %arg4[%c2_75, %c0_76, %c0_77] : memref<9x32x16xbf16, #tpu.memory_space<vmem>>, vector<1x32x16xbf16>
    %78 = vector.shape_cast %77 : vector<1x32x16xbf16> to vector<32x16xbf16>
    %cst_78 = arith.constant dense<0.000000e+00> : vector<128x16xf32>
    %79 = tpu.matmul %76, %78, %cst_78 {dimension_numbers = #tpu.dot_dimension_numbers<[1], [0], [0], [1], [0, 0, 1, 1], [], []>} : vector<128x32xbf16>, vector<32x16xbf16>, vector<128x16xf32> -> vector<128x16xf32>
    %80 = arith.addf %73, %79 : vector<128x16xf32>
    %c0_79 = arith.constant 0 : index
    %c1_80 = arith.constant 1 : index
    %c0_81 = arith.constant 0 : index
    %c0_82 = arith.constant 0 : index
    %c0_83 = arith.constant 0 : index
    %81 = vector.load %arg3[%c0_79, %c1_80, %c0_81, %c0_82, %c0_83] : memref<1x4x8x16x32xbf16, #tpu.memory_space<vmem>>, vector<1x1x8x16x32xbf16>
    %82 = vector.shape_cast %81 : vector<1x1x8x16x32xbf16> to vector<8x16x32xbf16>
    %83 = vector.shape_cast %82 : vector<8x16x32xbf16> to vector<128x32xbf16>
    %c6 = arith.constant 6 : index
    %c0_84 = arith.constant 0 : index
    %c0_85 = arith.constant 0 : index
    %84 = vector.load %arg4[%c6, %c0_84, %c0_85] : memref<9x32x16xbf16, #tpu.memory_space<vmem>>, vector<1x32x16xbf16>
    %85 = vector.shape_cast %84 : vector<1x32x16xbf16> to vector<32x16xbf16>
    %cst_86 = arith.constant dense<0.000000e+00> : vector<128x16xf32>
    %86 = tpu.matmul %83, %85, %cst_86 {dimension_numbers = #tpu.dot_dimension_numbers<[1], [0], [0], [1], [0, 0, 1, 1], [], []>} : vector<128x32xbf16>, vector<32x16xbf16>, vector<128x16xf32> -> vector<128x16xf32>
    %87 = arith.addf %80, %86 : vector<128x16xf32>
    %c0_87 = arith.constant 0 : index
    %c0_88 = arith.constant 0 : index
    %c0_89 = arith.constant 0 : index
    %c0_90 = arith.constant 0 : index
    %c0_91 = arith.constant 0 : index
    %88 = vector.load %arg3[%c0_87, %c0_88, %c0_89, %c0_90, %c0_91] : memref<1x4x8x16x32xbf16, #tpu.memory_space<vmem>>, vector<1x1x8x16x32xbf16>
    %89 = vector.shape_cast %88 : vector<1x1x8x16x32xbf16> to vector<8x16x32xbf16>
    %90 = vector.shape_cast %89 : vector<8x16x32xbf16> to vector<128x32xbf16>
    %c8 = arith.constant 8 : index
    %c0_92 = arith.constant 0 : index
    %c0_93 = arith.constant 0 : index
    %91 = vector.load %arg4[%c8, %c0_92, %c0_93] : memref<9x32x16xbf16, #tpu.memory_space<vmem>>, vector<1x32x16xbf16>
    %92 = vector.shape_cast %91 : vector<1x32x16xbf16> to vector<32x16xbf16>
    %cst_94 = arith.constant dense<0.000000e+00> : vector<128x16xf32>
    %93 = tpu.matmul %90, %92, %cst_94 {dimension_numbers = #tpu.dot_dimension_numbers<[1], [0], [0], [1], [0, 0, 1, 1], [], []>} : vector<128x32xbf16>, vector<32x16xbf16>, vector<128x16xf32> -> vector<128x16xf32>
    %94 = arith.addf %87, %93 : vector<128x16xf32>
    %95 = vector.broadcast %0 : vector<1x16xf32> to vector<128x16xf32>
    %96 = arith.addf %94, %95 : vector<128x16xf32>
    %cst_95 = arith.constant 0.000000e+00 : f32
    %97 = vector.broadcast %cst_95 : f32 to vector<128x16xf32>
    %98 = arith.maximumf %96, %97 : vector<128x16xf32>
    %99 = vector.shape_cast %98 : vector<128x16xf32> to vector<8x16x16xf32>
    %100 = arith.truncf %99 : vector<8x16x16xf32> to vector<8x16x16xbf16>
    %c0_96 = arith.constant 0 : index
    %c0_97 = arith.constant 0 : index
    %c3_98 = arith.constant 3 : index
    %c0_99 = arith.constant 0 : index
    %c0_100 = arith.constant 0 : index
    %101 = vector.load %arg6[%c0_96, %c0_97, %c3_98, %c0_99, %c0_100] : memref<1x8x4x16x16xbf16, #tpu.memory_space<vmem>>, vector<1x8x1x16x16xbf16>
    %102 = vector.shape_cast %101 : vector<1x8x1x16x16xbf16> to vector<8x16x16xbf16>
    %103 = vector.shape_cast %100 : vector<8x16x16xbf16> to vector<1x8x1x16x16xbf16>
    tpu.vector_store %arg6[%c0_96, %c0_97, %c3_98, %c0_99, %c0_100], %103 {strides = array<i32>} : memref<1x8x4x16x16xbf16, #tpu.memory_space<vmem>>, vector<1x8x1x16x16xbf16>,
    return
  }
  func.func @transform_0(%arg0: i32, %arg1: i32, %arg2: i32) -> (i32, i32, i32, i32, i32) {
    %c0_i32 = arith.constant 0 : i32
    %c0_i32_0 = arith.constant 0 : i32
    %c0_i32_1 = arith.constant 0 : i32
    %c0_i32_2 = arith.constant 0 : i32
    return %arg1, %c0_i32, %arg2, %c0_i32_0, %c0_i32_1 : i32, i32, i32, i32, i32
  }
  func.func @transform_1(%arg0: i32, %arg1: i32, %arg2: i32) -> (i32, i32, i32) {
    %c0_i32 = arith.constant 0 : i32
    %c0_i32_0 = arith.constant 0 : i32
    %c0_i32_1 = arith.constant 0 : i32
    return %c0_i32, %c0_i32_0, %arg0 : i32, i32, i32
  }
  func.func @transform_2(%arg0: i32, %arg1: i32, %arg2: i32) -> (i32, i32) {
    %c0_i32 = arith.constant 0 : i32
    %c0_i32_0 = arith.constant 0 : i32
    return %c0_i32, %arg0 : i32, i32
  }
  func.func @transform_3(%arg0: i32, %arg1: i32, %arg2: i32) -> (i32, i32, i32, i32, i32) {
    %c0_i32 = arith.constant 0 : i32
    %c0_i32_0 = arith.constant 0 : i32
    %c0_i32_1 = arith.constant 0 : i32
    return %arg1, %arg2, %c0_i32, %c0_i32_0, %arg0 : i32, i32, i32, i32, i32
  }
}

module attributes {stable_mosaic.version = 11 : i64} {
  func.func @_deconv_phase_kernel(%arg0: i32, %arg1: i32, %arg2: i32, %arg3: memref<1x4x8x32x16xbf16, #tpu.memory_space<vmem>>, %arg4: memref<9x16x3xbf16, #tpu.memory_space<vmem>>, %arg5: memref<1x3xf32, #tpu.memory_space<vmem>>, %arg6: memref<1x8x4x32x3xf32, #tpu.memory_space<vmem>>) attributes {dimension_semantics = [#tpu.dimension_semantics<parallel>, #tpu.dimension_semantics<parallel>, #tpu.dimension_semantics<parallel>], iteration_bounds = array<i64: 1, 2, 4>, scalar_prefetch = 0 : i64, scratch_operands = 0 : i64, tpu.core_type = #tpu.core_type<tc>, window_params = [{transform_indices = @transform_0, window_bounds = array<i64: 1, 4, 8, 32, 16>}, {transform_indices = @transform_1, window_bounds = array<i64: 9, 16, 3>}, {transform_indices = @transform_2, window_bounds = array<i64: 1, 3>}, {transform_indices = @transform_3, window_bounds = array<i64: 1, 8, 4, 32, 3>}]} {
    %c0 = arith.constant 0 : index
    %c0_0 = arith.constant 0 : index
    %0 = vector.load %arg5[%c0, %c0_0] : memref<1x3xf32, #tpu.memory_space<vmem>>, vector<1x3xf32>
    %cst = arith.constant 0.000000e+00 : f32
    %1 = vector.broadcast %cst : f32 to vector<256x3xf32>
    %c0_1 = arith.constant 0 : index
    %c0_2 = arith.constant 0 : index
    %c0_3 = arith.constant 0 : index
    %c0_4 = arith.constant 0 : index
    %c0_5 = arith.constant 0 : index
    %2 = vector.load %arg3[%c0_1, %c0_2, %c0_3, %c0_4, %c0_5] : memref<1x4x8x32x16xbf16, #tpu.memory_space<vmem>>, vector<1x1x8x32x16xbf16>
    %3 = vector.shape_cast %2 : vector<1x1x8x32x16xbf16> to vector<8x32x16xbf16>
    %4 = vector.shape_cast %3 : vector<8x32x16xbf16> to vector<256x16xbf16>
    %c4 = arith.constant 4 : index
    %c0_6 = arith.constant 0 : index
    %c0_7 = arith.constant 0 : index
    %5 = vector.load %arg4[%c4, %c0_6, %c0_7] : memref<9x16x3xbf16, #tpu.memory_space<vmem>>, vector<1x16x3xbf16>
    %6 = vector.shape_cast %5 : vector<1x16x3xbf16> to vector<16x3xbf16>
    %cst_8 = arith.constant dense<0.000000e+00> : vector<256x3xf32>
    %7 = tpu.matmul %4, %6, %cst_8 {dimension_numbers = #tpu.dot_dimension_numbers<[1], [0], [0], [1], [0, 0, 1, 1], [], []>} : vector<256x16xbf16>, vector<16x3xbf16>, vector<256x3xf32> -> vector<256x3xf32>
    %8 = arith.addf %1, %7 : vector<256x3xf32>
    %9 = vector.broadcast %0 : vector<1x3xf32> to vector<256x3xf32>
    %10 = arith.addf %8, %9 : vector<256x3xf32>
    %11 = arith.negf %10 : vector<256x3xf32>
    %12 = math.exp %11 : vector<256x3xf32>
    %cst_9 = arith.constant 1.000000e+00 : f32
    %13 = vector.broadcast %cst_9 : f32 to vector<256x3xf32>
    %14 = arith.addf %13, %12 : vector<256x3xf32>
    %15 = arith.divf %13, %14 : vector<256x3xf32>
    %16 = vector.shape_cast %15 : vector<256x3xf32> to vector<8x32x3xf32>
    %c0_10 = arith.constant 0 : index
    %c0_11 = arith.constant 0 : index
    %c0_12 = arith.constant 0 : index
    %c0_13 = arith.constant 0 : index
    %c0_14 = arith.constant 0 : index
    %17 = vector.load %arg6[%c0_10, %c0_11, %c0_12, %c0_13, %c0_14] : memref<1x8x4x32x3xf32, #tpu.memory_space<vmem>>, vector<1x8x1x32x3xf32>
    %18 = vector.shape_cast %17 : vector<1x8x1x32x3xf32> to vector<8x32x3xf32>
    %19 = vector.shape_cast %16 : vector<8x32x3xf32> to vector<1x8x1x32x3xf32>
    tpu.vector_store %arg6[%c0_10, %c0_11, %c0_12, %c0_13, %c0_14], %19 {strides = array<i32>} : memref<1x8x4x32x3xf32, #tpu.memory_space<vmem>>, vector<1x8x1x32x3xf32>,
    %cst_15 = arith.constant 0.000000e+00 : f32
    %20 = vector.broadcast %cst_15 : f32 to vector<256x3xf32>
    %c0_16 = arith.constant 0 : index
    %c1 = arith.constant 1 : index
    %c0_17 = arith.constant 0 : index
    %c0_18 = arith.constant 0 : index
    %c0_19 = arith.constant 0 : index
    %21 = vector.load %arg3[%c0_16, %c1, %c0_17, %c0_18, %c0_19] : memref<1x4x8x32x16xbf16, #tpu.memory_space<vmem>>, vector<1x1x8x32x16xbf16>
    %22 = vector.shape_cast %21 : vector<1x1x8x32x16xbf16> to vector<8x32x16xbf16>
    %23 = vector.shape_cast %22 : vector<8x32x16xbf16> to vector<256x16xbf16>
    %c3 = arith.constant 3 : index
    %c0_20 = arith.constant 0 : index
    %c0_21 = arith.constant 0 : index
    %24 = vector.load %arg4[%c3, %c0_20, %c0_21] : memref<9x16x3xbf16, #tpu.memory_space<vmem>>, vector<1x16x3xbf16>
    %25 = vector.shape_cast %24 : vector<1x16x3xbf16> to vector<16x3xbf16>
    %cst_22 = arith.constant dense<0.000000e+00> : vector<256x3xf32>
    %26 = tpu.matmul %23, %25, %cst_22 {dimension_numbers = #tpu.dot_dimension_numbers<[1], [0], [0], [1], [0, 0, 1, 1], [], []>} : vector<256x16xbf16>, vector<16x3xbf16>, vector<256x3xf32> -> vector<256x3xf32>
    %27 = arith.addf %20, %26 : vector<256x3xf32>
    %c0_23 = arith.constant 0 : index
    %c0_24 = arith.constant 0 : index
    %c0_25 = arith.constant 0 : index
    %c0_26 = arith.constant 0 : index
    %c0_27 = arith.constant 0 : index
    %28 = vector.load %arg3[%c0_23, %c0_24, %c0_25, %c0_26, %c0_27] : memref<1x4x8x32x16xbf16, #tpu.memory_space<vmem>>, vector<1x1x8x32x16xbf16>
    %29 = vector.shape_cast %28 : vector<1x1x8x32x16xbf16> to vector<8x32x16xbf16>
    %30 = vector.shape_cast %29 : vector<8x32x16xbf16> to vector<256x16xbf16>
    %c5 = arith.constant 5 : index
    %c0_28 = arith.constant 0 : index
    %c0_29 = arith.constant 0 : index
    %31 = vector.load %arg4[%c5, %c0_28, %c0_29] : memref<9x16x3xbf16, #tpu.memory_space<vmem>>, vector<1x16x3xbf16>
    %32 = vector.shape_cast %31 : vector<1x16x3xbf16> to vector<16x3xbf16>
    %cst_30 = arith.constant dense<0.000000e+00> : vector<256x3xf32>
    %33 = tpu.matmul %30, %32, %cst_30 {dimension_numbers = #tpu.dot_dimension_numbers<[1], [0], [0], [1], [0, 0, 1, 1], [], []>} : vector<256x16xbf16>, vector<16x3xbf16>, vector<256x3xf32> -> vector<256x3xf32>
    %34 = arith.addf %27, %33 : vector<256x3xf32>
    %35 = vector.broadcast %0 : vector<1x3xf32> to vector<256x3xf32>
    %36 = arith.addf %34, %35 : vector<256x3xf32>
    %37 = arith.negf %36 : vector<256x3xf32>
    %38 = math.exp %37 : vector<256x3xf32>
    %cst_31 = arith.constant 1.000000e+00 : f32
    %39 = vector.broadcast %cst_31 : f32 to vector<256x3xf32>
    %40 = arith.addf %39, %38 : vector<256x3xf32>
    %41 = arith.divf %39, %40 : vector<256x3xf32>
    %42 = vector.shape_cast %41 : vector<256x3xf32> to vector<8x32x3xf32>
    %c0_32 = arith.constant 0 : index
    %c0_33 = arith.constant 0 : index
    %c1_34 = arith.constant 1 : index
    %c0_35 = arith.constant 0 : index
    %c0_36 = arith.constant 0 : index
    %43 = vector.load %arg6[%c0_32, %c0_33, %c1_34, %c0_35, %c0_36] : memref<1x8x4x32x3xf32, #tpu.memory_space<vmem>>, vector<1x8x1x32x3xf32>
    %44 = vector.shape_cast %43 : vector<1x8x1x32x3xf32> to vector<8x32x3xf32>
    %45 = vector.shape_cast %42 : vector<8x32x3xf32> to vector<1x8x1x32x3xf32>
    tpu.vector_store %arg6[%c0_32, %c0_33, %c1_34, %c0_35, %c0_36], %45 {strides = array<i32>} : memref<1x8x4x32x3xf32, #tpu.memory_space<vmem>>, vector<1x8x1x32x3xf32>,
    %cst_37 = arith.constant 0.000000e+00 : f32
    %46 = vector.broadcast %cst_37 : f32 to vector<256x3xf32>
    %c0_38 = arith.constant 0 : index
    %c2 = arith.constant 2 : index
    %c0_39 = arith.constant 0 : index
    %c0_40 = arith.constant 0 : index
    %c0_41 = arith.constant 0 : index
    %47 = vector.load %arg3[%c0_38, %c2, %c0_39, %c0_40, %c0_41] : memref<1x4x8x32x16xbf16, #tpu.memory_space<vmem>>, vector<1x1x8x32x16xbf16>
    %48 = vector.shape_cast %47 : vector<1x1x8x32x16xbf16> to vector<8x32x16xbf16>
    %49 = vector.shape_cast %48 : vector<8x32x16xbf16> to vector<256x16xbf16>
    %c1_42 = arith.constant 1 : index
    %c0_43 = arith.constant 0 : index
    %c0_44 = arith.constant 0 : index
    %50 = vector.load %arg4[%c1_42, %c0_43, %c0_44] : memref<9x16x3xbf16, #tpu.memory_space<vmem>>, vector<1x16x3xbf16>
    %51 = vector.shape_cast %50 : vector<1x16x3xbf16> to vector<16x3xbf16>
    %cst_45 = arith.constant dense<0.000000e+00> : vector<256x3xf32>
    %52 = tpu.matmul %49, %51, %cst_45 {dimension_numbers = #tpu.dot_dimension_numbers<[1], [0], [0], [1], [0, 0, 1, 1], [], []>} : vector<256x16xbf16>, vector<16x3xbf16>, vector<256x3xf32> -> vector<256x3xf32>
    %53 = arith.addf %46, %52 : vector<256x3xf32>
    %c0_46 = arith.constant 0 : index
    %c0_47 = arith.constant 0 : index
    %c0_48 = arith.constant 0 : index
    %c0_49 = arith.constant 0 : index
    %c0_50 = arith.constant 0 : index
    %54 = vector.load %arg3[%c0_46, %c0_47, %c0_48, %c0_49, %c0_50] : memref<1x4x8x32x16xbf16, #tpu.memory_space<vmem>>, vector<1x1x8x32x16xbf16>
    %55 = vector.shape_cast %54 : vector<1x1x8x32x16xbf16> to vector<8x32x16xbf16>
    %56 = vector.shape_cast %55 : vector<8x32x16xbf16> to vector<256x16xbf16>
    %c7 = arith.constant 7 : index
    %c0_51 = arith.constant 0 : index
    %c0_52 = arith.constant 0 : index
    %57 = vector.load %arg4[%c7, %c0_51, %c0_52] : memref<9x16x3xbf16, #tpu.memory_space<vmem>>, vector<1x16x3xbf16>
    %58 = vector.shape_cast %57 : vector<1x16x3xbf16> to vector<16x3xbf16>
    %cst_53 = arith.constant dense<0.000000e+00> : vector<256x3xf32>
    %59 = tpu.matmul %56, %58, %cst_53 {dimension_numbers = #tpu.dot_dimension_numbers<[1], [0], [0], [1], [0, 0, 1, 1], [], []>} : vector<256x16xbf16>, vector<16x3xbf16>, vector<256x3xf32> -> vector<256x3xf32>
    %60 = arith.addf %53, %59 : vector<256x3xf32>
    %61 = vector.broadcast %0 : vector<1x3xf32> to vector<256x3xf32>
    %62 = arith.addf %60, %61 : vector<256x3xf32>
    %63 = arith.negf %62 : vector<256x3xf32>
    %64 = math.exp %63 : vector<256x3xf32>
    %cst_54 = arith.constant 1.000000e+00 : f32
    %65 = vector.broadcast %cst_54 : f32 to vector<256x3xf32>
    %66 = arith.addf %65, %64 : vector<256x3xf32>
    %67 = arith.divf %65, %66 : vector<256x3xf32>
    %68 = vector.shape_cast %67 : vector<256x3xf32> to vector<8x32x3xf32>
    %c0_55 = arith.constant 0 : index
    %c0_56 = arith.constant 0 : index
    %c2_57 = arith.constant 2 : index
    %c0_58 = arith.constant 0 : index
    %c0_59 = arith.constant 0 : index
    %69 = vector.load %arg6[%c0_55, %c0_56, %c2_57, %c0_58, %c0_59] : memref<1x8x4x32x3xf32, #tpu.memory_space<vmem>>, vector<1x8x1x32x3xf32>
    %70 = vector.shape_cast %69 : vector<1x8x1x32x3xf32> to vector<8x32x3xf32>
    %71 = vector.shape_cast %68 : vector<8x32x3xf32> to vector<1x8x1x32x3xf32>
    tpu.vector_store %arg6[%c0_55, %c0_56, %c2_57, %c0_58, %c0_59], %71 {strides = array<i32>} : memref<1x8x4x32x3xf32, #tpu.memory_space<vmem>>, vector<1x8x1x32x3xf32>,
    %cst_60 = arith.constant 0.000000e+00 : f32
    %72 = vector.broadcast %cst_60 : f32 to vector<256x3xf32>
    %c0_61 = arith.constant 0 : index
    %c3_62 = arith.constant 3 : index
    %c0_63 = arith.constant 0 : index
    %c0_64 = arith.constant 0 : index
    %c0_65 = arith.constant 0 : index
    %73 = vector.load %arg3[%c0_61, %c3_62, %c0_63, %c0_64, %c0_65] : memref<1x4x8x32x16xbf16, #tpu.memory_space<vmem>>, vector<1x1x8x32x16xbf16>
    %74 = vector.shape_cast %73 : vector<1x1x8x32x16xbf16> to vector<8x32x16xbf16>
    %75 = vector.shape_cast %74 : vector<8x32x16xbf16> to vector<256x16xbf16>
    %c0_66 = arith.constant 0 : index
    %c0_67 = arith.constant 0 : index
    %c0_68 = arith.constant 0 : index
    %76 = vector.load %arg4[%c0_66, %c0_67, %c0_68] : memref<9x16x3xbf16, #tpu.memory_space<vmem>>, vector<1x16x3xbf16>
    %77 = vector.shape_cast %76 : vector<1x16x3xbf16> to vector<16x3xbf16>
    %cst_69 = arith.constant dense<0.000000e+00> : vector<256x3xf32>
    %78 = tpu.matmul %75, %77, %cst_69 {dimension_numbers = #tpu.dot_dimension_numbers<[1], [0], [0], [1], [0, 0, 1, 1], [], []>} : vector<256x16xbf16>, vector<16x3xbf16>, vector<256x3xf32> -> vector<256x3xf32>
    %79 = arith.addf %72, %78 : vector<256x3xf32>
    %c0_70 = arith.constant 0 : index
    %c2_71 = arith.constant 2 : index
    %c0_72 = arith.constant 0 : index
    %c0_73 = arith.constant 0 : index
    %c0_74 = arith.constant 0 : index
    %80 = vector.load %arg3[%c0_70, %c2_71, %c0_72, %c0_73, %c0_74] : memref<1x4x8x32x16xbf16, #tpu.memory_space<vmem>>, vector<1x1x8x32x16xbf16>
    %81 = vector.shape_cast %80 : vector<1x1x8x32x16xbf16> to vector<8x32x16xbf16>
    %82 = vector.shape_cast %81 : vector<8x32x16xbf16> to vector<256x16xbf16>
    %c2_75 = arith.constant 2 : index
    %c0_76 = arith.constant 0 : index
    %c0_77 = arith.constant 0 : index
    %83 = vector.load %arg4[%c2_75, %c0_76, %c0_77] : memref<9x16x3xbf16, #tpu.memory_space<vmem>>, vector<1x16x3xbf16>
    %84 = vector.shape_cast %83 : vector<1x16x3xbf16> to vector<16x3xbf16>
    %cst_78 = arith.constant dense<0.000000e+00> : vector<256x3xf32>
    %85 = tpu.matmul %82, %84, %cst_78 {dimension_numbers = #tpu.dot_dimension_numbers<[1], [0], [0], [1], [0, 0, 1, 1], [], []>} : vector<256x16xbf16>, vector<16x3xbf16>, vector<256x3xf32> -> vector<256x3xf32>
    %86 = arith.addf %79, %85 : vector<256x3xf32>
    %c0_79 = arith.constant 0 : index
    %c1_80 = arith.constant 1 : index
    %c0_81 = arith.constant 0 : index
    %c0_82 = arith.constant 0 : index
    %c0_83 = arith.constant 0 : index
    %87 = vector.load %arg3[%c0_79, %c1_80, %c0_81, %c0_82, %c0_83] : memref<1x4x8x32x16xbf16, #tpu.memory_space<vmem>>, vector<1x1x8x32x16xbf16>
    %88 = vector.shape_cast %87 : vector<1x1x8x32x16xbf16> to vector<8x32x16xbf16>
    %89 = vector.shape_cast %88 : vector<8x32x16xbf16> to vector<256x16xbf16>
    %c6 = arith.constant 6 : index
    %c0_84 = arith.constant 0 : index
    %c0_85 = arith.constant 0 : index
    %90 = vector.load %arg4[%c6, %c0_84, %c0_85] : memref<9x16x3xbf16, #tpu.memory_space<vmem>>, vector<1x16x3xbf16>
    %91 = vector.shape_cast %90 : vector<1x16x3xbf16> to vector<16x3xbf16>
    %cst_86 = arith.constant dense<0.000000e+00> : vector<256x3xf32>
    %92 = tpu.matmul %89, %91, %cst_86 {dimension_numbers = #tpu.dot_dimension_numbers<[1], [0], [0], [1], [0, 0, 1, 1], [], []>} : vector<256x16xbf16>, vector<16x3xbf16>, vector<256x3xf32> -> vector<256x3xf32>
    %93 = arith.addf %86, %92 : vector<256x3xf32>
    %c0_87 = arith.constant 0 : index
    %c0_88 = arith.constant 0 : index
    %c0_89 = arith.constant 0 : index
    %c0_90 = arith.constant 0 : index
    %c0_91 = arith.constant 0 : index
    %94 = vector.load %arg3[%c0_87, %c0_88, %c0_89, %c0_90, %c0_91] : memref<1x4x8x32x16xbf16, #tpu.memory_space<vmem>>, vector<1x1x8x32x16xbf16>
    %95 = vector.shape_cast %94 : vector<1x1x8x32x16xbf16> to vector<8x32x16xbf16>
    %96 = vector.shape_cast %95 : vector<8x32x16xbf16> to vector<256x16xbf16>
    %c8 = arith.constant 8 : index
    %c0_92 = arith.constant 0 : index
    %c0_93 = arith.constant 0 : index
    %97 = vector.load %arg4[%c8, %c0_92, %c0_93] : memref<9x16x3xbf16, #tpu.memory_space<vmem>>, vector<1x16x3xbf16>
    %98 = vector.shape_cast %97 : vector<1x16x3xbf16> to vector<16x3xbf16>
    %cst_94 = arith.constant dense<0.000000e+00> : vector<256x3xf32>
    %99 = tpu.matmul %96, %98, %cst_94 {dimension_numbers = #tpu.dot_dimension_numbers<[1], [0], [0], [1], [0, 0, 1, 1], [], []>} : vector<256x16xbf16>, vector<16x3xbf16>, vector<256x3xf32> -> vector<256x3xf32>
    %100 = arith.addf %93, %99 : vector<256x3xf32>
    %101 = vector.broadcast %0 : vector<1x3xf32> to vector<256x3xf32>
    %102 = arith.addf %100, %101 : vector<256x3xf32>
    %103 = arith.negf %102 : vector<256x3xf32>
    %104 = math.exp %103 : vector<256x3xf32>
    %cst_95 = arith.constant 1.000000e+00 : f32
    %105 = vector.broadcast %cst_95 : f32 to vector<256x3xf32>
    %106 = arith.addf %105, %104 : vector<256x3xf32>
    %107 = arith.divf %105, %106 : vector<256x3xf32>
    %108 = vector.shape_cast %107 : vector<256x3xf32> to vector<8x32x3xf32>
    %c0_96 = arith.constant 0 : index
    %c0_97 = arith.constant 0 : index
    %c3_98 = arith.constant 3 : index
    %c0_99 = arith.constant 0 : index
    %c0_100 = arith.constant 0 : index
    %109 = vector.load %arg6[%c0_96, %c0_97, %c3_98, %c0_99, %c0_100] : memref<1x8x4x32x3xf32, #tpu.memory_space<vmem>>, vector<1x8x1x32x3xf32>
    %110 = vector.shape_cast %109 : vector<1x8x1x32x3xf32> to vector<8x32x3xf32>
    %111 = vector.shape_cast %108 : vector<8x32x3xf32> to vector<1x8x1x32x3xf32>
    tpu.vector_store %arg6[%c0_96, %c0_97, %c3_98, %c0_99, %c0_100], %111 {strides = array<i32>} : memref<1x8x4x32x3xf32, #tpu.memory_space<vmem>>, vector<1x8x1x32x3xf32>,
    return
  }
  func.func @transform_0(%arg0: i32, %arg1: i32, %arg2: i32) -> (i32, i32, i32, i32, i32) {
    %c0_i32 = arith.constant 0 : i32
    %c0_i32_0 = arith.constant 0 : i32
    %c0_i32_1 = arith.constant 0 : i32
    %c0_i32_2 = arith.constant 0 : i32
    return %arg1, %c0_i32, %arg2, %c0_i32_0, %c0_i32_1 : i32, i32, i32, i32, i32
  }
  func.func @transform_1(%arg0: i32, %arg1: i32, %arg2: i32) -> (i32, i32, i32) {
    %c0_i32 = arith.constant 0 : i32
    %c0_i32_0 = arith.constant 0 : i32
    %c0_i32_1 = arith.constant 0 : i32
    return %c0_i32, %c0_i32_0, %arg0 : i32, i32, i32
  }
  func.func @transform_2(%arg0: i32, %arg1: i32, %arg2: i32) -> (i32, i32) {
    %c0_i32 = arith.constant 0 : i32
    %c0_i32_0 = arith.constant 0 : i32
    return %c0_i32, %arg0 : i32, i32
  }
  func.func @transform_3(%arg0: i32, %arg1: i32, %arg2: i32) -> (i32, i32, i32, i32, i32) {
    %c0_i32 = arith.constant 0 : i32
    %c0_i32_0 = arith.constant 0 : i32
    %c0_i32_1 = arith.constant 0 : i32
    return %arg1, %arg2, %c0_i32, %c0_i32_0, %arg0 : i32, i32, i32, i32, i32
  }
}

</mosaic_0001>

<bundles_post_ra>
// kernel: celeba_decoder.5
= control target key start
LH: loop header
LB: loop body
LE: loop exit
PB: predicated region body
PF: predicated region fallthrough
CT: control target
= control target key end

     0   :  { %s676_s12 = smov 0   ;;  %s678_s13 = smov 0   ;;  %s756_s0 = inlined_call_operand.vmem [shape: bf16[2,64], index: 0, kind: input, shape index: {}]   ;;  %s757_s1 = inlined_call_operand.vmem [shape: bf16[64,2048], index: 1, kind: input, shape index: {}]   ;;  %s758_s2 = inlined_call_operand.vmem [shape: f32[1,2048], index: 2, kind: input, shape index: {}]   ;;  %s759_s3 = inlined_call_operand.vmem [shape: bf16[2,2048], index: 3, kind: output, shape index: {}]  }
   0x1   :  { %s680_s14 = smov 0  }
   0x2 LB: > { %s545_s15 = sadd.s32 4294967295, %s652_s14   ;;  %s693_s16 = sadd.s32 1, %s652_s14   ;;  %s652_s14 = sphi %s680_s14, %s762_s14   ;;  %s648_s13 = sphi %s678_s13, %s761_s13   ;;  %s644_s12 = sphi %s676_s12, %s760_s12  }
   0x3   : > { %s38_s17 = ssub.s32 %s652_s14, %s693_s16  ;;  %s41_s18 = sadd.s32 1, %s648_s13 }
   0x4   : > { %p39_p0 = scmp.eq.s32.totalorder %s38_s17, 0  ;;  %p48_p1 = scmp.ne.s32.totalorder %s648_s13, %s644_s12 }
   0x5   : > { %p49_p2 = scmp.eq.s32.totalorder %s652_s14, 0  ;;  %p548_p4 = scmp.ge.s32.totalorder %s652_s14, 4 }
   0x6   : > { %s702_s19 = scalar_select %p39_p0, %s648_s13, %s41_s18  }
   0x7   : > { %p50_p3 = por %p49_p2, %p48_p1  ;;  %129 = sbr.rel (%p548_p4) target bundleno = 26 (0x1a), region = 20 }
   0xe   : > { %132 = sbr.rel (!%p50_p3) target bundleno = 26 (0x1a), region = 24  ;;  %s134_s20 = sand.u32 (%p50_p3), 1, %s648_s13  }
   0xf   : > { %s579_s21 = sshll.u32 (%p50_p3), %s652_s14, 4  ;;  %s549_s22 = sshll.u32 (%p50_p3), %s134_s20, 7 }
  0x10   : > { %s710_s25 = scalar_lea.vmem (%p50_p3), %s757_s1, %s579_s21  ;;  %s136_s26 = scalar_lea.vmem (%p50_p3), [#allocation2], %s549_s22 }
  0x11   : > { %v152_v0 = vld [vmem:[%s710_s25] sm:$0xff] (%p50_p3)  ;;  %v154_v1 = vld [vmem:[%s710_s25 + $0x8] sm:$0xff] (%p50_p3) }
  0x12   : > { %v156_v2 = vld [vmem:[%s710_s25 + $0x40] sm:$0xff] (%p50_p3)  ;;  %153 = vst [vmem:[%s136_s26] sm:$0xff] (%p50_p3), %v152_v0  ;;  %155 = vst [vmem:[%s136_s26 + $0x8] sm:$0xff] (%p50_p3), %v154_v1  ;;  %v158_v3 = vld [vmem:[%s710_s25 + $0x48] sm:$0xff] (%p50_p3) }
  0x13   : > { %157 = vst [vmem:[%s136_s26 + $0x10] sm:$0xff] (%p50_p3), %v156_v2  ;;  %v160_v4 = vld [vmem:[%s710_s25 + $0x80] sm:$0xff] (%p50_p3)  ;;  %v162_v5 = vld [vmem:[%s710_s25 + $0x88] sm:$0xff] (%p50_p3)  ;;  %159 = vst [vmem:[%s136_s26 + $0x18] sm:$0xff] (%p50_p3), %v158_v3 }
  0x14   : > { %161 = vst [vmem:[%s136_s26 + $0x20] sm:$0xff] (%p50_p3), %v160_v4  ;;  %163 = vst [vmem:[%s136_s26 + $0x28] sm:$0xff] (%p50_p3), %v162_v5  ;;  %v164_v6 = vld [vmem:[%s710_s25 + $0xc0] sm:$0xff] (%p50_p3)  ;;  %v166_v7 = vld [vmem:[%s710_s25 + $0xc8] sm:$0xff] (%p50_p3) }
  0x15   : > { %v168_v8 = vld [vmem:[%s710_s25 + $0x100] sm:$0xff]  ;;  %165 = vst [vmem:[%s136_s26 + $0x30] sm:$0xff] %v164_v6  ;;  %167 = vst [vmem:[%s136_s26 + $0x38] sm:$0xff] %v166_v7  ;;  %v170_v9 = vld [vmem:[%s710_s25 + $0x108] sm:$0xff] }
  0x16   : > { %169 = vst [vmem:[%s136_s26 + $0x40] sm:$0xff] %v168_v8  ;;  %v172_v10 = vld [vmem:[%s710_s25 + $0x140] sm:$0xff]  ;;  %v174_v11 = vld [vmem:[%s710_s25 + $0x148] sm:$0xff]  ;;  %171 = vst [vmem:[%s136_s26 + $0x48] sm:$0xff] %v170_v9 }
  0x17   : > { %173 = vst [vmem:[%s136_s26 + $0x50] sm:$0xff] %v172_v10  ;;  %175 = vst [vmem:[%s136_s26 + $0x58] sm:$0xff] %v174_v11  ;;  %v176_v12 = vld [vmem:[%s710_s25 + $0x180] sm:$0xff]  ;;  %v178_v13 = vld [vmem:[%s710_s25 + $0x188] sm:$0xff] }
  0x18   : > { %v180_v14 = vld [vmem:[%s710_s25 + $0x1c0] sm:$0xff]  ;;  %177 = vst [vmem:[%s136_s26 + $0x60] sm:$0xff] %v176_v12  ;;  %179 = vst [vmem:[%s136_s26 + $0x68] sm:$0xff] %v178_v13  ;;  %v182_v15 = vld [vmem:[%s710_s25 + $0x1c8] sm:$0xff] }
  0x19   : > { %181 = vst [vmem:[%s136_s26 + $0x70] sm:$0xff] %v180_v14  ;;  %183 = vst [vmem:[%s136_s26 + $0x78] sm:$0xff] %v182_v15 }
  0x1a PF: > { %p552_p5 = scmp.ge.s32.totalorder %s652_s14, 1  ;;  %p196_p6 = scmp.lt.s32.totalorder %s652_s14, 5 }
  0x1c   : > { %p197_p7 = pnand %p552_p5, %p196_p6 }
  0x1d   : > { %s203_s27 = sand.u32 (!%p197_p7), 1, %s644_s12   ;;  %v654_v16 = vmov (!%p197_p7), 0   ;;  %v241_v33 = vld [vmem:[%s756_s0] sm:$0x1] (!%p197_p7)  ;;  %vm360_vm0 = vcmask (!%p197_p7), 523264   ;;  %s554_s5 = sshll.u32 (!%p197_p7), %s545_s15, 2  ;;  %v260_v34 = vlaneseq (!%p197_p7) }
  0x1e   : > { %200 = sbr.rel (%p197_p7) target bundleno = 271 (0x10f), region = 51  ;;  %s553_s28 = sshll.u32 (!%p197_p7), %s203_s27, 7  ;;  %396 = vmatprep.mubr.bf16.mxu0 (!%p197_p7), %v654_v16  ;;  %437 = vmatprep.mubr.bf16.mxu1 (!%p197_p7), %v654_v16  ;;  %v655_v40 = vmov (!%p197_p7), 1966171168  }
  0x1f   : > { %s205_s29 = scalar_lea.vmem (!%p197_p7), [#allocation2], %s553_s28  ;;  %p231_p8 = scmp.lt.s32.totalorder (!%p197_p7), %s554_s5, 15  ;;  %v261_v35 = vshrl.u32 (!%p197_p7), %v260_v34, 7  ;;  %v457_v41 = vunpack.c.l.s4 (!%p197_p7), %v655_v40 }
  0x20   : > { %v606_v17 = vld [vmem:[%s205_s29 + $0x4] ss:$16 sps:$4 sm:$0xff] (!%p197_p7)   ;;  %v608_v18 = vld [vmem:[%s205_s29 + $0xc] ss:$16 sps:$4 sm:$0xff] (!%p197_p7)   ;;  %v610_v19 = vld [vmem:[%s205_s29] ss:$16 sps:$4 sm:$0xff] (!%p197_p7)  }
  0x21   : > { %364 = vmatprep.subr.bf16.mxu0 (!%p197_p7), %v606_v17  ;;  %v611_v20 = vld [vmem:[%s205_s29 + $0x8] ss:$16 sps:$4 sm:$0xff] (!%p197_p7)   ;;  %405 = vmatprep.subr.bf16.mxu1 (!%p197_p7), %v608_v18  ;;  %v612_v21 = vld [vmem:[%s205_s29 + $0x24] ss:$16 sps:$4 sm:$0xff] (!%p197_p7)   ;;  %v614_v22 = vld [vmem:[%s205_s29 + $0x2c] ss:$16 sps:$4 sm:$0xff] (!%p197_p7)   ;;  %v458_v46 = vunpack.c.0.s8 (!%p197_p7), %v457_v41 }
  0x22   : > { %365 = vmatpush1.bf16.msra.mxu0 (!%p197_p7), %v610_v19  ;;  %406 = vmatpush1.bf16.msra.mxu1 (!%p197_p7), %v611_v20  ;;  %v616_v23 = vld [vmem:[%s205_s29 + $0x20] ss:$16 sps:$4 sm:$0xff] (!%p197_p7)   ;;  %v617_v24 = vld [vmem:[%s205_s29 + $0x28] ss:$16 sps:$4 sm:$0xff] (!%p197_p7)   ;;  %v618_v25 = vld [vmem:[%s205_s29 + $0x44] ss:$16 sps:$4 sm:$0xff] (!%p197_p7)  }
  0x23   : > { %366 = vmatprep.subr.bf16.mxu0 (!%p197_p7), %v612_v21  ;;  %407 = vmatprep.subr.bf16.mxu1 (!%p197_p7), %v614_v22  ;;  %v620_v26 = vld [vmem:[%s205_s29 + $0x4c] ss:$16 sps:$4 sm:$0xff] (!%p197_p7)   ;;  %v622_v27 = vld [vmem:[%s205_s29 + $0x40] ss:$16 sps:$4 sm:$0xff] (!%p197_p7)   ;;  %v623_v28 = vld [vmem:[%s205_s29 + $0x48] ss:$16 sps:$4 sm:$0xff] (!%p197_p7)   ;;  %v461_v55 = vsub.s32 (!%p197_p7), %v458_v46, %v261_v35 }
  0x24   : > { %v624_v29 = vld [vmem:[%s205_s29 + $0x64] ss:$16 sps:$4 sm:$0xff] (!%p197_p7)   ;;  %v626_v30 = vld [vmem:[%s205_s29 + $0x6c] ss:$16 sps:$4 sm:$0xff] (!%p197_p7)   ;;  %v628_v31 = vld [vmem:[%s205_s29 + $0x60] ss:$16 sps:$4 sm:$0xff] (!%p197_p7)  }
  0x25   : > { %v629_v32 = vld [vmem:[%s205_s29 + $0x68] ss:$16 sps:$4 sm:$0xff]   ;;  %s764_s5 = smov (!%p231_p8, %s554_s5), 15  ;;  %v262_v36 = vsub.s32 0, %v261_v35  ;;  %v270_v37 = vsub.s32 2, %v261_v35  ;;  %v266_v39 = vsub.s32 1, %v261_v35 }
  0x26   : > { %367 = vmatpush1.bf16.msra.mxu0 %v616_v23  ;;  %408 = vmatpush1.bf16.msra.mxu1 %v617_v24  ;;  %s233_s8 = scalar_lea.vmem %s758_s2, %s764_s5  ;;  %v274_v42 = vsub.s32 3, %v261_v35  ;;  %s238_s11 = scalar_lea.vmem %s759_s3, %s764_s5 }
  0x27   : > { %368 = vmatprep.subr.bf16.mxu0 %v618_v25  ;;  %409 = vmatprep.subr.bf16.mxu1 %v620_v26  ;;  %v258_v38 = vld [vmem:[%s233_s8] sm:$0xf] }
  0x28   : > { %v263_v43 = vrot.slane %v258_v38, %v262_v36  ;;  %v271_v44 = vrot.slane %v258_v38, %v270_v37  ;;  %v267_v45 = vrot.slane %v258_v38, %v266_v39  ;;  %v275_v47 = vrot.slane %v258_v38, %v274_v42 }
  0x2a   : > { %369 = vmatpush1.bf16.msra.mxu0 %v622_v27  ;;  %410 = vmatpush1.bf16.msra.mxu1 %v623_v28 }
  0x2b   : > { %370 = vmatprep.subr.bf16.mxu0 %v624_v29  ;;  %411 = vmatprep.subr.bf16.mxu1 %v626_v30 }
  0x2e   : > { %371 = vmatpush1.bf16.msra.mxu0 %v628_v31  ;;  %412 = vmatpush1.bf16.msra.mxu1 %v629_v32 }
  0x31   : > { %572 = vmatmul.mubr.msk.bf16.vlgmr.msra.gmra.mrb[0].mxu0 %vm360_vm0, %v241_v33  ;;  %573 = vmatmul.mubr.msk.bf16.vlgmr.msra.gmra.mrb[0].mxu1 %vm360_vm0, %v241_v33 }
 0x104   : > { %v398_v48 = vpop.f32.mrb[0].mxu0  ;;  %v439_v49 = vpop.f32.mrb[0].mxu1 }
 0x105   : > { %v399_v50 = vadd.f32 %v398_v48, %v263_v43  ;;  %v440_v51 = vadd.f32 %v439_v49, %v271_v44  ;;  %v400_v52 = vpop.f32.mrb[1].mxu0  ;;  %v441_v53 = vpop.f32.mrb[1].mxu1 }
 0x106   : > { %v401_v54 = vadd.f32 %v400_v52, %v267_v45  ;;  %v442_v56 = vadd.f32 %v441_v53, %v275_v47  ;;  %v402_v57 = vpop.f32.mrb[2].mxu0  ;;  %v443_v58 = vpop.f32.mrb[2].mxu1 }
 0x107   : > { %v403_v59 = vpop.f32.mrb[3].mxu0  ;;  %v444_v60 = vpop.f32.mrb[3].mxu1 }
 0x108   : > { %v574_v61 = vpack.c.bf16 %v401_v54, %v399_v50  ;;  %v575_v62 = vpack.c.bf16 %v442_v56, %v440_v51 }
 0x10a   : > { %v462_v63 = vrot.slane %v574_v61, %v461_v55  ;;  %v469_v0 = vrot.slane %v575_v62, %v461_v55 }
 0x10c   : > { %v470_v1 = vcombine.low %v462_v63, %v469_v0 }
 0x10e   : > { %576 = vst.sshfl [vmem:[%s238_s11] sm:$0x55 pattern:$0x73625140] %v470_v1 }
 0x10f PF: > { %p10_p9 = scmp.ge.s32.totalorder %s693_s16, 6   ;;  %s760_s12 = smov %s648_s13 }
 0x110   : > { %s761_s13 = smov %s702_s19  ;;  %s762_s14 = smov %s693_s16 }
 0x111   :  { %12 = sbr.rel (!%p10_p9) target bundleno = 2 (0x2), region = 93 }

// kernel: celeba_decoder.6
= control target key start
LH: loop header
LB: loop body
LE: loop exit
PB: predicated region body
PF: predicated region fallthrough
CT: control target
= control target key end

     0   :  { %s5522_s12 = smov 0   ;;  %s5524_s13 = smov 0   ;;  %s6640_s0 = inlined_call_operand.vmem [shape: bf16[2,9,4,4,128], index: 0, kind: input, shape index: {}]   ;;  %s6641_s1 = inlined_call_operand.vmem [shape: bf16[25,128,64], index: 1, kind: input, shape index: {}]   ;;  %s6642_s2 = inlined_call_operand.vmem [shape: f32[1,64], index: 2, kind: input, shape index: {}]   ;;  %s6643_s3 = inlined_call_operand.vmem [shape: bf16[2,4,4,4,64], index: 3, kind: output, shape index: {}]  }
   0x1   :  { %s5526_s14 = smov 0  }
   0x2 LB: > { %s28_s15 = sadd.s32 1, %s5493_s13  ;;  %p3822_p0 = scmp.ge.s32.totalorder %s5497_s14, 1  ;;  %s5497_s14 = sphi %s5526_s14, %s13_s14   ;;  %s5493_s13 = sphi %s5524_s13, %s6645_s13   ;;  %s5489_s12 = sphi %s5522_s12, %s6644_s12  }
   0x3   : > { %p30_p1 = scmp.ge.s32.totalorder %s28_s15, 2  ;;  %p184_p2 = scmp.lt.s32.totalorder %s5497_s14, 3 }
   0x5   : > { %s6647_s15 = smov (%p30_p1, %s28_s15), 0  ;;  %p185_p3 = pnand %p3822_p0, %p184_p2 }
   0x6   : > { %v5275_v0 = vld [vmem:[%s6641_s1 + $0x80] sm:$0xff] (!%p185_p3)   ;;  %v5499_v1 = vmov (!%p185_p3), 0.0   ;;  %v5277_v3 = vld [vmem:[%s6641_s1 + $0x88] sm:$0xff] (!%p185_p3)   ;;  %vm5500_vm0 = vmmov (!%p185_p3), 0   ;;  %p228_p4 = scmp.lt.s32.totalorder (!%p185_p3), %s5489_s12, 1  ;;  %v5279_v5 = vld [vmem:[%s6641_s1 + $0x90] sm:$0xff] (!%p185_p3)   ;;  %v312_v9 = vlaneseq (!%p185_p3) }
   0x7   : > { %188 = sbr.rel (%p185_p3) target bundleno = 648 (0x288), region = 32  ;;  %4747 = vmatprep.subr.bf16.mxu0 (!%p185_p3), %v5499_v1  ;;  %4767 = vmatprep.subr.bf16.mxu1 (!%p185_p3), %v5499_v1  ;;  %v5276_v2 = vld [vmem:[%s6641_s1] sm:$0xff] (!%p185_p3)   ;;  %v5278_v4 = vld [vmem:[%s6641_s1 + $0x8] sm:$0xff] (!%p185_p3)   ;;  %v5280_v6 = vld [vmem:[%s6641_s1 + $0x10] sm:$0xff] (!%p185_p3)   ;;  %v5501_v19 = vmov (!%p185_p3), 1983009808  }
   0x8   : > { %4748 = vmatpush3.bf16.msra.mxu0 (!%p185_p3), %v5275_v0  ;;  %4763 = vmatprep.mubr.msk.bf16.mxu0 (!%p185_p3), %vm5500_vm0, %v5499_v1  ;;  %v5281_v7 = vld [vmem:[%s6641_s1 + $0x98] sm:$0xff] (!%p185_p3)   ;;  %v5283_v10 = vld [vmem:[%s6641_s1 + $0xa0] sm:$0xff] (!%p185_p3)   ;;  %v5285_v12 = vld [vmem:[%s6641_s1 + $0xa8] sm:$0xff] (!%p185_p3)   ;;  %v313_v15 = vshrl.u32 (!%p185_p3), %v312_v9, 7  ;;  %v310_v20 = vunpack.c.l.s4 (!%p185_p3), %v5501_v19  ;;  %vm1489_vm1 = vcmask (!%p185_p3), 517120  }
   0x9   : > { %4768 = vmatpush3.bf16.msra.mxu1 (!%p185_p3), %v5276_v2  ;;  %4749 = vmatprep.subr.bf16.mxu0 (!%p185_p3), %v5499_v1  ;;  %v5282_v8 = vld [vmem:[%s6641_s1 + $0x18] sm:$0xff] (!%p185_p3)   ;;  %v5284_v11 = vld [vmem:[%s6641_s1 + $0x20] sm:$0xff] (!%p185_p3)   ;;  %v5286_v16 = vld [vmem:[%s6641_s1 + $0x28] sm:$0xff] (!%p185_p3)  }
   0xa   : > { %4769 = vmatprep.subr.bf16.mxu1 (!%p185_p3), %v5499_v1  ;;  %4783 = vmatprep.mubr.msk.bf16.mxu1 (!%p185_p3), %vm5500_vm0, %v5499_v1  ;;  %v311_v25 = vunpack.c.0.s8 (!%p185_p3), %v310_v20  ;;  %v5287_v28 = vld [vmem:[%s6641_s1 + $0xb0] sm:$0xff] (!%p185_p3)   ;;  %v5289_v35 = vld [vmem:[%s6641_s1 + $0xb8] sm:$0xff] (!%p185_p3)   ;;  %v5291_v41 = vld [vmem:[%s6641_s1 + $0x100] sm:$0xff] (!%p185_p3)  }
   0xb   : > { %v5288_v32 = vld [vmem:[%s6641_s1 + $0x30] sm:$0xff] (!%p185_p3)   ;;  %v5290_v38 = vld [vmem:[%s6641_s1 + $0x38] sm:$0xff] (!%p185_p3)   ;;  %v5292_v42 = vld [vmem:[%s6641_s1 + $0x280] sm:$0xff] (!%p185_p3)  }
   0xc   : > { %4750 = vmatpush3.bf16.msra.mxu0 (!%p185_p3), %v5277_v3  ;;  %v5611_v29 = vsub.s32 (!%p185_p3), %v311_v25, %v313_v15  ;;  %v5293_v43 = vld [vmem:[%s6641_s1 + $0x108] sm:$0xff] (!%p185_p3)   ;;  %v5295_v45 = vld [vmem:[%s6641_s1 + $0x110] sm:$0xff] (!%p185_p3)   ;;  %v5297_v47 = vld [vmem:[%s6641_s1 + $0x118] sm:$0xff] (!%p185_p3)  }
   0xd   : > { %4770 = vmatpush3.bf16.msra.mxu1 (!%p185_p3), %v5278_v4  ;;  %4751 = vmatprep.subr.bf16.mxu0 (!%p185_p3), %v5499_v1  ;;  %v5294_v44 = vld [vmem:[%s6641_s1 + $0x288] sm:$0xff] (!%p185_p3)   ;;  %v5296_v46 = vld [vmem:[%s6641_s1 + $0x290] sm:$0xff] (!%p185_p3)   ;;  %v5298_v48 = vld [vmem:[%s6641_s1 + $0x298] sm:$0xff] (!%p185_p3)  }
   0xe   : > { %s6649_s12 = smov (!%p228_p4, %s5489_s12), 1  ;;  %4771 = vmatprep.subr.bf16.mxu1 %v5499_v1  ;;  %v5299_v49 = vld [vmem:[%s6641_s1 + $0x120] sm:$0xff]   ;;  %v5301_v51 = vld [vmem:[%s6641_s1 + $0x128] sm:$0xff]   ;;  %v5303_v63 = vld [vmem:[%s6641_s1 + $0x130] sm:$0xff]  }
   0xf   : > { %s5247_s28 = smul.u32 72, %s6649_s12  ;;  %v5300_v50 = vld [vmem:[%s6641_s1 + $0x2a0] sm:$0xff]   ;;  %v5302_v56 = vld [vmem:[%s6641_s1 + $0x2a8] sm:$0xff]   ;;  %v5304_v3 = vld [vmem:[%s6641_s1 + $0x2b0] sm:$0xff]   ;;  %s4521_s25 = sshll.u32 %s6649_s12, 5 }
  0x10   : > { %4752 = vmatpush3.bf16.msra.mxu0 %v5279_v5  ;;  %v5306_v9 = vld [vmem:[%s6641_s1 + $0x2b8] sm:$0xff]   ;;  %v5310_v15 = vld [vmem:[%s6641_s1 + $0x388] sm:$0xff]   ;;  %v5315_v20 = vld [vmem:[%s6641_s1 + $0x320] sm:$0xff]   ;;  %s6539_s29 = scalar_lea.vmem %s6643_s3, %s4521_s25 }
  0x11   : > { %4772 = vmatpush3.bf16.msra.mxu1 %v5280_v6  ;;  %4753 = vmatprep.subr.bf16.mxu0 %v5499_v1  ;;  %s5582_s8 = scalar_lea.vmem %s6640_s0, %s5247_s28  ;;  %v5305_v6 = vld [vmem:[%s6641_s1 + $0x138] sm:$0xff]  }
  0x12   : > { %4773 = vmatprep.subr.bf16.mxu1 %v5499_v1  ;;  %v3830_v13 = vld [vmem:[%s5582_s8 + $0x38] sm:$0x3]  ;;  %v3831_v14 = vld [vmem:[%s5582_s8 + $0x3a] sm:$0x3]  ;;  %v3832_v17 = vld [vmem:[%s5582_s8 + $0x3c] sm:$0x3] }
  0x13   : > { %v3833_v18 = vld [vmem:[%s5582_s8 + $0x3e] sm:$0x3]  ;;  %v3826_v21 = vld [vmem:[%s5582_s8 + $0x40] sm:$0x3]  ;;  %v3827_v22 = vld [vmem:[%s5582_s8 + $0x42] sm:$0x3]  ;;  %v307_v26 = vcombine.low %v3830_v13, %v3831_v14 }
  0x14   : > { %4754 = vmatpush3.bf16.msra.mxu0 %v5281_v7  ;;  %v3828_v23 = vld [vmem:[%s5582_s8 + $0x44] sm:$0x3]  ;;  %v3829_v24 = vld [vmem:[%s5582_s8 + $0x46] sm:$0x3]  ;;  %v308_v27 = vcombine.low %v3832_v17, %v3833_v18  ;;  %v418_v30 = vcombine.low %v3826_v21, %v3827_v22  ;;  %v3866_v52 = vld [vmem:[%s5582_s8 + $0x30] sm:$0x3] }
  0x15   : > { %4774 = vmatpush3.bf16.msra.mxu1 %v5282_v8  ;;  %4755 = vmatprep.subr.bf16.mxu0 %v5499_v1  ;;  %v419_v31 = vcombine.low %v3828_v23, %v3829_v24  ;;  %v315_v33 = vrot.slane %v307_v26, %v5611_v29  ;;  %v3867_v53 = vld [vmem:[%s5582_s8 + $0x32] sm:$0x3]  ;;  %v3868_v54 = vld [vmem:[%s5582_s8 + $0x34] sm:$0x3]  ;;  %v3869_v55 = vld [vmem:[%s5582_s8 + $0x36] sm:$0x3] }
  0x16   : > { %4775 = vmatprep.subr.bf16.mxu1 %v5499_v1  ;;  %v322_v34 = vrot.slane %v308_v27, %v5611_v29  ;;  %v426_v36 = vrot.slane %v418_v30, %v5611_v29  ;;  %v3894_v57 = vld [vmem:[%s5582_s8 + $0x28] sm:$0x3]  ;;  %v3895_v58 = vld [vmem:[%s5582_s8 + $0x2a] sm:$0x3]  ;;  %v3896_v59 = vld [vmem:[%s5582_s8 + $0x2c] sm:$0x3]  ;;  %v551_v61 = vcombine.low %v3866_v52, %v3867_v53  ;;  %v552_v62 = vcombine.low %v3868_v54, %v3869_v55 }
  0x17   : > { %v433_v37 = vrot.slane %v419_v31, %v5611_v29  ;;  %v3897_v60 = vld [vmem:[%s5582_s8 + $0x2e] sm:$0x3]  ;;  %v686_v0 = vcombine.low %v3894_v57, %v3895_v58  ;;  %v5308_v13 = vld [vmem:[%s6641_s1 + $0x380] sm:$0xff]   ;;  %v5312_v17 = vld [vmem:[%s6641_s1 + $0x390] sm:$0xff]  }
  0x18   : > { %4756 = vmatpush3.bf16.msra.mxu0 %v5283_v10  ;;  %v323_v39 = vcombine.low %v315_v33, %v322_v34  ;;  %v687_v2 = vcombine.low %v3896_v59, %v3897_v60  ;;  %v559_v4 = vrot.slane %v551_v61, %v5611_v29  ;;  %v566_v5 = vrot.slane %v552_v62, %v5611_v29  ;;  %v5309_v14 = vld [vmem:[%s6641_s1 + $0x308] sm:$0xff]   ;;  %v5313_v18 = vld [vmem:[%s6641_s1 + $0x318] sm:$0xff]   ;;  %v5316_v21 = vld [vmem:[%s6641_s1 + $0x3a0] sm:$0xff]  }
  0x19   : > { %4776 = vmatpush3.bf16.msra.mxu1 %v5284_v11  ;;  %4757 = vmatprep.subr.bf16.mxu0 %v5499_v1  ;;  %v434_v40 = vcombine.low %v426_v36, %v433_v37  ;;  %v694_v7 = vrot.slane %v686_v0, %v5611_v29  ;;  %v5307_v11 = vld [vmem:[%s6641_s1 + $0x300] sm:$0xff]   ;;  %v5314_v19 = vld [vmem:[%s6641_s1 + $0x398] sm:$0xff]   ;;  %v5317_v22 = vld [vmem:[%s6641_s1 + $0x328] sm:$0xff]  }
  0x1a   : > { %4777 = vmatprep.subr.bf16.mxu1 %v5499_v1  ;;  %v701_v8 = vrot.slane %v687_v2, %v5611_v29  ;;  %v567_v10 = vcombine.low %v559_v4, %v566_v5  ;;  %v3922_v23 = vld [vmem:[%s5582_s8 + $0x20] sm:$0x3]  ;;  %v3923_v24 = vld [vmem:[%s5582_s8 + $0x22] sm:$0x3]  ;;  %v3924_v25 = vld [vmem:[%s5582_s8 + $0x24] sm:$0x3] }
  0x1b   : > { %v3925_v26 = vld [vmem:[%s5582_s8 + $0x26] sm:$0x3]  ;;  %v5318_v27 = vld [vmem:[%s6641_s1 + $0x3a8] sm:$0xff]   ;;  %v3951_v30 = vld [vmem:[%s5582_s8 + $0x1a] sm:$0x3]  ;;  %v821_v33 = vcombine.low %v3922_v23, %v3923_v24 }
  0x1c   : > { %4758 = vmatpush3.bf16.msra.mxu0 %v5285_v12  ;;  %v702_v12 = vcombine.low %v694_v7, %v701_v8  ;;  %v3952_v31 = vld [vmem:[%s5582_s8 + $0x1c] sm:$0x3]  ;;  %v822_v34 = vcombine.low %v3924_v25, %v3925_v26  ;;  %v5328_v52 = vld [vmem:[%s6641_s1 + $0x590] sm:$0xff]   ;;  %v5331_v55 = vld [vmem:[%s6641_s1 + $0x520] sm:$0xff]  }
  0x1d   : > { %4778 = vmatpush3.bf16.msra.mxu1 %v5286_v16  ;;  %4759 = vmatprep.subr.bf16.mxu0 %v5499_v1  ;;  %v5311_v16 = vld [vmem:[%s6641_s1 + $0x310] sm:$0xff]   ;;  %v5329_v53 = vld [vmem:[%s6641_s1 + $0x518] sm:$0xff]   ;;  %v5333_v57 = vld [vmem:[%s6641_s1 + $0x528] sm:$0xff]  }
  0x1e   : > { %4779 = vmatprep.subr.bf16.mxu1 %v5499_v1  ;;  %v5330_v54 = vld [vmem:[%s6641_s1 + $0x598] sm:$0xff]   ;;  %v3978_v58 = vld [vmem:[%s5582_s8 + $0x10] sm:$0x3]  ;;  %v3979_v59 = vld [vmem:[%s5582_s8 + $0x12] sm:$0x3] }
  0x1f   : > { %v3980_v60 = vld [vmem:[%s5582_s8 + $0x14] sm:$0x3]  ;;  %v3981_v61 = vld [vmem:[%s5582_s8 + $0x16] sm:$0x3]  ;;  %v5334_v62 = vld [vmem:[%s6641_s1 + $0x5a8] sm:$0xff]   ;;  %v1091_v4 = vcombine.low %v3978_v58, %v3979_v59 }
  0x20   : > { %4760 = vmatpush3.bf16.msra.mxu0 %v5287_v28  ;;  %v3950_v28 = vld [vmem:[%s5582_s8 + $0x18] sm:$0x3]  ;;  %v4007_v0 = vld [vmem:[%s5582_s8 + $0xa] sm:$0x3]  ;;  %v4008_v2 = vld [vmem:[%s5582_s8 + $0xc] sm:$0x3]  ;;  %v1092_v5 = vcombine.low %v3980_v60, %v3981_v61 }
  0x21   : > { %4780 = vmatpush3.bf16.msra.mxu1 %v5288_v32  ;;  %4761 = vmatprep.subr.bf16.mxu0 %v5499_v1  ;;  %v3953_v32 = vld [vmem:[%s5582_s8 + $0x1e] sm:$0x3]  ;;  %v956_v36 = vcombine.low %v3950_v28, %v3951_v30  ;;  %v5344_v23 = vld [vmem:[%s6641_s1 + $0xd0] sm:$0xff]   ;;  %v5347_v26 = vld [vmem:[%s6641_s1 + $0x620] sm:$0xff]  }
  0x22   : > { %4781 = vmatprep.subr.bf16.mxu1 %v5499_v1  ;;  %v957_v37 = vcombine.low %v3952_v31, %v3953_v32  ;;  %v5345_v24 = vld [vmem:[%s6641_s1 + $0x618] sm:$0xff]   ;;  %v5349_v28 = vld [vmem:[%s6641_s1 + $0x628] sm:$0xff]   ;;  %v1335_v30 = vld [vmem:[%s5582_s8] sm:$0x3] }
  0x23   : > { %v5346_v25 = vld [vmem:[%s6641_s1 + $0xd8] sm:$0xff]   ;;  %v1336_v31 = vld [vmem:[%s5582_s8 + $0x2] sm:$0x3]  ;;  %v1337_v32 = vld [vmem:[%s5582_s8 + $0x4] sm:$0x3] }
  0x24   : > { %4762 = vmatpush3.bf16.msra.mxu0 %v5289_v35  ;;  %v5319_v35 = vld [vmem:[%s6641_s1 + $0x330] sm:$0xff]   ;;  %v5361_v59 = vld [vmem:[%s6641_s1 + $0x58] sm:$0xff]   ;;  %v5363_v61 = vld [vmem:[%s6641_s1 + $0x60] sm:$0xff]  }
  0x25   : > { %4782 = vmatpush3.bf16.msra.mxu1 %v5290_v38  ;;  %4787 = vmatprep.subr.bf16.mxu0 %v5499_v1  ;;  %v5320_v38 = vld [vmem:[%s6641_s1 + $0x3b0] sm:$0xff]   ;;  %v5362_v60 = vld [vmem:[%s6641_s1 + $0x2d8] sm:$0xff]  }
  0x26   : > { %4807 = vmatprep.subr.bf16.mxu1 %v5499_v1  ;;  %v5360_v58 = vld [vmem:[%s6641_s1 + $0x2d0] sm:$0xff]  }
  0x27   : > { %4764 = vmatmul.mubr.bf16.vlgmr.msra.gmra.mrb[0].mxu0 %v323_v39  ;;  %v829_v39 = vrot.slane %v821_v33, %v5611_v29  ;;  %v5350_v33 = vld [vmem:[%s6641_s1 + $0xe8] sm:$0xff]  }
  0x28   : > { %4784 = vmatmul.mubr.bf16.vlgmr.msra.gmra.mrb[0].mxu1 %v434_v40  ;;  %4788 = vmatpush3.bf16.msra.mxu0 %v5291_v41  ;;  %v836_v40 = vrot.slane %v822_v34, %v5611_v29  ;;  %v5321_v41 = vld [vmem:[%s6641_s1 + $0x338] sm:$0xff]   ;;  %v1338_v34 = vld [vmem:[%s5582_s8 + $0x6] sm:$0x3] }
  0x29   : > { %4808 = vmatpush3.bf16.msra.mxu1 %v5292_v42  ;;  %4789 = vmatprep.subr.bf16.mxu0 %v5499_v1  ;;  %v964_v42 = vrot.slane %v956_v36, %v5611_v29  ;;  %v4080_v36 = vld [vmem:[%s5582_s8 + $0x3a] sm:$0x3] }
  0x2a   : > { %4809 = vmatprep.subr.bf16.mxu1 %v5499_v1  ;;  %4803 = vmatprep.mubr.msk.bf16.mxu0 %vm5500_vm0, %v5499_v1 }
  0x2b   : > { %4823 = vmatprep.mubr.msk.bf16.mxu1 %vm5500_vm0, %v5499_v1 }
  0x2c   : > { %4790 = vmatpush3.bf16.msra.mxu0 %v5293_v43  ;;  %v971_v43 = vrot.slane %v957_v37, %v5611_v29  ;;  %v4081_v37 = vld [vmem:[%s5582_s8 + $0x3c] sm:$0x3] }
  0x2d   : > { %4810 = vmatpush3.bf16.msra.mxu1 %v5294_v44  ;;  %4791 = vmatprep.subr.bf16.mxu0 %v5499_v1  ;;  %v5322_v44 = vld [vmem:[%s6641_s1 + $0x3b8] sm:$0xff]  }
  0x2e   : > { %4811 = vmatprep.subr.bf16.mxu1 %v5499_v1 }
  0x30   : > { %4792 = vmatpush3.bf16.msra.mxu0 %v5295_v45  ;;  %v837_v45 = vcombine.low %v829_v39, %v836_v40  ;;  %v1360_v39 = vcombine.low %v1335_v30, %v1336_v31  ;;  %v1361_v40 = vcombine.low %v1337_v32, %v1338_v34  ;;  %v5376_v30 = vld [vmem:[%s6641_s1 + $0x550] sm:$0xff]   ;;  %v5377_v31 = vld [vmem:[%s6641_s1 + $0x358] sm:$0xff]   ;;  %v5380_v34 = vld [vmem:[%s6641_s1 + $0x560] sm:$0xff]  }
  0x31   : > { %4812 = vmatpush3.bf16.msra.mxu1 %v5296_v46  ;;  %4793 = vmatprep.subr.bf16.mxu0 %v5499_v1  ;;  %v5323_v46 = vld [vmem:[%s6641_s1 + $0x500] sm:$0xff]   ;;  %v5378_v32 = vld [vmem:[%s6641_s1 + $0x558] sm:$0xff]  }
  0x32   : > { %4813 = vmatprep.subr.bf16.mxu1 %v5499_v1 }
  0x34   : > { %4794 = vmatpush3.bf16.msra.mxu0 %v5297_v47  ;;  %v972_v47 = vcombine.low %v964_v42, %v971_v43 }
  0x35   : > { %4814 = vmatpush3.bf16.msra.mxu1 %v5298_v48  ;;  %4795 = vmatprep.subr.bf16.mxu0 %v5499_v1  ;;  %v5324_v48 = vld [vmem:[%s6641_s1 + $0x580] sm:$0xff]  }
  0x36   : > { %4815 = vmatprep.subr.bf16.mxu1 %v5499_v1 }
  0x38   : > { %4796 = vmatpush3.bf16.msra.mxu0 %v5299_v49  ;;  %v5325_v49 = vld [vmem:[%s6641_s1 + $0x508] sm:$0xff]  }
  0x39   : > { %4816 = vmatpush3.bf16.msra.mxu1 %v5300_v50  ;;  %4797 = vmatprep.subr.bf16.mxu0 %v5499_v1  ;;  %v5326_v50 = vld [vmem:[%s6641_s1 + $0x588] sm:$0xff]  }
  0x3a   : > { %4817 = vmatprep.subr.bf16.mxu1 %v5499_v1 }
  0x3c   : > { %4798 = vmatpush3.bf16.msra.mxu0 %v5301_v51  ;;  %v5327_v51 = vld [vmem:[%s6641_s1 + $0x510] sm:$0xff]  }
  0x3d   : > { %4818 = vmatpush3.bf16.msra.mxu1 %v5302_v56  ;;  %4799 = vmatprep.subr.bf16.mxu0 %v5499_v1  ;;  %v5332_v56 = vld [vmem:[%s6641_s1 + $0x5a0] sm:$0xff]  }
  0x3e   : > { %4819 = vmatprep.subr.bf16.mxu1 %v5499_v1 }
  0x40   : > { %4800 = vmatpush3.bf16.msra.mxu0 %v5303_v63  ;;  %v4006_v63 = vld [vmem:[%s5582_s8 + $0x8] sm:$0x3] }
  0x41   : > { %4820 = vmatpush3.bf16.msra.mxu1 %v5304_v3  ;;  %4801 = vmatprep.subr.bf16.mxu0 %v5499_v1  ;;  %v4009_v3 = vld [vmem:[%s5582_s8 + $0xe] sm:$0x3]  ;;  %v1226_v7 = vcombine.low %v4006_v63, %v4007_v0  ;;  %v4059_v0 = vld [vmem:[%s5582_s8 + $0x40] sm:$0x3] }
  0x42   : > { %4821 = vmatprep.subr.bf16.mxu1 %v5499_v1  ;;  %v1227_v8 = vcombine.low %v4008_v2, %v4009_v3  ;;  %v5365_v63 = vld [vmem:[%s6641_s1 + $0x68] sm:$0xff]   ;;  %v4060_v2 = vld [vmem:[%s5582_s8 + $0x42] sm:$0x3]  ;;  %v4061_v3 = vld [vmem:[%s5582_s8 + $0x44] sm:$0x3] }
  0x44   : > { %4802 = vmatpush3.bf16.msra.mxu0 %v5305_v6  ;;  %v5335_v6 = vld [vmem:[%s6641_s1 + $0x530] sm:$0xff]  }
  0x45   : > { %4822 = vmatpush3.bf16.msra.mxu1 %v5306_v9  ;;  %4827 = vmatprep.subr.bf16.mxu0 %v5499_v1  ;;  %v5336_v9 = vld [vmem:[%s6641_s1 + $0x5b0] sm:$0xff]  }
  0x46   : > { %4847 = vmatprep.subr.bf16.mxu1 %v5499_v1 }
  0x47   : > { %4804 = vmatmul.mubr.bf16.vlgmr.msra.gmra.mrb[4].mxu0 %v567_v10  ;;  %v1099_v10 = vrot.slane %v1091_v4, %v5611_v29  ;;  %v4062_v4 = vld [vmem:[%s5582_s8 + $0x46] sm:$0x3] }
  0x48   : > { %4828 = vmatpush3.bf16.msra.mxu0 %v5307_v11  ;;  %4824 = vmatmul.mubr.bf16.vlgmr.msra.gmra.mrb[4].mxu1 %v702_v12  ;;  %v1106_v11 = vrot.slane %v1092_v5, %v5611_v29  ;;  %v5337_v12 = vld [vmem:[%s6641_s1 + $0x538] sm:$0xff]   ;;  %v5366_v5 = vld [vmem:[%s6641_s1 + $0x2e8] sm:$0xff]  }
  0x49   : > { %4848 = vmatpush3.bf16.msra.mxu1 %v5308_v13  ;;  %4829 = vmatprep.subr.bf16.mxu0 %v5499_v1  ;;  %v1234_v13 = vrot.slane %v1226_v7, %v5611_v29  ;;  %v4116_v7 = vld [vmem:[%s5582_s8 + $0x2a] sm:$0x3] }
  0x4a   : > { %4849 = vmatprep.subr.bf16.mxu1 %v5499_v1  ;;  %4843 = vmatprep.mubr.msk.bf16.mxu0 %vm5500_vm0, %v5499_v1 }
  0x4b   : > { %4863 = vmatprep.mubr.msk.bf16.mxu1 %vm5500_vm0, %v5499_v1 }
  0x4c   : > { %4830 = vmatpush3.bf16.msra.mxu0 %v5309_v14  ;;  %v1241_v14 = vrot.slane %v1227_v8, %v5611_v29  ;;  %v4117_v8 = vld [vmem:[%s5582_s8 + $0x2c] sm:$0x3] }
  0x4d   : > { %4850 = vmatpush3.bf16.msra.mxu1 %v5310_v15  ;;  %4831 = vmatprep.subr.bf16.mxu0 %v5499_v1  ;;  %v5338_v15 = vld [vmem:[%s6641_s1 + $0x5b8] sm:$0xff]  }
  0x4e   : > { %4851 = vmatprep.subr.bf16.mxu1 %v5499_v1 }
  0x50   : > { %4832 = vmatpush3.bf16.msra.mxu0 %v5311_v16  ;;  %v1107_v16 = vcombine.low %v1099_v10, %v1106_v11  ;;  %v5367_v10 = vld [vmem:[%s6641_s1 + $0x70] sm:$0xff]   ;;  %v1651_v11 = vcombine.low %v4059_v0, %v4060_v2  ;;  %v5393_v2 = vld [vmem:[%s6641_s1 + $0x5d8] sm:$0xff]  }
  0x51   : > { %4852 = vmatpush3.bf16.msra.mxu1 %v5312_v17  ;;  %4833 = vmatprep.subr.bf16.mxu0 %v5499_v1  ;;  %v5339_v17 = vld [vmem:[%s6641_s1 + $0x600] sm:$0xff]   ;;  %v5392_v0 = vld [vmem:[%s6641_s1 + $0x1d0] sm:$0xff]  }
  0x52   : > { %4853 = vmatprep.subr.bf16.mxu1 %v5499_v1 }
  0x54   : > { %4834 = vmatpush3.bf16.msra.mxu0 %v5313_v18  ;;  %v1242_v18 = vcombine.low %v1234_v13, %v1241_v14 }
  0x55   : > { %4854 = vmatpush3.bf16.msra.mxu1 %v5314_v19  ;;  %4835 = vmatprep.subr.bf16.mxu0 %v5499_v1  ;;  %v5340_v19 = vld [vmem:[%s6641_s1 + $0xc0] sm:$0xff]  }
  0x56   : > { %4855 = vmatprep.subr.bf16.mxu1 %v5499_v1 }
  0x58   : > { %4836 = vmatpush3.bf16.msra.mxu0 %v5315_v20  ;;  %v5341_v20 = vld [vmem:[%s6641_s1 + $0x608] sm:$0xff]  }
  0x59   : > { %4856 = vmatpush3.bf16.msra.mxu1 %v5316_v21  ;;  %4837 = vmatprep.subr.bf16.mxu0 %v5499_v1  ;;  %v5342_v21 = vld [vmem:[%s6641_s1 + $0xc8] sm:$0xff]  }
  0x5a   : > { %4857 = vmatprep.subr.bf16.mxu1 %v5499_v1 }
  0x5c   : > { %4838 = vmatpush3.bf16.msra.mxu0 %v5317_v22  ;;  %v5343_v22 = vld [vmem:[%s6641_s1 + $0x610] sm:$0xff]  }
  0x5d   : > { %4858 = vmatpush3.bf16.msra.mxu1 %v5318_v27  ;;  %4839 = vmatprep.subr.bf16.mxu0 %v5499_v1  ;;  %v5348_v27 = vld [vmem:[%s6641_s1 + $0xe0] sm:$0xff]  }
  0x5e   : > { %4859 = vmatprep.subr.bf16.mxu1 %v5499_v1 }
  0x60   : > { %4840 = vmatpush3.bf16.msra.mxu0 %v5319_v35  ;;  %v4079_v35 = vld [vmem:[%s5582_s8 + $0x38] sm:$0x3] }
  0x61   : > { %4860 = vmatpush3.bf16.msra.mxu1 %v5320_v38  ;;  %4841 = vmatprep.subr.bf16.mxu0 %v5499_v1  ;;  %v4082_v38 = vld [vmem:[%s5582_s8 + $0x3e] sm:$0x3]  ;;  %v1540_v42 = vcombine.low %v4079_v35, %v4080_v36  ;;  %v5381_v35 = vld [vmem:[%s6641_s1 + $0x368] sm:$0xff]   ;;  %v4143_v36 = vld [vmem:[%s5582_s8 + $0x20] sm:$0x3] }
  0x62   : > { %4861 = vmatprep.subr.bf16.mxu1 %v5499_v1  ;;  %v1541_v43 = vcombine.low %v4081_v37, %v4082_v38  ;;  %v4144_v37 = vld [vmem:[%s5582_s8 + $0x22] sm:$0x3]  ;;  %v4145_v38 = vld [vmem:[%s5582_s8 + $0x24] sm:$0x3] }
  0x64   : > { %4842 = vmatpush3.bf16.msra.mxu0 %v5321_v41  ;;  %v5351_v41 = vld [vmem:[%s6641_s1 + $0x630] sm:$0xff]  }
  0x65   : > { %4862 = vmatpush3.bf16.msra.mxu1 %v5322_v44  ;;  %4867 = vmatprep.subr.bf16.mxu0 %v5499_v1  ;;  %v5352_v44 = vld [vmem:[%s6641_s1 + $0xf0] sm:$0xff]  }
  0x66   : > { %4887 = vmatprep.subr.bf16.mxu1 %v5499_v1 }
  0x67   : > { %4844 = vmatmul.mubr.bf16.vlgmr.msra.gmra.mrb[8].mxu0 %v837_v45  ;;  %v1368_v45 = vrot.slane %v1360_v39, %v5611_v29  ;;  %v4146_v39 = vld [vmem:[%s5582_s8 + $0x26] sm:$0x3] }
  0x68   : > { %4868 = vmatpush3.bf16.msra.mxu0 %v5323_v46  ;;  %4864 = vmatmul.mubr.bf16.vlgmr.msra.gmra.mrb[8].mxu1 %v972_v47  ;;  %v1375_v46 = vrot.slane %v1361_v40, %v5611_v29  ;;  %v5353_v47 = vld [vmem:[%s6641_s1 + $0x638] sm:$0xff]   ;;  %v5382_v40 = vld [vmem:[%s6641_s1 + $0x568] sm:$0xff]  }
  0x69   : > { %4888 = vmatpush3.bf16.msra.mxu1 %v5324_v48  ;;  %4869 = vmatprep.subr.bf16.mxu0 %v5499_v1  ;;  %v1548_v48 = vrot.slane %v1540_v42, %v5611_v29  ;;  %v4172_v42 = vld [vmem:[%s5582_s8 + $0x12] sm:$0x3] }
  0x6a   : > { %4889 = vmatprep.subr.bf16.mxu1 %v5499_v1  ;;  %4883 = vmatprep.mubr.msk.bf16.mxu0 %vm5500_vm0, %v5499_v1 }
  0x6b   : > { %4903 = vmatprep.mubr.msk.bf16.mxu1 %vm5500_vm0, %v5499_v1 }
  0x6c   : > { %4870 = vmatpush3.bf16.msra.mxu0 %v5325_v49  ;;  %v1555_v49 = vrot.slane %v1541_v43, %v5611_v29  ;;  %v4173_v43 = vld [vmem:[%s5582_s8 + $0x14] sm:$0x3] }
  0x6d   : > { %4890 = vmatpush3.bf16.msra.mxu1 %v5326_v50  ;;  %4871 = vmatprep.subr.bf16.mxu0 %v5499_v1  ;;  %v5354_v50 = vld [vmem:[%s6641_s1 + $0xf8] sm:$0xff]  }
  0x6e   : > { %4891 = vmatprep.subr.bf16.mxu1 %v5499_v1 }
  0x70   : > { %4872 = vmatpush3.bf16.msra.mxu0 %v5327_v51  ;;  %v1376_v51 = vcombine.low %v1368_v45, %v1375_v46  ;;  %v5383_v45 = vld [vmem:[%s6641_s1 + $0x370] sm:$0xff]   ;;  %v1917_v46 = vcombine.low %v4143_v36, %v4144_v37 }
  0x71   : > { %4892 = vmatpush3.bf16.msra.mxu1 %v5328_v52  ;;  %4873 = vmatprep.subr.bf16.mxu0 %v5499_v1  ;;  %v5355_v52 = vld [vmem:[%s6641_s1 + $0x40] sm:$0xff]  }
  0x72   : > { %4893 = vmatprep.subr.bf16.mxu1 %v5499_v1 }
  0x74   : > { %4874 = vmatpush3.bf16.msra.mxu0 %v5329_v53  ;;  %v1556_v53 = vcombine.low %v1548_v48, %v1555_v49 }
  0x75   : > { %4894 = vmatpush3.bf16.msra.mxu1 %v5330_v54  ;;  %4875 = vmatprep.subr.bf16.mxu0 %v5499_v1  ;;  %v5356_v54 = vld [vmem:[%s6641_s1 + $0x2c0] sm:$0xff]  }
  0x76   : > { %4895 = vmatprep.subr.bf16.mxu1 %v5499_v1 }
  0x78   : > { %4876 = vmatpush3.bf16.msra.mxu0 %v5331_v55  ;;  %v5357_v55 = vld [vmem:[%s6641_s1 + $0x48] sm:$0xff]  }
  0x79   : > { %4896 = vmatpush3.bf16.msra.mxu1 %v5332_v56  ;;  %4877 = vmatprep.subr.bf16.mxu0 %v5499_v1  ;;  %v5358_v56 = vld [vmem:[%s6641_s1 + $0x2c8] sm:$0xff]  }
  0x7a   : > { %4897 = vmatprep.subr.bf16.mxu1 %v5499_v1 }
  0x7c   : > { %4878 = vmatpush3.bf16.msra.mxu0 %v5333_v57  ;;  %v5359_v57 = vld [vmem:[%s6641_s1 + $0x50] sm:$0xff]  }
  0x7d   : > { %4898 = vmatpush3.bf16.msra.mxu1 %v5334_v62  ;;  %4879 = vmatprep.subr.bf16.mxu0 %v5499_v1  ;;  %v5364_v62 = vld [vmem:[%s6641_s1 + $0x2e0] sm:$0xff]  }
  0x7e   : > { %4899 = vmatprep.subr.bf16.mxu1 %v5499_v1 }
  0x80   : > { %4880 = vmatpush3.bf16.msra.mxu0 %v5335_v6  ;;  %v4115_v6 = vld [vmem:[%s5582_s8 + $0x28] sm:$0x3] }
  0x81   : > { %4900 = vmatpush3.bf16.msra.mxu1 %v5336_v9  ;;  %4881 = vmatprep.subr.bf16.mxu0 %v5499_v1  ;;  %v4118_v9 = vld [vmem:[%s5582_s8 + $0x2e] sm:$0x3]  ;;  %v1783_v13 = vcombine.low %v4115_v6, %v4116_v7 }
  0x82   : > { %4901 = vmatprep.subr.bf16.mxu1 %v5499_v1  ;;  %v1784_v14 = vcombine.low %v4117_v8, %v4118_v9  ;;  %v5397_v6 = vld [vmem:[%s6641_s1 + $0x5e8] sm:$0xff]  }
  0x83   : > { %v5398_v7 = vld [vmem:[%s6641_s1 + $0x1e8] sm:$0xff]  }
  0x84   : > { %4882 = vmatpush3.bf16.msra.mxu0 %v5337_v12  ;;  %v1652_v12 = vcombine.low %v4061_v3, %v4062_v4  ;;  %v5394_v3 = vld [vmem:[%s6641_s1 + $0x1d8] sm:$0xff]   ;;  %v5395_v4 = vld [vmem:[%s6641_s1 + $0x5e0] sm:$0xff]   ;;  %v4199_v8 = vld [vmem:[%s5582_s8 + $0x8] sm:$0x3] }
  0x85   : > { %4902 = vmatpush3.bf16.msra.mxu1 %v5338_v15  ;;  %4907 = vmatprep.subr.bf16.mxu0 %v5499_v1  ;;  %v5368_v15 = vld [vmem:[%s6641_s1 + $0x2f0] sm:$0xff]   ;;  %v4200_v9 = vld [vmem:[%s5582_s8 + $0xa] sm:$0x3] }
  0x86   : > { %4927 = vmatprep.subr.bf16.mxu1 %v5499_v1 }
  0x87   : > { %4884 = vmatmul.mubr.bf16.vlgmr.msra.gmra.mrb[12].mxu0 %v1107_v16  ;;  %v1659_v16 = vrot.slane %v1651_v11, %v5611_v29  ;;  %v4202_v11 = vld [vmem:[%s5582_s8 + $0xe] sm:$0x3] }
  0x88   : > { %4908 = vmatpush3.bf16.msra.mxu0 %v5339_v17  ;;  %4904 = vmatmul.mubr.bf16.vlgmr.msra.gmra.mrb[12].mxu1 %v1242_v18  ;;  %v1666_v17 = vrot.slane %v1652_v12, %v5611_v29  ;;  %v5369_v18 = vld [vmem:[%s6641_s1 + $0x78] sm:$0xff]  }
  0x89   : > { %4928 = vmatpush3.bf16.msra.mxu1 %v5340_v19  ;;  %4909 = vmatprep.subr.bf16.mxu0 %v5499_v1  ;;  %v1791_v19 = vrot.slane %v1783_v13, %v5611_v29  ;;  %v4251_v12 = vld [vmem:[%s5582_s8 + $0x38] sm:$0x3]  ;;  %v4252_v13 = vld [vmem:[%s5582_s8 + $0x3a] sm:$0x3] }
  0x8a   : > { %4929 = vmatprep.subr.bf16.mxu1 %v5499_v1  ;;  %4923 = vmatprep.mubr.msk.bf16.mxu0 %vm5500_vm0, %v5499_v1 }
  0x8b   : > { %4943 = vmatprep.mubr.msk.bf16.mxu1 %vm5500_vm0, %v5499_v1 }
  0x8c   : > { %4910 = vmatpush3.bf16.msra.mxu0 %v5341_v20  ;;  %v1798_v20 = vrot.slane %v1784_v14, %v5611_v29  ;;  %v4253_v14 = vld [vmem:[%s5582_s8 + $0x3c] sm:$0x3] }
  0x8d   : > { %4930 = vmatpush3.bf16.msra.mxu1 %v5342_v21  ;;  %4911 = vmatprep.subr.bf16.mxu0 %v5499_v1  ;;  %v5370_v21 = vld [vmem:[%s6641_s1 + $0x2f8] sm:$0xff]  }
  0x8e   : > { %4931 = vmatprep.subr.bf16.mxu1 %v5499_v1 }
  0x90   : > { %4912 = vmatpush3.bf16.msra.mxu0 %v5343_v22  ;;  %v1667_v22 = vcombine.low %v1659_v16, %v1666_v17 }
  0x91   : > { %4932 = vmatpush3.bf16.msra.mxu1 %v5344_v23  ;;  %4913 = vmatprep.subr.bf16.mxu0 %v5499_v1  ;;  %v5371_v23 = vld [vmem:[%s6641_s1 + $0x340] sm:$0xff]  }
  0x92   : > { %4933 = vmatprep.subr.bf16.mxu1 %v5499_v1 }
  0x94   : > { %4914 = vmatpush3.bf16.msra.mxu0 %v5345_v24  ;;  %v1799_v24 = vcombine.low %v1791_v19, %v1798_v20  ;;  %v2185_v19 = vcombine.low %v4199_v8, %v4200_v9 }
  0x95   : > { %4934 = vmatpush3.bf16.msra.mxu1 %v5346_v25  ;;  %4915 = vmatprep.subr.bf16.mxu0 %v5499_v1  ;;  %v5372_v25 = vld [vmem:[%s6641_s1 + $0x540] sm:$0xff]  }
  0x96   : > { %4935 = vmatprep.subr.bf16.mxu1 %v5499_v1 }
  0x98   : > { %4916 = vmatpush3.bf16.msra.mxu0 %v5347_v26  ;;  %v5373_v26 = vld [vmem:[%s6641_s1 + $0x348] sm:$0xff]  }
  0x99   : > { %4936 = vmatpush3.bf16.msra.mxu1 %v5348_v27  ;;  %4917 = vmatprep.subr.bf16.mxu0 %v5499_v1  ;;  %v5374_v27 = vld [vmem:[%s6641_s1 + $0x548] sm:$0xff]  }
  0x9a   : > { %4937 = vmatprep.subr.bf16.mxu1 %v5499_v1 }
  0x9c   : > { %4918 = vmatpush3.bf16.msra.mxu0 %v5349_v28  ;;  %v5375_v28 = vld [vmem:[%s6641_s1 + $0x350] sm:$0xff]  }
  0x9d   : > { %4938 = vmatpush3.bf16.msra.mxu1 %v5350_v33  ;;  %4919 = vmatprep.subr.bf16.mxu0 %v5499_v1  ;;  %v5379_v33 = vld [vmem:[%s6641_s1 + $0x360] sm:$0xff]  }
  0x9e   : > { %4939 = vmatprep.subr.bf16.mxu1 %v5499_v1 }
  0xa0   : > { %4920 = vmatpush3.bf16.msra.mxu0 %v5351_v41  ;;  %v4171_v41 = vld [vmem:[%s5582_s8 + $0x10] sm:$0x3] }
  0xa1   : > { %4940 = vmatpush3.bf16.msra.mxu1 %v5352_v44  ;;  %4921 = vmatprep.subr.bf16.mxu0 %v5499_v1  ;;  %v4174_v44 = vld [vmem:[%s5582_s8 + $0x16] sm:$0x3]  ;;  %v2051_v48 = vcombine.low %v4171_v41, %v4172_v42  ;;  %v5404_v42 = vld [vmem:[%s6641_s1 + $0x240] sm:$0xff]  }
  0xa2   : > { %4941 = vmatprep.subr.bf16.mxu1 %v5499_v1  ;;  %v2052_v49 = vcombine.low %v4173_v43, %v4174_v44  ;;  %v5405_v43 = vld [vmem:[%s6641_s1 + $0x148] sm:$0xff]  }
  0xa3   : > { %v5406_v44 = vld [vmem:[%s6641_s1 + $0x248] sm:$0xff]  }
  0xa4   : > { %4922 = vmatpush3.bf16.msra.mxu0 %v5353_v47  ;;  %v1918_v47 = vcombine.low %v4145_v38, %v4146_v39  ;;  %v5402_v38 = vld [vmem:[%s6641_s1 + $0x1f8] sm:$0xff]  }
  0xa5   : > { %4942 = vmatpush3.bf16.msra.mxu1 %v5354_v50  ;;  %4947 = vmatprep.subr.bf16.mxu0 %v5499_v1  ;;  %v5384_v50 = vld [vmem:[%s6641_s1 + $0x570] sm:$0xff]  }
  0xa6   : > { %4967 = vmatprep.subr.bf16.mxu1 %v5499_v1 }
  0xa7   : > { %4924 = vmatmul.mubr.bf16.vlgmr.msra.gmra.mrb[16].mxu0 %v1376_v51  ;;  %v1925_v51 = vrot.slane %v1917_v46, %v5611_v29  ;;  %v5408_v46 = vld [vmem:[%s6641_s1 + $0x250] sm:$0xff]  }
  0xa8   : > { %4948 = vmatpush3.bf16.msra.mxu0 %v5355_v52  ;;  %4944 = vmatmul.mubr.bf16.vlgmr.msra.gmra.mrb[16].mxu1 %v1556_v53  ;;  %v1932_v52 = vrot.slane %v1918_v47, %v5611_v29  ;;  %v5385_v53 = vld [vmem:[%s6641_s1 + $0x378] sm:$0xff]  }
  0xa9   : > { %4968 = vmatpush3.bf16.msra.mxu1 %v5356_v54  ;;  %4949 = vmatprep.subr.bf16.mxu0 %v5499_v1  ;;  %v2059_v54 = vrot.slane %v2051_v48, %v5611_v29  ;;  %v5409_v47 = vld [vmem:[%s6641_s1 + $0x158] sm:$0xff]  }
  0xaa   : > { %4969 = vmatprep.subr.bf16.mxu1 %v5499_v1  ;;  %4963 = vmatprep.mubr.msk.bf16.mxu0 %vm5500_vm0, %v5499_v1  ;;  %v5410_v48 = vld [vmem:[%s6641_s1 + $0x258] sm:$0xff]  }
  0xab   : > { %4983 = vmatprep.mubr.msk.bf16.mxu1 %vm5500_vm0, %v5499_v1 }
  0xac   : > { %4950 = vmatpush3.bf16.msra.mxu0 %v5357_v55  ;;  %v2066_v55 = vrot.slane %v2052_v49, %v5611_v29  ;;  %v5411_v49 = vld [vmem:[%s6641_s1 + $0x160] sm:$0xff]  }
  0xad   : > { %4970 = vmatpush3.bf16.msra.mxu1 %v5358_v56  ;;  %4951 = vmatprep.subr.bf16.mxu0 %v5499_v1  ;;  %v5386_v56 = vld [vmem:[%s6641_s1 + $0x578] sm:$0xff]  }
  0xae   : > { %4971 = vmatprep.subr.bf16.mxu1 %v5499_v1 }
  0xb0   : > { %4952 = vmatpush3.bf16.msra.mxu0 %v5359_v57  ;;  %v1933_v57 = vcombine.low %v1925_v51, %v1932_v52  ;;  %v5413_v51 = vld [vmem:[%s6641_s1 + $0x168] sm:$0xff]  }
  0xb1   : > { %4972 = vmatpush3.bf16.msra.mxu1 %v5360_v58  ;;  %4953 = vmatprep.subr.bf16.mxu0 %v5499_v1  ;;  %v5387_v58 = vld [vmem:[%s6641_s1 + $0x5c0] sm:$0xff]   ;;  %v5414_v52 = vld [vmem:[%s6641_s1 + $0x268] sm:$0xff]  }
  0xb2   : > { %4973 = vmatprep.subr.bf16.mxu1 %v5499_v1 }
  0xb4   : > { %4954 = vmatpush3.bf16.msra.mxu0 %v5361_v59  ;;  %v2067_v59 = vcombine.low %v2059_v54, %v2066_v55  ;;  %v4232_v54 = vld [vmem:[%s5582_s8 + $0x42] sm:$0x3]  ;;  %v4233_v55 = vld [vmem:[%s5582_s8 + $0x44] sm:$0x3] }
  0xb5   : > { %4974 = vmatpush3.bf16.msra.mxu1 %v5362_v60  ;;  %4955 = vmatprep.subr.bf16.mxu0 %v5499_v1  ;;  %v5388_v60 = vld [vmem:[%s6641_s1 + $0x1c0] sm:$0xff]  }
  0xb6   : > { %4975 = vmatprep.subr.bf16.mxu1 %v5499_v1 }
  0xb8   : > { %4956 = vmatpush3.bf16.msra.mxu0 %v5363_v61  ;;  %v5389_v61 = vld [vmem:[%s6641_s1 + $0x5c8] sm:$0xff]  }
  0xb9   : > { %4976 = vmatpush3.bf16.msra.mxu1 %v5364_v62  ;;  %4957 = vmatprep.subr.bf16.mxu0 %v5499_v1  ;;  %v5390_v62 = vld [vmem:[%s6641_s1 + $0x1c8] sm:$0xff]  }
  0xba   : > { %4977 = vmatprep.subr.bf16.mxu1 %v5499_v1 }
  0xbc   : > { %4958 = vmatpush3.bf16.msra.mxu0 %v5365_v63  ;;  %v5391_v63 = vld [vmem:[%s6641_s1 + $0x5d0] sm:$0xff]  }
  0xbd   : > { %4978 = vmatpush3.bf16.msra.mxu1 %v5366_v5  ;;  %4959 = vmatprep.subr.bf16.mxu0 %v5499_v1  ;;  %v5396_v5 = vld [vmem:[%s6641_s1 + $0x1e0] sm:$0xff]  }
  0xbe   : > { %4979 = vmatprep.subr.bf16.mxu1 %v5499_v1 }
  0xc0   : > { %4960 = vmatpush3.bf16.msra.mxu0 %v5367_v10  ;;  %v4201_v10 = vld [vmem:[%s5582_s8 + $0xc] sm:$0x3] }
  0xc1   : > { %4980 = vmatpush3.bf16.msra.mxu1 %v5368_v15  ;;  %4961 = vmatprep.subr.bf16.mxu0 %v5499_v1  ;;  %v4254_v15 = vld [vmem:[%s5582_s8 + $0x3e] sm:$0x3]  ;;  %v2186_v20 = vcombine.low %v4201_v10, %v4202_v11 }
  0xc2   : > { %4981 = vmatprep.subr.bf16.mxu1 %v5499_v1 }
  0xc4   : > { %4962 = vmatpush3.bf16.msra.mxu0 %v5369_v18 }
  0xc5   : > { %4982 = vmatpush3.bf16.msra.mxu1 %v5370_v21  ;;  %4987 = vmatprep.subr.bf16.mxu0 %v5499_v1 }
  0xc6   : > { %5007 = vmatprep.subr.bf16.mxu1 %v5499_v1 }
  0xc7   : > { %4964 = vmatmul.mubr.bf16.vlgmr.msra.gmra.mrb[20].mxu0 %v1667_v22 }
  0xc8   : > { %4988 = vmatpush3.bf16.msra.mxu0 %v5371_v23  ;;  %4984 = vmatmul.mubr.bf16.vlgmr.msra.gmra.mrb[20].mxu1 %v1799_v24  ;;  %v5399_v24 = vld [vmem:[%s6641_s1 + $0x5f0] sm:$0xff]  }
  0xc9   : > { %5008 = vmatpush3.bf16.msra.mxu1 %v5372_v25  ;;  %4989 = vmatprep.subr.bf16.mxu0 %v5499_v1  ;;  %v2359_v25 = vcombine.low %v4251_v12, %v4252_v13  ;;  %v5416_v13 = vld [vmem:[%s6641_s1 + $0x270] sm:$0xff]  }
  0xca   : > { %5009 = vmatprep.subr.bf16.mxu1 %v5499_v1  ;;  %5003 = vmatprep.mubr.msk.bf16.mxu0 %vm5500_vm0, %v5499_v1 }
  0xcb   : > { %5023 = vmatprep.mubr.msk.bf16.mxu1 %vm5500_vm0, %v5499_v1  ;;  %v2367_v36 = vrot.slane %v2359_v25, %v5611_v29  ;;  %v5420_v25 = vld [vmem:[%s6641_s1 + $0x440] sm:$0xff]  }
  0xcc   : > { %4990 = vmatpush3.bf16.msra.mxu0 %v5373_v26  ;;  %v2360_v26 = vcombine.low %v4253_v14, %v4254_v15 }
  0xcd   : > { %5010 = vmatpush3.bf16.msra.mxu1 %v5374_v27  ;;  %4991 = vmatprep.subr.bf16.mxu0 %v5499_v1 }
  0xce   : > { %5011 = vmatprep.subr.bf16.mxu1 %v5499_v1  ;;  %v2374_v37 = vrot.slane %v2360_v26, %v5611_v29  ;;  %v5421_v26 = vld [vmem:[%s6641_s1 + $0x3c8] sm:$0xff]  }
  0xd0   : > { %4992 = vmatpush3.bf16.msra.mxu0 %v5375_v28  ;;  %v2375_v41 = vcombine.low %v2367_v36, %v2374_v37  ;;  %v5430_v36 = vld [vmem:[%s6641_s1 + $0x468] sm:$0xff]  }
  0xd1   : > { %5012 = vmatpush3.bf16.msra.mxu1 %v5376_v30  ;;  %4993 = vmatprep.subr.bf16.mxu0 %v5499_v1  ;;  %v5400_v30 = vld [vmem:[%s6641_s1 + $0x1f0] sm:$0xff]   ;;  %v4315_v37 = vld [vmem:[%s5582_s8 + $0x28] sm:$0x3] }
  0xd2   : > { %5013 = vmatprep.subr.bf16.mxu1 %v5499_v1 }
  0xd4   : > { %4994 = vmatpush3.bf16.msra.mxu0 %v5377_v31 }
  0xd5   : > { %5014 = vmatpush3.bf16.msra.mxu1 %v5378_v32  ;;  %4995 = vmatprep.subr.bf16.mxu0 %v5499_v1 }
  0xd6   : > { %5015 = vmatprep.subr.bf16.mxu1 %v5499_v1 }
  0xd8   : > { %4996 = vmatpush3.bf16.msra.mxu0 %v5379_v33  ;;  %v2193_v33 = vrot.slane %v2185_v19, %v5611_v29 }
  0xd9   : > { %5016 = vmatpush3.bf16.msra.mxu1 %v5380_v34  ;;  %4997 = vmatprep.subr.bf16.mxu0 %v5499_v1  ;;  %v2200_v34 = vrot.slane %v2186_v20, %v5611_v29 }
  0xda   : > { %5017 = vmatprep.subr.bf16.mxu1 %v5499_v1 }
  0xdb   : > { %v2201_v39 = vcombine.low %v2193_v33, %v2200_v34  ;;  %v5427_v33 = vld [vmem:[%s6641_s1 + $0x3e0] sm:$0xff]  }
  0xdc   : > { %4998 = vmatpush3.bf16.msra.mxu0 %v5381_v35  ;;  %v5401_v35 = vld [vmem:[%s6641_s1 + $0x5f8] sm:$0xff]   ;;  %v5428_v34 = vld [vmem:[%s6641_s1 + $0x460] sm:$0xff]  }
  0xdd   : > { %5018 = vmatpush3.bf16.msra.mxu1 %v5382_v40  ;;  %4999 = vmatprep.subr.bf16.mxu0 %v5499_v1  ;;  %v5403_v40 = vld [vmem:[%s6641_s1 + $0x140] sm:$0xff]  }
  0xde   : > { %5019 = vmatprep.subr.bf16.mxu1 %v5499_v1 }
  0xe0   : > { %5000 = vmatpush3.bf16.msra.mxu0 %v5383_v45  ;;  %v5407_v45 = vld [vmem:[%s6641_s1 + $0x150] sm:$0xff]  }
  0xe1   : > { %5020 = vmatpush3.bf16.msra.mxu1 %v5384_v50  ;;  %5001 = vmatprep.subr.bf16.mxu0 %v5499_v1  ;;  %v5412_v50 = vld [vmem:[%s6641_s1 + $0x260] sm:$0xff]  }
  0xe2   : > { %5021 = vmatprep.subr.bf16.mxu1 %v5499_v1 }
  0xe4   : > { %5002 = vmatpush3.bf16.msra.mxu0 %v5385_v53  ;;  %v4231_v53 = vld [vmem:[%s5582_s8 + $0x40] sm:$0x3] }
  0xe5   : > { %5022 = vmatpush3.bf16.msra.mxu1 %v5386_v56  ;;  %5027 = vmatprep.subr.bf16.mxu0 %v5499_v1  ;;  %v4234_v56 = vld [vmem:[%s5582_s8 + $0x46] sm:$0x3] }
  0xe6   : > { %5047 = vmatprep.subr.bf16.mxu1 %v5499_v1 }
  0xe7   : > { %5004 = vmatmul.mubr.bf16.vlgmr.msra.gmra.mrb[24].mxu0 %v1933_v57  ;;  %v4287_v57 = vld [vmem:[%s5582_s8 + $0x30] sm:$0x3] }
  0xe8   : > { %5028 = vmatpush3.bf16.msra.mxu0 %v5387_v58  ;;  %5024 = vmatmul.mubr.bf16.vlgmr.msra.gmra.mrb[24].mxu1 %v2067_v59  ;;  %v4288_v58 = vld [vmem:[%s5582_s8 + $0x32] sm:$0x3]  ;;  %v4289_v59 = vld [vmem:[%s5582_s8 + $0x34] sm:$0x3] }
  0xe9   : > { %5048 = vmatpush3.bf16.msra.mxu1 %v5388_v60  ;;  %5029 = vmatprep.subr.bf16.mxu0 %v5499_v1  ;;  %v4290_v60 = vld [vmem:[%s5582_s8 + $0x36] sm:$0x3] }
  0xea   : > { %5049 = vmatprep.subr.bf16.mxu1 %v5499_v1  ;;  %5043 = vmatprep.mubr.msk.bf16.mxu0 %vm5500_vm0, %v5499_v1  ;;  %v2603_v8 = vcombine.low %v4289_v59, %v4290_v60  ;;  %v5432_v60 = vld [vmem:[%s6641_s1 + $0x470] sm:$0xff]  }
  0xeb   : > { %5063 = vmatprep.mubr.msk.bf16.mxu1 %vm5500_vm0, %v5499_v1 }
  0xec   : > { %5030 = vmatpush3.bf16.msra.mxu0 %v5389_v61  ;;  %v2617_v20 = vrot.slane %v2603_v8, %v5611_v29 }
  0xed   : > { %5050 = vmatpush3.bf16.msra.mxu1 %v5390_v62  ;;  %5031 = vmatprep.subr.bf16.mxu0 %v5499_v1 }
  0xee   : > { %5051 = vmatprep.subr.bf16.mxu1 %v5499_v1 }
  0xf0   : > { %5032 = vmatpush3.bf16.msra.mxu0 %v5391_v63 }
  0xf1   : > { %5052 = vmatpush3.bf16.msra.mxu1 %v5392_v0  ;;  %5033 = vmatprep.subr.bf16.mxu0 %v5499_v1 }
  0xf2   : > { %5053 = vmatprep.subr.bf16.mxu1 %v5499_v1 }
  0xf4   : > { %5034 = vmatpush3.bf16.msra.mxu0 %v5393_v2  ;;  %v2470_v2 = vcombine.low %v4231_v53, %v4232_v54  ;;  %v5431_v53 = vld [vmem:[%s6641_s1 + $0x3f0] sm:$0xff]  }
  0xf5   : > { %5054 = vmatpush3.bf16.msra.mxu1 %v5394_v3  ;;  %5035 = vmatprep.subr.bf16.mxu0 %v5499_v1  ;;  %v2471_v3 = vcombine.low %v4233_v55, %v4234_v56 }
  0xf6   : > { %5055 = vmatprep.subr.bf16.mxu1 %v5499_v1 }
  0xf8   : > { %5036 = vmatpush3.bf16.msra.mxu0 %v5395_v4 }
  0xf9   : > { %5056 = vmatpush3.bf16.msra.mxu1 %v5396_v5  ;;  %5037 = vmatprep.subr.bf16.mxu0 %v5499_v1 }
  0xfa   : > { %v407_v16 = vpop.f32.mrb[0].mxu0  ;;  %5057 = vmatprep.subr.bf16.mxu1 %v5499_v1 }
  0xfb   : > { %v518_v17 = vpop.f32.mrb[0].mxu1  ;;  %v4765_v18 = vpop.f32.mrb[1].mxu0 }
  0xfc   : > { %v6170_v21 = vadd.f32 %v518_v17, %v407_v16  ;;  %v4785_v22 = vpop.f32.mrb[1].mxu1  ;;  %v410_v23 = vpop.f32.mrb[2].mxu0  ;;  %5038 = vmatpush3.bf16.msra.mxu0 %v5397_v6  ;;  %v5415_v6 = vld [vmem:[%s6641_s1 + $0x170] sm:$0xff]   ;;  %v2478_v16 = vrot.slane %v2470_v2, %v5611_v29  ;;  %v2485_v17 = vrot.slane %v2471_v3, %v5611_v29  ;;  %v5417_v18 = vld [vmem:[%s6641_s1 + $0x178] sm:$0xff]  }
  0xfd   : > { %v521_v27 = vpop.f32.mrb[2].mxu1  ;;  %v4766_v28 = vpop.f32.mrb[3].mxu0  ;;  %5058 = vmatpush3.bf16.msra.mxu1 %v5398_v7  ;;  %5039 = vmatprep.subr.bf16.mxu0 %v5499_v1  ;;  %v2602_v7 = vcombine.low %v4287_v57, %v4288_v58  ;;  %v5433_v2 = vld [vmem:[%s6641_s1 + $0x3f8] sm:$0xff]  }
  0xfe   : > { %v6179_v31 = vadd.f32 %v521_v27, %v410_v23  ;;  %5059 = vmatprep.subr.bf16.mxu1 %v5499_v1  ;;  %v4786_v32 = vpop.f32.mrb[3].mxu1  ;;  %v2486_v22 = vcombine.low %v2478_v16, %v2485_v17  ;;  %v5419_v23 = vld [vmem:[%s6641_s1 + $0x3c0] sm:$0xff]   ;;  %v5422_v27 = vld [vmem:[%s6641_s1 + $0x448] sm:$0xff]   ;;  %v5423_v28 = vld [vmem:[%s6641_s1 + $0x3d0] sm:$0xff]  }
  0xff   : > { %v2610_v19 = vrot.slane %v2602_v7, %v5611_v29  ;;  %v5426_v32 = vld [vmem:[%s6641_s1 + $0x458] sm:$0xff]   ;;  %v5435_v7 = vld [vmem:[%s6641_s1 + $0x4c0] sm:$0xff]  }
 0x100   : > { %5040 = vmatpush3.bf16.msra.mxu0 %v5399_v24  ;;  %v5443_v16 = vld [vmem:[%s6641_s1 + $0x4e0] sm:$0xff]  }
 0x101   : > { %5060 = vmatpush3.bf16.msra.mxu1 %v5400_v30  ;;  %5041 = vmatprep.subr.bf16.mxu0 %v5499_v1  ;;  %v2618_v24 = vcombine.low %v2610_v19, %v2617_v20  ;;  %v5424_v30 = vld [vmem:[%s6641_s1 + $0x450] sm:$0xff]   ;;  %v5444_v17 = vld [vmem:[%s6641_s1 + $0x220] sm:$0xff]   ;;  %v5446_v19 = vld [vmem:[%s6641_s1 + $0x228] sm:$0xff]  }
 0x102   : > { %5061 = vmatprep.subr.bf16.mxu1 %v5499_v1  ;;  %v4371_v20 = vld [vmem:[%s5582_s8 + $0x18] sm:$0x3] }
 0x104   : > { %5042 = vmatpush3.bf16.msra.mxu0 %v5401_v35  ;;  %v5429_v35 = vld [vmem:[%s6641_s1 + $0x3e8] sm:$0xff]  }
 0x105   : > { %5062 = vmatpush3.bf16.msra.mxu1 %v5402_v38  ;;  %5067 = vmatprep.subr.bf16.mxu0 %v5499_v1  ;;  %v4316_v38 = vld [vmem:[%s5582_s8 + $0x2a] sm:$0x3] }
 0x106   : > { %5087 = vmatprep.subr.bf16.mxu1 %v5499_v1 }
 0x107   : > { %5044 = vmatmul.mubr.bf16.vlgmr.msra.gmra.mrb[28].mxu0 %v2201_v39  ;;  %v4317_v39 = vld [vmem:[%s5582_s8 + $0x2c] sm:$0x3] }
 0x108   : > { %5068 = vmatpush3.bf16.msra.mxu0 %v5403_v40  ;;  %5064 = vmatmul.mubr.bf16.vlgmr.msra.gmra.mrb[28].mxu1 %v2375_v41  ;;  %v4318_v40 = vld [vmem:[%s5582_s8 + $0x2e] sm:$0x3]  ;;  %v4343_v41 = vld [vmem:[%s5582_s8 + $0x20] sm:$0x3] }
 0x109   : > { %5088 = vmatpush3.bf16.msra.mxu1 %v5404_v42  ;;  %5069 = vmatprep.subr.bf16.mxu0 %v5499_v1  ;;  %v4344_v42 = vld [vmem:[%s5582_s8 + $0x22] sm:$0x3] }
 0x10a   : > { %5089 = vmatprep.subr.bf16.mxu1 %v5499_v1  ;;  %5083 = vmatprep.mubr.msk.bf16.mxu0 %vm5500_vm0, %v5499_v1  ;;  %v2870_v54 = vcombine.low %v4343_v41, %v4344_v42 }
 0x10b   : > { %5103 = vmatprep.mubr.msk.bf16.mxu1 %vm5500_vm0, %v5499_v1 }
 0x10c   : > { %5070 = vmatpush3.bf16.msra.mxu0 %v5405_v43  ;;  %v4345_v43 = vld [vmem:[%s5582_s8 + $0x24] sm:$0x3]  ;;  %v2878_v3 = vrot.slane %v2870_v54, %v5611_v29 }
 0x10d   : > { %5090 = vmatpush3.bf16.msra.mxu1 %v5406_v44  ;;  %5071 = vmatprep.subr.bf16.mxu0 %v5499_v1  ;;  %v4346_v44 = vld [vmem:[%s5582_s8 + $0x26] sm:$0x3] }
 0x10e   : > { %5091 = vmatprep.subr.bf16.mxu1 %v5499_v1  ;;  %v2871_v55 = vcombine.low %v4345_v43, %v4346_v44  ;;  %v5448_v44 = vld [vmem:[%s6641_s1 + $0x230] sm:$0xff]   ;;  %v5451_v54 = vld [vmem:[%s6641_s1 + $0x180] sm:$0xff]  }
 0x110   : > { %5072 = vmatpush3.bf16.msra.mxu0 %v5407_v45 }
 0x111   : > { %5092 = vmatpush3.bf16.msra.mxu1 %v5408_v46  ;;  %5073 = vmatprep.subr.bf16.mxu0 %v5499_v1 }
 0x112   : > { %5093 = vmatprep.subr.bf16.mxu1 %v5499_v1 }
 0x114   : > { %5074 = vmatpush3.bf16.msra.mxu0 %v5409_v47 }
 0x115   : > { %5094 = vmatpush3.bf16.msra.mxu1 %v5410_v48  ;;  %5075 = vmatprep.subr.bf16.mxu0 %v5499_v1 }
 0x116   : > { %5095 = vmatprep.subr.bf16.mxu1 %v5499_v1 }
 0x118   : > { %5076 = vmatpush3.bf16.msra.mxu0 %v5411_v49  ;;  %v2736_v49 = vcombine.low %v4315_v37, %v4316_v38  ;;  %v5447_v37 = vld [vmem:[%s6641_s1 + $0x4f0] sm:$0xff]  }
 0x119   : > { %5096 = vmatpush3.bf16.msra.mxu1 %v5412_v50  ;;  %5077 = vmatprep.subr.bf16.mxu0 %v5499_v1  ;;  %v2737_v50 = vcombine.low %v4317_v39, %v4318_v40 }
 0x11a   : > { %v651_v61 = vpop.f32.mrb[4].mxu0  ;;  %5097 = vmatprep.subr.bf16.mxu1 %v5499_v1 }
 0x11b   : > { %v658_v62 = vadd.f32 %v651_v61, %v6170_v21  ;;  %v4805_v63 = vpop.f32.mrb[5].mxu0  ;;  %v786_v0 = vpop.f32.mrb[4].mxu1  ;;  %v5418_v21 = vld [vmem:[%s6641_s1 + $0x278] sm:$0xff]  }
 0x11c   : > { %v654_v4 = vpop.f32.mrb[6].mxu0  ;;  %5078 = vmatpush3.bf16.msra.mxu0 %v5413_v51  ;;  %v4825_v5 = vpop.f32.mrb[5].mxu1  ;;  %v2744_v63 = vrot.slane %v2736_v49, %v5611_v29  ;;  %v5449_v49 = vld [vmem:[%s6641_s1 + $0x4f8] sm:$0xff]  }
 0x11d   : > { %v659_v9 = vadd.f32 %v654_v4, %v6179_v31  ;;  %v6259_v10 = vadd.f32 %v786_v0, %v658_v62  ;;  %v4806_v11 = vpop.f32.mrb[7].mxu0  ;;  %v789_v12 = vpop.f32.mrb[6].mxu1  ;;  %5098 = vmatpush3.bf16.msra.mxu1 %v5414_v52  ;;  %5079 = vmatprep.subr.bf16.mxu0 %v5499_v1  ;;  %v5425_v31 = vld [vmem:[%s6641_s1 + $0x3d8] sm:$0xff]   ;;  %v2751_v0 = vrot.slane %v2737_v50, %v5611_v29 }
 0x11e   : > { %5099 = vmatprep.subr.bf16.mxu1 %v5499_v1  ;;  %v4826_v14 = vpop.f32.mrb[7].mxu1  ;;  %v2885_v4 = vrot.slane %v2871_v55, %v5611_v29  ;;  %v5434_v5 = vld [vmem:[%s6641_s1 + $0x478] sm:$0xff]   ;;  %v5438_v11 = vld [vmem:[%s6641_s1 + $0x208] sm:$0xff]  }
 0x11f   : > { %v6266_v15 = vadd.f32 %v789_v12, %v659_v9  ;;  %v5436_v9 = vld [vmem:[%s6641_s1 + $0x200] sm:$0xff]   ;;  %v5439_v12 = vld [vmem:[%s6641_s1 + $0x4d0] sm:$0xff]   ;;  %v5441_v14 = vld [vmem:[%s6641_s1 + $0x4d8] sm:$0xff]  }
 0x120   : > { %5080 = vmatpush3.bf16.msra.mxu0 %v5415_v6  ;;  %v2752_v6 = vcombine.low %v2744_v63, %v2751_v0  ;;  %v2886_v8 = vcombine.low %v2878_v3, %v2885_v4  ;;  %v5459_v63 = vld [vmem:[%s6641_s1 + $0x1a0] sm:$0xff]   ;;  %v5462_v3 = vld [vmem:[%s6641_s1 + $0x428] sm:$0xff]  }
 0x121   : > { %5100 = vmatpush3.bf16.msra.mxu1 %v5416_v13  ;;  %5081 = vmatprep.subr.bf16.mxu0 %v5499_v1  ;;  %v5440_v13 = vld [vmem:[%s6641_s1 + $0x210] sm:$0xff]   ;;  %v5460_v0 = vld [vmem:[%s6641_s1 + $0x420] sm:$0xff]  }
 0x122   : > { %5101 = vmatprep.subr.bf16.mxu1 %v5499_v1  ;;  %v4403_v4 = vld [vmem:[%s5582_s8 + $0x40] sm:$0x3] }
 0x124   : > { %5082 = vmatpush3.bf16.msra.mxu0 %v5417_v18  ;;  %v5445_v18 = vld [vmem:[%s6641_s1 + $0x4e8] sm:$0xff]  }
 0x125   : > { %5102 = vmatpush3.bf16.msra.mxu1 %v5418_v21  ;;  %5107 = vmatprep.subr.bf16.mxu0 %v5499_v1  ;;  %v4372_v21 = vld [vmem:[%s5582_s8 + $0x1a] sm:$0x3] }
 0x126   : > { %5127 = vmatprep.subr.bf16.mxu1 %v5499_v1 }
 0x127   : > { %5084 = vmatmul.mubr.bf16.vlgmr.msra.gmra.mrb[32].mxu0 %v2486_v22  ;;  %v4373_v22 = vld [vmem:[%s5582_s8 + $0x1c] sm:$0x3] }
 0x128   : > { %5108 = vmatpush3.bf16.msra.mxu0 %v5419_v23  ;;  %5104 = vmatmul.mubr.bf16.vlgmr.msra.gmra.mrb[32].mxu1 %v2618_v24  ;;  %v4374_v23 = vld [vmem:[%s5582_s8 + $0x1e] sm:$0x3]  ;;  %v4423_v24 = vld [vmem:[%s5582_s8 + $0x38] sm:$0x3] }
 0x129   : > { %5128 = vmatpush3.bf16.msra.mxu1 %v5420_v25  ;;  %5109 = vmatprep.subr.bf16.mxu0 %v5499_v1  ;;  %v4424_v25 = vld [vmem:[%s5582_s8 + $0x3a] sm:$0x3] }
 0x12a   : > { %5129 = vmatprep.subr.bf16.mxu1 %v5499_v1  ;;  %5123 = vmatprep.mubr.msk.bf16.mxu0 %vm5500_vm0, %v5499_v1  ;;  %v3178_v38 = vcombine.low %v4423_v24, %v4424_v25 }
 0x12b   : > { %5143 = vmatprep.mubr.msk.bf16.mxu1 %vm5500_vm0, %v5499_v1 }
 0x12c   : > { %5110 = vmatpush3.bf16.msra.mxu0 %v5421_v26  ;;  %v4425_v26 = vld [vmem:[%s5582_s8 + $0x3c] sm:$0x3]  ;;  %v3186_v50 = vrot.slane %v3178_v38, %v5611_v29 }
 0x12d   : > { %5130 = vmatpush3.bf16.msra.mxu1 %v5422_v27  ;;  %5111 = vmatprep.subr.bf16.mxu0 %v5499_v1  ;;  %v4426_v27 = vld [vmem:[%s5582_s8 + $0x3e] sm:$0x3] }
 0x12e   : > { %5131 = vmatprep.subr.bf16.mxu1 %v5499_v1  ;;  %v3179_v39 = vcombine.low %v4425_v26, %v4426_v27  ;;  %v5464_v27 = vld [vmem:[%s6641_s1 + $0x430] sm:$0xff]  }
 0x130   : > { %5112 = vmatpush3.bf16.msra.mxu0 %v5423_v28 }
 0x131   : > { %5132 = vmatpush3.bf16.msra.mxu1 %v5424_v30  ;;  %5113 = vmatprep.subr.bf16.mxu0 %v5499_v1 }
 0x132   : > { %5133 = vmatprep.subr.bf16.mxu1 %v5499_v1 }
 0x134   : > { %5114 = vmatpush3.bf16.msra.mxu0 %v5425_v31 }
 0x135   : > { %5134 = vmatpush3.bf16.msra.mxu1 %v5426_v32  ;;  %5115 = vmatprep.subr.bf16.mxu0 %v5499_v1 }
 0x136   : > { %5135 = vmatprep.subr.bf16.mxu1 %v5499_v1 }
 0x138   : > { %5116 = vmatpush3.bf16.msra.mxu0 %v5427_v33  ;;  %v3004_v33 = vcombine.low %v4371_v20, %v4372_v21  ;;  %v5463_v20 = vld [vmem:[%s6641_s1 + $0x1b0] sm:$0xff]  }
 0x139   : > { %5136 = vmatpush3.bf16.msra.mxu1 %v5428_v34  ;;  %5117 = vmatprep.subr.bf16.mxu0 %v5499_v1  ;;  %v3005_v34 = vcombine.low %v4373_v22, %v4374_v23 }
 0x13a   : > { %v921_v45 = vpop.f32.mrb[8].mxu0  ;;  %5137 = vmatprep.subr.bf16.mxu1 %v5499_v1 }
 0x13b   : > { %v928_v46 = vadd.f32 %v921_v45, %v6259_v10  ;;  %v4845_v47 = vpop.f32.mrb[9].mxu0  ;;  %v1056_v48 = vpop.f32.mrb[8].mxu1  ;;  %v5437_v10 = vld [vmem:[%s6641_s1 + $0x4c8] sm:$0xff]  }
 0x13c   : > { %v924_v51 = vpop.f32.mrb[10].mxu0  ;;  %5118 = vmatpush3.bf16.msra.mxu0 %v5429_v35  ;;  %v4865_v52 = vpop.f32.mrb[9].mxu1  ;;  %v3012_v47 = vrot.slane %v3004_v33, %v5611_v29 }
 0x13d   : > { %v929_v56 = vadd.f32 %v924_v51, %v6266_v15  ;;  %v6345_v57 = vadd.f32 %v1056_v48, %v928_v46  ;;  %v4846_v58 = vpop.f32.mrb[11].mxu0  ;;  %v1059_v59 = vpop.f32.mrb[10].mxu1  ;;  %5138 = vmatpush3.bf16.msra.mxu1 %v5430_v36  ;;  %5119 = vmatprep.subr.bf16.mxu0 %v5499_v1  ;;  %v5442_v15 = vld [vmem:[%s6641_s1 + $0x218] sm:$0xff]   ;;  %v3019_v48 = vrot.slane %v3005_v34, %v5611_v29 }
 0x13e   : > { %5139 = vmatprep.subr.bf16.mxu1 %v5499_v1  ;;  %v4866_v61 = vpop.f32.mrb[11].mxu1  ;;  %v3193_v51 = vrot.slane %v3179_v39, %v5611_v29  ;;  %v5450_v52 = vld [vmem:[%s6641_s1 + $0x238] sm:$0xff]   ;;  %v5454_v58 = vld [vmem:[%s6641_s1 + $0x408] sm:$0xff]  }
 0x13f   : > { %v6352_v62 = vadd.f32 %v1059_v59, %v929_v56  ;;  %v5452_v56 = vld [vmem:[%s6641_s1 + $0x400] sm:$0xff]   ;;  %v5455_v59 = vld [vmem:[%s6641_s1 + $0x190] sm:$0xff]   ;;  %v5457_v61 = vld [vmem:[%s6641_s1 + $0x198] sm:$0xff]  }
 0x140   : > { %5120 = vmatpush3.bf16.msra.mxu0 %v5431_v53  ;;  %v3020_v53 = vcombine.low %v3012_v47, %v3019_v48  ;;  %v3194_v55 = vcombine.low %v3186_v50, %v3193_v51  ;;  %v5469_v50 = vld [vmem:[%s6641_s1 + $0x490] sm:$0xff]   ;;  %v5470_v51 = vld [vmem:[%s6641_s1 + $0x498] sm:$0xff]  }
 0x141   : > { %5140 = vmatpush3.bf16.msra.mxu1 %v5432_v60  ;;  %5121 = vmatprep.subr.bf16.mxu0 %v5499_v1  ;;  %v5456_v60 = vld [vmem:[%s6641_s1 + $0x410] sm:$0xff]  }
 0x142   : > { %5141 = vmatprep.subr.bf16.mxu1 %v5499_v1 }
 0x144   : > { %5122 = vmatpush3.bf16.msra.mxu0 %v5433_v2  ;;  %v5461_v2 = vld [vmem:[%s6641_s1 + $0x1a8] sm:$0xff]  }
 0x145   : > { %5142 = vmatpush3.bf16.msra.mxu1 %v5434_v5  ;;  %5147 = vmatprep.subr.bf16.mxu0 %v5499_v1  ;;  %v4404_v5 = vld [vmem:[%s5582_s8 + $0x42] sm:$0x3] }
 0x146   : > { %5167 = vmatprep.subr.bf16.mxu1 %v5499_v1 }
 0x147   : > { %5124 = vmatmul.mubr.bf16.vlgmr.msra.gmra.mrb[36].mxu0 %v2752_v6  ;;  %v4405_v6 = vld [vmem:[%s5582_s8 + $0x44] sm:$0x3] }
 0x148   : > { %5148 = vmatpush3.bf16.msra.mxu0 %v5435_v7  ;;  %5144 = vmatmul.mubr.bf16.vlgmr.msra.gmra.mrb[36].mxu1 %v2886_v8  ;;  %v4406_v7 = vld [vmem:[%s5582_s8 + $0x46] sm:$0x3]  ;;  %v4459_v8 = vld [vmem:[%s5582_s8 + $0x28] sm:$0x3] }
 0x149   : > { %5168 = vmatpush3.bf16.msra.mxu1 %v5436_v9  ;;  %5149 = vmatprep.subr.bf16.mxu0 %v5499_v1  ;;  %v4460_v9 = vld [vmem:[%s5582_s8 + $0x2a] sm:$0x3] }
 0x14a   : > { %5169 = vmatprep.subr.bf16.mxu1 %v5499_v1  ;;  %5163 = vmatprep.mubr.msk.bf16.mxu0 %vm5500_vm0, %v5499_v1  ;;  %v3421_v21 = vcombine.low %v4459_v8, %v4460_v9 }
 0x14b   : > { %5183 = vmatprep.mubr.msk.bf16.mxu1 %vm5500_vm0, %v5499_v1 }
 0x14c   : > { %5150 = vmatpush3.bf16.msra.mxu0 %v5437_v10  ;;  %v4461_v10 = vld [vmem:[%s5582_s8 + $0x2c] sm:$0x3] }
 0x14d   : > { %5170 = vmatpush3.bf16.msra.mxu1 %v5438_v11  ;;  %5151 = vmatprep.subr.bf16.mxu0 %v5499_v1  ;;  %v4462_v11 = vld [vmem:[%s5582_s8 + $0x2e] sm:$0x3] }
 0x14e   : > { %5171 = vmatprep.subr.bf16.mxu1 %v5499_v1  ;;  %v3422_v22 = vcombine.low %v4461_v10, %v4462_v11 }
 0x150   : > { %5152 = vmatpush3.bf16.msra.mxu0 %v5439_v12  ;;  %v6514_v12 = vld [vmem:[%s6642_s2] ss:$0 sm:$0xff] }
 0x151   : > { %5172 = vmatpush3.bf16.msra.mxu1 %v5440_v13  ;;  %5153 = vmatprep.subr.bf16.mxu0 %v5499_v1 }
 0x152   : > { %5173 = vmatprep.subr.bf16.mxu1 %v5499_v1 }
 0x154   : > { %5154 = vmatpush3.bf16.msra.mxu0 %v5441_v14 }
 0x155   : > { %5174 = vmatpush3.bf16.msra.mxu1 %v5442_v15  ;;  %5155 = vmatprep.subr.bf16.mxu0 %v5499_v1 }
 0x156   : > { %5175 = vmatprep.subr.bf16.mxu1 %v5499_v1 }
 0x158   : > { %5156 = vmatpush3.bf16.msra.mxu0 %v5443_v16  ;;  %v3289_v16 = vcombine.low %v4403_v4, %v4404_v5 }
 0x159   : > { %5176 = vmatpush3.bf16.msra.mxu1 %v5444_v17  ;;  %5157 = vmatprep.subr.bf16.mxu0 %v5499_v1  ;;  %v3290_v17 = vcombine.low %v4405_v6, %v4406_v7 }
 0x15a   : > { %v1191_v28 = vpop.f32.mrb[12].mxu0  ;;  %5177 = vmatprep.subr.bf16.mxu1 %v5499_v1  ;;  %v3297_v33 = vrot.slane %v3289_v16, %v5611_v29 }
 0x15b   : > { %v1198_v30 = vadd.f32 %v1191_v28, %v6345_v57  ;;  %v4885_v31 = vpop.f32.mrb[13].mxu0  ;;  %v1326_v32 = vpop.f32.mrb[12].mxu1  ;;  %v5453_v57 = vld [vmem:[%s6641_s1 + $0x188] sm:$0xff]   ;;  %v3304_v34 = vrot.slane %v3290_v17, %v5611_v29 }
 0x15c   : > { %v1194_v35 = vpop.f32.mrb[14].mxu0  ;;  %5158 = vmatpush3.bf16.msra.mxu0 %v5445_v18  ;;  %v4905_v36 = vpop.f32.mrb[13].mxu1 }
 0x15d   : > { %v1199_v40 = vadd.f32 %v1194_v35, %v6352_v62  ;;  %v6431_v41 = vadd.f32 %v1326_v32, %v1198_v30  ;;  %v4886_v42 = vpop.f32.mrb[15].mxu0  ;;  %v1329_v43 = vpop.f32.mrb[14].mxu1  ;;  %5178 = vmatpush3.bf16.msra.mxu1 %v5446_v19  ;;  %5159 = vmatprep.subr.bf16.mxu0 %v5499_v1  ;;  %v5458_v62 = vld [vmem:[%s6641_s1 + $0x418] sm:$0xff]   ;;  %v3429_v36 = vrot.slane %v3421_v21, %v5611_v29 }
 0x15e   : > { %5179 = vmatprep.subr.bf16.mxu1 %v5499_v1  ;;  %v4906_v45 = vpop.f32.mrb[15].mxu1  ;;  %v5465_v35 = vld [vmem:[%s6641_s1 + $0x1b8] sm:$0xff]  }
 0x15f   : > { %v6438_v46 = vadd.f32 %v1329_v43, %v1199_v40  ;;  %v3305_v45 = vcombine.low %v3297_v33, %v3304_v34 }
 0x160   : > { %5160 = vmatpush3.bf16.msra.mxu0 %v5447_v37  ;;  %v3436_v37 = vrot.slane %v3422_v22, %v5611_v29 }
 0x161   : > { %5180 = vmatpush3.bf16.msra.mxu1 %v5448_v44  ;;  %5161 = vmatprep.subr.bf16.mxu0 %v5499_v1 }
 0x162   : > { %5181 = vmatprep.subr.bf16.mxu1 %v5499_v1  ;;  %v3437_v47 = vcombine.low %v3429_v36, %v3436_v37 }
 0x164   : > { %5162 = vmatpush3.bf16.msra.mxu0 %v5449_v49  ;;  %v5468_v49 = vld [vmem:[%s6641_s1 + $0x488] sm:$0xff]  }
 0x165   : > { %5182 = vmatpush3.bf16.msra.mxu1 %v5450_v52  ;;  %5187 = vmatprep.subr.bf16.mxu0 %v5499_v1  ;;  %v5471_v52 = vld [vmem:[%s6641_s1 + $0x4a0] sm:$0xff]  }
 0x166   : > { %5207 = vmatprep.subr.bf16.mxu1 %v5499_v1 }
 0x167   : > { %5164 = vmatmul.mubr.bf16.vlgmr.msra.gmra.mrb[40].mxu0 %v3020_v53  ;;  %v5472_v53 = vld [vmem:[%s6641_s1 + $0x4a8] sm:$0xff]  }
 0x168   : > { %5188 = vmatpush3.bf16.msra.mxu0 %v5451_v54  ;;  %5184 = vmatmul.mubr.bf16.vlgmr.msra.gmra.mrb[40].mxu1 %v3194_v55  ;;  %v4487_v54 = vld [vmem:[%s5582_s8 + $0x20] sm:$0x3]  ;;  %v4488_v55 = vld [vmem:[%s5582_s8 + $0x22] sm:$0x3] }
 0x169   : > { %5208 = vmatpush3.bf16.msra.mxu1 %v5452_v56  ;;  %5189 = vmatprep.subr.bf16.mxu0 %v5499_v1  ;;  %v4489_v56 = vld [vmem:[%s5582_s8 + $0x24] sm:$0x3] }
 0x16a   : > { %5209 = vmatprep.subr.bf16.mxu1 %v5499_v1  ;;  %5203 = vmatprep.mubr.msk.bf16.mxu0 %vm5500_vm0, %v5499_v1 }
 0x16b   : > { %5223 = vmatprep.mubr.msk.bf16.mxu1 %vm5500_vm0, %v5499_v1 }
 0x16c   : > { %5190 = vmatpush3.bf16.msra.mxu0 %v5453_v57  ;;  %v4490_v57 = vld [vmem:[%s5582_s8 + $0x26] sm:$0x3] }
 0x16d   : > { %5210 = vmatpush3.bf16.msra.mxu1 %v5454_v58  ;;  %5191 = vmatprep.subr.bf16.mxu0 %v5499_v1 }
 0x16e   : > { %5211 = vmatprep.subr.bf16.mxu1 %v5499_v1 }
 0x170   : > { %5192 = vmatpush3.bf16.msra.mxu0 %v5455_v59 }
 0x171   : > { %5212 = vmatpush3.bf16.msra.mxu1 %v5456_v60  ;;  %5193 = vmatprep.subr.bf16.mxu0 %v5499_v1 }
 0x172   : > { %5213 = vmatprep.subr.bf16.mxu1 %v5499_v1 }
 0x174   : > { %5194 = vmatpush3.bf16.msra.mxu0 %v5457_v61 }
 0x175   : > { %5214 = vmatpush3.bf16.msra.mxu1 %v5458_v62  ;;  %5195 = vmatprep.subr.bf16.mxu0 %v5499_v1  ;;  %v3555_v62 = vcombine.low %v4487_v54, %v4488_v55 }
 0x176   : > { %5215 = vmatprep.subr.bf16.mxu1 %v5499_v1 }
 0x177   : > { %v3563_v10 = vrot.slane %v3555_v62, %v5611_v29 }
 0x178   : > { %5196 = vmatpush3.bf16.msra.mxu0 %v5459_v63  ;;  %v3556_v63 = vcombine.low %v4489_v56, %v4490_v57 }
 0x179   : > { %5216 = vmatpush3.bf16.msra.mxu1 %v5460_v0  ;;  %5197 = vmatprep.subr.bf16.mxu0 %v5499_v1 }
 0x17a   : > { %v1460_v13 = vpop.f32.mrb[16].mxu0  ;;  %5217 = vmatprep.subr.bf16.mxu1 %v5499_v1  ;;  %v3570_v11 = vrot.slane %v3556_v63, %v5611_v29 }
 0x17b   : > { %v1467_v14 = vadd.f32 %v1460_v13, %v6431_v41  ;;  %v4925_v15 = vpop.f32.mrb[17].mxu0  ;;  %v6518_v18 = vpop.f32.mrb[16].mxu1  ;;  %v5466_v41 = vld [vmem:[%s6641_s1 + $0x438] sm:$0xff]  }
 0x17c   : > { %v1463_v19 = vpop.f32.mrb[18].mxu0  ;;  %5198 = vmatpush3.bf16.msra.mxu0 %v5461_v2  ;;  %v4945_v23 = vpop.f32.mrb[17].mxu1  ;;  %v5474_v13 = vld [vmem:[%s6641_s1 + $0x4b8] sm:$0xff]  }
 0x17d   : > { %v1475_v24 = vadd.f32 %v6514_v12, %v1467_v14  ;;  %v1468_v25 = vadd.f32 %v1463_v19, %v6438_v46  ;;  %v4926_v26 = vpop.f32.mrb[19].mxu0  ;;  %5218 = vmatpush3.bf16.msra.mxu1 %v5462_v3  ;;  %5199 = vmatprep.subr.bf16.mxu0 %v5499_v1  ;;  %v6530_v28 = vpop.f32.mrb[18].mxu1  ;;  %v5467_v46 = vld [vmem:[%s6641_s1 + $0x480] sm:$0xff]   ;;  %v5473_v3 = vld [vmem:[%s6641_s1 + $0x4b0] sm:$0xff]   ;;  %v3571_v14 = vcombine.low %v3563_v10, %v3570_v11 }
 0x17e   : > { %5219 = vmatprep.subr.bf16.mxu1 %v5499_v1  ;;  %v4946_v30 = vpop.f32.mrb[19].mxu1 }
 0x17f   : > { %v1477_v31 = vmax.f32 %v1475_v24, 0.0  ;;  %v1476_v32 = vadd.f32 %v6514_v12, %v1468_v25 }
 0x180   : > { %5200 = vmatpush3.bf16.msra.mxu0 %v5463_v20 }
 0x181   : > { %v1481_v38 = vcombine.high %v1477_v31, %v1477_v31  ;;  %v1485_v39 = vpack.c.bf16 %v1477_v31, %v1477_v31  ;;  %v1478_v40 = vmax.f32 %v1476_v32, 0.0  ;;  %5220 = vmatpush3.bf16.msra.mxu1 %v5464_v27  ;;  %5201 = vmatprep.subr.bf16.mxu0 %v5499_v1 }
 0x182   : > { %5221 = vmatprep.subr.bf16.mxu1 %v5499_v1 }
 0x183   : > { %v1486_v42 = vpack.c.bf16 %v1481_v38, %v1481_v38  ;;  %1490 = vst.msk [vmem:[%s6539_s29] sm:$0x3] %vm1489_vm1, %v1485_v39  ;;  %v1482_v43 = vcombine.high %v1478_v40, %v1478_v40  ;;  %v1487_v44 = vpack.c.bf16 %v1478_v40, %v1478_v40 }
 0x184   : > { %5202 = vmatpush3.bf16.msra.mxu0 %v5465_v35 }
 0x185   : > { %1491 = vst.msk [vmem:[%s6539_s29 + $0x8] sm:$0x3] %vm1489_vm1, %v1486_v42  ;;  %v1488_v48 = vpack.c.bf16 %v1482_v43, %v1482_v43  ;;  %1492 = vst.msk [vmem:[%s6539_s29 + $0x10] sm:$0x3] %vm1489_vm1, %v1487_v44  ;;  %5222 = vmatpush3.bf16.msra.mxu1 %v5466_v41  ;;  %5227 = vmatprep.subr.bf16.mxu0 %v5499_v1 }
 0x187   : > { %1493 = vst.msk [vmem:[%s6539_s29 + $0x18] sm:$0x3] %vm1489_vm1, %v1488_v48  ;;  %5204 = vmatmul.mubr.bf16.vlgmr.msra.gmra.mrb[44].mxu0 %v3305_v45 }
 0x188   : > { %5228 = vmatpush3.bf16.msra.mxu0 %v5467_v46  ;;  %5224 = vmatmul.mubr.bf16.vlgmr.msra.gmra.mrb[44].mxu1 %v3437_v47 }
 0x189   : > { %5229 = vmatprep.subr.bf16.mxu0 %v5499_v1  ;;  %5243 = vmatprep.mubr.msk.bf16.mxu0 %vm5500_vm0, %v5499_v1 }
 0x18c   : > { %5230 = vmatpush3.bf16.msra.mxu0 %v5468_v49 }
 0x18d   : > { %5231 = vmatprep.subr.bf16.mxu0 %v5499_v1 }
 0x190   : > { %5232 = vmatpush3.bf16.msra.mxu0 %v5469_v50 }
 0x191   : > { %5233 = vmatprep.subr.bf16.mxu0 %v5499_v1 }
 0x194   : > { %5234 = vmatpush3.bf16.msra.mxu0 %v5470_v51 }
 0x195   : > { %5235 = vmatprep.subr.bf16.mxu0 %v5499_v1 }
 0x198   : > { %5236 = vmatpush3.bf16.msra.mxu0 %v5471_v52 }
 0x199   : > { %5237 = vmatprep.subr.bf16.mxu0 %v5499_v1 }
 0x19a   : > { %v1751_v58 = vpop.f32.mrb[20].mxu0 }
 0x19b   : > { %v1752_v59 = vadd.f32 %v1751_v58, %v6518_v18  ;;  %v4965_v60 = vpop.f32.mrb[21].mxu0  ;;  %v1883_v61 = vpop.f32.mrb[20].mxu1 }
 0x19c   : > { %v1754_v0 = vpop.f32.mrb[22].mxu0  ;;  %5238 = vmatpush3.bf16.msra.mxu0 %v5472_v53  ;;  %v4985_v2 = vpop.f32.mrb[21].mxu1 }
 0x19d   : > { %v1755_v4 = vadd.f32 %v1754_v0, %v6530_v28  ;;  %v1890_v5 = vadd.f32 %v1883_v61, %v1752_v59  ;;  %v4966_v6 = vpop.f32.mrb[23].mxu0  ;;  %v1886_v7 = vpop.f32.mrb[22].mxu1  ;;  %5239 = vmatprep.subr.bf16.mxu0 %v5499_v1 }
 0x19e   : > { %v4986_v8 = vpop.f32.mrb[23].mxu1 }
 0x19f   : > { %v1891_v9 = vadd.f32 %v1886_v7, %v1755_v4 }
 0x1a0   : > { %5240 = vmatpush3.bf16.msra.mxu0 %v5473_v3 }
 0x1a1   : > { %5241 = vmatprep.subr.bf16.mxu0 %v5499_v1 }
 0x1a4   : > { %5242 = vmatpush3.bf16.msra.mxu0 %v5474_v13 }
 0x1a7   : > { %5244 = vmatmul.mubr.bf16.vlgmr.msra.gmra.mrb[48].mxu0 %v3571_v14 }
 0x1ba   : > { %v2017_v15 = vpop.f32.mrb[24].mxu0 }
 0x1bb   : > { %v2024_v16 = vadd.f32 %v2017_v15, %v1890_v5  ;;  %v5005_v17 = vpop.f32.mrb[25].mxu0  ;;  %v2151_v18 = vpop.f32.mrb[24].mxu1 }
 0x1bc   : > { %v2020_v19 = vpop.f32.mrb[26].mxu0  ;;  %v5025_v20 = vpop.f32.mrb[25].mxu1 }
 0x1bd   : > { %v2025_v21 = vadd.f32 %v2020_v19, %v1891_v9  ;;  %v2158_v22 = vadd.f32 %v2151_v18, %v2024_v16  ;;  %v5006_v23 = vpop.f32.mrb[27].mxu0  ;;  %v2154_v29 = vpop.f32.mrb[26].mxu1 }
 0x1be   : > { %v5026_v24 = vpop.f32.mrb[27].mxu1 }
 0x1bf   : > { %v2159_v25 = vadd.f32 %v2154_v29, %v2025_v21 }
 0x1da   : > { %v2285_v26 = vpop.f32.mrb[28].mxu0 }
 0x1db   : > { %v2292_v27 = vadd.f32 %v2285_v26, %v2158_v22  ;;  %v5045_v28 = vpop.f32.mrb[29].mxu0  ;;  %v2459_v1 = vpop.f32.mrb[28].mxu1 }
 0x1dc   : > { %v2288_v30 = vpop.f32.mrb[30].mxu0  ;;  %v5065_v31 = vpop.f32.mrb[29].mxu1 }
 0x1dd   : > { %v2294_v32 = vadd.f32 %v6514_v12, %v2292_v27  ;;  %v2293_v33 = vadd.f32 %v2288_v30, %v2159_v25  ;;  %v5046_v34 = vpop.f32.mrb[31].mxu0  ;;  %v2462_v35 = vpop.f32.mrb[30].mxu1 }
 0x1de   : > { %v5066_v36 = vpop.f32.mrb[31].mxu1 }
 0x1df   : > { %v2296_v37 = vmax.f32 %v2294_v32, 0.0  ;;  %v2295_v38 = vadd.f32 %v6514_v12, %v2293_v33 }
 0x1e1   : > { %v2300_v39 = vcombine.high %v2296_v37, %v2296_v37  ;;  %v2304_v40 = vpack.c.bf16 %v2296_v37, %v2296_v37  ;;  %v2297_v41 = vmax.f32 %v2295_v38, 0.0 }
 0x1e3   : > { %v2305_v42 = vpack.c.bf16 %v2300_v39, %v2300_v39  ;;  %4227 = vst.msk [vmem:[%s6539_s29 + $0x2] sm:$0x3] %vm1489_vm1, %v2304_v40  ;;  %v2301_v43 = vcombine.high %v2297_v41, %v2297_v41  ;;  %v2306_v44 = vpack.c.bf16 %v2297_v41, %v2297_v41 }
 0x1e5   : > { %4228 = vst.msk [vmem:[%s6539_s29 + $0xa] sm:$0x3] %vm1489_vm1, %v2305_v42  ;;  %v2307_v45 = vpack.c.bf16 %v2301_v43, %v2301_v43  ;;  %4229 = vst.msk [vmem:[%s6539_s29 + $0x12] sm:$0x3] %vm1489_vm1, %v2306_v44 }
 0x1e7   : > { %4230 = vst.msk [vmem:[%s6539_s29 + $0x1a] sm:$0x3] %vm1489_vm1, %v2307_v45 }
 0x1fa   : > { %v2570_v46 = vpop.f32.mrb[32].mxu0 }
 0x1fb   : > { %v2571_v47 = vadd.f32 %v2570_v46, %v2459_v1  ;;  %v5085_v48 = vpop.f32.mrb[33].mxu0  ;;  %v2702_v49 = vpop.f32.mrb[32].mxu1 }
 0x1fc   : > { %v2573_v50 = vpop.f32.mrb[34].mxu0  ;;  %v5105_v51 = vpop.f32.mrb[33].mxu1 }
 0x1fd   : > { %v2574_v52 = vadd.f32 %v2573_v50, %v2462_v35  ;;  %v2709_v53 = vadd.f32 %v2702_v49, %v2571_v47  ;;  %v5086_v54 = vpop.f32.mrb[35].mxu0  ;;  %v2705_v55 = vpop.f32.mrb[34].mxu1 }
 0x1fe   : > { %v5106_v56 = vpop.f32.mrb[35].mxu1 }
 0x1ff   : > { %v2710_v57 = vadd.f32 %v2705_v55, %v2574_v52 }
 0x21a   : > { %v2836_v58 = vpop.f32.mrb[36].mxu0 }
 0x21b   : > { %v2843_v59 = vadd.f32 %v2836_v58, %v2709_v53  ;;  %v5125_v60 = vpop.f32.mrb[37].mxu0  ;;  %v2970_v61 = vpop.f32.mrb[36].mxu1 }
 0x21c   : > { %v2839_v62 = vpop.f32.mrb[38].mxu0  ;;  %v5145_v63 = vpop.f32.mrb[37].mxu1 }
 0x21d   : > { %v2844_v0 = vadd.f32 %v2839_v62, %v2710_v57  ;;  %v2977_v2 = vadd.f32 %v2970_v61, %v2843_v59  ;;  %v5126_v3 = vpop.f32.mrb[39].mxu0  ;;  %v2973_v4 = vpop.f32.mrb[38].mxu1 }
 0x21e   : > { %v5146_v5 = vpop.f32.mrb[39].mxu1 }
 0x21f   : > { %v2978_v6 = vadd.f32 %v2973_v4, %v2844_v0 }
 0x23a   : > { %v3104_v7 = vpop.f32.mrb[40].mxu0 }
 0x23b   : > { %v3111_v8 = vadd.f32 %v3104_v7, %v2977_v2  ;;  %v5165_v9 = vpop.f32.mrb[41].mxu0  ;;  %v3278_v10 = vpop.f32.mrb[40].mxu1 }
 0x23c   : > { %v3107_v11 = vpop.f32.mrb[42].mxu0  ;;  %v5185_v13 = vpop.f32.mrb[41].mxu1 }
 0x23d   : > { %v3113_v14 = vadd.f32 %v6514_v12, %v3111_v8  ;;  %v3112_v15 = vadd.f32 %v3107_v11, %v2978_v6  ;;  %v5166_v16 = vpop.f32.mrb[43].mxu0  ;;  %v3281_v17 = vpop.f32.mrb[42].mxu1 }
 0x23e   : > { %v5186_v18 = vpop.f32.mrb[43].mxu1 }
 0x23f   : > { %v3115_v19 = vmax.f32 %v3113_v14, 0.0  ;;  %v3114_v20 = vadd.f32 %v6514_v12, %v3112_v15 }
 0x241   : > { %v3119_v21 = vcombine.high %v3115_v19, %v3115_v19  ;;  %v3123_v22 = vpack.c.bf16 %v3115_v19, %v3115_v19  ;;  %v3116_v23 = vmax.f32 %v3114_v20, 0.0 }
 0x243   : > { %v3124_v29 = vpack.c.bf16 %v3119_v21, %v3119_v21  ;;  %4399 = vst.msk [vmem:[%s6539_s29 + $0x4] sm:$0x3] %vm1489_vm1, %v3123_v22  ;;  %v3120_v24 = vcombine.high %v3116_v23, %v3116_v23  ;;  %v3125_v25 = vpack.c.bf16 %v3116_v23, %v3116_v23 }
 0x245   : > { %4400 = vst.msk [vmem:[%s6539_s29 + $0xc] sm:$0x3] %vm1489_vm1, %v3124_v29  ;;  %v3126_v26 = vpack.c.bf16 %v3120_v24, %v3120_v24  ;;  %4401 = vst.msk [vmem:[%s6539_s29 + $0x14] sm:$0x3] %vm1489_vm1, %v3125_v25 }
 0x247   : > { %4402 = vst.msk [vmem:[%s6539_s29 + $0x1c] sm:$0x3] %vm1489_vm1, %v3126_v26 }
 0x25a   : > { %v3389_v27 = vpop.f32.mrb[44].mxu0 }
 0x25b   : > { %v3390_v28 = vadd.f32 %v3389_v27, %v3278_v10  ;;  %v5205_v1 = vpop.f32.mrb[45].mxu0  ;;  %v3521_v30 = vpop.f32.mrb[44].mxu1 }
 0x25c   : > { %v3392_v31 = vpop.f32.mrb[46].mxu0  ;;  %v5225_v32 = vpop.f32.mrb[45].mxu1 }
 0x25d   : > { %v3393_v33 = vadd.f32 %v3392_v31, %v3281_v17  ;;  %v3528_v34 = vadd.f32 %v3521_v30, %v3390_v28  ;;  %v5206_v35 = vpop.f32.mrb[47].mxu0  ;;  %v3524_v36 = vpop.f32.mrb[46].mxu1 }
 0x25e   : > { %v5226_v37 = vpop.f32.mrb[47].mxu1 }
 0x25f   : > { %v3529_v38 = vadd.f32 %v3524_v36, %v3393_v33 }
 0x27a   : > { %v3655_v39 = vpop.f32.mrb[48].mxu0 }
 0x27b   : > { %v3662_v40 = vadd.f32 %v3655_v39, %v3528_v34  ;;  %v5245_v41 = vpop.f32.mrb[49].mxu0 }
 0x27c   : > { %v3658_v42 = vpop.f32.mrb[50].mxu0 }
 0x27d   : > { %v3664_v43 = vadd.f32 %v6514_v12, %v3662_v40  ;;  %v3663_v44 = vadd.f32 %v3658_v42, %v3529_v38  ;;  %v5246_v45 = vpop.f32.mrb[51].mxu0 }
 0x27f   : > { %v3666_v46 = vmax.f32 %v3664_v43, 0.0  ;;  %v3665_v47 = vadd.f32 %v6514_v12, %v3663_v44 }
 0x281   : > { %v3670_v48 = vcombine.high %v3666_v46, %v3666_v46  ;;  %v3674_v49 = vpack.c.bf16 %v3666_v46, %v3666_v46  ;;  %v3667_v50 = vmax.f32 %v3665_v47, 0.0 }
 0x283   : > { %v3675_v51 = vpack.c.bf16 %v3670_v48, %v3670_v48  ;;  %4515 = vst.msk [vmem:[%s6539_s29 + $0x6] sm:$0x3] %vm1489_vm1, %v3674_v49  ;;  %v3671_v52 = vcombine.high %v3667_v50, %v3667_v50  ;;  %v3676_v53 = vpack.c.bf16 %v3667_v50, %v3667_v50 }
 0x285   : > { %4516 = vst.msk [vmem:[%s6539_s29 + $0xe] sm:$0x3] %vm1489_vm1, %v3675_v51  ;;  %v3677_v54 = vpack.c.bf16 %v3671_v52, %v3671_v52  ;;  %4517 = vst.msk [vmem:[%s6539_s29 + $0x16] sm:$0x3] %vm1489_vm1, %v3676_v53 }
 0x287   : > { %4518 = vst.msk [vmem:[%s6539_s29 + $0x1e] sm:$0x3] %vm1489_vm1, %v3677_v54 }
 0x288 PF: > { %s13_s14 = sadd.s32 1, %s5497_s14   ;;  %s6644_s12 = smov %s5493_s13 }
 0x289   : > { %p10_p5 = scmp.ge.s32.totalorder %s13_s14, 4   ;;  %s6645_s13 = smov %s6647_s15 }
 0x28b   :  { %12 = sbr.rel (!%p10_p5) target bundleno = 2 (0x2), region = 103 }

// kernel: celeba_decoder.7
= control target key start
LH: loop header
LB: loop body
LE: loop exit
PB: predicated region body
PF: predicated region fallthrough
CT: control target
= control target key end

     0   :  { %s5892_s12 = smov 0   ;;  %s5894_s13 = smov 0   ;;  %s6534_s0 = inlined_call_operand.vmem [shape: bf16[2,9,8,8,64], index: 0, kind: input, shape index: {}]   ;;  %s6535_s1 = inlined_call_operand.vmem [shape: bf16[25,64,32], index: 1, kind: input, shape index: {}]   ;;  %s6536_s2 = inlined_call_operand.vmem [shape: f32[1,32], index: 2, kind: input, shape index: {}]   ;;  %s6537_s3 = inlined_call_operand.vmem [shape: bf16[2,8,4,8,32], index: 3, kind: output, shape index: {}]  }
   0x1   :  { %s5896_s14 = smov 0  }
   0x2 LB: > { %s28_s15 = sadd.s32 1, %s5866_s13  ;;  %p4131_p0 = scmp.ge.s32.totalorder %s5870_s14, 1  ;;  %s5870_s14 = sphi %s5896_s14, %s13_s14   ;;  %s5866_s13 = sphi %s5894_s13, %s6539_s13   ;;  %s5862_s12 = sphi %s5892_s12, %s6538_s12  }
   0x3   : > { %p30_p1 = scmp.ge.s32.totalorder %s28_s15, 2  ;;  %p184_p2 = scmp.lt.s32.totalorder %s5870_s14, 3 }
   0x5   : > { %s6541_s15 = smov (%p30_p1, %s28_s15), 0  ;;  %p185_p3 = pnand %p4131_p0, %p184_p2 }
   0x6   : > { %v5648_v0 = vld [vmem:[%s6535_s1 + $0x40] sm:$0xff] (!%p185_p3)   ;;  %p228_p4 = scmp.lt.s32.totalorder (!%p185_p3), %s5862_s12, 1  ;;  %v5650_v2 = vld [vmem:[%s6535_s1 + $0x48] sm:$0xff] (!%p185_p3)   ;;  %v5652_v4 = vld [vmem:[%s6535_s1 + $0x50] sm:$0xff] (!%p185_p3)   ;;  %vm339_vm0 = vcmask (!%p185_p3), 523264   ;;  %vm1596_vm1 = vcmask (!%p185_p3), 257024  }
   0x7   : > { %188 = sbr.rel (%p185_p3) target bundleno = 440 (0x1b8), region = 32  ;;  %v5649_v1 = vld [vmem:[%s6535_s1 + $0x60] sm:$0xff] (!%p185_p3)   ;;  %5047 = vmatprep.subr.bf16.mxu0 (!%p185_p3), %v5648_v0  ;;  %v5651_v3 = vld [vmem:[%s6535_s1 + $0x68] sm:$0xff] (!%p185_p3)   ;;  %v5653_v5 = vld [vmem:[%s6535_s1 + $0x70] sm:$0xff] (!%p185_p3)  }
   0x8   : > { %5191 = vmatprep.subr.bf16.mxu1 (!%p185_p3), %v5649_v1  ;;  %5048 = vmatpush3.bf16.msra.mxu0 (!%p185_p3), %v5648_v0  ;;  %v5654_v6 = vld [vmem:[%s6535_s1 + $0x58] sm:$0xff] (!%p185_p3)   ;;  %v5659_v11 = vld [vmem:[%s6535_s1] sm:$0xff] (!%p185_p3)   ;;  %v5662_v14 = vld [vmem:[%s6535_s1 + $0x8] sm:$0xff] (!%p185_p3)  }
   0x9   : > { %5192 = vmatpush3.bf16.msra.mxu1 (!%p185_p3), %v5649_v1  ;;  %5049 = vmatprep.subr.bf16.mxu0 (!%p185_p3), %v5650_v2  ;;  %v5655_v7 = vld [vmem:[%s6535_s1 + $0x78] sm:$0xff] (!%p185_p3)   ;;  %v5661_v12 = vld [vmem:[%s6535_s1 + $0x20] sm:$0xff] (!%p185_p3)   ;;  %v5663_v15 = vld [vmem:[%s6535_s1 + $0x28] sm:$0xff] (!%p185_p3)  }
   0xa   : > { %5193 = vmatprep.subr.bf16.mxu1 (!%p185_p3), %v5651_v3  ;;  %v5667_v19 = vld [vmem:[%s6535_s1 + $0x10] sm:$0xff] (!%p185_p3)   ;;  %v5670_v22 = vld [vmem:[%s6535_s1 + $0x18] sm:$0xff] (!%p185_p3)   ;;  %v5675_v27 = vld [vmem:[%s6535_s1 + $0x80] sm:$0xff] (!%p185_p3)  }
   0xb   : > { %v5669_v20 = vld [vmem:[%s6535_s1 + $0x30] sm:$0xff] (!%p185_p3)   ;;  %v5671_v23 = vld [vmem:[%s6535_s1 + $0x38] sm:$0xff] (!%p185_p3)   ;;  %v5677_v28 = vld [vmem:[%s6535_s1 + $0x160] sm:$0xff] (!%p185_p3)  }
   0xc   : > { %5050 = vmatpush3.bf16.msra.mxu0 (!%p185_p3), %v5650_v2  ;;  %v5678_v30 = vld [vmem:[%s6535_s1 + $0x88] sm:$0xff] (!%p185_p3)   ;;  %v5683_v35 = vld [vmem:[%s6535_s1 + $0x90] sm:$0xff] (!%p185_p3)   ;;  %v5686_v38 = vld [vmem:[%s6535_s1 + $0x98] sm:$0xff] (!%p185_p3)  }
   0xd   : > { %5194 = vmatpush3.bf16.msra.mxu1 (!%p185_p3), %v5651_v3  ;;  %5051 = vmatprep.subr.bf16.mxu0 (!%p185_p3), %v5652_v4  ;;  %v5679_v31 = vld [vmem:[%s6535_s1 + $0x168] sm:$0xff] (!%p185_p3)   ;;  %v5685_v36 = vld [vmem:[%s6535_s1 + $0x170] sm:$0xff] (!%p185_p3)   ;;  %v5687_v39 = vld [vmem:[%s6535_s1 + $0x178] sm:$0xff] (!%p185_p3)  }
   0xe   : > { %s6543_s12 = smov (!%p228_p4, %s5862_s12), 1  ;;  %5195 = vmatprep.subr.bf16.mxu1 %v5653_v5  ;;  %v5691_v43 = vld [vmem:[%s6535_s1 + $0x140] sm:$0xff]   ;;  %v5694_v46 = vld [vmem:[%s6535_s1 + $0x148] sm:$0xff]   ;;  %v5699_v51 = vld [vmem:[%s6535_s1 + $0x150] sm:$0xff]  }
   0xf   : > { %s5623_s26 = smul.u32 288, %s6543_s12  ;;  %v5693_v44 = vld [vmem:[%s6535_s1 + $0x1a0] sm:$0xff]   ;;  %v5695_v47 = vld [vmem:[%s6535_s1 + $0x1a8] sm:$0xff]   ;;  %v5701_v52 = vld [vmem:[%s6535_s1 + $0x1b0] sm:$0xff]   ;;  %s4846_s23 = sshll.u32 %s6543_s12, 7 }
  0x10   : > { %5052 = vmatpush3.bf16.msra.mxu0 %v5652_v4  ;;  %v5702_v54 = vld [vmem:[%s6535_s1 + $0x158] sm:$0xff]   ;;  %v5707_v59 = vld [vmem:[%s6535_s1 + $0x180] sm:$0xff]   ;;  %v5710_v62 = vld [vmem:[%s6535_s1 + $0x188] sm:$0xff]   ;;  %s6430_s25 = scalar_lea.vmem %s6537_s3, %s4846_s23 }
  0x11   : > { %s5937_s6 = scalar_lea.vmem %s6534_s0, %s5623_s26  ;;  %5196 = vmatpush3.bf16.msra.mxu1 %v5653_v5  ;;  %5053 = vmatprep.subr.bf16.mxu0 %v5654_v6  ;;  %v5703_v55 = vld [vmem:[%s6535_s1 + $0x1b8] sm:$0xff]   ;;  %v5709_v60 = vld [vmem:[%s6535_s1 + $0x2a0] sm:$0xff]   ;;  %v5711_v63 = vld [vmem:[%s6535_s1 + $0x2a8] sm:$0xff]  }
  0x12   : > { %v5656_v8 = vld [vmem:[%s5937_s6 + $0xe0] sm:$0xff]   ;;  %v5658_v10 = vld [vmem:[%s5937_s6 + $0xe8] sm:$0xff]   ;;  %5197 = vmatprep.subr.bf16.mxu1 %v5655_v7  ;;  %v5664_v16 = vld [vmem:[%s5937_s6 + $0xf0] sm:$0xff]  }
  0x13   : > { %v5657_v9 = vld [vmem:[%s5937_s6 + $0xe0] sm:$0xff]   ;;  %5055 = vmatprep.mubr.msk.bf16.mxu0 %vm339_vm0, %v5656_v8  ;;  %v5660_v13 = vld [vmem:[%s5937_s6 + $0xe8] sm:$0xff]   ;;  %v5665_v17 = vld [vmem:[%s5937_s6 + $0xf0] sm:$0xff]  }
  0x14   : > { %5199 = vmatprep.mubr.msk.bf16.mxu1 %vm339_vm0, %v5657_v9  ;;  %5054 = vmatpush3.bf16.msra.mxu0 %v5654_v6  ;;  %v5666_v18 = vld [vmem:[%s5937_s6 + $0xf8] sm:$0xff]   ;;  %v5672_v24 = vld [vmem:[%s5937_s6 + $0x100] sm:$0xff]   ;;  %v5674_v26 = vld [vmem:[%s5937_s6 + $0x108] sm:$0xff]  }
  0x15   : > { %5198 = vmatpush3.bf16.msra.mxu1 %v5655_v7  ;;  %5063 = vmatprep.subr.bf16.mxu0 %v5659_v11  ;;  %v5668_v21 = vld [vmem:[%s5937_s6 + $0xf8] sm:$0xff]   ;;  %v5673_v25 = vld [vmem:[%s5937_s6 + $0x100] sm:$0xff]   ;;  %v5676_v29 = vld [vmem:[%s5937_s6 + $0x108] sm:$0xff]  }
  0x16   : > { %5207 = vmatprep.subr.bf16.mxu1 %v5661_v12  ;;  %v5680_v32 = vld [vmem:[%s5937_s6 + $0x110] sm:$0xff]   ;;  %v5682_v34 = vld [vmem:[%s5937_s6 + $0x118] sm:$0xff]   ;;  %v5688_v40 = vld [vmem:[%s5937_s6 + $0xc0] sm:$0xff]  }
  0x17   : > { %5056 = vmatmul.mubr.msk.bf16.vlgmr.msra.gmra.mrb[0].mxu0 %vm339_vm0, %v5658_v10  ;;  %v5681_v33 = vld [vmem:[%s5937_s6 + $0x110] sm:$0xff]   ;;  %v5684_v37 = vld [vmem:[%s5937_s6 + $0x118] sm:$0xff]   ;;  %v5689_v41 = vld [vmem:[%s5937_s6 + $0xa0] sm:$0xff]  }
  0x18   : > { %5200 = vmatmul.mubr.msk.bf16.vlgmr.msra.gmra.mrb[0].mxu1 %vm339_vm0, %v5660_v13  ;;  %5064 = vmatpush3.bf16.msra.mxu0 %v5659_v11  ;;  %v5690_v42 = vld [vmem:[%s5937_s6 + $0xc8] sm:$0xff]   ;;  %v5696_v48 = vld [vmem:[%s5937_s6 + $0xd0] sm:$0xff]   ;;  %v5698_v50 = vld [vmem:[%s5937_s6 + $0xd8] sm:$0xff]  }
  0x19   : > { %5208 = vmatpush3.bf16.msra.mxu1 %v5661_v12  ;;  %5065 = vmatprep.subr.bf16.mxu0 %v5662_v14  ;;  %v5692_v45 = vld [vmem:[%s5937_s6 + $0xa8] sm:$0xff]   ;;  %v5697_v49 = vld [vmem:[%s5937_s6 + $0xb0] sm:$0xff]   ;;  %v5700_v53 = vld [vmem:[%s5937_s6 + $0xb8] sm:$0xff]  }
  0x1a   : > { %5209 = vmatprep.subr.bf16.mxu1 %v5663_v15  ;;  %5059 = vmatprep.mubr.msk.bf16.mxu0 %vm339_vm0, %v5664_v16  ;;  %v5704_v56 = vld [vmem:[%s5937_s6 + $0xa0] sm:$0xff]   ;;  %v5706_v58 = vld [vmem:[%s5937_s6 + $0xa8] sm:$0xff]   ;;  %v5712_v0 = vld [vmem:[%s5937_s6 + $0xb0] sm:$0xff]  }
  0x1b   : > { %5203 = vmatprep.mubr.msk.bf16.mxu1 %vm339_vm0, %v5665_v17  ;;  %v5705_v57 = vld [vmem:[%s5937_s6 + $0x80] sm:$0xff]   ;;  %v5708_v61 = vld [vmem:[%s5937_s6 + $0x88] sm:$0xff]   ;;  %v5713_v1 = vld [vmem:[%s5937_s6 + $0x90] sm:$0xff]  }
  0x1c   : > { %5066 = vmatpush3.bf16.msra.mxu0 %v5662_v14  ;;  %v5714_v2 = vld [vmem:[%s5937_s6 + $0xb8] sm:$0xff]   ;;  %v5715_v3 = vld [vmem:[%s6535_s1 + $0x190] sm:$0xff]   ;;  %v5720_v8 = vld [vmem:[%s5937_s6 + $0x80] sm:$0xff]  }
  0x1d   : > { %5210 = vmatpush3.bf16.msra.mxu1 %v5663_v15  ;;  %5067 = vmatprep.subr.bf16.mxu0 %v5667_v19  ;;  %v5717_v4 = vld [vmem:[%s6535_s1 + $0x2b0] sm:$0xff]   ;;  %v5716_v5 = vld [vmem:[%s5937_s6 + $0x98] sm:$0xff]   ;;  %v5721_v9 = vld [vmem:[%s5937_s6 + $0x40] sm:$0xff]  }
  0x1e   : > { %5211 = vmatprep.subr.bf16.mxu1 %v5669_v20  ;;  %v5718_v6 = vld [vmem:[%s6535_s1 + $0x198] sm:$0xff]   ;;  %v5722_v10 = vld [vmem:[%s5937_s6 + $0x88] sm:$0xff]   ;;  %v5723_v11 = vld [vmem:[%s6535_s1 + $0x1c0] sm:$0xff]  }
  0x1f   : > { %5060 = vmatmul.mubr.msk.bf16.gmra.mrb[4].mxu0 %vm339_vm0, %v5666_v18  ;;  %v5719_v7 = vld [vmem:[%s6535_s1 + $0x2b8] sm:$0xff]   ;;  %v5725_v12 = vld [vmem:[%s6535_s1 + $0x2e0] sm:$0xff]   ;;  %v5724_v13 = vld [vmem:[%s5937_s6 + $0x48] sm:$0xff]  }
  0x20   : > { %5204 = vmatmul.mubr.msk.bf16.gmra.mrb[4].mxu1 %vm339_vm0, %v5668_v21  ;;  %5068 = vmatpush3.bf16.msra.mxu0 %v5667_v19  ;;  %v5726_v14 = vld [vmem:[%s6535_s1 + $0x1c8] sm:$0xff]   ;;  %v5728_v16 = vld [vmem:[%s5937_s6 + $0x90] sm:$0xff]   ;;  %v5730_v18 = vld [vmem:[%s5937_s6 + $0x98] sm:$0xff]  }
  0x21   : > { %5212 = vmatpush3.bf16.msra.mxu1 %v5669_v20  ;;  %5069 = vmatprep.subr.bf16.mxu0 %v5670_v22  ;;  %v5727_v15 = vld [vmem:[%s6535_s1 + $0x2e8] sm:$0xff]   ;;  %v5729_v17 = vld [vmem:[%s5937_s6 + $0x50] sm:$0xff]   ;;  %v5732_v21 = vld [vmem:[%s5937_s6 + $0x58] sm:$0xff]  }
  0x22   : > { %5213 = vmatprep.subr.bf16.mxu1 %v5671_v23  ;;  %5071 = vmatprep.mubr.msk.bf16.mxu0 %vm339_vm0, %v5672_v24  ;;  %v5731_v19 = vld [vmem:[%s6535_s1 + $0x1d0] sm:$0xff]   ;;  %v5736_v24 = vld [vmem:[%s5937_s6 + $0x60] sm:$0xff]  }
  0x23   : > { %5215 = vmatprep.mubr.msk.bf16.mxu1 %vm339_vm0, %v5673_v25  ;;  %v5733_v20 = vld [vmem:[%s6535_s1 + $0x2f0] sm:$0xff]   ;;  %v5737_v25 = vld [vmem:[%s5937_s6 + $0x20] sm:$0xff]  }
  0x24   : > { %5070 = vmatpush3.bf16.msra.mxu0 %v5670_v22  ;;  %v5734_v22 = vld [vmem:[%s6535_s1 + $0x1d8] sm:$0xff]  }
  0x25   : > { %5214 = vmatpush3.bf16.msra.mxu1 %v5671_v23  ;;  %5079 = vmatprep.subr.bf16.mxu0 %v5675_v27  ;;  %v5735_v23 = vld [vmem:[%s6535_s1 + $0x2f8] sm:$0xff]  }
  0x26   : > { %5223 = vmatprep.subr.bf16.mxu1 %v5677_v28 }
  0x27   : > { %5072 = vmatmul.mubr.msk.bf16.vlgmr.msra.gmra.mrb[0].mxu0 %vm339_vm0, %v5674_v26  ;;  %v5738_v26 = vld [vmem:[%s5937_s6 + $0x68] sm:$0xff]  }
  0x28   : > { %5216 = vmatmul.mubr.msk.bf16.vlgmr.msra.gmra.mrb[0].mxu1 %vm339_vm0, %v5676_v29  ;;  %5080 = vmatpush3.bf16.msra.mxu0 %v5675_v27  ;;  %v5739_v27 = vld [vmem:[%s6535_s1 + $0x280] sm:$0xff]   ;;  %v5740_v29 = vld [vmem:[%s5937_s6 + $0x28] sm:$0xff]  }
  0x29   : > { %5224 = vmatpush3.bf16.msra.mxu1 %v5677_v28  ;;  %5081 = vmatprep.subr.bf16.mxu0 %v5678_v30  ;;  %v5741_v28 = vld [vmem:[%s6535_s1 + $0xe0] sm:$0xff]  }
  0x2a   : > { %5225 = vmatprep.subr.bf16.mxu1 %v5679_v31  ;;  %5075 = vmatprep.mubr.msk.bf16.mxu0 %vm339_vm0, %v5680_v32  ;;  %v5744_v32 = vld [vmem:[%s5937_s6 + $0x70] sm:$0xff]  }
  0x2b   : > { %5219 = vmatprep.mubr.msk.bf16.mxu1 %vm339_vm0, %v5681_v33  ;;  %v5745_v33 = vld [vmem:[%s5937_s6 + $0x30] sm:$0xff]  }
  0x2c   : > { %5082 = vmatpush3.bf16.msra.mxu0 %v5678_v30  ;;  %v5742_v30 = vld [vmem:[%s6535_s1 + $0x288] sm:$0xff]  }
  0x2d   : > { %5226 = vmatpush3.bf16.msra.mxu1 %v5679_v31  ;;  %5083 = vmatprep.subr.bf16.mxu0 %v5683_v35  ;;  %v5743_v31 = vld [vmem:[%s6535_s1 + $0xe8] sm:$0xff]  }
  0x2e   : > { %5227 = vmatprep.subr.bf16.mxu1 %v5685_v36 }
  0x2f   : > { %5076 = vmatmul.mubr.msk.bf16.gmra.mrb[4].mxu0 %vm339_vm0, %v5682_v34  ;;  %v5746_v34 = vld [vmem:[%s5937_s6 + $0x78] sm:$0xff]  }
  0x30   : > { %5220 = vmatmul.mubr.msk.bf16.gmra.mrb[4].mxu1 %vm339_vm0, %v5684_v37  ;;  %5084 = vmatpush3.bf16.msra.mxu0 %v5683_v35  ;;  %v5747_v35 = vld [vmem:[%s6535_s1 + $0x290] sm:$0xff]   ;;  %v5748_v37 = vld [vmem:[%s5937_s6 + $0x38] sm:$0xff]  }
  0x31   : > { %5228 = vmatpush3.bf16.msra.mxu1 %v5685_v36  ;;  %5085 = vmatprep.subr.bf16.mxu0 %v5686_v38  ;;  %v5749_v36 = vld [vmem:[%s6535_s1 + $0xf0] sm:$0xff]  }
  0x32   : > { %5229 = vmatprep.subr.bf16.mxu1 %v5687_v39  ;;  %5087 = vmatprep.mubr.msk.bf16.mxu0 %vm339_vm0, %v5688_v40  ;;  %v5752_v40 = vld [vmem:[%s5937_s6 + $0x40] sm:$0xff]  }
  0x33   : > { %5231 = vmatprep.mubr.msk.bf16.mxu1 %vm339_vm0, %v5689_v41  ;;  %v5753_v41 = vld [vmem:[%s5937_s6 + $0xe0] sm:$0xff]  }
  0x34   : > { %5086 = vmatpush3.bf16.msra.mxu0 %v5686_v38  ;;  %v5750_v38 = vld [vmem:[%s6535_s1 + $0x298] sm:$0xff]  }
  0x35   : > { %5230 = vmatpush3.bf16.msra.mxu1 %v5687_v39  ;;  %5095 = vmatprep.subr.bf16.mxu0 %v5691_v43  ;;  %v5751_v39 = vld [vmem:[%s6535_s1 + $0xf8] sm:$0xff]  }
  0x36   : > { %5239 = vmatprep.subr.bf16.mxu1 %v5693_v44 }
  0x37   : > { %5088 = vmatmul.mubr.msk.bf16.vlgmr.msra.gmra.mrb[0].mxu0 %vm339_vm0, %v5690_v42  ;;  %v5754_v42 = vld [vmem:[%s5937_s6 + $0x48] sm:$0xff]  }
  0x38   : > { %5232 = vmatmul.mubr.msk.bf16.vlgmr.msra.gmra.mrb[0].mxu1 %vm339_vm0, %v5692_v45  ;;  %5096 = vmatpush3.bf16.msra.mxu0 %v5691_v43  ;;  %v5755_v43 = vld [vmem:[%s6535_s1 + $0x2c0] sm:$0xff]   ;;  %v5756_v45 = vld [vmem:[%s5937_s6 + $0xe8] sm:$0xff]  }
  0x39   : > { %5240 = vmatpush3.bf16.msra.mxu1 %v5693_v44  ;;  %5097 = vmatprep.subr.bf16.mxu0 %v5694_v46  ;;  %v5757_v44 = vld [vmem:[%s6535_s1 + $0xa0] sm:$0xff]  }
  0x3a   : > { %5241 = vmatprep.subr.bf16.mxu1 %v5695_v47  ;;  %5091 = vmatprep.mubr.msk.bf16.mxu0 %vm339_vm0, %v5696_v48  ;;  %v5760_v48 = vld [vmem:[%s5937_s6 + $0x50] sm:$0xff]  }
  0x3b   : > { %5235 = vmatprep.mubr.msk.bf16.mxu1 %vm339_vm0, %v5697_v49  ;;  %v5761_v49 = vld [vmem:[%s5937_s6 + $0xf0] sm:$0xff]  }
  0x3c   : > { %5098 = vmatpush3.bf16.msra.mxu0 %v5694_v46  ;;  %v5758_v46 = vld [vmem:[%s6535_s1 + $0x2c8] sm:$0xff]  }
  0x3d   : > { %5242 = vmatpush3.bf16.msra.mxu1 %v5695_v47  ;;  %5099 = vmatprep.subr.bf16.mxu0 %v5699_v51  ;;  %v5759_v47 = vld [vmem:[%s6535_s1 + $0xa8] sm:$0xff]  }
  0x3e   : > { %5243 = vmatprep.subr.bf16.mxu1 %v5701_v52 }
  0x3f   : > { %5092 = vmatmul.mubr.msk.bf16.gmra.mrb[4].mxu0 %vm339_vm0, %v5698_v50  ;;  %v5762_v50 = vld [vmem:[%s5937_s6 + $0x58] sm:$0xff]  }
  0x40   : > { %5236 = vmatmul.mubr.msk.bf16.gmra.mrb[4].mxu1 %vm339_vm0, %v5700_v53  ;;  %5100 = vmatpush3.bf16.msra.mxu0 %v5699_v51  ;;  %v5763_v51 = vld [vmem:[%s6535_s1 + $0x2d0] sm:$0xff]   ;;  %v5764_v53 = vld [vmem:[%s5937_s6 + $0xf8] sm:$0xff]  }
  0x41   : > { %5244 = vmatpush3.bf16.msra.mxu1 %v5701_v52  ;;  %5101 = vmatprep.subr.bf16.mxu0 %v5702_v54  ;;  %v5765_v52 = vld [vmem:[%s6535_s1 + $0xb0] sm:$0xff]  }
  0x42   : > { %5245 = vmatprep.subr.bf16.mxu1 %v5703_v55  ;;  %5103 = vmatprep.mubr.msk.bf16.mxu0 %vm339_vm0, %v5704_v56  ;;  %v5768_v56 = vld [vmem:[%s5937_s6 + $0x20] sm:$0xff]  }
  0x43   : > { %5247 = vmatprep.mubr.msk.bf16.mxu1 %vm339_vm0, %v5705_v57  ;;  %v5769_v57 = vld [vmem:[%s5937_s6 + $0x100] sm:$0xff]  }
  0x44   : > { %5102 = vmatpush3.bf16.msra.mxu0 %v5702_v54  ;;  %v5766_v54 = vld [vmem:[%s6535_s1 + $0x2d8] sm:$0xff]  }
  0x45   : > { %5246 = vmatpush3.bf16.msra.mxu1 %v5703_v55  ;;  %5111 = vmatprep.subr.bf16.mxu0 %v5707_v59  ;;  %v5767_v55 = vld [vmem:[%s6535_s1 + $0xb8] sm:$0xff]  }
  0x46   : > { %5255 = vmatprep.subr.bf16.mxu1 %v5709_v60 }
  0x47   : > { %5104 = vmatmul.mubr.msk.bf16.vlgmr.msra.gmra.mrb[0].mxu0 %vm339_vm0, %v5706_v58  ;;  %v5770_v58 = vld [vmem:[%s5937_s6 + $0x28] sm:$0xff]  }
  0x48   : > { %5248 = vmatmul.mubr.msk.bf16.vlgmr.msra.gmra.mrb[0].mxu1 %vm339_vm0, %v5708_v61  ;;  %5112 = vmatpush3.bf16.msra.mxu0 %v5707_v59  ;;  %v5771_v59 = vld [vmem:[%s6535_s1 + $0x300] sm:$0xff]   ;;  %v5772_v61 = vld [vmem:[%s5937_s6 + $0x108] sm:$0xff]  }
  0x49   : > { %5256 = vmatpush3.bf16.msra.mxu1 %v5709_v60  ;;  %5113 = vmatprep.subr.bf16.mxu0 %v5710_v62  ;;  %v5773_v60 = vld [vmem:[%s6535_s1 + $0x120] sm:$0xff]  }
  0x4a   : > { %5257 = vmatprep.subr.bf16.mxu1 %v5711_v63  ;;  %5107 = vmatprep.mubr.msk.bf16.mxu0 %vm339_vm0, %v5712_v0  ;;  %v5776_v0 = vld [vmem:[%s5937_s6 + $0x30] sm:$0xff]  }
  0x4b   : > { %5251 = vmatprep.mubr.msk.bf16.mxu1 %vm339_vm0, %v5713_v1  ;;  %v5777_v1 = vld [vmem:[%s5937_s6 + $0x110] sm:$0xff]  }
  0x4c   : > { %5114 = vmatpush3.bf16.msra.mxu0 %v5710_v62  ;;  %v5774_v62 = vld [vmem:[%s6535_s1 + $0x308] sm:$0xff]  }
  0x4d   : > { %5258 = vmatpush3.bf16.msra.mxu1 %v5711_v63  ;;  %5115 = vmatprep.subr.bf16.mxu0 %v5715_v3  ;;  %v5775_v63 = vld [vmem:[%s6535_s1 + $0x128] sm:$0xff]  }
  0x4e   : > { %5259 = vmatprep.subr.bf16.mxu1 %v5717_v4 }
  0x4f   : > { %5108 = vmatmul.mubr.msk.bf16.gmra.mrb[4].mxu0 %vm339_vm0, %v5714_v2  ;;  %v5778_v2 = vld [vmem:[%s5937_s6 + $0x38] sm:$0xff]  }
  0x50   : > { %5252 = vmatmul.mubr.msk.bf16.gmra.mrb[4].mxu1 %vm339_vm0, %v5716_v5  ;;  %5116 = vmatpush3.bf16.msra.mxu0 %v5715_v3  ;;  %v5779_v3 = vld [vmem:[%s6535_s1 + $0x310] sm:$0xff]   ;;  %v5780_v5 = vld [vmem:[%s5937_s6 + $0x118] sm:$0xff]  }
  0x51   : > { %5260 = vmatpush3.bf16.msra.mxu1 %v5717_v4  ;;  %5117 = vmatprep.subr.bf16.mxu0 %v5718_v6  ;;  %v5781_v4 = vld [vmem:[%s6535_s1 + $0x130] sm:$0xff]  }
  0x52   : > { %5261 = vmatprep.subr.bf16.mxu1 %v5719_v7  ;;  %5119 = vmatprep.mubr.msk.bf16.mxu0 %vm339_vm0, %v5720_v8  ;;  %v5784_v8 = vld [vmem:[%s5937_s6] sm:$0xff]  }
  0x53   : > { %5263 = vmatprep.mubr.msk.bf16.mxu1 %vm339_vm0, %v5721_v9  ;;  %v5785_v9 = vld [vmem:[%s5937_s6 + $0xc0] sm:$0xff]  }
  0x54   : > { %5118 = vmatpush3.bf16.msra.mxu0 %v5718_v6  ;;  %v5782_v6 = vld [vmem:[%s6535_s1 + $0x318] sm:$0xff]  }
  0x55   : > { %5262 = vmatpush3.bf16.msra.mxu1 %v5719_v7  ;;  %5127 = vmatprep.subr.bf16.mxu0 %v5723_v11  ;;  %v5783_v7 = vld [vmem:[%s6535_s1 + $0x138] sm:$0xff]  }
  0x56   : > { %5271 = vmatprep.subr.bf16.mxu1 %v5725_v12 }
  0x57   : > { %5120 = vmatmul.mubr.msk.bf16.vlgmr.msra.gmra.mrb[0].mxu0 %vm339_vm0, %v5722_v10  ;;  %v5786_v10 = vld [vmem:[%s5937_s6 + $0x8] sm:$0xff]  }
  0x58   : > { %5264 = vmatmul.mubr.msk.bf16.vlgmr.msra.gmra.mrb[0].mxu1 %vm339_vm0, %v5724_v13  ;;  %5128 = vmatpush3.bf16.msra.mxu0 %v5723_v11  ;;  %v5788_v11 = vld [vmem:[%s6535_s1 + $0x1e0] sm:$0xff]   ;;  %v5787_v13 = vld [vmem:[%s5937_s6 + $0xc8] sm:$0xff]  }
  0x59   : > { %5272 = vmatpush3.bf16.msra.mxu1 %v5725_v12  ;;  %5129 = vmatprep.subr.bf16.mxu0 %v5726_v14  ;;  %v5789_v12 = vld [vmem:[%s6535_s1 + $0x100] sm:$0xff]  }
  0x5a   : > { %5273 = vmatprep.subr.bf16.mxu1 %v5727_v15  ;;  %5123 = vmatprep.mubr.msk.bf16.mxu0 %vm339_vm0, %v5728_v16  ;;  %v5792_v16 = vld [vmem:[%s5937_s6 + $0x10] sm:$0xff]  }
  0x5b   : > { %5267 = vmatprep.mubr.msk.bf16.mxu1 %vm339_vm0, %v5729_v17  ;;  %v5793_v17 = vld [vmem:[%s5937_s6 + $0xd0] sm:$0xff]  }
  0x5c   : > { %5130 = vmatpush3.bf16.msra.mxu0 %v5726_v14  ;;  %v5790_v14 = vld [vmem:[%s6535_s1 + $0x1e8] sm:$0xff]  }
  0x5d   : > { %5274 = vmatpush3.bf16.msra.mxu1 %v5727_v15  ;;  %5131 = vmatprep.subr.bf16.mxu0 %v5731_v19  ;;  %v5791_v15 = vld [vmem:[%s6535_s1 + $0x108] sm:$0xff]  }
  0x5e   : > { %5275 = vmatprep.subr.bf16.mxu1 %v5733_v20 }
  0x5f   : > { %5124 = vmatmul.mubr.msk.bf16.gmra.mrb[4].mxu0 %vm339_vm0, %v5730_v18  ;;  %v5794_v18 = vld [vmem:[%s5937_s6 + $0x18] sm:$0xff]  }
  0x60   : > { %5268 = vmatmul.mubr.msk.bf16.gmra.mrb[4].mxu1 %vm339_vm0, %v5732_v21  ;;  %5132 = vmatpush3.bf16.msra.mxu0 %v5731_v19  ;;  %v5796_v19 = vld [vmem:[%s6535_s1 + $0x1f0] sm:$0xff]   ;;  %v5795_v21 = vld [vmem:[%s5937_s6 + $0xd8] sm:$0xff]  }
  0x61   : > { %5276 = vmatpush3.bf16.msra.mxu1 %v5733_v20  ;;  %5133 = vmatprep.subr.bf16.mxu0 %v5734_v22  ;;  %v5797_v20 = vld [vmem:[%s6535_s1 + $0x110] sm:$0xff]  }
  0x62   : > { %5277 = vmatprep.subr.bf16.mxu1 %v5735_v23  ;;  %5135 = vmatprep.mubr.msk.bf16.mxu0 %vm339_vm0, %v5736_v24  ;;  %v5800_v24 = vld [vmem:[%s5937_s6 + $0xa0] sm:$0xff]  }
  0x63   : > { %5279 = vmatprep.mubr.msk.bf16.mxu1 %vm339_vm0, %v5737_v25  ;;  %v5801_v25 = vld [vmem:[%s5937_s6 + $0xe0] sm:$0xff]  }
  0x64   : > { %5134 = vmatpush3.bf16.msra.mxu0 %v5734_v22  ;;  %v5798_v22 = vld [vmem:[%s6535_s1 + $0x1f8] sm:$0xff]  }
  0x65   : > { %5278 = vmatpush3.bf16.msra.mxu1 %v5735_v23  ;;  %5143 = vmatprep.subr.bf16.mxu0 %v5739_v27  ;;  %v5799_v23 = vld [vmem:[%s6535_s1 + $0x118] sm:$0xff]  }
  0x66   : > { %5287 = vmatprep.subr.bf16.mxu1 %v5741_v28 }
  0x67   : > { %5136 = vmatmul.mubr.msk.bf16.vlgmr.msra.gmra.mrb[0].mxu0 %vm339_vm0, %v5738_v26  ;;  %v5803_v26 = vld [vmem:[%s6535_s1 + $0x220] sm:$0xff]  }
  0x68   : > { %5280 = vmatmul.mubr.msk.bf16.vlgmr.msra.gmra.mrb[0].mxu1 %vm339_vm0, %v5740_v29  ;;  %5144 = vmatpush3.bf16.msra.mxu0 %v5739_v27  ;;  %v5802_v27 = vld [vmem:[%s5937_s6 + $0xa8] sm:$0xff]  }
  0x69   : > { %5288 = vmatpush3.bf16.msra.mxu1 %v5741_v28  ;;  %5145 = vmatprep.subr.bf16.mxu0 %v5742_v30  ;;  %v5805_v28 = vld [vmem:[%s6535_s1 + $0xc0] sm:$0xff]   ;;  %v5804_v29 = vld [vmem:[%s5937_s6 + $0xe8] sm:$0xff]  }
  0x6a   : > { %5289 = vmatprep.subr.bf16.mxu1 %v5743_v31  ;;  %5139 = vmatprep.mubr.msk.bf16.mxu0 %vm339_vm0, %v5744_v32  ;;  %v5808_v32 = vld [vmem:[%s5937_s6 + $0xb0] sm:$0xff]  }
  0x6b   : > { %5283 = vmatprep.mubr.msk.bf16.mxu1 %vm339_vm0, %v5745_v33  ;;  %v5809_v33 = vld [vmem:[%s5937_s6 + $0xf0] sm:$0xff]  }
  0x6c   : > { %5146 = vmatpush3.bf16.msra.mxu0 %v5742_v30  ;;  %v5806_v30 = vld [vmem:[%s6535_s1 + $0x228] sm:$0xff]  }
  0x6d   : > { %5290 = vmatpush3.bf16.msra.mxu1 %v5743_v31  ;;  %5147 = vmatprep.subr.bf16.mxu0 %v5747_v35  ;;  %v5807_v31 = vld [vmem:[%s6535_s1 + $0xc8] sm:$0xff]  }
  0x6e   : > { %5291 = vmatprep.subr.bf16.mxu1 %v5749_v36 }
  0x6f   : > { %5140 = vmatmul.mubr.msk.bf16.gmra.mrb[4].mxu0 %vm339_vm0, %v5746_v34  ;;  %v5811_v34 = vld [vmem:[%s6535_s1 + $0x230] sm:$0xff]  }
  0x70   : > { %5284 = vmatmul.mubr.msk.bf16.gmra.mrb[4].mxu1 %vm339_vm0, %v5748_v37  ;;  %5148 = vmatpush3.bf16.msra.mxu0 %v5747_v35  ;;  %v5810_v35 = vld [vmem:[%s5937_s6 + $0xb8] sm:$0xff]  }
  0x71   : > { %5292 = vmatpush3.bf16.msra.mxu1 %v5749_v36  ;;  %5149 = vmatprep.subr.bf16.mxu0 %v5750_v38  ;;  %v5813_v36 = vld [vmem:[%s6535_s1 + $0xd0] sm:$0xff]   ;;  %v5812_v37 = vld [vmem:[%s5937_s6 + $0xf8] sm:$0xff]  }
  0x72   : > { %5293 = vmatprep.subr.bf16.mxu1 %v5751_v39  ;;  %5151 = vmatprep.mubr.msk.bf16.mxu0 %vm339_vm0, %v5752_v40  ;;  %v5816_v40 = vld [vmem:[%s5937_s6 + $0x80] sm:$0xff]  }
  0x73   : > { %5295 = vmatprep.mubr.msk.bf16.mxu1 %vm339_vm0, %v5753_v41  ;;  %v5817_v41 = vld [vmem:[%s5937_s6 + $0x100] sm:$0xff]  }
  0x74   : > { %5150 = vmatpush3.bf16.msra.mxu0 %v5750_v38  ;;  %v5814_v38 = vld [vmem:[%s6535_s1 + $0x238] sm:$0xff]  }
  0x75   : > { %5294 = vmatpush3.bf16.msra.mxu1 %v5751_v39  ;;  %5159 = vmatprep.subr.bf16.mxu0 %v5755_v43  ;;  %v5815_v39 = vld [vmem:[%s6535_s1 + $0xd8] sm:$0xff]  }
  0x76   : > { %5303 = vmatprep.subr.bf16.mxu1 %v5757_v44 }
  0x77   : > { %5152 = vmatmul.mubr.msk.bf16.vlgmr.msra.gmra.mrb[0].mxu0 %vm339_vm0, %v5754_v42  ;;  %v5819_v42 = vld [vmem:[%s6535_s1 + $0x260] sm:$0xff]  }
  0x78   : > { %5296 = vmatmul.mubr.msk.bf16.vlgmr.msra.gmra.mrb[8].mxu1 %vm339_vm0, %v5756_v45  ;;  %5160 = vmatpush3.bf16.msra.mxu0 %v5755_v43  ;;  %v5818_v43 = vld [vmem:[%s5937_s6 + $0x88] sm:$0xff]  }
  0x79   : > { %5304 = vmatpush3.bf16.msra.mxu1 %v5757_v44  ;;  %5161 = vmatprep.subr.bf16.mxu0 %v5758_v46  ;;  %v5821_v44 = vld [vmem:[%s6535_s1 + $0x200] sm:$0xff]   ;;  %v5820_v45 = vld [vmem:[%s5937_s6 + $0x108] sm:$0xff]  }
  0x7a   : > { %5305 = vmatprep.subr.bf16.mxu1 %v5759_v47  ;;  %5155 = vmatprep.mubr.msk.bf16.mxu0 %vm339_vm0, %v5760_v48  ;;  %v5824_v48 = vld [vmem:[%s5937_s6 + $0x90] sm:$0xff]  }
  0x7b   : > { %5299 = vmatprep.mubr.msk.bf16.mxu1 %vm339_vm0, %v5761_v49  ;;  %v5825_v49 = vld [vmem:[%s5937_s6 + $0x110] sm:$0xff]  }
  0x7c   : > { %5162 = vmatpush3.bf16.msra.mxu0 %v5758_v46  ;;  %v5822_v46 = vld [vmem:[%s6535_s1 + $0x268] sm:$0xff]  }
  0x7d   : > { %5306 = vmatpush3.bf16.msra.mxu1 %v5759_v47  ;;  %5163 = vmatprep.subr.bf16.mxu0 %v5763_v51  ;;  %v5823_v47 = vld [vmem:[%s6535_s1 + $0x208] sm:$0xff]  }
  0x7e   : > { %5307 = vmatprep.subr.bf16.mxu1 %v5765_v52 }
  0x7f   : > { %5156 = vmatmul.mubr.msk.bf16.gmra.mrb[4].mxu0 %vm339_vm0, %v5762_v50  ;;  %v5827_v50 = vld [vmem:[%s6535_s1 + $0x270] sm:$0xff]  }
  0x80   : > { %5300 = vmatmul.mubr.msk.bf16.gmra.mrb[12].mxu1 %vm339_vm0, %v5764_v53  ;;  %5164 = vmatpush3.bf16.msra.mxu0 %v5763_v51  ;;  %v5826_v51 = vld [vmem:[%s5937_s6 + $0x98] sm:$0xff]  }
  0x81   : > { %5308 = vmatpush3.bf16.msra.mxu1 %v5765_v52  ;;  %5165 = vmatprep.subr.bf16.mxu0 %v5766_v54  ;;  %v5829_v52 = vld [vmem:[%s6535_s1 + $0x210] sm:$0xff]   ;;  %v5828_v53 = vld [vmem:[%s5937_s6 + $0x118] sm:$0xff]  }
  0x82   : > { %5309 = vmatprep.subr.bf16.mxu1 %v5767_v55  ;;  %5167 = vmatprep.mubr.msk.bf16.mxu0 %vm339_vm0, %v5768_v56  ;;  %v5832_v56 = vld [vmem:[%s5937_s6 + $0x60] sm:$0xff]  }
  0x83   : > { %5311 = vmatprep.mubr.msk.bf16.mxu1 %vm339_vm0, %v5769_v57  ;;  %v5833_v57 = vld [vmem:[%s5937_s6 + $0xa0] sm:$0xff]  }
  0x84   : > { %5166 = vmatpush3.bf16.msra.mxu0 %v5766_v54  ;;  %v5830_v54 = vld [vmem:[%s6535_s1 + $0x278] sm:$0xff]  }
  0x85   : > { %5310 = vmatpush3.bf16.msra.mxu1 %v5767_v55  ;;  %5175 = vmatprep.subr.bf16.mxu0 %v5771_v59  ;;  %v5831_v55 = vld [vmem:[%s6535_s1 + $0x218] sm:$0xff]  }
  0x86   : > { %5319 = vmatprep.subr.bf16.mxu1 %v5773_v60 }
  0x87   : > { %5168 = vmatmul.mubr.msk.bf16.vlgmr.msra.gmra.mrb[0].mxu0 %vm339_vm0, %v5770_v58  ;;  %v5836_v58 = vld [vmem:[%s6535_s1 + $0x240] sm:$0xff]  }
  0x88   : > { %5312 = vmatmul.mubr.msk.bf16.vlgmr.msra.gmra.mrb[8].mxu1 %vm339_vm0, %v5772_v61  ;;  %5176 = vmatpush3.bf16.msra.mxu0 %v5771_v59  ;;  %v5835_v59 = vld [vmem:[%s5937_s6 + $0xa8] sm:$0xff]  }
  0x89   : > { %5320 = vmatpush3.bf16.msra.mxu1 %v5773_v60  ;;  %5177 = vmatprep.subr.bf16.mxu0 %v5774_v62  ;;  %v5834_v60 = vld [vmem:[%s5937_s6 + $0x68] sm:$0xff]  }
  0x8a   : > { %5321 = vmatprep.subr.bf16.mxu1 %v5775_v63  ;;  %5171 = vmatprep.mubr.msk.bf16.mxu0 %vm339_vm0, %v5776_v0  ;;  %v5837_v61 = vld [vmem:[%s6535_s1 + $0x248] sm:$0xff]   ;;  %v5842_v0 = vld [vmem:[%s6535_s1 + $0x250] sm:$0xff]  }
  0x8b   : > { %5315 = vmatprep.mubr.msk.bf16.mxu1 %vm339_vm0, %v5777_v1  ;;  %v5841_v1 = vld [vmem:[%s5937_s6 + $0xb8] sm:$0xff]  }
  0x8c   : > { %5178 = vmatpush3.bf16.msra.mxu0 %v5774_v62  ;;  %v5838_v62 = vld [vmem:[%s5937_s6 + $0x70] sm:$0xff]  }
  0x8d   : > { %5322 = vmatpush3.bf16.msra.mxu1 %v5775_v63  ;;  %5179 = vmatprep.subr.bf16.mxu0 %v5779_v3  ;;  %v5839_v63 = vld [vmem:[%s5937_s6 + $0xb0] sm:$0xff]  }
  0x8e   : > { %5323 = vmatprep.subr.bf16.mxu1 %v5781_v4 }
  0x8f   : > { %5172 = vmatmul.mubr.msk.bf16.gmra.mrb[4].mxu0 %vm339_vm0, %v5778_v2  ;;  %v5840_v2 = vld [vmem:[%s5937_s6 + $0x78] sm:$0xff]  }
  0x90   : > { %5316 = vmatmul.mubr.msk.bf16.gmra.mrb[12].mxu1 %vm339_vm0, %v5780_v5  ;;  %5180 = vmatpush3.bf16.msra.mxu0 %v5779_v3  ;;  %v5843_v3 = vld [vmem:[%s6535_s1 + $0x258] sm:$0xff]   ;;  %v5845_v5 = vld [vmem:[%s5937_s6 + $0x90] sm:$0xff]  }
  0x91   : > { %5324 = vmatpush3.bf16.msra.mxu1 %v5781_v4  ;;  %5181 = vmatprep.subr.bf16.mxu0 %v5782_v6  ;;  %v5844_v4 = vld [vmem:[%s5937_s6 + $0x80] sm:$0xff]  }
  0x92   : > { %5325 = vmatprep.subr.bf16.mxu1 %v5783_v7  ;;  %5183 = vmatprep.mubr.msk.bf16.mxu0 %vm339_vm0, %v5784_v8  ;;  %v6421_v8 = vld [vmem:[%s6536_s2] ss:$0 sm:$0xff] }
  0x93   : > { %5327 = vmatprep.mubr.msk.bf16.mxu1 %vm339_vm0, %v5785_v9 }
  0x94   : > { %5182 = vmatpush3.bf16.msra.mxu0 %v5782_v6  ;;  %v5846_v6 = vld [vmem:[%s5937_s6 + $0x88] sm:$0xff]  }
  0x95   : > { %5326 = vmatpush3.bf16.msra.mxu1 %v5783_v7  ;;  %5383 = vmatprep.subr.bf16.mxu0 %v5789_v12  ;;  %v5847_v7 = vld [vmem:[%s5937_s6 + $0x98] sm:$0xff]  }
  0x96   : > { %5335 = vmatprep.subr.bf16.mxu1 %v5788_v11 }
  0x97   : > { %5184 = vmatmul.mubr.msk.bf16.vlgmr.msra.gmra.mrb[0].mxu0 %vm339_vm0, %v5786_v10 }
  0x98   : > { %5328 = vmatmul.mubr.msk.bf16.vlgmr.msra.gmra.mrb[8].mxu1 %vm339_vm0, %v5787_v13  ;;  %5384 = vmatpush3.bf16.msra.mxu0 %v5789_v12 }
  0x99   : > { %5336 = vmatpush3.bf16.msra.mxu1 %v5788_v11  ;;  %5385 = vmatprep.subr.bf16.mxu0 %v5791_v15 }
  0x9a   : > { %5337 = vmatprep.subr.bf16.mxu1 %v5790_v14  ;;  %5187 = vmatprep.mubr.msk.bf16.mxu0 %vm339_vm0, %v5792_v16 }
  0x9b   : > { %5331 = vmatprep.mubr.msk.bf16.mxu1 %vm339_vm0, %v5793_v17 }
  0x9c   : > { %5386 = vmatpush3.bf16.msra.mxu0 %v5791_v15 }
  0x9d   : > { %5338 = vmatpush3.bf16.msra.mxu1 %v5790_v14  ;;  %5387 = vmatprep.subr.bf16.mxu0 %v5797_v20 }
  0x9e   : > { %5339 = vmatprep.subr.bf16.mxu1 %v5796_v19 }
  0x9f   : > { %5188 = vmatmul.mubr.msk.bf16.gmra.mrb[4].mxu0 %vm339_vm0, %v5794_v18 }
  0xa0   : > { %5332 = vmatmul.mubr.msk.bf16.gmra.mrb[12].mxu1 %vm339_vm0, %v5795_v21  ;;  %5388 = vmatpush3.bf16.msra.mxu0 %v5797_v20 }
  0xa1   : > { %5340 = vmatpush3.bf16.msra.mxu1 %v5796_v19  ;;  %5389 = vmatprep.subr.bf16.mxu0 %v5799_v23 }
  0xa2   : > { %5341 = vmatprep.subr.bf16.mxu1 %v5798_v22  ;;  %5343 = vmatprep.mubr.msk.bf16.mxu1 %vm339_vm0, %v5800_v24 }
  0xa3   : > { %5391 = vmatprep.mubr.msk.bf16.mxu0 %vm339_vm0, %v5801_v25 }
  0xa4   : > { %5390 = vmatpush3.bf16.msra.mxu0 %v5799_v23 }
  0xa5   : > { %5342 = vmatpush3.bf16.msra.mxu1 %v5798_v22  ;;  %5399 = vmatprep.subr.bf16.mxu0 %v5805_v28 }
  0xa6   : > { %5351 = vmatprep.subr.bf16.mxu1 %v5803_v26 }
  0xa7   : > { %5392 = vmatmul.mubr.msk.bf16.vlgmr.msra.gmra.mrb[8].mxu0 %vm339_vm0, %v5804_v29 }
  0xa8   : > { %5344 = vmatmul.mubr.msk.bf16.vlgmr.msra.gmra.mrb[8].mxu1 %vm339_vm0, %v5802_v27  ;;  %5400 = vmatpush3.bf16.msra.mxu0 %v5805_v28 }
  0xa9   : > { %5352 = vmatpush3.bf16.msra.mxu1 %v5803_v26  ;;  %5401 = vmatprep.subr.bf16.mxu0 %v5807_v31 }
  0xaa   : > { %5353 = vmatprep.subr.bf16.mxu1 %v5806_v30  ;;  %5347 = vmatprep.mubr.msk.bf16.mxu1 %vm339_vm0, %v5808_v32 }
  0xab   : > { %5395 = vmatprep.mubr.msk.bf16.mxu0 %vm339_vm0, %v5809_v33 }
  0xac   : > { %5402 = vmatpush3.bf16.msra.mxu0 %v5807_v31 }
  0xad   : > { %5354 = vmatpush3.bf16.msra.mxu1 %v5806_v30  ;;  %5403 = vmatprep.subr.bf16.mxu0 %v5813_v36 }
  0xae   : > { %5355 = vmatprep.subr.bf16.mxu1 %v5811_v34 }
  0xaf   : > { %5396 = vmatmul.mubr.msk.bf16.gmra.mrb[12].mxu0 %vm339_vm0, %v5812_v37 }
  0xb0   : > { %5348 = vmatmul.mubr.msk.bf16.gmra.mrb[12].mxu1 %vm339_vm0, %v5810_v35  ;;  %5404 = vmatpush3.bf16.msra.mxu0 %v5813_v36 }
  0xb1   : > { %5356 = vmatpush3.bf16.msra.mxu1 %v5811_v34  ;;  %5405 = vmatprep.subr.bf16.mxu0 %v5815_v39 }
  0xb2   : > { %5357 = vmatprep.subr.bf16.mxu1 %v5814_v38  ;;  %5359 = vmatprep.mubr.msk.bf16.mxu1 %vm339_vm0, %v5816_v40 }
  0xb3   : > { %5407 = vmatprep.mubr.msk.bf16.mxu0 %vm339_vm0, %v5817_v41 }
  0xb4   : > { %5406 = vmatpush3.bf16.msra.mxu0 %v5815_v39 }
  0xb5   : > { %5358 = vmatpush3.bf16.msra.mxu1 %v5814_v38  ;;  %5415 = vmatprep.subr.bf16.mxu0 %v5821_v44 }
  0xb6   : > { %5367 = vmatprep.subr.bf16.mxu1 %v5819_v42 }
  0xb7   : > { %5408 = vmatmul.mubr.msk.bf16.vlgmr.msra.gmra.mrb[8].mxu0 %vm339_vm0, %v5820_v45 }
  0xb8   : > { %5360 = vmatmul.mubr.msk.bf16.vlgmr.msra.gmra.mrb[8].mxu1 %vm339_vm0, %v5818_v43  ;;  %5416 = vmatpush3.bf16.msra.mxu0 %v5821_v44 }
  0xb9   : > { %5368 = vmatpush3.bf16.msra.mxu1 %v5819_v42  ;;  %5417 = vmatprep.subr.bf16.mxu0 %v5823_v47 }
  0xba   : > { %5369 = vmatprep.subr.bf16.mxu1 %v5822_v46  ;;  %5363 = vmatprep.mubr.msk.bf16.mxu1 %vm339_vm0, %v5824_v48 }
  0xbb   : > { %5411 = vmatprep.mubr.msk.bf16.mxu0 %vm339_vm0, %v5825_v49 }
  0xbc   : > { %5418 = vmatpush3.bf16.msra.mxu0 %v5823_v47 }
  0xbd   : > { %5370 = vmatpush3.bf16.msra.mxu1 %v5822_v46  ;;  %5419 = vmatprep.subr.bf16.mxu0 %v5829_v52 }
  0xbe   : > { %5371 = vmatprep.subr.bf16.mxu1 %v5827_v50 }
  0xbf   : > { %5412 = vmatmul.mubr.msk.bf16.gmra.mrb[12].mxu0 %vm339_vm0, %v5828_v53 }
  0xc0   : > { %5364 = vmatmul.mubr.msk.bf16.gmra.mrb[12].mxu1 %vm339_vm0, %v5826_v51  ;;  %5420 = vmatpush3.bf16.msra.mxu0 %v5829_v52 }
  0xc1   : > { %5372 = vmatpush3.bf16.msra.mxu1 %v5827_v50  ;;  %5421 = vmatprep.subr.bf16.mxu0 %v5831_v55 }
  0xc2   : > { %5373 = vmatprep.subr.bf16.mxu1 %v5830_v54  ;;  %5375 = vmatprep.mubr.msk.bf16.mxu1 %vm339_vm0, %v5832_v56 }
  0xc3   : > { %5423 = vmatprep.mubr.msk.bf16.mxu0 %vm339_vm0, %v5833_v57 }
  0xc4   : > { %5422 = vmatpush3.bf16.msra.mxu0 %v5831_v55 }
  0xc5   : > { %5374 = vmatpush3.bf16.msra.mxu1 %v5830_v54  ;;  %5431 = vmatprep.subr.bf16.mxu0 %v5836_v58 }
  0xc6   : > { %5447 = vmatprep.subr.bf16.mxu1 %v5836_v58 }
  0xc7   : > { %5424 = vmatmul.mubr.msk.bf16.vlgmr.msra.gmra.mrb[8].mxu0 %vm339_vm0, %v5835_v59 }
  0xc8   : > { %5376 = vmatmul.mubr.msk.bf16.vlgmr.msra.gmra.mrb[8].mxu1 %vm339_vm0, %v5834_v60  ;;  %5432 = vmatpush3.bf16.msra.mxu0 %v5836_v58 }
  0xc9   : > { %5451 = vmatpush3.bf16.msra.mxu1 %v5836_v58  ;;  %5433 = vmatprep.subr.bf16.mxu0 %v5837_v61 }
  0xca   : > { %5448 = vmatprep.subr.bf16.mxu1 %v5837_v61  ;;  %5379 = vmatprep.mubr.msk.bf16.mxu1 %vm339_vm0, %v5838_v62 }
  0xcb   : > { %5427 = vmatprep.mubr.msk.bf16.mxu0 %vm339_vm0, %v5839_v63 }
  0xcc   : > { %5434 = vmatpush3.bf16.msra.mxu0 %v5837_v61 }
  0xcd   : > { %5452 = vmatpush3.bf16.msra.mxu1 %v5837_v61  ;;  %5435 = vmatprep.subr.bf16.mxu0 %v5842_v0 }
  0xce   : > { %5449 = vmatprep.subr.bf16.mxu1 %v5842_v0 }
  0xcf   : > { %5428 = vmatmul.mubr.msk.bf16.gmra.mrb[12].mxu0 %vm339_vm0, %v5841_v1 }
  0xd0   : > { %5380 = vmatmul.mubr.msk.bf16.gmra.mrb[12].mxu1 %vm339_vm0, %v5840_v2  ;;  %5436 = vmatpush3.bf16.msra.mxu0 %v5842_v0 }
  0xd1   : > { %5453 = vmatpush3.bf16.msra.mxu1 %v5842_v0  ;;  %5437 = vmatprep.subr.bf16.mxu0 %v5843_v3 }
  0xd2   : > { %5450 = vmatprep.subr.bf16.mxu1 %v5843_v3  ;;  %5439 = vmatprep.mubr.msk.bf16.mxu0 %vm339_vm0, %v5844_v4 }
  0xd3   : > { %5443 = vmatprep.mubr.msk.bf16.mxu1 %vm339_vm0, %v5845_v5 }
  0xd4   : > { %5438 = vmatpush3.bf16.msra.mxu0 %v5843_v3 }
  0xd5   : > { %5454 = vmatpush3.bf16.msra.mxu1 %v5843_v3 }
  0xd7   : > { %5440 = vmatmul.mubr.msk.bf16.vlgmr.msra.gmra.mrb[8].mxu0 %vm339_vm0, %v5846_v6 }
  0xd8   : > { %5444 = vmatmul.mubr.msk.bf16.vlgmr.msra.gmra.mrb[16].mxu1 %vm339_vm0, %v5847_v7 }
 0x13b   : > { %v5281_v9 = vpop.f32.mrb[0].mxu1 }
 0x13c   : > { %v2467_v10 = vadd.f32 %v5281_v9, %v6421_v8  ;;  %v2426_v11 = vpop.f32.mrb[1].mxu1 }
 0x13d   : > { %v2465_v12 = vadd.f32 %v6421_v8, %v2426_v11  ;;  %v5282_v13 = vpop.f32.mrb[2].mxu1 }
 0x13e   : > { %v2475_v14 = vmax.f32 %v2467_v10, 0.0  ;;  %v2468_v15 = vadd.f32 %v5282_v13, %v6421_v8  ;;  %v2429_v16 = vpop.f32.mrb[3].mxu1 }
 0x13f   : > { %v2473_v17 = vmax.f32 %v2465_v12, 0.0  ;;  %v2466_v18 = vadd.f32 %v6421_v8, %v2429_v16 }
 0x140   : > { %v2483_v19 = vpack.c.bf16 %v2475_v14, %v2475_v14  ;;  %v2476_v20 = vmax.f32 %v2468_v15, 0.0 }
 0x141   : > { %v2481_v21 = vpack.c.bf16 %v2473_v17, %v2473_v17  ;;  %v2474_v22 = vmax.f32 %v2466_v18, 0.0 }
 0x142   : > { %4542 = vst.msk [vmem:[%s6430_s25 + $0x24] sm:$0xf] %vm1596_vm1, %v2483_v19  ;;  %v2484_v23 = vpack.c.bf16 %v2476_v20, %v2476_v20 }
 0x143   : > { %4540 = vst.msk [vmem:[%s6430_s25 + $0x4] sm:$0xf] %vm1596_vm1, %v2481_v21  ;;  %v2482_v24 = vpack.c.bf16 %v2474_v22, %v2474_v22  ;;  %v5285_v25 = vpop.f32.mrb[4].mxu1 }
 0x144   : > { %4543 = vst.msk [vmem:[%s6430_s25 + $0x34] sm:$0xf] %vm1596_vm1, %v2484_v23  ;;  %v2471_v26 = vadd.f32 %v5285_v25, %v6421_v8  ;;  %v2442_v27 = vpop.f32.mrb[5].mxu1 }
 0x145   : > { %4541 = vst.msk [vmem:[%s6430_s25 + $0x14] sm:$0xf] %vm1596_vm1, %v2482_v24  ;;  %v2469_v28 = vadd.f32 %v6421_v8, %v2442_v27  ;;  %v5286_v29 = vpop.f32.mrb[6].mxu1 }
 0x146   : > { %v2479_v30 = vmax.f32 %v2471_v26, 0.0  ;;  %v2472_v31 = vadd.f32 %v5286_v29, %v6421_v8  ;;  %v2445_v32 = vpop.f32.mrb[7].mxu1 }
 0x147   : > { %v2477_v33 = vmax.f32 %v2469_v28, 0.0  ;;  %v2470_v34 = vadd.f32 %v6421_v8, %v2445_v32 }
 0x148   : > { %v2487_v35 = vpack.c.bf16 %v2479_v30, %v2479_v30  ;;  %v2480_v36 = vmax.f32 %v2472_v31, 0.0 }
 0x149   : > { %v2485_v37 = vpack.c.bf16 %v2477_v33, %v2477_v33  ;;  %v2478_v38 = vmax.f32 %v2470_v34, 0.0 }
 0x14a   : > { %4546 = vst.msk [vmem:[%s6430_s25 + $0x64] sm:$0xf] %vm1596_vm1, %v2487_v35  ;;  %v2488_v39 = vpack.c.bf16 %v2480_v36, %v2480_v36 }
 0x14b   : > { %4544 = vst.msk [vmem:[%s6430_s25 + $0x44] sm:$0xf] %vm1596_vm1, %v2485_v37  ;;  %v2486_v40 = vpack.c.bf16 %v2478_v38, %v2478_v38 }
 0x14c   : > { %4547 = vst.msk [vmem:[%s6430_s25 + $0x74] sm:$0xf] %vm1596_vm1, %v2488_v39 }
 0x14d   : > { %4545 = vst.msk [vmem:[%s6430_s25 + $0x54] sm:$0xf] %vm1596_vm1, %v2486_v40 }
 0x16a   : > { %v5185_v41 = vpop.f32.mrb[0].mxu0 }
 0x16b   : > { %v1574_v42 = vadd.f32 %v5185_v41, %v6421_v8  ;;  %v1527_v43 = vpop.f32.mrb[1].mxu0 }
 0x16c   : > { %v1572_v44 = vadd.f32 %v6421_v8, %v1527_v43  ;;  %v5186_v45 = vpop.f32.mrb[2].mxu0 }
 0x16d   : > { %v1582_v46 = vmax.f32 %v1574_v42, 0.0  ;;  %v1575_v47 = vadd.f32 %v5186_v45, %v6421_v8  ;;  %v1530_v48 = vpop.f32.mrb[3].mxu0 }
 0x16e   : > { %v1580_v49 = vmax.f32 %v1572_v44, 0.0  ;;  %v1573_v50 = vadd.f32 %v6421_v8, %v1530_v48 }
 0x16f   : > { %v1590_v51 = vpack.c.bf16 %v1582_v46, %v1582_v46  ;;  %v1583_v52 = vmax.f32 %v1575_v47, 0.0 }
 0x170   : > { %v1588_v53 = vpack.c.bf16 %v1580_v49, %v1580_v49  ;;  %v1581_v54 = vmax.f32 %v1573_v50, 0.0 }
 0x171   : > { %1599 = vst.msk [vmem:[%s6430_s25 + $0x20] sm:$0xf] %vm1596_vm1, %v1590_v51  ;;  %v1591_v55 = vpack.c.bf16 %v1583_v52, %v1583_v52 }
 0x172   : > { %1597 = vst.msk [vmem:[%s6430_s25] sm:$0xf] %vm1596_vm1, %v1588_v53  ;;  %v1589_v56 = vpack.c.bf16 %v1581_v54, %v1581_v54  ;;  %v5189_v57 = vpop.f32.mrb[4].mxu0 }
 0x173   : > { %1600 = vst.msk [vmem:[%s6430_s25 + $0x30] sm:$0xf] %vm1596_vm1, %v1591_v55  ;;  %v1578_v58 = vadd.f32 %v5189_v57, %v6421_v8  ;;  %v1543_v59 = vpop.f32.mrb[5].mxu0 }
 0x174   : > { %1598 = vst.msk [vmem:[%s6430_s25 + $0x10] sm:$0xf] %vm1596_vm1, %v1589_v56  ;;  %v1576_v60 = vadd.f32 %v6421_v8, %v1543_v59  ;;  %v5190_v61 = vpop.f32.mrb[6].mxu0 }
 0x175   : > { %v1586_v62 = vmax.f32 %v1578_v58, 0.0  ;;  %v1579_v63 = vadd.f32 %v5190_v61, %v6421_v8  ;;  %v1546_v0 = vpop.f32.mrb[7].mxu0 }
 0x176   : > { %v1584_v1 = vmax.f32 %v1576_v60, 0.0  ;;  %v1577_v2 = vadd.f32 %v6421_v8, %v1546_v0 }
 0x177   : > { %v1594_v3 = vpack.c.bf16 %v1586_v62, %v1586_v62  ;;  %v1587_v4 = vmax.f32 %v1579_v63, 0.0 }
 0x178   : > { %v1592_v5 = vpack.c.bf16 %v1584_v1, %v1584_v1  ;;  %v1585_v6 = vmax.f32 %v1577_v2, 0.0 }
 0x179   : > { %1603 = vst.msk [vmem:[%s6430_s25 + $0x60] sm:$0xf] %vm1596_vm1, %v1594_v3  ;;  %v1595_v7 = vpack.c.bf16 %v1587_v4, %v1587_v4 }
 0x17a   : > { %1601 = vst.msk [vmem:[%s6430_s25 + $0x40] sm:$0xf] %vm1596_vm1, %v1592_v5  ;;  %v1593_v9 = vpack.c.bf16 %v1585_v6, %v1585_v6 }
 0x17b   : > { %1604 = vst.msk [vmem:[%s6430_s25 + $0x70] sm:$0xf] %vm1596_vm1, %v1595_v7 }
 0x17c   : > { %1602 = vst.msk [vmem:[%s6430_s25 + $0x50] sm:$0xf] %vm1596_vm1, %v1593_v9 }
 0x19b   : > { %v5377_v10 = vpop.f32.mrb[8].mxu1 }
 0x19c   : > { %v3360_v11 = vadd.f32 %v5377_v10, %v6421_v8  ;;  %v3319_v12 = vpop.f32.mrb[9].mxu1 }
 0x19d   : > { %v3358_v13 = vadd.f32 %v6421_v8, %v3319_v12  ;;  %v5378_v14 = vpop.f32.mrb[10].mxu1 }
 0x19e   : > { %v3368_v15 = vmax.f32 %v3360_v11, 0.0  ;;  %v3361_v16 = vadd.f32 %v5378_v14, %v6421_v8  ;;  %v3322_v17 = vpop.f32.mrb[11].mxu1 }
 0x19f   : > { %v3366_v18 = vmax.f32 %v3358_v13, 0.0  ;;  %v3359_v19 = vadd.f32 %v6421_v8, %v3322_v17 }
 0x1a0   : > { %v3376_v20 = vpack.c.bf16 %v3368_v15, %v3368_v15  ;;  %v3369_v21 = vmax.f32 %v3361_v16, 0.0 }
 0x1a1   : > { %v3374_v22 = vpack.c.bf16 %v3366_v18, %v3366_v18  ;;  %v3367_v23 = vmax.f32 %v3359_v19, 0.0 }
 0x1a2   : > { %4718 = vst.msk [vmem:[%s6430_s25 + $0x28] sm:$0xf] %vm1596_vm1, %v3376_v20  ;;  %v3377_v24 = vpack.c.bf16 %v3369_v21, %v3369_v21  ;;  %v5429_v25 = vpop.f32.mrb[12].mxu0 }
 0x1a3   : > { %4716 = vst.msk [vmem:[%s6430_s25 + $0x8] sm:$0xf] %vm1596_vm1, %v3374_v22  ;;  %v3375_v26 = vpack.c.bf16 %v3367_v23, %v3367_v23  ;;  %v5381_v27 = vpop.f32.mrb[12].mxu1  ;;  %v3790_v28 = vpop.f32.mrb[13].mxu0 }
 0x1a4   : > { %4719 = vst.msk [vmem:[%s6430_s25 + $0x38] sm:$0xf] %vm1596_vm1, %v3377_v24  ;;  %v3364_v29 = vadd.f32 %v5381_v27, %v6421_v8  ;;  %v3335_v30 = vpop.f32.mrb[13].mxu1  ;;  %v5430_v31 = vpop.f32.mrb[14].mxu0 }
 0x1a5   : > { %4717 = vst.msk [vmem:[%s6430_s25 + $0x18] sm:$0xf] %vm1596_vm1, %v3375_v26  ;;  %v3362_v32 = vadd.f32 %v6421_v8, %v3335_v30  ;;  %v5382_v33 = vpop.f32.mrb[14].mxu1  ;;  %v3793_v34 = vpop.f32.mrb[15].mxu0 }
 0x1a6   : > { %v3372_v35 = vmax.f32 %v3364_v29, 0.0  ;;  %v3365_v36 = vadd.f32 %v5382_v33, %v6421_v8  ;;  %v3338_v37 = vpop.f32.mrb[15].mxu1 }
 0x1a7   : > { %v3370_v38 = vmax.f32 %v3362_v32, 0.0  ;;  %v3363_v39 = vadd.f32 %v6421_v8, %v3338_v37 }
 0x1a8   : > { %v3380_v40 = vpack.c.bf16 %v3372_v35, %v3372_v35  ;;  %v3373_v41 = vmax.f32 %v3365_v36, 0.0 }
 0x1a9   : > { %v3378_v42 = vpack.c.bf16 %v3370_v38, %v3370_v38  ;;  %v3371_v43 = vmax.f32 %v3363_v39, 0.0 }
 0x1aa   : > { %4722 = vst.msk [vmem:[%s6430_s25 + $0x68] sm:$0xf] %vm1596_vm1, %v3380_v40  ;;  %v3381_v44 = vpack.c.bf16 %v3373_v41, %v3373_v41  ;;  %v5441_v45 = vpop.f32.mrb[8].mxu0 }
 0x1ab   : > { %4720 = vst.msk [vmem:[%s6430_s25 + $0x48] sm:$0xf] %vm1596_vm1, %v3378_v42  ;;  %v3379_v46 = vpack.c.bf16 %v3371_v43, %v3371_v43  ;;  %v3961_v47 = vadd.f32 %v5441_v45, %v6421_v8  ;;  %v5445_v48 = vpop.f32.mrb[16].mxu1  ;;  %v3920_v49 = vpop.f32.mrb[9].mxu0 }
 0x1ac   : > { %4723 = vst.msk [vmem:[%s6430_s25 + $0x78] sm:$0xf] %vm1596_vm1, %v3381_v44  ;;  %v5455_v50 = vadd.f32 %v5445_v48, %v5429_v25  ;;  %v3959_v51 = vadd.f32 %v6421_v8, %v3920_v49  ;;  %v3936_v52 = vpop.f32.mrb[17].mxu1  ;;  %v5442_v53 = vpop.f32.mrb[10].mxu0 }
 0x1ad   : > { %4721 = vst.msk [vmem:[%s6430_s25 + $0x58] sm:$0xf] %vm1596_vm1, %v3379_v46  ;;  %v3969_v54 = vmax.f32 %v3961_v47, 0.0  ;;  %v5456_v55 = vadd.f32 %v3936_v52, %v3790_v28  ;;  %v3962_v56 = vadd.f32 %v5442_v53, %v6421_v8  ;;  %v5446_v57 = vpop.f32.mrb[18].mxu1  ;;  %v3923_v58 = vpop.f32.mrb[11].mxu0 }
 0x1ae   : > { %v3965_v59 = vadd.f32 %v5455_v50, %v6421_v8  ;;  %v3967_v60 = vmax.f32 %v3959_v51, 0.0  ;;  %v5457_v61 = vadd.f32 %v5446_v57, %v5430_v31  ;;  %v3960_v62 = vadd.f32 %v6421_v8, %v3923_v58  ;;  %v3939_v63 = vpop.f32.mrb[19].mxu1 }
 0x1af   : > { %v3977_v0 = vpack.c.bf16 %v3969_v54, %v3969_v54  ;;  %v3963_v1 = vadd.f32 %v5456_v55, %v6421_v8  ;;  %v3970_v2 = vmax.f32 %v3962_v56, 0.0  ;;  %v5458_v3 = vadd.f32 %v3939_v63, %v3793_v34 }
 0x1b0   : > { %v3973_v4 = vmax.f32 %v3965_v59, 0.0  ;;  %v3975_v5 = vpack.c.bf16 %v3967_v60, %v3967_v60  ;;  %v3966_v6 = vadd.f32 %v5457_v61, %v6421_v8  ;;  %v3968_v7 = vmax.f32 %v3960_v62, 0.0 }
 0x1b1   : > { %4838 = vst.msk [vmem:[%s6430_s25 + $0x2c] sm:$0xf] %vm1596_vm1, %v3977_v0  ;;  %v3971_v9 = vmax.f32 %v3963_v1, 0.0  ;;  %v3978_v10 = vpack.c.bf16 %v3970_v2, %v3970_v2  ;;  %v3964_v11 = vadd.f32 %v5458_v3, %v6421_v8 }
 0x1b2   : > { %v3981_v12 = vpack.c.bf16 %v3973_v4, %v3973_v4  ;;  %4836 = vst.msk [vmem:[%s6430_s25 + $0xc] sm:$0xf] %vm1596_vm1, %v3975_v5  ;;  %v3974_v13 = vmax.f32 %v3966_v6, 0.0  ;;  %v3976_v14 = vpack.c.bf16 %v3968_v7, %v3968_v7 }
 0x1b3   : > { %v3979_v15 = vpack.c.bf16 %v3971_v9, %v3971_v9  ;;  %4839 = vst.msk [vmem:[%s6430_s25 + $0x3c] sm:$0xf] %vm1596_vm1, %v3978_v10  ;;  %v3972_v16 = vmax.f32 %v3964_v11, 0.0 }
 0x1b4   : > { %4842 = vst.msk [vmem:[%s6430_s25 + $0x6c] sm:$0xf] %vm1596_vm1, %v3981_v12  ;;  %v3982_v17 = vpack.c.bf16 %v3974_v13, %v3974_v13  ;;  %4837 = vst.msk [vmem:[%s6430_s25 + $0x1c] sm:$0xf] %vm1596_vm1, %v3976_v14 }
 0x1b5   : > { %4840 = vst.msk [vmem:[%s6430_s25 + $0x4c] sm:$0xf] %vm1596_vm1, %v3979_v15  ;;  %v3980_v18 = vpack.c.bf16 %v3972_v16, %v3972_v16 }
 0x1b6   : > { %4843 = vst.msk [vmem:[%s6430_s25 + $0x7c] sm:$0xf] %vm1596_vm1, %v3982_v17 }
 0x1b7   : > { %4841 = vst.msk [vmem:[%s6430_s25 + $0x5c] sm:$0xf] %vm1596_vm1, %v3980_v18 }
 0x1b8 PF: > { %s13_s14 = sadd.s32 1, %s5870_s14   ;;  %s6538_s12 = smov %s5866_s13 }
 0x1b9   : > { %p10_p5 = scmp.ge.s32.totalorder %s13_s14, 4   ;;  %s6539_s13 = smov %s6541_s15 }
 0x1bb   :  { %12 = sbr.rel (!%p10_p5) target bundleno = 2 (0x2), region = 103 }

// kernel: celeba_decoder.8
= control target key start
LH: loop header
LB: loop body
LE: loop exit
PB: predicated region body
PF: predicated region fallthrough
CT: control target
= control target key end

     0   :  { %s3953_s12 = smov 0   ;;  %s3955_s13 = smov 0   ;;  %s4546_s0 = inlined_call_operand.vmem [shape: bf16[2,4,16,16,32], index: 0, kind: input, shape index: {}]   ;;  %s4547_s1 = inlined_call_operand.vmem [shape: bf16[9,32,16], index: 1, kind: input, shape index: {}]   ;;  %s4548_s2 = inlined_call_operand.vmem [shape: f32[1,16], index: 2, kind: input, shape index: {}]   ;;  %s4549_s3 = inlined_call_operand.vmem [shape: bf16[2,16,4,16,16], index: 3, kind: output, shape index: {}]  }
   0x1   :  { %s3957_s14 = smov 0   ;;  %s3959_s15 = smov 0  }
   0x2   :  { %s3961_s16 = smov 0   ;;  %s3963_s17 = smov 0  }
   0x3   :  { %s3965_s18 = smov 0  }
   0x4 LB: > { %s25_s19 = sadd.s32 1, %s3923_s16  ;;  %s28_s20 = sadd.s32 1, %s3927_s17  ;;  %s3931_s18 = sphi %s3965_s18, %s13_s18   ;;  %s3927_s17 = sphi %s3963_s17, %s4555_s17   ;;  %s3923_s16 = sphi %s3961_s16, %s4554_s16   ;;  %s3919_s15 = sphi %s3959_s15, %s4553_s15   ;;  %s3915_s14 = sphi %s3957_s14, %s4552_s14   ;;  %s3911_s13 = sphi %s3955_s13, %s4551_s13   ;;  %s3907_s12 = sphi %s3953_s12, %s4550_s12  }
   0x5   : > { %p26_p0 = scmp.ge.s32.totalorder %s25_s19, 2  ;;  %p48_p1 = scmp.ne.s32.totalorder %s3911_s13, %s3907_s12 }
   0x6   : > { %p49_p2 = scmp.eq.s32.totalorder %s3931_s18, 0  ;;  %s41_s24 = sadd.s32 1, %s3911_s13 }
   0x7   : > { %s4557_s19 = smov (%p26_p0, %s25_s19), 0  ;;  %s4559_s20 = smov (!%p26_p0, %s28_s20), %s3927_s17 }
   0x8   : > { %p50_p3 = por %p49_p2, %p48_p1  ;;  %p30_p4 = scmp.ge.s32.totalorder %s4559_s20, 2 }
   0x9   : > { %s37_s21 = ssub.s32 %s3923_s16, %s4557_s19  ;;  %p2911_p6 = scmp.ge.s32.totalorder %s3931_s18, 4 }
   0xa   : > { %s4561_s20 = smov (%p30_p4, %s4559_s20), 0 }
   0xb   : > { %s36_s22 = ssub.s32 %s3927_s17, %s4561_s20  ;;  %169 = sbr.rel (%p2911_p6) target bundleno = 41 (0x29), region = 24 }
   0xc   : > { %s38_s23 = sor.u32 %s37_s21, %s36_s22 }
   0xd   : > { %p39_p5 = scmp.eq.s32.totalorder %s38_s23, 0 }
   0xf   : > { %s4004_s25 = scalar_select %p39_p5, %s3911_s13, %s41_s24  }
  0x12   : > { %172 = sbr.rel (!%p50_p3) target bundleno = 41 (0x29), region = 28  ;;  %s174_s26 = sand.u32 (%p50_p3), 1, %s3911_s13  }
  0x13   : > { %s3312_s27 = sshll.u32 (%p50_p3), %s3923_s16, 4  ;;  %s2912_s28 = sshll.u32 (%p50_p3), %s174_s26, 8 }
  0x14   : > { %s2915_s29 = sshll.u32 (%p50_p3), %s3927_s17, 7  ;;  %s4018_s8 = scalar_lea.vmem (%p50_p3), [#allocation2], %s2912_s28 }
  0x15   : > { %s180_s30 = sadd.s32 (%p50_p3), %s3312_s27, %s2915_s29 }
  0x16   : > { %s2916_s4 = sshll.u32 (%p50_p3), %s180_s30, 2 }
  0x17   : > { %s4013_s7 = scalar_lea.vmem (%p50_p3), %s4546_s0, %s2916_s4 }
  0x18   : > { %v198_v0 = vld [vmem:[%s4013_s7] sm:$0xff] (%p50_p3)   ;;  %v202_v1 = vld [vmem:[%s4013_s7 + $0x8] sm:$0xff] (%p50_p3)   ;;  %v206_v2 = vld [vmem:[%s4013_s7 + $0x10] sm:$0xff] (%p50_p3)  }
  0x19   : > { %199 = vst [vmem:[%s4018_s8] sm:$0xff] %v198_v0   ;;  %203 = vst [vmem:[%s4018_s8 + $0x8] sm:$0xff] %v202_v1   ;;  %v210_v3 = vld [vmem:[%s4013_s7 + $0x18] sm:$0xff]   ;;  %v214_v4 = vld [vmem:[%s4013_s7 + $0x20] sm:$0xff]  }
  0x1a   : > { %207 = vst [vmem:[%s4018_s8 + $0x10] sm:$0xff] %v206_v2   ;;  %v218_v5 = vld [vmem:[%s4013_s7 + $0x28] sm:$0xff]   ;;  %211 = vst [vmem:[%s4018_s8 + $0x18] sm:$0xff] %v210_v3   ;;  %v222_v6 = vld [vmem:[%s4013_s7 + $0x30] sm:$0xff]  }
  0x1b   : > { %215 = vst [vmem:[%s4018_s8 + $0x20] sm:$0xff] %v214_v4   ;;  %219 = vst [vmem:[%s4018_s8 + $0x28] sm:$0xff] %v218_v5   ;;  %v226_v7 = vld [vmem:[%s4013_s7 + $0x38] sm:$0xff]   ;;  %v230_v8 = vld [vmem:[%s4013_s7 + $0x80] sm:$0xff]  }
  0x1c   : > { %223 = vst [vmem:[%s4018_s8 + $0x30] sm:$0xff] %v222_v6   ;;  %227 = vst [vmem:[%s4018_s8 + $0x38] sm:$0xff] %v226_v7   ;;  %v234_v9 = vld [vmem:[%s4013_s7 + $0x88] sm:$0xff]   ;;  %v238_v10 = vld [vmem:[%s4013_s7 + $0x90] sm:$0xff]  }
  0x1d   : > { %231 = vst [vmem:[%s4018_s8 + $0x40] sm:$0xff] %v230_v8   ;;  %v242_v11 = vld [vmem:[%s4013_s7 + $0x98] sm:$0xff]   ;;  %235 = vst [vmem:[%s4018_s8 + $0x48] sm:$0xff] %v234_v9   ;;  %v246_v12 = vld [vmem:[%s4013_s7 + $0xa0] sm:$0xff]  }
  0x1e   : > { %239 = vst [vmem:[%s4018_s8 + $0x50] sm:$0xff] %v238_v10   ;;  %243 = vst [vmem:[%s4018_s8 + $0x58] sm:$0xff] %v242_v11   ;;  %v250_v13 = vld [vmem:[%s4013_s7 + $0xa8] sm:$0xff]   ;;  %v254_v14 = vld [vmem:[%s4013_s7 + $0xb0] sm:$0xff]  }
  0x1f   : > { %247 = vst [vmem:[%s4018_s8 + $0x60] sm:$0xff] %v246_v12   ;;  %251 = vst [vmem:[%s4018_s8 + $0x68] sm:$0xff] %v250_v13   ;;  %v258_v15 = vld [vmem:[%s4013_s7 + $0xb8] sm:$0xff]   ;;  %v262_v16 = vld [vmem:[%s4013_s7 + $0x100] sm:$0xff]  }
  0x20   : > { %255 = vst [vmem:[%s4018_s8 + $0x70] sm:$0xff] %v254_v14   ;;  %v266_v17 = vld [vmem:[%s4013_s7 + $0x108] sm:$0xff]   ;;  %259 = vst [vmem:[%s4018_s8 + $0x78] sm:$0xff] %v258_v15   ;;  %v270_v18 = vld [vmem:[%s4013_s7 + $0x110] sm:$0xff]  }
  0x21   : > { %263 = vst [vmem:[%s4018_s8 + $0x80] sm:$0xff] %v262_v16   ;;  %267 = vst [vmem:[%s4018_s8 + $0x88] sm:$0xff] %v266_v17   ;;  %v274_v19 = vld [vmem:[%s4013_s7 + $0x118] sm:$0xff]   ;;  %v278_v20 = vld [vmem:[%s4013_s7 + $0x120] sm:$0xff]  }
  0x22   : > { %271 = vst [vmem:[%s4018_s8 + $0x90] sm:$0xff] %v270_v18   ;;  %275 = vst [vmem:[%s4018_s8 + $0x98] sm:$0xff] %v274_v19   ;;  %v282_v21 = vld [vmem:[%s4013_s7 + $0x128] sm:$0xff]   ;;  %v286_v22 = vld [vmem:[%s4013_s7 + $0x130] sm:$0xff]  }
  0x23   : > { %279 = vst [vmem:[%s4018_s8 + $0xa0] sm:$0xff] %v278_v20   ;;  %v290_v23 = vld [vmem:[%s4013_s7 + $0x138] sm:$0xff]   ;;  %283 = vst [vmem:[%s4018_s8 + $0xa8] sm:$0xff] %v282_v21   ;;  %v294_v24 = vld [vmem:[%s4013_s7 + $0x180] sm:$0xff]  }
  0x24   : > { %287 = vst [vmem:[%s4018_s8 + $0xb0] sm:$0xff] %v286_v22   ;;  %291 = vst [vmem:[%s4018_s8 + $0xb8] sm:$0xff] %v290_v23   ;;  %v298_v25 = vld [vmem:[%s4013_s7 + $0x188] sm:$0xff]   ;;  %v302_v26 = vld [vmem:[%s4013_s7 + $0x190] sm:$0xff]  }
  0x25   : > { %295 = vst [vmem:[%s4018_s8 + $0xc0] sm:$0xff] %v294_v24   ;;  %299 = vst [vmem:[%s4018_s8 + $0xc8] sm:$0xff] %v298_v25   ;;  %v306_v27 = vld [vmem:[%s4013_s7 + $0x198] sm:$0xff]   ;;  %v310_v28 = vld [vmem:[%s4013_s7 + $0x1a0] sm:$0xff]  }
  0x26   : > { %303 = vst [vmem:[%s4018_s8 + $0xd0] sm:$0xff] %v302_v26   ;;  %v314_v29 = vld [vmem:[%s4013_s7 + $0x1a8] sm:$0xff]   ;;  %307 = vst [vmem:[%s4018_s8 + $0xd8] sm:$0xff] %v306_v27   ;;  %v318_v30 = vld [vmem:[%s4013_s7 + $0x1b0] sm:$0xff]  }
  0x27   : > { %311 = vst [vmem:[%s4018_s8 + $0xe0] sm:$0xff] %v310_v28   ;;  %315 = vst [vmem:[%s4018_s8 + $0xe8] sm:$0xff] %v314_v29   ;;  %v322_v31 = vld [vmem:[%s4013_s7 + $0x1b8] sm:$0xff]  }
  0x28   : > { %319 = vst [vmem:[%s4018_s8 + $0xf0] sm:$0xff] %v318_v30   ;;  %323 = vst [vmem:[%s4018_s8 + $0xf8] sm:$0xff] %v322_v31  }
  0x29 PF: > { %p2917_p7 = scmp.ge.s32.totalorder %s3931_s18, 1  ;;  %p475_p8 = scmp.lt.s32.totalorder %s3931_s18, 5 }
  0x2b   : > { %p476_p9 = pnand %p2917_p7, %p475_p8 }
  0x2c   : > { %v3787_v32 = vld [vmem:[%s4547_s1 + $0x40] sm:$0xff] (!%p476_p9)   ;;  %s482_s11 = sand.u32 (!%p476_p9), 1, %s3907_s12   ;;  %v4090_v33 = vld [vmem:[%s4547_s1 + $0x30] sm:$0xff] (!%p476_p9)   ;;  %v3789_v34 = vld [vmem:[%s4547_s1 + $0x48] sm:$0xff] (!%p476_p9)   ;;  %vm623_vm0 = vcmask (!%p476_p9), 261120   ;;  %s2919_s22 = sshll.u32 (!%p476_p9), %s3915_s14, 3 }
  0x2d   : > { %479 = sbr.rel (%p476_p9) target bundleno = 411 (0x19b), region = 69  ;;  %s2918_s23 = sshll.u32 (!%p476_p9), %s482_s11, 8  ;;  %3467 = vmatprep.subr.bf16.mxu0 (!%p476_p9), %v3787_v32  ;;  %3647 = vmatprep.subr.bf16.mxu1 (!%p476_p9), %v4090_v33  ;;  %v4099_v35 = vld [vmem:[%s4547_s1 + $0x38] sm:$0xff] (!%p476_p9)   ;;  %v3794_v39 = vld [vmem:[%s4547_s1 + $0x50] sm:$0xff] (!%p476_p9)   ;;  %v3796_v41 = vld [vmem:[%s4547_s1 + $0x20] sm:$0xff] (!%p476_p9)   ;;  %vm825_vm1 = vcmask (!%p476_p9), 125952  }
  0x2e   : > { %3468 = vmatpush3.bf16.msra.mxu0 (!%p476_p9), %v3787_v32  ;;  %3649 = vmatpush3.bf16.msra.mxu1 (!%p476_p9), %v4090_v33  ;;  %s4102_s12 = scalar_lea.vmem (!%p476_p9), [#allocation2], %s2918_s23  ;;  %v3801_v46 = vld [vmem:[%s4547_s1 + $0x28] sm:$0xff] (!%p476_p9)   ;;  %v3805_v49 = vld [vmem:[%s4547_s1 + $0x58] sm:$0xff] (!%p476_p9)   ;;  %v3807_v50 = vld [vmem:[%s4547_s1] sm:$0xff] (!%p476_p9)   ;;  %p529_p10 = scmp.lt.s32.totalorder (!%p476_p9), %s3919_s15, 1 }
  0x2f   : > { %3469 = vmatprep.subr.bf16.mxu0 (!%p476_p9), %v3789_v34  ;;  %v3791_v36 = vld [vmem:[%s4102_s12] sm:$0xff] (!%p476_p9)   ;;  %3648 = vmatprep.subr.bf16.mxu1 (!%p476_p9), %v4099_v35  ;;  %v3793_v38 = vld [vmem:[%s4102_s12 + $0x8] sm:$0xff] (!%p476_p9)   ;;  %v3797_v42 = vld [vmem:[%s4102_s12 + $0x10] sm:$0xff] (!%p476_p9)   ;;  %p531_p11 = scmp.lt.s32.totalorder (!%p476_p9), %s2919_s22, 15 }
  0x30   : > { %v3792_v37 = vld [vmem:[%s4102_s12 + $0x60] sm:$0xff] (!%p476_p9)   ;;  %3471 = vmatprep.mubr.msk.bf16.mxu0 (!%p476_p9), %vm623_vm0, %v3791_v36  ;;  %v3795_v40 = vld [vmem:[%s4102_s12 + $0x68] sm:$0xff] (!%p476_p9)   ;;  %v3798_v43 = vld [vmem:[%s4102_s12 + $0x70] sm:$0xff] (!%p476_p9)  }
  0x31   : > { %3519 = vmatprep.mubr.msk.bf16.mxu1 (!%p476_p9), %vm623_vm0, %v3792_v37  ;;  %v3799_v44 = vld [vmem:[%s4102_s12 + $0x18] sm:$0xff] (!%p476_p9)   ;;  %v3802_v47 = vld [vmem:[%s4102_s12 + $0x20] sm:$0xff] (!%p476_p9)   ;;  %v3804_v51 = vld [vmem:[%s4102_s12 + $0x28] sm:$0xff] (!%p476_p9)  }
  0x32   : > { %3470 = vmatpush3.bf16.msra.mxu0 (!%p476_p9), %v3789_v34  ;;  %3650 = vmatpush3.bf16.msra.mxu1 (!%p476_p9), %v4099_v35  ;;  %v3800_v45 = vld [vmem:[%s4102_s12 + $0x78] sm:$0xff] (!%p476_p9)   ;;  %v3803_v48 = vld [vmem:[%s4102_s12 + $0x80] sm:$0xff] (!%p476_p9)   ;;  %v3806_v52 = vld [vmem:[%s4102_s12 + $0x88] sm:$0xff] (!%p476_p9)  }
  0x33   : > { %3487 = vmatprep.subr.bf16.mxu0 (!%p476_p9), %v3794_v39  ;;  %3567 = vmatprep.subr.bf16.mxu1 (!%p476_p9), %v3796_v41  ;;  %v3808_v53 = vld [vmem:[%s4102_s12 + $0x30] sm:$0xff] (!%p476_p9)   ;;  %v3810_v55 = vld [vmem:[%s4102_s12 + $0x38] sm:$0xff] (!%p476_p9)   ;;  %v3816_v56 = vld [vmem:[%s4547_s1 + $0x8] sm:$0xff] (!%p476_p9)  }
  0x34   : > { %v3809_v54 = vld [vmem:[%s4102_s12 + $0x90] sm:$0xff]   ;;  %v3811_v57 = vld [vmem:[%s4102_s12 + $0x98] sm:$0xff]   ;;  %v3812_v58 = vld [vmem:[%s4102_s12] sm:$0xff]   ;;  %s4563_s15 = smov (!%p529_p10, %s3919_s15), 1  ;;  %s4565_s22 = smov (!%p531_p11, %s2919_s22), 15 }
  0x35   : > { %3472 = vmatmul.mubr.msk.bf16.vlgmr.msra.gmra.mrb[0].mxu0 %vm623_vm0, %v3793_v38  ;;  %3520 = vmatmul.mubr.msk.bf16.vlgmr.msra.gmra.mrb[0].mxu1 %vm623_vm0, %v3795_v40  ;;  %v3813_v59 = vld [vmem:[%s4102_s12 + $0xa0] sm:$0xff]   ;;  %v3814_v60 = vld [vmem:[%s4102_s12 + $0x8] sm:$0xff]   ;;  %v3817_v63 = vld [vmem:[%s4102_s12 + $0x10] sm:$0xff]   ;;  %s2920_s23 = sshll.u32 %s4565_s22, 3  ;;  %s2921_s24 = sshll.u32 %s4563_s15, 7 }
  0x36   : > { %3488 = vmatpush3.bf16.msra.mxu0 %v3794_v39  ;;  %3568 = vmatpush3.bf16.msra.mxu1 %v3796_v41  ;;  %v3815_v61 = vld [vmem:[%s4102_s12 + $0xa8] sm:$0xff]   ;;  %v3825_v62 = vld [vmem:[%s4547_s1 + $0x60] sm:$0xff]   ;;  %v3818_v0 = vld [vmem:[%s4102_s12 + $0xb0] sm:$0xff]   ;;  %s538_s26 = sadd.s32 %s2921_s24, %s2920_s23 }
  0x37   : > { %3475 = vmatprep.mubr.msk.bf16.mxu0 %vm623_vm0, %v3797_v42  ;;  %3523 = vmatprep.mubr.msk.bf16.mxu1 %vm623_vm0, %v3798_v43  ;;  %v3819_v1 = vld [vmem:[%s4102_s12 + $0x18] sm:$0xff]   ;;  %v3833_v3 = vld [vmem:[%s4547_s1 + $0x70] sm:$0xff]   ;;  %v3821_v4 = vld [vmem:[%s4102_s12 + $0x20] sm:$0xff]   ;;  %s2922_s29 = sshll.u32 %s538_s26, 2 }
  0x38   : > { %3569 = vmatprep.subr.bf16.mxu1 %v3801_v46  ;;  %3489 = vmatprep.subr.bf16.mxu0 %v3805_v49  ;;  %v3820_v2 = vld [vmem:[%s4102_s12 + $0xb8] sm:$0xff]   ;;  %v3822_v5 = vld [vmem:[%s4102_s12 + $0xc0] sm:$0xff]   ;;  %v3823_v6 = vld [vmem:[%s4102_s12 + $0x28] sm:$0xff]  }
  0x39   : > { %v3824_v7 = vld [vmem:[%s4102_s12 + $0xc8] sm:$0xff]   ;;  %v3826_v8 = vld [vmem:[%s4102_s12 + $0x30] sm:$0xff]   ;;  %v3828_v11 = vld [vmem:[%s4102_s12 + $0x38] sm:$0xff]  }
  0x3a   : > { %3570 = vmatpush3.bf16.msra.mxu1 %v3801_v46  ;;  %3490 = vmatpush3.bf16.msra.mxu0 %v3805_v49  ;;  %v3827_v9 = vld [vmem:[%s4102_s12 + $0xd0] sm:$0xff]   ;;  %v3835_v10 = vld [vmem:[%s4547_s1 + $0x68] sm:$0xff]   ;;  %v3846_v12 = vld [vmem:[%s4547_s1 + $0x80] sm:$0xff]  }
  0x3b   : > { %3587 = vmatprep.subr.bf16.mxu1 %v3807_v50  ;;  %3507 = vmatprep.subr.bf16.mxu0 %v4090_v33  ;;  %v3829_v13 = vld [vmem:[%s4102_s12 + $0xd8] sm:$0xff]   ;;  %v3830_v14 = vld [vmem:[%s4102_s12 + $0x40] sm:$0xff]   ;;  %v3832_v16 = vld [vmem:[%s4102_s12 + $0x48] sm:$0xff]  }
  0x3c   : > { %v3831_v15 = vld [vmem:[%s4102_s12 + $0xe0] sm:$0xff]   ;;  %v3834_v17 = vld [vmem:[%s4102_s12 + $0xe8] sm:$0xff]   ;;  %v3836_v18 = vld [vmem:[%s4102_s12 + $0x50] sm:$0xff]  }
  0x3d   : > { %3476 = vmatmul.mubr.msk.bf16.gmra.mrb[4].mxu0 %vm623_vm0, %v3799_v44  ;;  %3524 = vmatmul.mubr.msk.bf16.gmra.mrb[4].mxu1 %vm623_vm0, %v3800_v45  ;;  %v3837_v19 = vld [vmem:[%s4102_s12 + $0xf0] sm:$0xff]   ;;  %v3839_v20 = vld [vmem:[%s4547_s1 + $0x78] sm:$0xff]   ;;  %v3841_v24 = vld [vmem:[%s4102_s12] sm:$0xff]  }
  0x3e   : > { %3479 = vmatprep.mubr.msk.bf16.mxu0 %vm623_vm0, %v3802_v47  ;;  %3571 = vmatprep.mubr.msk.bf16.mxu1 %vm623_vm0, %v3803_v48  ;;  %v3844_v21 = vld [vmem:[%s4547_s1 + $0x10] sm:$0xff]   ;;  %v3838_v22 = vld [vmem:[%s4102_s12 + $0x58] sm:$0xff]   ;;  %v3842_v25 = vld [vmem:[%s4102_s12 + $0x40] sm:$0xff]  }
  0x3f   : > { %v3840_v23 = vld [vmem:[%s4102_s12 + $0xf8] sm:$0xff]   ;;  %v3843_v26 = vld [vmem:[%s4102_s12 + $0x8] sm:$0xff]   ;;  %v3847_v28 = vld [vmem:[%s4102_s12 + $0x10] sm:$0xff]  }
  0x40   : > { %v3845_v27 = vld [vmem:[%s4102_s12 + $0x48] sm:$0xff]   ;;  %v3848_v29 = vld [vmem:[%s4102_s12 + $0x50] sm:$0xff]   ;;  %v3854_v30 = vld [vmem:[%s4547_s1 + $0x18] sm:$0xff]  }
  0x41   : > { %v3856_v31 = vld [vmem:[%s4547_s1 + $0x88] sm:$0xff]   ;;  %v3849_v32 = vld [vmem:[%s4102_s12 + $0x18] sm:$0xff]   ;;  %v3851_v34 = vld [vmem:[%s4102_s12 + $0x20] sm:$0xff]  }
  0x42   : > { %v3853_v36 = vld [vmem:[%s4102_s12 + $0x28] sm:$0xff]   ;;  %v3857_v38 = vld [vmem:[%s4102_s12 + $0x30] sm:$0xff]   ;;  %v3859_v40 = vld [vmem:[%s4102_s12 + $0x38] sm:$0xff]  }
  0x43   : > { %v3855_v37 = vld [vmem:[%s4102_s12 + $0x68] sm:$0xff]   ;;  %v3858_v39 = vld [vmem:[%s4102_s12 + $0x70] sm:$0xff]   ;;  %v3860_v41 = vld [vmem:[%s4102_s12 + $0x78] sm:$0xff]  }
  0x44   : > { %v3861_v42 = vld [vmem:[%s4102_s12 + $0x80] sm:$0xff]   ;;  %v3863_v44 = vld [vmem:[%s4102_s12 + $0x88] sm:$0xff]   ;;  %v3865_v46 = vld [vmem:[%s4102_s12 + $0x90] sm:$0xff]  }
  0x45   : > { %3480 = vmatmul.mubr.msk.bf16.gmra.mrb[8].mxu0 %vm623_vm0, %v3804_v51  ;;  %3572 = vmatmul.mubr.msk.bf16.vlgmr.msra.gmra.mrb[8].mxu1 %vm623_vm0, %v3806_v52  ;;  %v3862_v43 = vld [vmem:[%s4102_s12] sm:$0xff]   ;;  %v3864_v45 = vld [vmem:[%s4102_s12 + $0x8] sm:$0xff]   ;;  %v3866_v47 = vld [vmem:[%s4102_s12 + $0x10] sm:$0xff]  }
  0x46   : > { %3483 = vmatprep.mubr.msk.bf16.mxu0 %vm623_vm0, %v3808_v53  ;;  %3588 = vmatpush3.bf16.msra.mxu1 %v3807_v50  ;;  %v3867_v48 = vld [vmem:[%s4102_s12 + $0x98] sm:$0xff]   ;;  %v3869_v50 = vld [vmem:[%s4102_s12 + $0xa0] sm:$0xff]   ;;  %v3871_v52 = vld [vmem:[%s4102_s12 + $0xa8] sm:$0xff]  }
  0x47   : > { %3575 = vmatprep.mubr.msk.bf16.mxu1 %vm623_vm0, %v3809_v54  ;;  %3589 = vmatprep.subr.bf16.mxu1 %v3816_v56  ;;  %v3868_v49 = vld [vmem:[%s4102_s12 + $0x18] sm:$0xff]   ;;  %v3870_v51 = vld [vmem:[%s4102_s12 + $0x20] sm:$0xff]   ;;  %v3872_v53 = vld [vmem:[%s4102_s12 + $0x28] sm:$0xff]  }
  0x48   : > { %v3873_v54 = vld [vmem:[%s4102_s12 + $0xb0] sm:$0xff]  }
  0x4a   : > { %3590 = vmatpush3.bf16.msra.mxu1 %v3816_v56  ;;  %v3875_v56 = vld [vmem:[%s4102_s12 + $0xb8] sm:$0xff]  }
  0x4b   : > { %3607 = vmatprep.subr.bf16.mxu1 %v3825_v62 }
  0x4d   : > { %3484 = vmatmul.mubr.msk.bf16.gmra.mrb[12].mxu0 %vm623_vm0, %v3810_v55  ;;  %3576 = vmatmul.mubr.msk.bf16.gmra.mrb[12].mxu1 %vm623_vm0, %v3811_v57  ;;  %v3874_v55 = vld [vmem:[%s4102_s12 + $0x30] sm:$0xff]   ;;  %v3876_v57 = vld [vmem:[%s4102_s12 + $0x38] sm:$0xff]  }
  0x4e   : > { %3491 = vmatprep.mubr.msk.bf16.mxu0 %vm623_vm0, %v3812_v58  ;;  %3579 = vmatprep.mubr.msk.bf16.mxu1 %vm623_vm0, %v3813_v59  ;;  %v4302_v58 = vld [vmem:[%s4548_s2] ss:$0 sm:$0xff] }
  0x55   : > { %3492 = vmatmul.mubr.msk.bf16.vlgmr.msra.gmra.mrb[16].mxu0 %vm623_vm0, %v3814_v60  ;;  %3580 = vmatmul.mubr.msk.bf16.gmra.mrb[16].mxu1 %vm623_vm0, %v3815_v61 }
  0x56   : > { %3508 = vmatpush3.bf16.msra.mxu0 %v4090_v33  ;;  %3495 = vmatprep.mubr.msk.bf16.mxu0 %vm623_vm0, %v3817_v63  ;;  %v3850_v33 = vld [vmem:[%s4102_s12 + $0x58] sm:$0xff]  }
  0x57   : > { %3583 = vmatprep.mubr.msk.bf16.mxu1 %vm623_vm0, %v3818_v0  ;;  %3509 = vmatprep.subr.bf16.mxu0 %v4099_v35 }
  0x5a   : > { %3510 = vmatpush3.bf16.msra.mxu0 %v4099_v35  ;;  %v3852_v35 = vld [vmem:[%s4102_s12 + $0x60] sm:$0xff]   ;;  %s4316_s12 = scalar_lea.vmem %s4549_s3, %s2922_s29 }
  0x5b   : > { %3527 = vmatprep.subr.bf16.mxu0 %v3833_v3 }
  0x5d   : > { %3496 = vmatmul.mubr.msk.bf16.gmra.mrb[20].mxu0 %vm623_vm0, %v3819_v1  ;;  %3584 = vmatmul.mubr.msk.bf16.gmra.mrb[20].mxu1 %vm623_vm0, %v3820_v2 }
  0x5e   : > { %3499 = vmatprep.mubr.msk.bf16.mxu0 %vm623_vm0, %v3821_v4  ;;  %3591 = vmatprep.mubr.msk.bf16.mxu1 %vm623_vm0, %v3822_v5 }
  0x65   : > { %3500 = vmatmul.mubr.msk.bf16.gmra.mrb[24].mxu0 %vm623_vm0, %v3823_v6  ;;  %3592 = vmatmul.mubr.msk.bf16.vlgmr.msra.gmra.mrb[8].mxu1 %vm623_vm0, %v3824_v7 }
  0x66   : > { %3503 = vmatprep.mubr.msk.bf16.mxu0 %vm623_vm0, %v3826_v8  ;;  %3608 = vmatpush3.bf16.msra.mxu1 %v3825_v62 }
  0x67   : > { %3595 = vmatprep.mubr.msk.bf16.mxu1 %vm623_vm0, %v3827_v9  ;;  %3609 = vmatprep.subr.bf16.mxu1 %v3835_v10 }
  0x6a   : > { %3610 = vmatpush3.bf16.msra.mxu1 %v3835_v10 }
  0x6b   : > { %3627 = vmatprep.subr.bf16.mxu1 %v3846_v12 }
  0x6d   : > { %3504 = vmatmul.mubr.msk.bf16.gmra.mrb[28].mxu0 %vm623_vm0, %v3828_v11  ;;  %3596 = vmatmul.mubr.msk.bf16.gmra.mrb[12].mxu1 %vm623_vm0, %v3829_v13 }
  0x6e   : > { %3511 = vmatprep.mubr.msk.bf16.mxu0 %vm623_vm0, %v3830_v14  ;;  %3599 = vmatprep.mubr.msk.bf16.mxu1 %vm623_vm0, %v3831_v15 }
  0x75   : > { %3512 = vmatmul.mubr.msk.bf16.vlgmr.msra.gmra.mrb[16].mxu0 %vm623_vm0, %v3832_v16  ;;  %3600 = vmatmul.mubr.msk.bf16.gmra.mrb[16].mxu1 %vm623_vm0, %v3834_v17 }
  0x76   : > { %3528 = vmatpush3.bf16.msra.mxu0 %v3833_v3  ;;  %3515 = vmatprep.mubr.msk.bf16.mxu0 %vm623_vm0, %v3836_v18 }
  0x77   : > { %3603 = vmatprep.mubr.msk.bf16.mxu1 %vm623_vm0, %v3837_v19  ;;  %3529 = vmatprep.subr.bf16.mxu0 %v3839_v20 }
  0x7a   : > { %3530 = vmatpush3.bf16.msra.mxu0 %v3839_v20 }
  0x7b   : > { %3547 = vmatprep.subr.bf16.mxu0 %v3844_v21 }
  0x7d   : > { %3516 = vmatmul.mubr.msk.bf16.gmra.mrb[20].mxu0 %vm623_vm0, %v3838_v22  ;;  %3604 = vmatmul.mubr.msk.bf16.gmra.mrb[20].mxu1 %vm623_vm0, %v3840_v23 }
  0x7e   : > { %3531 = vmatprep.mubr.msk.bf16.mxu0 %vm623_vm0, %v3841_v24  ;;  %3611 = vmatprep.mubr.msk.bf16.mxu1 %vm623_vm0, %v3842_v25 }
  0x85   : > { %3532 = vmatmul.mubr.msk.bf16.vlgmr.msra.gmra.mrb[32].mxu0 %vm623_vm0, %v3843_v26  ;;  %3612 = vmatmul.mubr.msk.bf16.vlgmr.msra.gmra.mrb[8].mxu1 %vm623_vm0, %v3845_v27 }
  0x86   : > { %3548 = vmatpush3.bf16.msra.mxu0 %v3844_v21  ;;  %3628 = vmatpush3.bf16.msra.mxu1 %v3846_v12 }
  0x87   : > { %3535 = vmatprep.mubr.msk.bf16.mxu0 %vm623_vm0, %v3847_v28  ;;  %3615 = vmatprep.mubr.msk.bf16.mxu1 %vm623_vm0, %v3848_v29 }
  0x88   : > { %3549 = vmatprep.subr.bf16.mxu0 %v3854_v30  ;;  %3629 = vmatprep.subr.bf16.mxu1 %v3856_v31 }
  0x8a   : > { %3550 = vmatpush3.bf16.msra.mxu0 %v3854_v30  ;;  %3630 = vmatpush3.bf16.msra.mxu1 %v3856_v31 }
  0x8d   : > { %3536 = vmatmul.mubr.msk.bf16.gmra.mrb[36].mxu0 %vm623_vm0, %v3849_v32  ;;  %3616 = vmatmul.mubr.msk.bf16.gmra.mrb[12].mxu1 %vm623_vm0, %v3850_v33 }
  0x8e   : > { %3539 = vmatprep.mubr.msk.bf16.mxu0 %vm623_vm0, %v3851_v34  ;;  %3619 = vmatprep.mubr.msk.bf16.mxu1 %vm623_vm0, %v3852_v35 }
  0x95   : > { %3540 = vmatmul.mubr.msk.bf16.gmra.mrb[40].mxu0 %vm623_vm0, %v3853_v36  ;;  %3620 = vmatmul.mubr.msk.bf16.gmra.mrb[16].mxu1 %vm623_vm0, %v3855_v37 }
  0x96   : > { %3543 = vmatprep.mubr.msk.bf16.mxu0 %vm623_vm0, %v3857_v38  ;;  %3623 = vmatprep.mubr.msk.bf16.mxu1 %vm623_vm0, %v3858_v39 }
  0x9d   : > { %3544 = vmatmul.mubr.msk.bf16.gmra.mrb[44].mxu0 %vm623_vm0, %v3859_v40  ;;  %3624 = vmatmul.mubr.msk.bf16.gmra.mrb[20].mxu1 %vm623_vm0, %v3860_v41 }
  0x9e   : > { %3551 = vmatprep.mubr.msk.bf16.mxu0 %vm623_vm0, %v3861_v42  ;;  %3631 = vmatprep.mubr.msk.bf16.mxu1 %vm623_vm0, %v3862_v43 }
  0xa5   : > { %3552 = vmatmul.mubr.msk.bf16.vlgmr.msra.gmra.mrb[32].mxu0 %vm623_vm0, %v3863_v44  ;;  %3632 = vmatmul.mubr.msk.bf16.vlgmr.msra.gmra.mrb[8].mxu1 %vm623_vm0, %v3864_v45 }
  0xa6   : > { %3555 = vmatprep.mubr.msk.bf16.mxu0 %vm623_vm0, %v3865_v46  ;;  %3635 = vmatprep.mubr.msk.bf16.mxu1 %vm623_vm0, %v3866_v47 }
  0xad   : > { %3556 = vmatmul.mubr.msk.bf16.gmra.mrb[36].mxu0 %vm623_vm0, %v3867_v48  ;;  %3636 = vmatmul.mubr.msk.bf16.gmra.mrb[12].mxu1 %vm623_vm0, %v3868_v49 }
  0xae   : > { %3559 = vmatprep.mubr.msk.bf16.mxu0 %vm623_vm0, %v3869_v50  ;;  %3639 = vmatprep.mubr.msk.bf16.mxu1 %vm623_vm0, %v3870_v51 }
  0xb5   : > { %3560 = vmatmul.mubr.msk.bf16.gmra.mrb[40].mxu0 %vm623_vm0, %v3871_v52  ;;  %3640 = vmatmul.mubr.msk.bf16.gmra.mrb[16].mxu1 %vm623_vm0, %v3872_v53 }
  0xb6   : > { %3563 = vmatprep.mubr.msk.bf16.mxu0 %vm623_vm0, %v3873_v54  ;;  %3643 = vmatprep.mubr.msk.bf16.mxu1 %vm623_vm0, %v3874_v55 }
  0xbd   : > { %3564 = vmatmul.mubr.msk.bf16.gmra.mrb[44].mxu0 %vm623_vm0, %v3875_v56  ;;  %3644 = vmatmul.mubr.msk.bf16.gmra.mrb[20].mxu1 %vm623_vm0, %v3876_v57 }
 0x108   : > { %v3473_v59 = vpop.f32.mrb[0].mxu0  ;;  %v4305_v61 = vpop.f32.mrb[0].mxu1 }
 0x109   : > { %v691_v60 = vadd.f32 %v3473_v59, %v4302_v58  ;;  %v682_v62 = vpop.f32.mrb[1].mxu0  ;;  %v4308_v0 = vpop.f32.mrb[1].mxu1 }
 0x10a   : > { %v683_v63 = vadd.f32 %v4302_v58, %v682_v62  ;;  %v3474_v1 = vpop.f32.mrb[2].mxu0  ;;  %v4311_v4 = vpop.f32.mrb[2].mxu1 }
 0x10b   : > { %v747_v2 = vmax.f32 %v691_v60, 0.0  ;;  %v694_v3 = vadd.f32 %v3474_v1, %v4302_v58  ;;  %v685_v5 = vpop.f32.mrb[3].mxu0  ;;  %v4319_v8 = vpop.f32.mrb[3].mxu1 }
 0x10c   : > { %v745_v6 = vmax.f32 %v683_v63, 0.0  ;;  %v686_v7 = vadd.f32 %v4302_v58, %v685_v5 }
 0x10d   : > { %v3315_v9 = vpack.c.bf16 %v747_v2, %v747_v2  ;;  %v748_v10 = vmax.f32 %v694_v3, 0.0 }
 0x10e   : > { %v3313_v11 = vpack.c.bf16 %v745_v6, %v745_v6  ;;  %v746_v12 = vmax.f32 %v686_v7, 0.0 }
 0x10f   : > { %828 = vst.msk [vmem:[%s4316_s12 + $0x20] sm:$0xf] %vm825_vm1, %v3315_v9  ;;  %v3316_v13 = vpack.c.bf16 %v748_v10, %v748_v10 }
 0x110   : > { %826 = vst.msk [vmem:[%s4316_s12] sm:$0xf] %vm825_vm1, %v3313_v11  ;;  %v3314_v14 = vpack.c.bf16 %v746_v12, %v746_v12  ;;  %v3477_v15 = vpop.f32.mrb[4].mxu0  ;;  %v4328_v17 = vpop.f32.mrb[4].mxu1 }
 0x111   : > { %829 = vst.msk [vmem:[%s4316_s12 + $0x24] sm:$0xf] %vm825_vm1, %v3316_v13  ;;  %v707_v16 = vadd.f32 %v3477_v15, %v4302_v58  ;;  %v698_v18 = vpop.f32.mrb[5].mxu0  ;;  %v4333_v20 = vpop.f32.mrb[5].mxu1 }
 0x112   : > { %827 = vst.msk [vmem:[%s4316_s12 + $0x4] sm:$0xf] %vm825_vm1, %v3314_v14  ;;  %v699_v19 = vadd.f32 %v4302_v58, %v698_v18  ;;  %v3478_v21 = vpop.f32.mrb[6].mxu0  ;;  %v4336_v24 = vpop.f32.mrb[6].mxu1 }
 0x113   : > { %v751_v22 = vmax.f32 %v707_v16, 0.0  ;;  %v710_v23 = vadd.f32 %v3478_v21, %v4302_v58  ;;  %v701_v25 = vpop.f32.mrb[7].mxu0  ;;  %v4339_v28 = vpop.f32.mrb[7].mxu1 }
 0x114   : > { %v749_v26 = vmax.f32 %v699_v19, 0.0  ;;  %v702_v27 = vadd.f32 %v4302_v58, %v701_v25 }
 0x115   : > { %v3319_v29 = vpack.c.bf16 %v751_v22, %v751_v22  ;;  %v752_v30 = vmax.f32 %v710_v23, 0.0 }
 0x116   : > { %v3317_v31 = vpack.c.bf16 %v749_v26, %v749_v26  ;;  %v750_v32 = vmax.f32 %v702_v27, 0.0 }
 0x117   : > { %832 = vst.msk [vmem:[%s4316_s12 + $0x60] sm:$0xf] %vm825_vm1, %v3319_v29  ;;  %v3320_v33 = vpack.c.bf16 %v752_v30, %v752_v30 }
 0x118   : > { %830 = vst.msk [vmem:[%s4316_s12 + $0x40] sm:$0xf] %vm825_vm1, %v3317_v31  ;;  %v3318_v34 = vpack.c.bf16 %v750_v32, %v750_v32  ;;  %v3481_v35 = vpop.f32.mrb[8].mxu0 }
 0x119   : > { %833 = vst.msk [vmem:[%s4316_s12 + $0x64] sm:$0xf] %vm825_vm1, %v3320_v33  ;;  %v723_v36 = vadd.f32 %v3481_v35, %v4302_v58  ;;  %v714_v37 = vpop.f32.mrb[9].mxu0 }
 0x11a   : > { %831 = vst.msk [vmem:[%s4316_s12 + $0x44] sm:$0xf] %vm825_vm1, %v3318_v34  ;;  %v715_v38 = vadd.f32 %v4302_v58, %v714_v37  ;;  %v3482_v39 = vpop.f32.mrb[10].mxu0 }
 0x11b   : > { %v755_v40 = vmax.f32 %v723_v36, 0.0  ;;  %v726_v41 = vadd.f32 %v3482_v39, %v4302_v58  ;;  %v717_v42 = vpop.f32.mrb[11].mxu0 }
 0x11c   : > { %v753_v43 = vmax.f32 %v715_v38, 0.0  ;;  %v718_v44 = vadd.f32 %v4302_v58, %v717_v42 }
 0x11d   : > { %v3323_v45 = vpack.c.bf16 %v755_v40, %v755_v40  ;;  %v756_v46 = vmax.f32 %v726_v41, 0.0 }
 0x11e   : > { %v3321_v47 = vpack.c.bf16 %v753_v43, %v753_v43  ;;  %v754_v48 = vmax.f32 %v718_v44, 0.0 }
 0x11f   : > { %836 = vst.msk [vmem:[%s4316_s12 + $0xa0] sm:$0xf] %vm825_vm1, %v3323_v45  ;;  %v3324_v49 = vpack.c.bf16 %v756_v46, %v756_v46 }
 0x120   : > { %834 = vst.msk [vmem:[%s4316_s12 + $0x80] sm:$0xf] %vm825_vm1, %v3321_v47  ;;  %v3322_v50 = vpack.c.bf16 %v754_v48, %v754_v48  ;;  %v3485_v51 = vpop.f32.mrb[12].mxu0 }
 0x121   : > { %837 = vst.msk [vmem:[%s4316_s12 + $0xa4] sm:$0xf] %vm825_vm1, %v3324_v49  ;;  %v739_v52 = vadd.f32 %v3485_v51, %v4302_v58  ;;  %v730_v53 = vpop.f32.mrb[13].mxu0 }
 0x122   : > { %835 = vst.msk [vmem:[%s4316_s12 + $0x84] sm:$0xf] %vm825_vm1, %v3322_v50  ;;  %v731_v54 = vadd.f32 %v4302_v58, %v730_v53  ;;  %v3486_v55 = vpop.f32.mrb[14].mxu0 }
 0x123   : > { %v759_v56 = vmax.f32 %v739_v52, 0.0  ;;  %v742_v57 = vadd.f32 %v3486_v55, %v4302_v58  ;;  %v733_v59 = vpop.f32.mrb[15].mxu0 }
 0x124   : > { %v757_v60 = vmax.f32 %v731_v54, 0.0  ;;  %v734_v62 = vadd.f32 %v4302_v58, %v733_v59 }
 0x125   : > { %v3327_v63 = vpack.c.bf16 %v759_v56, %v759_v56  ;;  %v760_v1 = vmax.f32 %v742_v57, 0.0 }
 0x126   : > { %v3325_v2 = vpack.c.bf16 %v757_v60, %v757_v60  ;;  %v758_v3 = vmax.f32 %v734_v62, 0.0 }
 0x127   : > { %840 = vst.msk [vmem:[%s4316_s12 + $0xe0] sm:$0xf] %vm825_vm1, %v3327_v63  ;;  %v3328_v5 = vpack.c.bf16 %v760_v1, %v760_v1 }
 0x128   : > { %838 = vst.msk [vmem:[%s4316_s12 + $0xc0] sm:$0xf] %vm825_vm1, %v3325_v2  ;;  %v3326_v6 = vpack.c.bf16 %v758_v3, %v758_v3 }
 0x129   : > { %841 = vst.msk [vmem:[%s4316_s12 + $0xe4] sm:$0xf] %vm825_vm1, %v3328_v5 }
 0x12a   : > { %839 = vst.msk [vmem:[%s4316_s12 + $0xc4] sm:$0xf] %vm825_vm1, %v3326_v6 }
 0x138   : > { %v3501_v7 = vpop.f32.mrb[24].mxu0 }
 0x139   : > { %v1209_v9 = vadd.f32 %v4305_v61, %v3501_v7  ;;  %v1027_v10 = vpop.f32.mrb[25].mxu0 }
 0x13a   : > { %v1201_v11 = vadd.f32 %v4308_v0, %v1027_v10  ;;  %v3502_v12 = vpop.f32.mrb[26].mxu0 }
 0x13b   : > { %v1241_v13 = vadd.f32 %v4302_v58, %v1209_v9  ;;  %v1212_v14 = vadd.f32 %v4311_v4, %v3502_v12  ;;  %v1030_v15 = vpop.f32.mrb[27].mxu0 }
 0x13c   : > { %v1239_v16 = vadd.f32 %v4302_v58, %v1201_v11  ;;  %v1204_v18 = vadd.f32 %v4319_v8, %v1030_v15 }
 0x13d   : > { %v1257_v19 = vmax.f32 %v1241_v13, 0.0  ;;  %v1242_v21 = vadd.f32 %v4302_v58, %v1212_v14 }
 0x13e   : > { %v1255_v61 = vmax.f32 %v1239_v16, 0.0  ;;  %v1240_v22 = vadd.f32 %v4302_v58, %v1204_v18 }
 0x13f   : > { %v3339_v0 = vpack.c.bf16 %v1257_v19, %v1257_v19  ;;  %v1258_v23 = vmax.f32 %v1242_v21, 0.0 }
 0x140   : > { %v3337_v25 = vpack.c.bf16 %v1255_v61, %v1255_v61  ;;  %v1256_v26 = vmax.f32 %v1240_v22, 0.0  ;;  %v3505_v27 = vpop.f32.mrb[28].mxu0 }
 0x141   : > { %3048 = vst.msk [vmem:[%s4316_s12 + $0xa8] sm:$0xf] %vm825_vm1, %v3339_v0  ;;  %v3340_v4 = vpack.c.bf16 %v1258_v23, %v1258_v23  ;;  %v1225_v29 = vadd.f32 %v4328_v17, %v3505_v27  ;;  %v1043_v30 = vpop.f32.mrb[29].mxu0 }
 0x142   : > { %3046 = vst.msk [vmem:[%s4316_s12 + $0x88] sm:$0xf] %vm825_vm1, %v3337_v25  ;;  %v3338_v8 = vpack.c.bf16 %v1256_v26, %v1256_v26  ;;  %v1217_v31 = vadd.f32 %v4333_v20, %v1043_v30  ;;  %v3506_v32 = vpop.f32.mrb[30].mxu0 }
 0x143   : > { %3049 = vst.msk [vmem:[%s4316_s12 + $0xac] sm:$0xf] %vm825_vm1, %v3340_v4  ;;  %v1245_v33 = vadd.f32 %v4302_v58, %v1225_v29  ;;  %v1228_v34 = vadd.f32 %v4336_v24, %v3506_v32  ;;  %v1046_v35 = vpop.f32.mrb[31].mxu0 }
 0x144   : > { %3047 = vst.msk [vmem:[%s4316_s12 + $0x8c] sm:$0xf] %vm825_vm1, %v3338_v8  ;;  %v1243_v17 = vadd.f32 %v4302_v58, %v1217_v31  ;;  %v1220_v36 = vadd.f32 %v4339_v28, %v1046_v35 }
 0x145   : > { %v1261_v37 = vmax.f32 %v1245_v33, 0.0  ;;  %v1246_v38 = vadd.f32 %v4302_v58, %v1228_v34 }
 0x146   : > { %v1259_v20 = vmax.f32 %v1243_v17, 0.0  ;;  %v1244_v39 = vadd.f32 %v4302_v58, %v1220_v36 }
 0x147   : > { %v3343_v40 = vpack.c.bf16 %v1261_v37, %v1261_v37  ;;  %v1262_v41 = vmax.f32 %v1246_v38, 0.0 }
 0x148   : > { %v3341_v42 = vpack.c.bf16 %v1259_v20, %v1259_v20  ;;  %v1260_v24 = vmax.f32 %v1244_v39, 0.0  ;;  %v3513_v43 = vpop.f32.mrb[16].mxu0 }
 0x149   : > { %3052 = vst.msk [vmem:[%s4316_s12 + $0xe8] sm:$0xf] %vm825_vm1, %v3343_v40  ;;  %v3344_v44 = vpack.c.bf16 %v1262_v41, %v1262_v41  ;;  %v1233_v45 = vadd.f32 %v3513_v43, %v4302_v58  ;;  %v1168_v46 = vpop.f32.mrb[17].mxu0 }
 0x14a   : > { %3050 = vst.msk [vmem:[%s4316_s12 + $0xc8] sm:$0xf] %vm825_vm1, %v3341_v42  ;;  %v3342_v28 = vpack.c.bf16 %v1260_v24, %v1260_v24  ;;  %v1231_v47 = vadd.f32 %v4302_v58, %v1168_v46  ;;  %v3514_v48 = vpop.f32.mrb[18].mxu0 }
 0x14b   : > { %3053 = vst.msk [vmem:[%s4316_s12 + $0xec] sm:$0xf] %vm825_vm1, %v3344_v44  ;;  %v1249_v49 = vmax.f32 %v1233_v45, 0.0  ;;  %v1234_v50 = vadd.f32 %v3514_v48, %v4302_v58  ;;  %v1171_v51 = vpop.f32.mrb[19].mxu0 }
 0x14c   : > { %3051 = vst.msk [vmem:[%s4316_s12 + $0xcc] sm:$0xf] %vm825_vm1, %v3342_v28  ;;  %v1247_v52 = vmax.f32 %v1231_v47, 0.0  ;;  %v1232_v53 = vadd.f32 %v4302_v58, %v1171_v51 }
 0x14d   : > { %v3331_v54 = vpack.c.bf16 %v1249_v49, %v1249_v49  ;;  %v1250_v55 = vmax.f32 %v1234_v50, 0.0 }
 0x14e   : > { %v3329_v56 = vpack.c.bf16 %v1247_v52, %v1247_v52  ;;  %v1248_v57 = vmax.f32 %v1232_v53, 0.0 }
 0x14f   : > { %3040 = vst.msk [vmem:[%s4316_s12 + $0x28] sm:$0xf] %vm825_vm1, %v3331_v54  ;;  %v3332_v59 = vpack.c.bf16 %v1250_v55, %v1250_v55 }
 0x150   : > { %3038 = vst.msk [vmem:[%s4316_s12 + $0x8] sm:$0xf] %vm825_vm1, %v3329_v56  ;;  %v3330_v60 = vpack.c.bf16 %v1248_v57, %v1248_v57  ;;  %v3517_v62 = vpop.f32.mrb[20].mxu0 }
 0x151   : > { %3041 = vst.msk [vmem:[%s4316_s12 + $0x2c] sm:$0xf] %vm825_vm1, %v3332_v59  ;;  %v1237_v63 = vadd.f32 %v3517_v62, %v4302_v58  ;;  %v1184_v1 = vpop.f32.mrb[21].mxu0 }
 0x152   : > { %3039 = vst.msk [vmem:[%s4316_s12 + $0xc] sm:$0xf] %vm825_vm1, %v3330_v60  ;;  %v1235_v2 = vadd.f32 %v4302_v58, %v1184_v1  ;;  %v3518_v3 = vpop.f32.mrb[22].mxu0 }
 0x153   : > { %v1253_v5 = vmax.f32 %v1237_v63, 0.0  ;;  %v1238_v6 = vadd.f32 %v3518_v3, %v4302_v58  ;;  %v1187_v7 = vpop.f32.mrb[23].mxu0 }
 0x154   : > { %v1251_v9 = vmax.f32 %v1235_v2, 0.0  ;;  %v1236_v10 = vadd.f32 %v4302_v58, %v1187_v7 }
 0x155   : > { %v3335_v11 = vpack.c.bf16 %v1253_v5, %v1253_v5  ;;  %v1254_v12 = vmax.f32 %v1238_v6, 0.0 }
 0x156   : > { %v3333_v13 = vpack.c.bf16 %v1251_v9, %v1251_v9  ;;  %v1252_v14 = vmax.f32 %v1236_v10, 0.0 }
 0x157   : > { %3044 = vst.msk [vmem:[%s4316_s12 + $0x68] sm:$0xf] %vm825_vm1, %v3335_v11  ;;  %v3336_v15 = vpack.c.bf16 %v1254_v12, %v1254_v12 }
 0x158   : > { %3042 = vst.msk [vmem:[%s4316_s12 + $0x48] sm:$0xf] %vm825_vm1, %v3333_v13  ;;  %v3334_v16 = vpack.c.bf16 %v1252_v14, %v1252_v14 }
 0x159   : > { %3045 = vst.msk [vmem:[%s4316_s12 + $0x6c] sm:$0xf] %vm825_vm1, %v3336_v15 }
 0x15a   : > { %3043 = vst.msk [vmem:[%s4316_s12 + $0x4c] sm:$0xf] %vm825_vm1, %v3334_v16 }
 0x178   : > { %v3553_v18 = vpop.f32.mrb[32].mxu0  ;;  %v3633_v21 = vpop.f32.mrb[8].mxu1 }
 0x179   : > { %v1735_v19 = vadd.f32 %v3553_v18, %v4302_v58  ;;  %v1670_v61 = vpop.f32.mrb[33].mxu0  ;;  %v2656_v22 = vadd.f32 %v3633_v21, %v4302_v58  ;;  %v2575_v23 = vpop.f32.mrb[9].mxu1 }
 0x17a   : > { %v1733_v0 = vadd.f32 %v4302_v58, %v1670_v61  ;;  %v3554_v25 = vpop.f32.mrb[34].mxu0  ;;  %v2654_v27 = vadd.f32 %v4302_v58, %v2575_v23  ;;  %v3634_v29 = vpop.f32.mrb[10].mxu1 }
 0x17b   : > { %v1751_v26 = vmax.f32 %v1735_v19, 0.0  ;;  %v1736_v4 = vadd.f32 %v3554_v25, %v4302_v58  ;;  %v1673_v30 = vpop.f32.mrb[35].mxu0  ;;  %v2672_v8 = vmax.f32 %v2656_v22, 0.0  ;;  %v2657_v32 = vadd.f32 %v3634_v29, %v4302_v58  ;;  %v2578_v34 = vpop.f32.mrb[11].mxu1 }
 0x17c   : > { %v1749_v31 = vmax.f32 %v1733_v0, 0.0  ;;  %v1734_v33 = vadd.f32 %v4302_v58, %v1673_v30  ;;  %v2670_v17 = vmax.f32 %v2654_v27, 0.0  ;;  %v2655_v37 = vadd.f32 %v4302_v58, %v2578_v34 }
 0x17d   : > { %v3347_v35 = vpack.c.bf16 %v1751_v26, %v1751_v26  ;;  %v1752_v36 = vmax.f32 %v1736_v4, 0.0  ;;  %v3363_v38 = vpack.c.bf16 %v2672_v8, %v2672_v8  ;;  %v2673_v39 = vmax.f32 %v2657_v32, 0.0 }
 0x17e   : > { %v3345_v20 = vpack.c.bf16 %v1749_v31, %v1749_v31  ;;  %v1750_v40 = vmax.f32 %v1734_v33, 0.0  ;;  %v3361_v41 = vpack.c.bf16 %v2670_v17, %v2670_v17  ;;  %v2671_v24 = vmax.f32 %v2655_v37, 0.0 }
 0x17f   : > { %3132 = vst.msk [vmem:[%s4316_s12 + $0x30] sm:$0xf] %vm825_vm1, %v3347_v35  ;;  %v3348_v42 = vpack.c.bf16 %v1752_v36, %v1752_v36  ;;  %3296 = vst.msk [vmem:[%s4316_s12 + $0x38] sm:$0xf] %vm825_vm1, %v3363_v38  ;;  %v3364_v43 = vpack.c.bf16 %v2673_v39, %v2673_v39 }
 0x180   : > { %3130 = vst.msk [vmem:[%s4316_s12 + $0x10] sm:$0xf] %vm825_vm1, %v3345_v20  ;;  %v3346_v44 = vpack.c.bf16 %v1750_v40, %v1750_v40  ;;  %v3557_v45 = vpop.f32.mrb[36].mxu0  ;;  %3294 = vst.msk [vmem:[%s4316_s12 + $0x18] sm:$0xf] %vm825_vm1, %v3361_v41  ;;  %v3362_v46 = vpack.c.bf16 %v2671_v24, %v2671_v24  ;;  %v3637_v47 = vpop.f32.mrb[12].mxu1 }
 0x181   : > { %3133 = vst.msk [vmem:[%s4316_s12 + $0x34] sm:$0xf] %vm825_vm1, %v3348_v42  ;;  %v1739_v28 = vadd.f32 %v3557_v45, %v4302_v58  ;;  %v1686_v48 = vpop.f32.mrb[37].mxu0  ;;  %3297 = vst.msk [vmem:[%s4316_s12 + $0x3c] sm:$0xf] %vm825_vm1, %v3364_v43  ;;  %v2660_v49 = vadd.f32 %v3637_v47, %v4302_v58  ;;  %v2591_v51 = vpop.f32.mrb[13].mxu1 }
 0x182   : > { %3131 = vst.msk [vmem:[%s4316_s12 + $0x14] sm:$0xf] %vm825_vm1, %v3346_v44  ;;  %v1737_v50 = vadd.f32 %v4302_v58, %v1686_v48  ;;  %v3558_v52 = vpop.f32.mrb[38].mxu0  ;;  %3295 = vst.msk [vmem:[%s4316_s12 + $0x1c] sm:$0xf] %vm825_vm1, %v3362_v46  ;;  %v2658_v54 = vadd.f32 %v4302_v58, %v2591_v51  ;;  %v3638_v56 = vpop.f32.mrb[14].mxu1 }
 0x183   : > { %v1755_v53 = vmax.f32 %v1739_v28, 0.0  ;;  %v1740_v55 = vadd.f32 %v3558_v52, %v4302_v58  ;;  %v1689_v57 = vpop.f32.mrb[39].mxu0  ;;  %v2676_v59 = vmax.f32 %v2660_v49, 0.0  ;;  %v2661_v62 = vadd.f32 %v3638_v56, %v4302_v58  ;;  %v2594_v1 = vpop.f32.mrb[15].mxu1 }
 0x184   : > { %v1753_v60 = vmax.f32 %v1737_v50, 0.0  ;;  %v1738_v63 = vadd.f32 %v4302_v58, %v1689_v57  ;;  %v2674_v3 = vmax.f32 %v2658_v54, 0.0  ;;  %v2659_v6 = vadd.f32 %v4302_v58, %v2594_v1 }
 0x185   : > { %v3351_v2 = vpack.c.bf16 %v1755_v53, %v1755_v53  ;;  %v1756_v5 = vmax.f32 %v1740_v55, 0.0  ;;  %v3367_v7 = vpack.c.bf16 %v2676_v59, %v2676_v59  ;;  %v2677_v10 = vmax.f32 %v2661_v62, 0.0 }
 0x186   : > { %v3349_v9 = vpack.c.bf16 %v1753_v60, %v1753_v60  ;;  %v1754_v11 = vmax.f32 %v1738_v63, 0.0  ;;  %v3365_v12 = vpack.c.bf16 %v2674_v3, %v2674_v3  ;;  %v2675_v14 = vmax.f32 %v2659_v6, 0.0 }
 0x187   : > { %3136 = vst.msk [vmem:[%s4316_s12 + $0x70] sm:$0xf] %vm825_vm1, %v3351_v2  ;;  %v3352_v13 = vpack.c.bf16 %v1756_v5, %v1756_v5  ;;  %3300 = vst.msk [vmem:[%s4316_s12 + $0x78] sm:$0xf] %vm825_vm1, %v3367_v7  ;;  %v3368_v15 = vpack.c.bf16 %v2677_v10, %v2677_v10 }
 0x188   : > { %3134 = vst.msk [vmem:[%s4316_s12 + $0x50] sm:$0xf] %vm825_vm1, %v3349_v9  ;;  %v3350_v16 = vpack.c.bf16 %v1754_v11, %v1754_v11  ;;  %v3561_v18 = vpop.f32.mrb[40].mxu0  ;;  %3298 = vst.msk [vmem:[%s4316_s12 + $0x58] sm:$0xf] %vm825_vm1, %v3365_v12  ;;  %v3366_v19 = vpack.c.bf16 %v2675_v14, %v2675_v14  ;;  %v3641_v61 = vpop.f32.mrb[16].mxu1 }
 0x189   : > { %3137 = vst.msk [vmem:[%s4316_s12 + $0x74] sm:$0xf] %vm825_vm1, %v3352_v13  ;;  %v1743_v21 = vadd.f32 %v3561_v18, %v4302_v58  ;;  %v1702_v22 = vpop.f32.mrb[41].mxu0  ;;  %3301 = vst.msk [vmem:[%s4316_s12 + $0x7c] sm:$0xf] %vm825_vm1, %v3368_v15  ;;  %v2664_v0 = vadd.f32 %v3641_v61, %v4302_v58  ;;  %v2607_v25 = vpop.f32.mrb[17].mxu1 }
 0x18a   : > { %3135 = vst.msk [vmem:[%s4316_s12 + $0x54] sm:$0xf] %vm825_vm1, %v3350_v16  ;;  %v1741_v23 = vadd.f32 %v4302_v58, %v1702_v22  ;;  %v3562_v26 = vpop.f32.mrb[42].mxu0  ;;  %3299 = vst.msk [vmem:[%s4316_s12 + $0x5c] sm:$0xf] %vm825_vm1, %v3366_v19  ;;  %v2662_v4 = vadd.f32 %v4302_v58, %v2607_v25  ;;  %v3642_v30 = vpop.f32.mrb[18].mxu1 }
 0x18b   : > { %v1759_v27 = vmax.f32 %v1743_v21, 0.0  ;;  %v1744_v29 = vadd.f32 %v3562_v26, %v4302_v58  ;;  %v1705_v8 = vpop.f32.mrb[43].mxu0  ;;  %v2680_v31 = vmax.f32 %v2664_v0, 0.0  ;;  %v2665_v33 = vadd.f32 %v3642_v30, %v4302_v58  ;;  %v2610_v35 = vpop.f32.mrb[19].mxu1 }
 0x18c   : > { %v1757_v32 = vmax.f32 %v1741_v23, 0.0  ;;  %v1742_v34 = vadd.f32 %v4302_v58, %v1705_v8  ;;  %v2678_v36 = vmax.f32 %v2662_v4, 0.0  ;;  %v2663_v38 = vadd.f32 %v4302_v58, %v2610_v35 }
 0x18d   : > { %v3355_v17 = vpack.c.bf16 %v1759_v27, %v1759_v27  ;;  %v1760_v37 = vmax.f32 %v1744_v29, 0.0  ;;  %v3371_v20 = vpack.c.bf16 %v2680_v31, %v2680_v31  ;;  %v2681_v40 = vmax.f32 %v2665_v33, 0.0 }
 0x18e   : > { %v3353_v39 = vpack.c.bf16 %v1757_v32, %v1757_v32  ;;  %v1758_v41 = vmax.f32 %v1742_v34, 0.0  ;;  %v3369_v42 = vpack.c.bf16 %v2678_v36, %v2678_v36  ;;  %v2679_v43 = vmax.f32 %v2663_v38, 0.0 }
 0x18f   : > { %3140 = vst.msk [vmem:[%s4316_s12 + $0xb0] sm:$0xf] %vm825_vm1, %v3355_v17  ;;  %v3356_v24 = vpack.c.bf16 %v1760_v37, %v1760_v37  ;;  %3304 = vst.msk [vmem:[%s4316_s12 + $0xb8] sm:$0xf] %vm825_vm1, %v3371_v20  ;;  %v3372_v44 = vpack.c.bf16 %v2681_v40, %v2681_v40 }
 0x190   : > { %3138 = vst.msk [vmem:[%s4316_s12 + $0x90] sm:$0xf] %vm825_vm1, %v3353_v39  ;;  %v3354_v45 = vpack.c.bf16 %v1758_v41, %v1758_v41  ;;  %v3565_v46 = vpop.f32.mrb[44].mxu0  ;;  %3302 = vst.msk [vmem:[%s4316_s12 + $0x98] sm:$0xf] %vm825_vm1, %v3369_v42  ;;  %v3370_v28 = vpack.c.bf16 %v2679_v43, %v2679_v43  ;;  %v3645_v48 = vpop.f32.mrb[20].mxu1 }
 0x191   : > { %3141 = vst.msk [vmem:[%s4316_s12 + $0xb4] sm:$0xf] %vm825_vm1, %v3356_v24  ;;  %v1747_v47 = vadd.f32 %v3565_v46, %v4302_v58  ;;  %v1718_v49 = vpop.f32.mrb[45].mxu0  ;;  %3305 = vst.msk [vmem:[%s4316_s12 + $0xbc] sm:$0xf] %vm825_vm1, %v3372_v44  ;;  %v2668_v50 = vadd.f32 %v3645_v48, %v4302_v58  ;;  %v2623_v52 = vpop.f32.mrb[21].mxu1 }
 0x192   : > { %3139 = vst.msk [vmem:[%s4316_s12 + $0x94] sm:$0xf] %vm825_vm1, %v3354_v45  ;;  %v1745_v51 = vadd.f32 %v4302_v58, %v1718_v49  ;;  %v3566_v53 = vpop.f32.mrb[46].mxu0  ;;  %3303 = vst.msk [vmem:[%s4316_s12 + $0x9c] sm:$0xf] %vm825_vm1, %v3370_v28  ;;  %v2666_v55 = vadd.f32 %v4302_v58, %v2623_v52  ;;  %v3646_v57 = vpop.f32.mrb[22].mxu1 }
 0x193   : > { %v1763_v54 = vmax.f32 %v1747_v47, 0.0  ;;  %v1748_v56 = vadd.f32 %v3566_v53, %v4302_v58  ;;  %v1721_v59 = vpop.f32.mrb[47].mxu0  ;;  %v2684_v60 = vmax.f32 %v2668_v50, 0.0  ;;  %v2669_v63 = vadd.f32 %v3646_v57, %v4302_v58  ;;  %v2626_v2 = vpop.f32.mrb[23].mxu1 }
 0x194   : > { %v1761_v62 = vmax.f32 %v1745_v51, 0.0  ;;  %v1746_v1 = vadd.f32 %v4302_v58, %v1721_v59  ;;  %v2682_v5 = vmax.f32 %v2666_v55, 0.0  ;;  %v2667_v7 = vadd.f32 %v4302_v58, %v2626_v2 }
 0x195   : > { %v3359_v3 = vpack.c.bf16 %v1763_v54, %v1763_v54  ;;  %v1764_v6 = vmax.f32 %v1748_v56, 0.0  ;;  %v3375_v9 = vpack.c.bf16 %v2684_v60, %v2684_v60  ;;  %v2685_v11 = vmax.f32 %v2669_v63, 0.0 }
 0x196   : > { %v3357_v10 = vpack.c.bf16 %v1761_v62, %v1761_v62  ;;  %v1762_v12 = vmax.f32 %v1746_v1, 0.0  ;;  %v3373_v13 = vpack.c.bf16 %v2682_v5, %v2682_v5  ;;  %v2683_v15 = vmax.f32 %v2667_v7, 0.0 }
 0x197   : > { %3144 = vst.msk [vmem:[%s4316_s12 + $0xf0] sm:$0xf] %vm825_vm1, %v3359_v3  ;;  %v3360_v14 = vpack.c.bf16 %v1764_v6, %v1764_v6  ;;  %3308 = vst.msk [vmem:[%s4316_s12 + $0xf8] sm:$0xf] %vm825_vm1, %v3375_v9  ;;  %v3376_v16 = vpack.c.bf16 %v2685_v11, %v2685_v11 }
 0x198   : > { %3142 = vst.msk [vmem:[%s4316_s12 + $0xd0] sm:$0xf] %vm825_vm1, %v3357_v10  ;;  %v3358_v18 = vpack.c.bf16 %v1762_v12, %v1762_v12  ;;  %3306 = vst.msk [vmem:[%s4316_s12 + $0xd8] sm:$0xf] %vm825_vm1, %v3373_v13  ;;  %v3374_v58 = vpack.c.bf16 %v2683_v15, %v2683_v15 }
 0x199   : > { %3145 = vst.msk [vmem:[%s4316_s12 + $0xf4] sm:$0xf] %vm825_vm1, %v3360_v14  ;;  %3309 = vst.msk [vmem:[%s4316_s12 + $0xfc] sm:$0xf] %vm825_vm1, %v3376_v16 }
 0x19a   : > { %3143 = vst.msk [vmem:[%s4316_s12 + $0xd4] sm:$0xf] %vm825_vm1, %v3358_v18  ;;  %3307 = vst.msk [vmem:[%s4316_s12 + $0xdc] sm:$0xf] %vm825_vm1, %v3374_v58 }
 0x19b PF: > { %s13_s18 = sadd.s32 1, %s3931_s18   ;;  %s4550_s12 = smov %s3911_s13 }
 0x19c   : > { %p10_p12 = scmp.ge.s32.totalorder %s13_s18, 6   ;;  %s4551_s13 = smov %s4004_s25 }
 0x19d   : > { %s4552_s14 = smov %s3923_s16  ;;  %s4553_s15 = smov %s3927_s17 }
 0x19e   : > { %s4554_s16 = smov %s4557_s19  ;;  %s4555_s17 = smov %s4561_s20 }
 0x19f   :  { %12 = sbr.rel (!%p10_p12) target bundleno = 4 (0x4), region = 128 }

// kernel: celeba_decoder.9
= control target key start
LH: loop header
LB: loop body
LE: loop exit
PB: predicated region body
PF: predicated region fallthrough
CT: control target
= control target key end

     0   :  { %s7116_s12 = smov 0   ;;  %s7118_s13 = smov 0   ;;  %s8255_s0 = inlined_call_operand.vmem [shape: bf16[2,4,32,32,16], index: 0, kind: input, shape index: {}]   ;;  %s8256_s1 = inlined_call_operand.vmem [shape: bf16[9,16,3], index: 1, kind: input, shape index: {}]   ;;  %s8257_s2 = inlined_call_operand.vmem [shape: f32[1,3], index: 2, kind: input, shape index: {}]   ;;  %s8258_s3 = inlined_call_operand.vmem [shape: f32[2,32,4,32,3], index: 3, kind: output, shape index: {}]  }
   0x1   :  { %s7120_s14 = smov 0   ;;  %s7122_s15 = smov 0  }
   0x2   :  { %s7124_s16 = smov 0   ;;  %s7126_s17 = smov 0  }
   0x3   :  { %s7128_s18 = smov 0  }
   0x4 LB: > { %s25_s19 = sadd.s32 1, %s7086_s16  ;;  %s28_s20 = sadd.s32 1, %s7090_s17  ;;  %s7094_s18 = sphi %s7128_s18, %s13_s18   ;;  %s7090_s17 = sphi %s7126_s17, %s8265_s17   ;;  %s7086_s16 = sphi %s7124_s16, %s8264_s16   ;;  %s7082_s15 = sphi %s7122_s15, %s8263_s15   ;;  %s7078_s14 = sphi %s7120_s14, %s8262_s14   ;;  %s7074_s13 = sphi %s7118_s13, %s8261_s13   ;;  %s7070_s12 = sphi %s7116_s12, %s8260_s12  }
   0x5   : > { %p26_p0 = scmp.ge.s32.totalorder %s25_s19, 4  ;;  %p48_p1 = scmp.ne.s32.totalorder %s7074_s13, %s7070_s12 }
   0x6   : > { %p49_p2 = scmp.eq.s32.totalorder %s7094_s18, 0  ;;  %s41_s24 = sadd.s32 1, %s7074_s13 }
   0x7   : > { %s8267_s19 = smov (%p26_p0, %s25_s19), 0  ;;  %s8269_s20 = smov (!%p26_p0, %s28_s20), %s7090_s17 }
   0x8   : > { %p50_p3 = por %p49_p2, %p48_p1  ;;  %p30_p4 = scmp.ge.s32.totalorder %s8269_s20, 2 }
   0x9   : > { %s37_s21 = ssub.s32 %s7086_s16, %s8267_s19  ;;  %p4983_p6 = scmp.ge.s32.totalorder %s7094_s18, 8 }
   0xa   : > { %s8271_s20 = smov (%p30_p4, %s8269_s20), 0 }
   0xb   : > { %s36_s22 = ssub.s32 %s7090_s17, %s8271_s20  ;;  %169 = sbr.rel (%p4983_p6) target bundleno = 57 (0x39), region = 24 }
   0xc   : > { %s38_s23 = sor.u32 %s37_s21, %s36_s22 }
   0xd   : > { %p39_p5 = scmp.eq.s32.totalorder %s38_s23, 0 }
   0xf   : > { %s7167_s25 = scalar_select %p39_p5, %s7074_s13, %s41_s24  }
  0x12   : > { %172 = sbr.rel (!%p50_p3) target bundleno = 57 (0x39), region = 28  ;;  %s174_s26 = sand.u32 (%p50_p3), 1, %s7074_s13  }
  0x13   : > { %s5695_s27 = sshll.u32 (%p50_p3), %s7086_s16, 5  ;;  %s4984_s28 = sshll.u32 (%p50_p3), %s174_s26, 9 }
  0x14   : > { %s4987_s29 = sshll.u32 (%p50_p3), %s7090_s17, 9  ;;  %s7181_s8 = scalar_lea.vmem (%p50_p3), [#allocation2], %s4984_s28 }
  0x15   : > { %s180_s30 = sadd.s32 (%p50_p3), %s5695_s27, %s4987_s29 }
  0x16   : > { %s4988_s4 = sshll.u32 (%p50_p3), %s180_s30, 2 }
  0x17   : > { %s7176_s7 = scalar_lea.vmem (%p50_p3), %s8255_s0, %s4988_s4 }
  0x18   : > { %v198_v0 = vld [vmem:[%s7176_s7] sm:$0xff] (%p50_p3)   ;;  %v202_v1 = vld [vmem:[%s7176_s7 + $0x8] sm:$0xff] (%p50_p3)   ;;  %v206_v2 = vld [vmem:[%s7176_s7 + $0x10] sm:$0xff] (%p50_p3)  }
  0x19   : > { %199 = vst [vmem:[%s7181_s8] sm:$0xff] %v198_v0   ;;  %203 = vst [vmem:[%s7181_s8 + $0x8] sm:$0xff] %v202_v1   ;;  %v210_v3 = vld [vmem:[%s7176_s7 + $0x18] sm:$0xff]   ;;  %v214_v4 = vld [vmem:[%s7176_s7 + $0x20] sm:$0xff]  }
  0x1a   : > { %207 = vst [vmem:[%s7181_s8 + $0x10] sm:$0xff] %v206_v2   ;;  %v218_v5 = vld [vmem:[%s7176_s7 + $0x28] sm:$0xff]   ;;  %211 = vst [vmem:[%s7181_s8 + $0x18] sm:$0xff] %v210_v3   ;;  %v222_v6 = vld [vmem:[%s7176_s7 + $0x30] sm:$0xff]  }
  0x1b   : > { %215 = vst [vmem:[%s7181_s8 + $0x20] sm:$0xff] %v214_v4   ;;  %219 = vst [vmem:[%s7181_s8 + $0x28] sm:$0xff] %v218_v5   ;;  %v226_v7 = vld [vmem:[%s7176_s7 + $0x38] sm:$0xff]   ;;  %v230_v8 = vld [vmem:[%s7176_s7 + $0x40] sm:$0xff]  }
  0x1c   : > { %223 = vst [vmem:[%s7181_s8 + $0x30] sm:$0xff] %v222_v6   ;;  %227 = vst [vmem:[%s7181_s8 + $0x38] sm:$0xff] %v226_v7   ;;  %v234_v9 = vld [vmem:[%s7176_s7 + $0x48] sm:$0xff]   ;;  %v238_v10 = vld [vmem:[%s7176_s7 + $0x50] sm:$0xff]  }
  0x1d   : > { %231 = vst [vmem:[%s7181_s8 + $0x40] sm:$0xff] %v230_v8   ;;  %v242_v11 = vld [vmem:[%s7176_s7 + $0x58] sm:$0xff]   ;;  %235 = vst [vmem:[%s7181_s8 + $0x48] sm:$0xff] %v234_v9   ;;  %v246_v12 = vld [vmem:[%s7176_s7 + $0x60] sm:$0xff]  }
  0x1e   : > { %239 = vst [vmem:[%s7181_s8 + $0x50] sm:$0xff] %v238_v10   ;;  %243 = vst [vmem:[%s7181_s8 + $0x58] sm:$0xff] %v242_v11   ;;  %v250_v13 = vld [vmem:[%s7176_s7 + $0x68] sm:$0xff]   ;;  %v254_v14 = vld [vmem:[%s7176_s7 + $0x70] sm:$0xff]  }
  0x1f   : > { %247 = vst [vmem:[%s7181_s8 + $0x60] sm:$0xff] %v246_v12   ;;  %251 = vst [vmem:[%s7181_s8 + $0x68] sm:$0xff] %v250_v13   ;;  %v258_v15 = vld [vmem:[%s7176_s7 + $0x78] sm:$0xff]   ;;  %v262_v16 = vld [vmem:[%s7176_s7 + $0x200] sm:$0xff]  }
  0x20   : > { %255 = vst [vmem:[%s7181_s8 + $0x70] sm:$0xff] %v254_v14   ;;  %v266_v17 = vld [vmem:[%s7176_s7 + $0x208] sm:$0xff]   ;;  %259 = vst [vmem:[%s7181_s8 + $0x78] sm:$0xff] %v258_v15   ;;  %v270_v18 = vld [vmem:[%s7176_s7 + $0x210] sm:$0xff]  }
  0x21   : > { %263 = vst [vmem:[%s7181_s8 + $0x80] sm:$0xff] %v262_v16   ;;  %267 = vst [vmem:[%s7181_s8 + $0x88] sm:$0xff] %v266_v17   ;;  %v274_v19 = vld [vmem:[%s7176_s7 + $0x218] sm:$0xff]   ;;  %v278_v20 = vld [vmem:[%s7176_s7 + $0x220] sm:$0xff]  }
  0x22   : > { %271 = vst [vmem:[%s7181_s8 + $0x90] sm:$0xff] %v270_v18   ;;  %275 = vst [vmem:[%s7181_s8 + $0x98] sm:$0xff] %v274_v19   ;;  %v282_v21 = vld [vmem:[%s7176_s7 + $0x228] sm:$0xff]   ;;  %v286_v22 = vld [vmem:[%s7176_s7 + $0x230] sm:$0xff]  }
  0x23   : > { %279 = vst [vmem:[%s7181_s8 + $0xa0] sm:$0xff] %v278_v20   ;;  %v290_v23 = vld [vmem:[%s7176_s7 + $0x238] sm:$0xff]   ;;  %283 = vst [vmem:[%s7181_s8 + $0xa8] sm:$0xff] %v282_v21   ;;  %v294_v24 = vld [vmem:[%s7176_s7 + $0x240] sm:$0xff]  }
  0x24   : > { %287 = vst [vmem:[%s7181_s8 + $0xb0] sm:$0xff] %v286_v22   ;;  %291 = vst [vmem:[%s7181_s8 + $0xb8] sm:$0xff] %v290_v23   ;;  %v298_v25 = vld [vmem:[%s7176_s7 + $0x248] sm:$0xff]   ;;  %v302_v26 = vld [vmem:[%s7176_s7 + $0x250] sm:$0xff]  }
  0x25   : > { %295 = vst [vmem:[%s7181_s8 + $0xc0] sm:$0xff] %v294_v24   ;;  %299 = vst [vmem:[%s7181_s8 + $0xc8] sm:$0xff] %v298_v25   ;;  %v306_v27 = vld [vmem:[%s7176_s7 + $0x258] sm:$0xff]   ;;  %v310_v28 = vld [vmem:[%s7176_s7 + $0x260] sm:$0xff]  }
  0x26   : > { %303 = vst [vmem:[%s7181_s8 + $0xd0] sm:$0xff] %v302_v26   ;;  %v314_v29 = vld [vmem:[%s7176_s7 + $0x268] sm:$0xff]   ;;  %307 = vst [vmem:[%s7181_s8 + $0xd8] sm:$0xff] %v306_v27   ;;  %v318_v30 = vld [vmem:[%s7176_s7 + $0x270] sm:$0xff]  }
  0x27   : > { %311 = vst [vmem:[%s7181_s8 + $0xe0] sm:$0xff] %v310_v28   ;;  %315 = vst [vmem:[%s7181_s8 + $0xe8] sm:$0xff] %v314_v29   ;;  %v322_v31 = vld [vmem:[%s7176_s7 + $0x278] sm:$0xff]   ;;  %v326_v32 = vld [vmem:[%s7176_s7 + $0x400] sm:$0xff]  }
  0x28   : > { %319 = vst [vmem:[%s7181_s8 + $0xf0] sm:$0xff] %v318_v30   ;;  %323 = vst [vmem:[%s7181_s8 + $0xf8] sm:$0xff] %v322_v31   ;;  %v330_v33 = vld [vmem:[%s7176_s7 + $0x408] sm:$0xff]   ;;  %v334_v34 = vld [vmem:[%s7176_s7 + $0x410] sm:$0xff]  }
  0x29   : > { %327 = vst [vmem:[%s7181_s8 + $0x100] sm:$0xff] %v326_v32   ;;  %v338_v35 = vld [vmem:[%s7176_s7 + $0x418] sm:$0xff]   ;;  %331 = vst [vmem:[%s7181_s8 + $0x108] sm:$0xff] %v330_v33   ;;  %v342_v36 = vld [vmem:[%s7176_s7 + $0x420] sm:$0xff]  }
  0x2a   : > { %335 = vst [vmem:[%s7181_s8 + $0x110] sm:$0xff] %v334_v34   ;;  %339 = vst [vmem:[%s7181_s8 + $0x118] sm:$0xff] %v338_v35   ;;  %v346_v37 = vld [vmem:[%s7176_s7 + $0x428] sm:$0xff]   ;;  %v350_v38 = vld [vmem:[%s7176_s7 + $0x430] sm:$0xff]  }
  0x2b   : > { %343 = vst [vmem:[%s7181_s8 + $0x120] sm:$0xff] %v342_v36   ;;  %347 = vst [vmem:[%s7181_s8 + $0x128] sm:$0xff] %v346_v37   ;;  %v354_v39 = vld [vmem:[%s7176_s7 + $0x438] sm:$0xff]   ;;  %v358_v40 = vld [vmem:[%s7176_s7 + $0x440] sm:$0xff]  }
  0x2c   : > { %351 = vst [vmem:[%s7181_s8 + $0x130] sm:$0xff] %v350_v38   ;;  %v362_v41 = vld [vmem:[%s7176_s7 + $0x448] sm:$0xff]   ;;  %355 = vst [vmem:[%s7181_s8 + $0x138] sm:$0xff] %v354_v39   ;;  %v366_v42 = vld [vmem:[%s7176_s7 + $0x450] sm:$0xff]  }
  0x2d   : > { %359 = vst [vmem:[%s7181_s8 + $0x140] sm:$0xff] %v358_v40   ;;  %363 = vst [vmem:[%s7181_s8 + $0x148] sm:$0xff] %v362_v41   ;;  %v370_v43 = vld [vmem:[%s7176_s7 + $0x458] sm:$0xff]   ;;  %v374_v44 = vld [vmem:[%s7176_s7 + $0x460] sm:$0xff]  }
  0x2e   : > { %367 = vst [vmem:[%s7181_s8 + $0x150] sm:$0xff] %v366_v42   ;;  %371 = vst [vmem:[%s7181_s8 + $0x158] sm:$0xff] %v370_v43   ;;  %v378_v45 = vld [vmem:[%s7176_s7 + $0x468] sm:$0xff]   ;;  %v382_v46 = vld [vmem:[%s7176_s7 + $0x470] sm:$0xff]  }
  0x2f   : > { %375 = vst [vmem:[%s7181_s8 + $0x160] sm:$0xff] %v374_v44   ;;  %v386_v47 = vld [vmem:[%s7176_s7 + $0x478] sm:$0xff]   ;;  %379 = vst [vmem:[%s7181_s8 + $0x168] sm:$0xff] %v378_v45   ;;  %v390_v48 = vld [vmem:[%s7176_s7 + $0x600] sm:$0xff]  }
  0x30   : > { %383 = vst [vmem:[%s7181_s8 + $0x170] sm:$0xff] %v382_v46   ;;  %387 = vst [vmem:[%s7181_s8 + $0x178] sm:$0xff] %v386_v47   ;;  %v394_v49 = vld [vmem:[%s7176_s7 + $0x608] sm:$0xff]   ;;  %v398_v50 = vld [vmem:[%s7176_s7 + $0x610] sm:$0xff]  }
  0x31   : > { %391 = vst [vmem:[%s7181_s8 + $0x180] sm:$0xff] %v390_v48   ;;  %395 = vst [vmem:[%s7181_s8 + $0x188] sm:$0xff] %v394_v49   ;;  %v402_v51 = vld [vmem:[%s7176_s7 + $0x618] sm:$0xff]   ;;  %v406_v52 = vld [vmem:[%s7176_s7 + $0x620] sm:$0xff]  }
  0x32   : > { %399 = vst [vmem:[%s7181_s8 + $0x190] sm:$0xff] %v398_v50   ;;  %v410_v53 = vld [vmem:[%s7176_s7 + $0x628] sm:$0xff]   ;;  %403 = vst [vmem:[%s7181_s8 + $0x198] sm:$0xff] %v402_v51   ;;  %v414_v54 = vld [vmem:[%s7176_s7 + $0x630] sm:$0xff]  }
  0x33   : > { %407 = vst [vmem:[%s7181_s8 + $0x1a0] sm:$0xff] %v406_v52   ;;  %411 = vst [vmem:[%s7181_s8 + $0x1a8] sm:$0xff] %v410_v53   ;;  %v418_v55 = vld [vmem:[%s7176_s7 + $0x638] sm:$0xff]   ;;  %v422_v56 = vld [vmem:[%s7176_s7 + $0x640] sm:$0xff]  }
  0x34   : > { %415 = vst [vmem:[%s7181_s8 + $0x1b0] sm:$0xff] %v414_v54   ;;  %419 = vst [vmem:[%s7181_s8 + $0x1b8] sm:$0xff] %v418_v55   ;;  %v426_v57 = vld [vmem:[%s7176_s7 + $0x648] sm:$0xff]   ;;  %v430_v58 = vld [vmem:[%s7176_s7 + $0x650] sm:$0xff]  }
  0x35   : > { %423 = vst [vmem:[%s7181_s8 + $0x1c0] sm:$0xff] %v422_v56   ;;  %v434_v59 = vld [vmem:[%s7176_s7 + $0x658] sm:$0xff]   ;;  %427 = vst [vmem:[%s7181_s8 + $0x1c8] sm:$0xff] %v426_v57   ;;  %v438_v60 = vld [vmem:[%s7176_s7 + $0x660] sm:$0xff]  }
  0x36   : > { %431 = vst [vmem:[%s7181_s8 + $0x1d0] sm:$0xff] %v430_v58   ;;  %435 = vst [vmem:[%s7181_s8 + $0x1d8] sm:$0xff] %v434_v59   ;;  %v442_v61 = vld [vmem:[%s7176_s7 + $0x668] sm:$0xff]   ;;  %v446_v62 = vld [vmem:[%s7176_s7 + $0x670] sm:$0xff]  }
  0x37   : > { %439 = vst [vmem:[%s7181_s8 + $0x1e0] sm:$0xff] %v438_v60   ;;  %443 = vst [vmem:[%s7181_s8 + $0x1e8] sm:$0xff] %v442_v61   ;;  %v450_v63 = vld [vmem:[%s7176_s7 + $0x678] sm:$0xff]  }
  0x38   : > { %447 = vst [vmem:[%s7181_s8 + $0x1f0] sm:$0xff] %v446_v62   ;;  %451 = vst [vmem:[%s7181_s8 + $0x1f8] sm:$0xff] %v450_v63  }
  0x39 PF: > { %p4989_p7 = scmp.ge.s32.totalorder %s7094_s18, 1  ;;  %p731_p8 = scmp.lt.s32.totalorder %s7094_s18, 9 }
  0x3b   : > { %p732_p9 = pnand %p4989_p7, %p731_p8 }
  0x3c   : > { %v6373_v0 = vld [vmem:[%s8256_s1 + $0x20] sm:$0xff] (!%p732_p9)   ;;  %s738_s11 = sand.u32 (!%p732_p9), 1, %s7070_s12   ;;  %v7317_v1 = vld [vmem:[%s8256_s1 + $0x18] sm:$0xff] (!%p732_p9)   ;;  %vm927_vm0 = vcmask (!%p732_p9), 130048   ;;  %v6378_v5 = vld [vmem:[%s8256_s1 + $0x28] sm:$0xff] (!%p732_p9)   ;;  %p785_p10 = scmp.lt.s32.totalorder (!%p732_p9), %s7082_s15, 1 }
  0x3d   : > { %735 = sbr.rel (%p732_p9) target bundleno = 646 (0x286), region = 69  ;;  %s4990_s23 = sshll.u32 (!%p732_p9), %s738_s11, 9  ;;  %5849 = vmatprep.subr.bf16.mxu0 (!%p732_p9), %v6373_v0  ;;  %6155 = vmatprep.subr.bf16.mxu1 (!%p732_p9), %v7317_v1  ;;  %v6380_v7 = vld [vmem:[%s8256_s1 + $0x10] sm:$0xff] (!%p732_p9)   ;;  %v6397_v18 = vld [vmem:[%s8256_s1] sm:$0xff] (!%p732_p9)   ;;  %v7416_v44 = vld [vmem:[%s8256_s1 + $0x38] sm:$0xff] (!%p732_p9)   ;;  %vm1329_vm1 = vcmask (!%p732_p9), 23552  }
  0x3e   : > { %5850 = vmatpush3.bf16.msra.mxu0 (!%p732_p9), %v6373_v0  ;;  %s7320_s24 = scalar_lea.vmem (!%p732_p9), [#allocation2], %s4990_s23  ;;  %6156 = vmatpush3.bf16.msra.mxu1 (!%p732_p9), %v7317_v1  ;;  %v6430_v35 = vld [vmem:[%s8256_s1 + $0x30] sm:$0xff] (!%p732_p9)   ;;  %v7451_v61 = vld [vmem:[%s8256_s1 + $0x40] sm:$0xff] (!%p732_p9)   ;;  %s4991_s23 = sshll.u32 (!%p732_p9), %s7078_s14, 3 }
  0x3f   : > { %v6375_v2 = vld [vmem:[%s7320_s24] sm:$0xff] (!%p732_p9)   ;;  %v6377_v4 = vld [vmem:[%s7320_s24 + $0x8] sm:$0xff] (!%p732_p9)   ;;  %5883 = vmatprep.subr.bf16.mxu0 (!%p732_p9), %v6378_v5  ;;  %v6381_v8 = vld [vmem:[%s7320_s24 + $0x10] sm:$0xff] (!%p732_p9)   ;;  %6019 = vmatprep.subr.bf16.mxu1 (!%p732_p9), %v6380_v7  ;;  %p7601_p11 = scmp.lt.s32.totalorder (!%p732_p9), %s4991_s23, 31 }
  0x40   : > { %v6376_v3 = vld [vmem:[%s7320_s24 + $0xc0] sm:$0xff] (!%p732_p9)   ;;  %5851 = vmatprep.mubr.msk.bf16.mxu0 (!%p732_p9), %vm927_vm0, %v6375_v2  ;;  %v6379_v6 = vld [vmem:[%s7320_s24 + $0xc8] sm:$0xff] (!%p732_p9)   ;;  %v6382_v9 = vld [vmem:[%s7320_s24 + $0xd0] sm:$0xff] (!%p732_p9)  }
  0x41   : > { %5935 = vmatprep.mubr.msk.bf16.mxu1 (!%p732_p9), %vm927_vm0, %v6376_v3  ;;  %5852 = vmatmul.mubr.msk.bf16.vlgmr.msra.gmra.mrb[0].mxu0 (!%p732_p9), %vm927_vm0, %v6377_v4  ;;  %v6383_v10 = vld [vmem:[%s7320_s24 + $0x18] sm:$0xff] (!%p732_p9)   ;;  %v6385_v12 = vld [vmem:[%s7320_s24 + $0x20] sm:$0xff] (!%p732_p9)   ;;  %v6387_v14 = vld [vmem:[%s7320_s24 + $0x28] sm:$0xff] (!%p732_p9)  }
  0x42   : > { %5936 = vmatmul.mubr.msk.bf16.vlgmr.msra.gmra.mrb[0].mxu1 (!%p732_p9), %vm927_vm0, %v6379_v6  ;;  %5884 = vmatpush3.bf16.msra.mxu0 (!%p732_p9), %v6378_v5  ;;  %v6384_v11 = vld [vmem:[%s7320_s24 + $0xd8] sm:$0xff] (!%p732_p9)   ;;  %v6386_v13 = vld [vmem:[%s7320_s24 + $0xe0] sm:$0xff] (!%p732_p9)   ;;  %v6389_v15 = vld [vmem:[%s7320_s24 + $0x30] sm:$0xff] (!%p732_p9)  }
  0x43   : > { %5917 = vmatprep.subr.bf16.mxu0 (!%p732_p9), %v7317_v1  ;;  %6020 = vmatpush3.bf16.msra.mxu1 (!%p732_p9), %v6380_v7  ;;  %v6388_v16 = vld [vmem:[%s7320_s24 + $0xe8] sm:$0xff] (!%p732_p9)   ;;  %v6390_v17 = vld [vmem:[%s7320_s24 + $0xf0] sm:$0xff] (!%p732_p9)   ;;  %v6391_v19 = vld [vmem:[%s7320_s24 + $0x38] sm:$0xff] (!%p732_p9)  }
  0x44   : > { %5855 = vmatprep.mubr.msk.bf16.mxu0 %vm927_vm0, %v6381_v8  ;;  %5939 = vmatprep.mubr.msk.bf16.mxu1 %vm927_vm0, %v6382_v9  ;;  %v6393_v20 = vld [vmem:[%s7320_s24 + $0x40] sm:$0xff]   ;;  %v6392_v21 = vld [vmem:[%s7320_s24 + $0xf8] sm:$0xff]   ;;  %v6395_v23 = vld [vmem:[%s7320_s24 + $0x48] sm:$0xff]   ;;  %s8273_s15 = smov (!%p785_p10, %s7082_s15), 1  ;;  %s8275_s23 = smov (!%p7601_p11, %s4991_s23), 31 }
  0x45   : > { %6053 = vmatprep.subr.bf16.mxu1 %v6397_v18  ;;  %v6394_v22 = vld [vmem:[%s7320_s24 + $0x100] sm:$0xff]   ;;  %v6398_v24 = vld [vmem:[%s7320_s24 + $0x50] sm:$0xff]   ;;  %v6396_v25 = vld [vmem:[%s7320_s24 + $0x108] sm:$0xff]   ;;  %s4992_s14 = sshll.u32 %s8275_s23, 4  ;;  %s4993_s26 = sshll.u32 %s8273_s15, 9 }
  0x46   : > { %v6399_v26 = vld [vmem:[%s7320_s24 + $0x110] sm:$0xff]   ;;  %v6400_v27 = vld [vmem:[%s7320_s24 + $0x58] sm:$0xff]   ;;  %v6402_v28 = vld [vmem:[%s7320_s24 + $0x60] sm:$0xff]   ;;  %s7646_s15 = sadd.s32 %s4993_s26, %s4992_s14 }
  0x47   : > { %v6401_v29 = vld [vmem:[%s7320_s24 + $0x118] sm:$0xff]   ;;  %v6403_v30 = vld [vmem:[%s7320_s24 + $0x120] sm:$0xff]   ;;  %v6404_v31 = vld [vmem:[%s7320_s24 + $0x68] sm:$0xff]   ;;  %s4994_s27 = sshll.u32 %s7646_s15, 3 }
  0x48   : > { %v6406_v32 = vld [vmem:[%s7320_s24 + $0x70] sm:$0xff]   ;;  %v6405_v33 = vld [vmem:[%s7320_s24 + $0x128] sm:$0xff]   ;;  %v6408_v36 = vld [vmem:[%s7320_s24 + $0x78] sm:$0xff]   ;;  %s7664_s30 = scalar_lea.vmem %s8258_s3, %s4994_s27 }
  0x49   : > { %5856 = vmatmul.mubr.msk.bf16.gmra.mrb[4].mxu0 %vm927_vm0, %v6383_v10  ;;  %v6407_v34 = vld [vmem:[%s7320_s24 + $0x130] sm:$0xff]   ;;  %v6410_v37 = vld [vmem:[%s7320_s24] sm:$0xff]   ;;  %v6409_v38 = vld [vmem:[%s7320_s24 + $0x138] sm:$0xff]  }
  0x4a   : > { %5859 = vmatprep.mubr.msk.bf16.mxu0 %vm927_vm0, %v6385_v12  ;;  %5940 = vmatmul.mubr.msk.bf16.gmra.mrb[4].mxu1 %vm927_vm0, %v6384_v11  ;;  %v6411_v39 = vld [vmem:[%s7320_s24 + $0x140] sm:$0xff]   ;;  %v6412_v40 = vld [vmem:[%s7320_s24 + $0x8] sm:$0xff]   ;;  %v6414_v41 = vld [vmem:[%s7320_s24 + $0x10] sm:$0xff]  }
  0x4b   : > { %5943 = vmatprep.mubr.msk.bf16.mxu1 %vm927_vm0, %v6386_v13  ;;  %v6413_v42 = vld [vmem:[%s7320_s24 + $0x148] sm:$0xff]   ;;  %v6415_v43 = vld [vmem:[%s7320_s24 + $0x150] sm:$0xff]   ;;  %v6416_v45 = vld [vmem:[%s7320_s24 + $0x18] sm:$0xff]  }
  0x4c   : > { %v6418_v46 = vld [vmem:[%s7320_s24 + $0x20] sm:$0xff]   ;;  %v6417_v47 = vld [vmem:[%s7320_s24 + $0x158] sm:$0xff]   ;;  %v6420_v49 = vld [vmem:[%s7320_s24 + $0x28] sm:$0xff]  }
  0x4d   : > { %v6419_v48 = vld [vmem:[%s7320_s24 + $0x160] sm:$0xff]   ;;  %v6422_v50 = vld [vmem:[%s7320_s24 + $0x30] sm:$0xff]   ;;  %v6421_v51 = vld [vmem:[%s7320_s24 + $0x168] sm:$0xff]  }
  0x4e   : > { %v6423_v52 = vld [vmem:[%s7320_s24 + $0x170] sm:$0xff]   ;;  %v6424_v53 = vld [vmem:[%s7320_s24 + $0x38] sm:$0xff]   ;;  %v6426_v54 = vld [vmem:[%s7320_s24 + $0x40] sm:$0xff]  }
  0x4f   : > { %v6425_v55 = vld [vmem:[%s7320_s24 + $0x178] sm:$0xff]   ;;  %v6427_v56 = vld [vmem:[%s7320_s24 + $0x180] sm:$0xff]   ;;  %v6428_v57 = vld [vmem:[%s7320_s24 + $0x48] sm:$0xff]  }
  0x50   : > { %v6431_v58 = vld [vmem:[%s7320_s24 + $0x50] sm:$0xff]   ;;  %v6429_v59 = vld [vmem:[%s7320_s24 + $0x188] sm:$0xff]   ;;  %v6433_v62 = vld [vmem:[%s7320_s24 + $0x58] sm:$0xff]  }
  0x51   : > { %5860 = vmatmul.mubr.msk.bf16.gmra.mrb[8].mxu0 %vm927_vm0, %v6387_v14  ;;  %v6432_v60 = vld [vmem:[%s7320_s24 + $0x190] sm:$0xff]   ;;  %v6435_v63 = vld [vmem:[%s7320_s24 + $0x60] sm:$0xff]   ;;  %v6434_v0 = vld [vmem:[%s7320_s24 + $0x198] sm:$0xff]  }
  0x52   : > { %5863 = vmatprep.mubr.msk.bf16.mxu0 %vm927_vm0, %v6389_v15  ;;  %5944 = vmatmul.mubr.msk.bf16.gmra.mrb[8].mxu1 %vm927_vm0, %v6388_v16  ;;  %v6437_v2 = vld [vmem:[%s7320_s24 + $0x68] sm:$0xff]   ;;  %v6439_v3 = vld [vmem:[%s7320_s24 + $0x70] sm:$0xff]   ;;  %v6441_v6 = vld [vmem:[%s7320_s24 + $0x78] sm:$0xff]  }
  0x53   : > { %5947 = vmatprep.mubr.msk.bf16.mxu1 %vm927_vm0, %v6390_v17  ;;  %v6438_v4 = vld [vmem:[%s7320_s24 + $0x1a8] sm:$0xff]   ;;  %v6440_v5 = vld [vmem:[%s7320_s24 + $0x1b0] sm:$0xff]   ;;  %v6443_v7 = vld [vmem:[%s7320_s24 + $0x80] sm:$0xff]  }
  0x54   : > { %v6442_v8 = vld [vmem:[%s7320_s24 + $0x1b8] sm:$0xff]   ;;  %v6444_v9 = vld [vmem:[%s7320_s24 + $0x1c0] sm:$0xff]   ;;  %v6445_v10 = vld [vmem:[%s7320_s24 + $0x88] sm:$0xff]  }
  0x55   : > { %v6447_v11 = vld [vmem:[%s7320_s24 + $0x1c8] sm:$0xff]   ;;  %v6448_v12 = vld [vmem:[%s7320_s24 + $0x90] sm:$0xff]   ;;  %v6450_v15 = vld [vmem:[%s7320_s24 + $0x98] sm:$0xff]  }
  0x56   : > { %v6463_v13 = vld [vmem:[%s8256_s1 + $0x8] sm:$0xff]   ;;  %v6449_v14 = vld [vmem:[%s7320_s24 + $0x1d0] sm:$0xff]   ;;  %v6451_v16 = vld [vmem:[%s7320_s24 + $0x1d8] sm:$0xff]  }
  0x57   : > { %v6452_v17 = vld [vmem:[%s7320_s24 + $0xa0] sm:$0xff]  }
  0x59   : > { %5864 = vmatmul.mubr.msk.bf16.gmra.mrb[12].mxu0 %vm927_vm0, %v6391_v19  ;;  %v6454_v19 = vld [vmem:[%s7320_s24 + $0xa8] sm:$0xff]  }
  0x5a   : > { %5867 = vmatprep.mubr.msk.bf16.mxu0 %vm927_vm0, %v6393_v20  ;;  %5948 = vmatmul.mubr.msk.bf16.gmra.mrb[12].mxu1 %vm927_vm0, %v6392_v21  ;;  %v6456_v20 = vld [vmem:[%s7320_s24 + $0xb0] sm:$0xff]   ;;  %v6455_v21 = vld [vmem:[%s7320_s24 + $0x1e8] sm:$0xff]  }
  0x5b   : > { %6021 = vmatprep.mubr.msk.bf16.mxu1 %vm927_vm0, %v6394_v22  ;;  %v6457_v22 = vld [vmem:[%s7320_s24 + $0x1f0] sm:$0xff]  }
  0x61   : > { %5868 = vmatmul.mubr.msk.bf16.gmra.mrb[16].mxu0 %vm927_vm0, %v6395_v23  ;;  %v6458_v23 = vld [vmem:[%s7320_s24 + $0xb8] sm:$0xff]  }
  0x62   : > { %5871 = vmatprep.mubr.msk.bf16.mxu0 %vm927_vm0, %v6398_v24  ;;  %6022 = vmatmul.mubr.msk.bf16.vlgmr.msra.gmra.mrb[16].mxu1 %vm927_vm0, %v6396_v25  ;;  %v6460_v24 = vld [vmem:[%s7320_s24] sm:$0xff]   ;;  %v6459_v25 = vld [vmem:[%s7320_s24 + $0x1f8] sm:$0xff]  }
  0x63   : > { %6054 = vmatpush3.bf16.msra.mxu1 %v6397_v18  ;;  %6025 = vmatprep.mubr.msk.bf16.mxu1 %vm927_vm0, %v6399_v26  ;;  %v6453_v18 = vld [vmem:[%s7320_s24 + $0x1e0] sm:$0xff]  }
  0x64   : > { %6087 = vmatprep.subr.bf16.mxu1 %v6430_v35  ;;  %v6461_v26 = vld [vmem:[%s7320_s24 + $0x80] sm:$0xff]  }
  0x69   : > { %5872 = vmatmul.mubr.msk.bf16.gmra.mrb[20].mxu0 %vm927_vm0, %v6400_v27  ;;  %v6462_v27 = vld [vmem:[%s7320_s24 + $0x8] sm:$0xff]  }
  0x6a   : > { %5875 = vmatprep.mubr.msk.bf16.mxu0 %vm927_vm0, %v6402_v28  ;;  %6026 = vmatmul.mubr.msk.bf16.gmra.mrb[20].mxu1 %vm927_vm0, %v6401_v29  ;;  %v6466_v28 = vld [vmem:[%s7320_s24 + $0x10] sm:$0xff]   ;;  %v6464_v29 = vld [vmem:[%s7320_s24 + $0x88] sm:$0xff]  }
  0x6b   : > { %6029 = vmatprep.mubr.msk.bf16.mxu1 %vm927_vm0, %v6403_v30  ;;  %v6467_v30 = vld [vmem:[%s7320_s24 + $0x90] sm:$0xff]  }
  0x71   : > { %5876 = vmatmul.mubr.msk.bf16.gmra.mrb[24].mxu0 %vm927_vm0, %v6404_v31  ;;  %v6468_v31 = vld [vmem:[%s7320_s24 + $0x18] sm:$0xff]  }
  0x72   : > { %5879 = vmatprep.mubr.msk.bf16.mxu0 %vm927_vm0, %v6406_v32  ;;  %6030 = vmatmul.mubr.msk.bf16.gmra.mrb[24].mxu1 %vm927_vm0, %v6405_v33  ;;  %v6470_v32 = vld [vmem:[%s7320_s24 + $0x20] sm:$0xff]   ;;  %v6469_v33 = vld [vmem:[%s7320_s24 + $0x98] sm:$0xff]  }
  0x73   : > { %6033 = vmatprep.mubr.msk.bf16.mxu1 %vm927_vm0, %v6407_v34  ;;  %v6471_v34 = vld [vmem:[%s7320_s24 + $0xa0] sm:$0xff]  }
  0x79   : > { %5880 = vmatmul.mubr.msk.bf16.gmra.mrb[28].mxu0 %vm927_vm0, %v6408_v36  ;;  %v6474_v36 = vld [vmem:[%s7320_s24 + $0x30] sm:$0xff]  }
  0x7a   : > { %5885 = vmatprep.mubr.msk.bf16.mxu0 %vm927_vm0, %v6410_v37  ;;  %6034 = vmatmul.mubr.msk.bf16.gmra.mrb[28].mxu1 %vm927_vm0, %v6409_v38  ;;  %v6473_v37 = vld [vmem:[%s7320_s24 + $0xa8] sm:$0xff]   ;;  %v6475_v38 = vld [vmem:[%s7320_s24 + $0xb0] sm:$0xff]  }
  0x7b   : > { %6037 = vmatprep.mubr.msk.bf16.mxu1 %vm927_vm0, %v6411_v39  ;;  %v6476_v39 = vld [vmem:[%s7320_s24 + $0x38] sm:$0xff]  }
  0x81   : > { %5886 = vmatmul.mubr.msk.bf16.vlgmr.msra.gmra.mrb[32].mxu0 %vm927_vm0, %v6412_v40  ;;  %v6478_v40 = vld [vmem:[%s7320_s24 + $0x40] sm:$0xff]  }
  0x82   : > { %5918 = vmatpush3.bf16.msra.mxu0 %v7317_v1  ;;  %5889 = vmatprep.mubr.msk.bf16.mxu0 %vm927_vm0, %v6414_v41  ;;  %v6436_v1 = vld [vmem:[%s7320_s24 + $0x1a0] sm:$0xff]   ;;  %v6477_v41 = vld [vmem:[%s7320_s24 + $0xb8] sm:$0xff]  }
  0x83   : > { %6038 = vmatmul.mubr.msk.bf16.gmra.mrb[32].mxu1 %vm927_vm0, %v6413_v42  ;;  %5951 = vmatprep.subr.bf16.mxu0 %v7416_v44  ;;  %v6479_v42 = vld [vmem:[%s7320_s24 + $0xc0] sm:$0xff]  }
  0x84   : > { %6041 = vmatprep.mubr.msk.bf16.mxu1 %vm927_vm0, %v6415_v43  ;;  %v6480_v43 = vld [vmem:[%s7320_s24 + $0x48] sm:$0xff]  }
  0x89   : > { %5890 = vmatmul.mubr.msk.bf16.gmra.mrb[36].mxu0 %vm927_vm0, %v6416_v45  ;;  %v6481_v45 = vld [vmem:[%s7320_s24 + $0xc8] sm:$0xff]  }
  0x8a   : > { %5893 = vmatprep.mubr.msk.bf16.mxu0 %vm927_vm0, %v6418_v46  ;;  %v6483_v46 = vld [vmem:[%s7320_s24 + $0xd0] sm:$0xff]  }
  0x8b   : > { %6042 = vmatmul.mubr.msk.bf16.gmra.mrb[36].mxu1 %vm927_vm0, %v6417_v47  ;;  %v6484_v47 = vld [vmem:[%s7320_s24 + $0x58] sm:$0xff]  }
  0x8c   : > { %6045 = vmatprep.mubr.msk.bf16.mxu1 %vm927_vm0, %v6419_v48  ;;  %v6486_v48 = vld [vmem:[%s7320_s24 + $0x60] sm:$0xff]  }
  0x91   : > { %5894 = vmatmul.mubr.msk.bf16.gmra.mrb[40].mxu0 %vm927_vm0, %v6420_v49  ;;  %v6485_v49 = vld [vmem:[%s7320_s24 + $0xd8] sm:$0xff]  }
  0x92   : > { %5897 = vmatprep.mubr.msk.bf16.mxu0 %vm927_vm0, %v6422_v50  ;;  %v6487_v50 = vld [vmem:[%s7320_s24 + $0xe0] sm:$0xff]  }
  0x93   : > { %6046 = vmatmul.mubr.msk.bf16.gmra.mrb[40].mxu1 %vm927_vm0, %v6421_v51  ;;  %v6488_v51 = vld [vmem:[%s7320_s24 + $0x68] sm:$0xff]  }
  0x94   : > { %6049 = vmatprep.mubr.msk.bf16.mxu1 %vm927_vm0, %v6423_v52  ;;  %v6490_v52 = vld [vmem:[%s7320_s24 + $0x70] sm:$0xff]  }
  0x99   : > { %5898 = vmatmul.mubr.msk.bf16.gmra.mrb[44].mxu0 %vm927_vm0, %v6424_v53  ;;  %v6489_v53 = vld [vmem:[%s7320_s24 + $0xe8] sm:$0xff]  }
  0x9a   : > { %5901 = vmatprep.mubr.msk.bf16.mxu0 %vm927_vm0, %v6426_v54  ;;  %v6491_v54 = vld [vmem:[%s7320_s24 + $0xf0] sm:$0xff]  }
  0x9b   : > { %6050 = vmatmul.mubr.msk.bf16.gmra.mrb[44].mxu1 %vm927_vm0, %v6425_v55  ;;  %v7574_v55 = vld [vmem:[%s8257_s2] ss:$0 sm:$0xff] }
  0x9c   : > { %6055 = vmatprep.mubr.msk.bf16.mxu1 %vm927_vm0, %v6427_v56 }
  0xa1   : > { %5902 = vmatmul.mubr.msk.bf16.gmra.mrb[48].mxu0 %vm927_vm0, %v6428_v57 }
  0xa2   : > { %5905 = vmatprep.mubr.msk.bf16.mxu0 %vm927_vm0, %v6431_v58 }
  0xa3   : > { %6056 = vmatmul.mubr.msk.bf16.vlgmr.msra.gmra.mrb[16].mxu1 %vm927_vm0, %v6429_v59  ;;  %v6492_v59 = vld [vmem:[%s7320_s24 + $0x78] sm:$0xff]  }
  0xa4   : > { %6088 = vmatpush3.bf16.msra.mxu1 %v6430_v35  ;;  %6059 = vmatprep.mubr.msk.bf16.mxu1 %vm927_vm0, %v6432_v60  ;;  %v6472_v35 = vld [vmem:[%s7320_s24 + $0x28] sm:$0xff]  }
  0xa5   : > { %6121 = vmatprep.subr.bf16.mxu1 %v7451_v61 }
  0xa9   : > { %5906 = vmatmul.mubr.msk.bf16.gmra.mrb[52].mxu0 %vm927_vm0, %v6433_v62 }
  0xaa   : > { %5909 = vmatprep.mubr.msk.bf16.mxu0 %vm927_vm0, %v6435_v63  ;;  %v6494_v63 = vld [vmem:[%s7320_s24 + $0x100] sm:$0xff]  }
  0xab   : > { %6060 = vmatmul.mubr.msk.bf16.gmra.mrb[20].mxu1 %vm927_vm0, %v6434_v0 }
  0xac   : > { %6063 = vmatprep.mubr.msk.bf16.mxu1 %vm927_vm0, %v6436_v1 }
  0xb1   : > { %5910 = vmatmul.mubr.msk.bf16.gmra.mrb[56].mxu0 %vm927_vm0, %v6437_v2 }
  0xb2   : > { %5913 = vmatprep.mubr.msk.bf16.mxu0 %vm927_vm0, %v6439_v3 }
  0xb3   : > { %6064 = vmatmul.mubr.msk.bf16.gmra.mrb[24].mxu1 %vm927_vm0, %v6438_v4  ;;  %v6493_v4 = vld [vmem:[%s7320_s24 + $0xf8] sm:$0xff]  }
  0xb4   : > { %6067 = vmatprep.mubr.msk.bf16.mxu1 %vm927_vm0, %v6440_v5 }
  0xb9   : > { %5914 = vmatmul.mubr.msk.bf16.gmra.mrb[60].mxu0 %vm927_vm0, %v6441_v6 }
  0xba   : > { %5919 = vmatprep.mubr.msk.bf16.mxu0 %vm927_vm0, %v6443_v7 }
  0xbb   : > { %6068 = vmatmul.mubr.msk.bf16.gmra.mrb[28].mxu1 %vm927_vm0, %v6442_v8  ;;  %v6495_v8 = vld [vmem:[%s7320_s24] sm:$0xff]  }
  0xbc   : > { %6071 = vmatprep.mubr.msk.bf16.mxu1 %vm927_vm0, %v6444_v9 }
  0xc1   : > { %5920 = vmatmul.mubr.msk.bf16.vlgmr.msra.gmra.mrb[32].mxu0 %vm927_vm0, %v6445_v10 }
  0xc2   : > { %5952 = vmatpush3.bf16.msra.mxu0 %v7416_v44  ;;  %5923 = vmatprep.mubr.msk.bf16.mxu0 %vm927_vm0, %v6448_v12  ;;  %v6482_v44 = vld [vmem:[%s7320_s24 + $0x50] sm:$0xff]  }
  0xc3   : > { %6072 = vmatmul.mubr.msk.bf16.gmra.mrb[32].mxu1 %vm927_vm0, %v6447_v11  ;;  %5985 = vmatprep.subr.bf16.mxu0 %v6463_v13 }
  0xc4   : > { %6075 = vmatprep.mubr.msk.bf16.mxu1 %vm927_vm0, %v6449_v14 }
  0xc9   : > { %5924 = vmatmul.mubr.msk.bf16.gmra.mrb[36].mxu0 %vm927_vm0, %v6450_v15  ;;  %v6496_v15 = vld [vmem:[%s7320_s24 + $0x108] sm:$0xff]  }
  0xca   : > { %5927 = vmatprep.mubr.msk.bf16.mxu0 %vm927_vm0, %v6452_v17 }
  0xcb   : > { %6076 = vmatmul.mubr.msk.bf16.gmra.mrb[36].mxu1 %vm927_vm0, %v6451_v16 }
  0xcc   : > { %6079 = vmatprep.mubr.msk.bf16.mxu1 %vm927_vm0, %v6453_v18 }
  0xd1   : > { %5928 = vmatmul.mubr.msk.bf16.gmra.mrb[40].mxu0 %vm927_vm0, %v6454_v19  ;;  %v6498_v19 = vld [vmem:[%s7320_s24 + $0x110] sm:$0xff]  }
  0xd2   : > { %5931 = vmatprep.mubr.msk.bf16.mxu0 %vm927_vm0, %v6456_v20 }
  0xd3   : > { %6080 = vmatmul.mubr.msk.bf16.gmra.mrb[40].mxu1 %vm927_vm0, %v6455_v21 }
  0xd4   : > { %6083 = vmatprep.mubr.msk.bf16.mxu1 %vm927_vm0, %v6457_v22 }
  0xd9   : > { %5932 = vmatmul.mubr.msk.bf16.gmra.mrb[44].mxu0 %vm927_vm0, %v6458_v23 }
  0xda   : > { %5953 = vmatprep.mubr.msk.bf16.mxu0 %vm927_vm0, %v6460_v24  ;;  %v6497_v24 = vld [vmem:[%s7320_s24 + $0x8] sm:$0xff]  }
  0xdb   : > { %6084 = vmatmul.mubr.msk.bf16.gmra.mrb[44].mxu1 %vm927_vm0, %v6459_v25 }
  0xdc   : > { %6089 = vmatprep.mubr.msk.bf16.mxu1 %vm927_vm0, %v6461_v26 }
  0xe1   : > { %5954 = vmatmul.mubr.msk.bf16.vlgmr.msra.gmra.mrb[64].mxu0 %vm927_vm0, %v6462_v27 }
  0xe2   : > { %5986 = vmatpush3.bf16.msra.mxu0 %v6463_v13  ;;  %5957 = vmatprep.mubr.msk.bf16.mxu0 %vm927_vm0, %v6466_v28  ;;  %v6499_v28 = vld [vmem:[%s7320_s24 + $0x10] sm:$0xff]  }
  0xe3   : > { %6090 = vmatmul.mubr.msk.bf16.vlgmr.msra.gmra.mrb[16].mxu1 %vm927_vm0, %v6464_v29 }
  0xe4   : > { %6122 = vmatpush3.bf16.msra.mxu1 %v7451_v61  ;;  %6093 = vmatprep.mubr.msk.bf16.mxu1 %vm927_vm0, %v6467_v30 }
  0xe9   : > { %5958 = vmatmul.mubr.msk.bf16.gmra.mrb[68].mxu0 %vm927_vm0, %v6468_v31 }
  0xea   : > { %5961 = vmatprep.mubr.msk.bf16.mxu0 %vm927_vm0, %v6470_v32 }
  0xeb   : > { %6094 = vmatmul.mubr.msk.bf16.gmra.mrb[20].mxu1 %vm927_vm0, %v6469_v33 }
  0xec   : > { %6097 = vmatprep.mubr.msk.bf16.mxu1 %vm927_vm0, %v6471_v34 }
  0xf1   : > { %5962 = vmatmul.mubr.msk.bf16.gmra.mrb[72].mxu0 %vm927_vm0, %v6472_v35 }
  0xf2   : > { %5965 = vmatprep.mubr.msk.bf16.mxu0 %vm927_vm0, %v6474_v36 }
  0xf3   : > { %6098 = vmatmul.mubr.msk.bf16.gmra.mrb[24].mxu1 %vm927_vm0, %v6473_v37 }
  0xf4   : > { %6101 = vmatprep.mubr.msk.bf16.mxu1 %vm927_vm0, %v6475_v38 }
  0xf9   : > { %5966 = vmatmul.mubr.msk.bf16.gmra.mrb[76].mxu0 %vm927_vm0, %v6476_v39 }
  0xfa   : > { %5969 = vmatprep.mubr.msk.bf16.mxu0 %vm927_vm0, %v6478_v40  ;;  %v6500_v40 = vld [vmem:[%s7320_s24 + $0x118] sm:$0xff]  }
  0xfb   : > { %6102 = vmatmul.mubr.msk.bf16.gmra.mrb[28].mxu1 %vm927_vm0, %v6477_v41 }
  0xfc   : > { %6105 = vmatprep.mubr.msk.bf16.mxu1 %vm927_vm0, %v6479_v42 }
 0x101   : > { %5970 = vmatmul.mubr.msk.bf16.gmra.mrb[80].mxu0 %vm927_vm0, %v6480_v43 }
 0x102   : > { %5973 = vmatprep.mubr.msk.bf16.mxu0 %vm927_vm0, %v6482_v44 }
 0x103   : > { %6106 = vmatmul.mubr.msk.bf16.gmra.mrb[32].mxu1 %vm927_vm0, %v6481_v45 }
 0x104   : > { %6109 = vmatprep.mubr.msk.bf16.mxu1 %vm927_vm0, %v6483_v46  ;;  %v6502_v46 = vld [vmem:[%s7320_s24 + $0x120] sm:$0xff]  }
 0x109   : > { %5974 = vmatmul.mubr.msk.bf16.gmra.mrb[84].mxu0 %vm927_vm0, %v6484_v47 }
 0x10a   : > { %5977 = vmatprep.mubr.msk.bf16.mxu0 %vm927_vm0, %v6486_v48 }
 0x10b   : > { %6110 = vmatmul.mubr.msk.bf16.gmra.mrb[36].mxu1 %vm927_vm0, %v6485_v49 }
 0x10c   : > { %6113 = vmatprep.mubr.msk.bf16.mxu1 %vm927_vm0, %v6487_v50 }
 0x111   : > { %5978 = vmatmul.mubr.msk.bf16.gmra.mrb[88].mxu0 %vm927_vm0, %v6488_v51 }
 0x112   : > { %5981 = vmatprep.mubr.msk.bf16.mxu0 %vm927_vm0, %v6490_v52  ;;  %v6501_v52 = vld [vmem:[%s7320_s24 + $0x18] sm:$0xff]  }
 0x113   : > { %6114 = vmatmul.mubr.msk.bf16.gmra.mrb[40].mxu1 %vm927_vm0, %v6489_v53 }
 0x114   : > { %v5853_v56 = vpop.f32.mrb[0].mxu0  ;;  %6117 = vmatprep.mubr.msk.bf16.mxu1 %vm927_vm0, %v6491_v54 }
 0x115   : > { %v1019_v57 = vadd.f32 %v5853_v56, %v7574_v55  ;;  %v1010_v58 = vpop.f32.mrb[1].mxu0  ;;  %v7581_v60 = vpop.f32.mrb[0].mxu1 }
 0x116   : > { %v1011_v61 = vadd.f32 %v7574_v55, %v1010_v58  ;;  %v5854_v62 = vpop.f32.mrb[2].mxu0  ;;  %v7585_v1 = vpop.f32.mrb[1].mxu1 }
 0x117   : > { %v5033_v0 = vmul.f32 -1.442695, %v1019_v57  ;;  %v1022_v2 = vadd.f32 %v5854_v62, %v7574_v55  ;;  %v1013_v3 = vpop.f32.mrb[3].mxu0  ;;  %v7589_v6 = vpop.f32.mrb[2].mxu1  ;;  %v6503_v57 = vld [vmem:[%s7320_s24 + $0x20] sm:$0xff]  }
 0x118   : > { %v5031_v5 = vmul.f32 -1.442695, %v1011_v61  ;;  %v1014_v7 = vadd.f32 %v7574_v55, %v1013_v3  ;;  %v7593_v10 = vpop.f32.mrb[3].mxu1 }
 0x119   : > { %6526 = vpow2.f32 %v5033_v0  ;;  %v5034_v9 = vmul.f32 -1.442695, %v1022_v2  ;;  %5982 = vmatmul.mubr.msk.bf16.gmra.mrb[92].mxu0 %vm927_vm0, %v6492_v59 }
 0x11a   : > { %6528 = vpow2.f32 %v5031_v5  ;;  %v5032_v11 = vmul.f32 -1.442695, %v1014_v7  ;;  %5987 = vmatprep.mubr.msk.bf16.mxu0 %vm927_vm0, %v6494_v63 }
 0x11b   : > { %6530 = vpow2.f32 %v5034_v9  ;;  %6118 = vmatmul.mubr.msk.bf16.gmra.mrb[44].mxu1 %vm927_vm0, %v6493_v4 }
 0x11c   : > { %6532 = vpow2.f32 %v5032_v11  ;;  %v5857_v12 = vpop.f32.mrb[4].mxu0  ;;  %6123 = vmatprep.mubr.msk.bf16.mxu1 %vm927_vm0, %v6495_v8  ;;  %v6504_v8 = vld [vmem:[%s7320_s24 + $0x128] sm:$0xff]  }
 0x11d   : > { %v1035_v13 = vadd.f32 %v5857_v12, %v7574_v55  ;;  %v1026_v14 = vpop.f32.mrb[5].mxu0  ;;  %v7607_v16 = vpop.f32.mrb[4].mxu1 }
 0x11e   : > { %v1027_v17 = vadd.f32 %v7574_v55, %v1026_v14  ;;  %v5858_v18 = vpop.f32.mrb[6].mxu0  ;;  %v7611_v21 = vpop.f32.mrb[5].mxu1 }
 0x11f   : > { %v5037_v20 = vmul.f32 -1.442695, %v1035_v13  ;;  %v1038_v22 = vadd.f32 %v5858_v18, %v7574_v55  ;;  %v1029_v23 = vpop.f32.mrb[7].mxu0  ;;  %v7620_v26 = vpop.f32.mrb[6].mxu1 }
 0x120   : > { %v5035_v25 = vmul.f32 -1.442695, %v1027_v17  ;;  %v1030_v27 = vadd.f32 %v7574_v55, %v1029_v23  ;;  %v7628_v30 = vpop.f32.mrb[7].mxu1  ;;  %v6505_v23 = vld [vmem:[%s7320_s24 + $0x28] sm:$0xff]  }
 0x121   : > { %6534 = vpow2.f32 %v5037_v20  ;;  %v5038_v29 = vmul.f32 -1.442695, %v1038_v22  ;;  %5988 = vmatmul.mubr.msk.bf16.vlgmr.msra.gmra.mrb[64].mxu0 %vm927_vm0, %v6496_v15  ;;  %v6506_v15 = vld [vmem:[%s7320_s24 + $0x130] sm:$0xff]  }
 0x122   : > { %6536 = vpow2.f32 %v5035_v25  ;;  %v5036_v31 = vmul.f32 -1.442695, %v1030_v27  ;;  %5991 = vmatprep.mubr.msk.bf16.mxu0 %vm927_vm0, %v6498_v19 }
 0x123   : > { %v6527_v32 = vpop.eup %6526  ;;  %6538 = vpow2.f32 %v5038_v29  ;;  %6124 = vmatmul.mubr.msk.bf16.vlgmr.msra.gmra.mrb[16].mxu1 %vm927_vm0, %v6497_v24  ;;  %v6507_v29 = vld [vmem:[%s7320_s24 + $0x30] sm:$0xff]  }
 0x124   : > { %v6529_v33 = vpop.eup %6528  ;;  %v1235_v34 = vadd.f32 1.0, %v6527_v32  ;;  %6540 = vpow2.f32 %v5036_v31  ;;  %v5861_v35 = vpop.f32.mrb[8].mxu0  ;;  %6127 = vmatprep.mubr.msk.bf16.mxu1 %vm927_vm0, %v6499_v28 }
 0x125   : > { %v6531_v36 = vpop.eup %6530  ;;  %v1233_v37 = vadd.f32 1.0, %v6529_v33  ;;  %v1051_v38 = vadd.f32 %v5861_v35, %v7574_v55  ;;  %v1042_v39 = vpop.f32.mrb[9].mxu0 }
 0x126   : > { %v6533_v41 = vpop.eup %6532  ;;  %6542 = vrcp.f32 %v1235_v34  ;;  %v1236_v42 = vadd.f32 1.0, %v6531_v36  ;;  %v7638_v43 = vpop.f32.mrb[8].mxu1  ;;  %v1043_v44 = vadd.f32 %v7574_v55, %v1042_v39 }
 0x127   : > { %v5862_v45 = vpop.f32.mrb[10].mxu0  ;;  %6544 = vrcp.f32 %v1233_v37  ;;  %v1234_v47 = vadd.f32 1.0, %v6533_v41  ;;  %v5041_v48 = vmul.f32 -1.442695, %v1051_v38  ;;  %v7642_v49 = vpop.f32.mrb[9].mxu1 }
 0x128   : > { %v1054_v50 = vadd.f32 %v5862_v45, %v7574_v55  ;;  %v1045_v51 = vpop.f32.mrb[11].mxu0  ;;  %6546 = vrcp.f32 %v1236_v42  ;;  %v5039_v53 = vmul.f32 -1.442695, %v1043_v44  ;;  %v7648_v54 = vpop.f32.mrb[10].mxu1  ;;  %v6508_v44 = vld [vmem:[%s7320_s24 + $0x138] sm:$0xff]  }
 0x129   : > { %v1046_v56 = vadd.f32 %v7574_v55, %v1045_v51  ;;  %6548 = vrcp.f32 %v1234_v47  ;;  %v7652_v59 = vpop.f32.mrb[11].mxu1  ;;  %5992 = vmatmul.mubr.msk.bf16.gmra.mrb[68].mxu0 %vm927_vm0, %v6500_v40 }
 0x12a   : > { %v5042_v58 = vmul.f32 -1.442695, %v1054_v50  ;;  %6550 = vpow2.f32 %v5041_v48  ;;  %5995 = vmatprep.mubr.msk.bf16.mxu0 %vm927_vm0, %v6502_v46  ;;  %v6510_v50 = vld [vmem:[%s7320_s24 + $0x140] sm:$0xff]  }
 0x12b   : > { %v5040_v61 = vmul.f32 -1.442695, %v1046_v56  ;;  %v6535_v62 = vpop.eup %6534  ;;  %6552 = vpow2.f32 %v5039_v53  ;;  %6128 = vmatmul.mubr.msk.bf16.gmra.mrb[20].mxu1 %vm927_vm0, %v6501_v52 }
 0x12c   : > { %v6537_v63 = vpop.eup %6536  ;;  %v1239_v0 = vadd.f32 1.0, %v6535_v62  ;;  %6554 = vpow2.f32 %v5042_v58  ;;  %v5865_v2 = vpop.f32.mrb[12].mxu0  ;;  %6131 = vmatprep.mubr.msk.bf16.mxu1 %vm927_vm0, %v6503_v57  ;;  %v6509_v58 = vld [vmem:[%s7320_s24 + $0x38] sm:$0xff]  }
 0x12d   : > { %v6539_v3 = vpop.eup %6538  ;;  %v1237_v4 = vadd.f32 1.0, %v6537_v63  ;;  %6556 = vpow2.f32 %v5040_v61  ;;  %v1067_v5 = vadd.f32 %v5865_v2, %v7574_v55  ;;  %v1058_v7 = vpop.f32.mrb[13].mxu0  ;;  %v6511_v2 = vld [vmem:[%s7320_s24 + $0x40] sm:$0xff]  }
 0x12e   : > { %v6541_v9 = vpop.eup %6540  ;;  %6558 = vrcp.f32 %v1239_v0  ;;  %v1240_v11 = vadd.f32 1.0, %v6539_v3  ;;  %v7666_v12 = vpop.f32.mrb[12].mxu1  ;;  %v1059_v13 = vadd.f32 %v7574_v55, %v1058_v7 }
 0x12f   : > { %v5866_v14 = vpop.f32.mrb[14].mxu0  ;;  %6560 = vrcp.f32 %v1237_v4  ;;  %v1238_v17 = vadd.f32 1.0, %v6541_v9  ;;  %v5045_v18 = vmul.f32 -1.442695, %v1067_v5  ;;  %v7670_v19 = vpop.f32.mrb[13].mxu1 }
 0x130   : > { %v1070_v20 = vadd.f32 %v5866_v14, %v7574_v55  ;;  %v1061_v22 = vpop.f32.mrb[15].mxu0  ;;  %v6543_v24 = vpop.eup %6542  ;;  %6562 = vrcp.f32 %v1240_v11  ;;  %v5043_v25 = vmul.f32 -1.442695, %v1059_v13 }
 0x131   : > { %v7674_v27 = vpop.f32.mrb[14].mxu1  ;;  %v1062_v28 = vadd.f32 %v7574_v55, %v1061_v22  ;;  %v6545_v31 = vpop.eup %6544  ;;  %1332 = vst.msk [vmem:[%s7664_s30 + $0x10] sm:$0xff] %vm1329_vm1, %v6543_v24  ;;  %6564 = vrcp.f32 %v1238_v17  ;;  %5996 = vmatmul.mubr.msk.bf16.gmra.mrb[72].mxu0 %vm927_vm0, %v6504_v8 }
 0x132   : > { %v5046_v32 = vmul.f32 -1.442695, %v1070_v20  ;;  %v7680_v33 = vpop.f32.mrb[15].mxu1  ;;  %v6547_v34 = vpop.eup %6546  ;;  %1330 = vst.msk [vmem:[%s7664_s30] sm:$0xff] %vm1329_vm1, %v6545_v31  ;;  %6566 = vpow2.f32 %v5045_v18  ;;  %5999 = vmatprep.mubr.msk.bf16.mxu0 %vm927_vm0, %v6506_v15  ;;  %v6512_v18 = vld [vmem:[%s7320_s24 + $0x148] sm:$0xff]  }
 0x133   : > { %v5044_v35 = vmul.f32 -1.442695, %v1062_v28  ;;  %v6549_v36 = vpop.eup %6548  ;;  %1333 = vst.msk [vmem:[%s7664_s30 + $0x18] sm:$0xff] %vm1329_vm1, %v6547_v34  ;;  %6568 = vpow2.f32 %v5043_v25  ;;  %6132 = vmatmul.mubr.msk.bf16.gmra.mrb[24].mxu1 %vm927_vm0, %v6505_v23  ;;  %v6514_v25 = vld [vmem:[%s7320_s24 + $0x150] sm:$0xff]  }
 0x134   : > { %v6551_v37 = vpop.eup %6550  ;;  %1331 = vst.msk [vmem:[%s7664_s30 + $0x8] sm:$0xff] %vm1329_vm1, %v6549_v36  ;;  %6570 = vpow2.f32 %v5046_v32  ;;  %v5869_v38 = vpop.f32.mrb[16].mxu0  ;;  %6135 = vmatprep.mubr.msk.bf16.mxu1 %vm927_vm0, %v6507_v29 }
 0x135   : > { %v6553_v39 = vpop.eup %6552  ;;  %v1243_v40 = vadd.f32 1.0, %v6551_v37  ;;  %6572 = vpow2.f32 %v5044_v35  ;;  %v1083_v41 = vadd.f32 %v5869_v38, %v7574_v55  ;;  %v1074_v42 = vpop.f32.mrb[17].mxu0  ;;  %v6513_v35 = vld [vmem:[%s7320_s24 + $0x48] sm:$0xff]  }
 0x136   : > { %v6555_v45 = vpop.eup %6554  ;;  %v1241_v46 = vadd.f32 1.0, %v6553_v39  ;;  %v1075_v47 = vadd.f32 %v7574_v55, %v1074_v42  ;;  %v5870_v48 = vpop.f32.mrb[18].mxu0  ;;  %v6515_v39 = vld [vmem:[%s7320_s24 + $0x50] sm:$0xff]  }
 0x137   : > { %v6557_v51 = vpop.eup %6556  ;;  %6574 = vrcp.f32 %v1243_v40  ;;  %v1244_v52 = vadd.f32 1.0, %v6555_v45  ;;  %v5049_v53 = vmul.f32 -1.442695, %v1083_v41  ;;  %v1086_v56 = vadd.f32 %v5870_v48, %v7574_v55  ;;  %v1077_v57 = vpop.f32.mrb[19].mxu0 }
 0x138   : > { %v6559_v61 = vpop.eup %6558  ;;  %6576 = vrcp.f32 %v1241_v46  ;;  %v1242_v62 = vadd.f32 1.0, %v6557_v51  ;;  %v5047_v63 = vmul.f32 -1.442695, %v1075_v47  ;;  %v1078_v0 = vadd.f32 %v7574_v55, %v1077_v57 }
 0x139   : > { %v6561_v3 = vpop.eup %6560  ;;  %1336 = vst.msk [vmem:[%s7664_s30 + $0x90] sm:$0xff] %vm1329_vm1, %v6559_v61  ;;  %6578 = vrcp.f32 %v1244_v52  ;;  %v5050_v4 = vmul.f32 -1.442695, %v1086_v56  ;;  %6000 = vmatmul.mubr.msk.bf16.gmra.mrb[76].mxu0 %vm927_vm0, %v6508_v44  ;;  %v6516_v52 = vld [vmem:[%s7320_s24 + $0x158] sm:$0xff]   ;;  %v6518_v61 = vld [vmem:[%s7320_s24 + $0x160] sm:$0xff]  }
 0x13a   : > { %v6563_v5 = vpop.eup %6562  ;;  %1334 = vst.msk [vmem:[%s7664_s30 + $0x80] sm:$0xff] %vm1329_vm1, %v6561_v3  ;;  %6580 = vrcp.f32 %v1242_v62  ;;  %v5048_v7 = vmul.f32 -1.442695, %v1078_v0  ;;  %6003 = vmatprep.mubr.msk.bf16.mxu0 %vm927_vm0, %v6510_v50  ;;  %v6517_v3 = vld [vmem:[%s7320_s24 + $0x58] sm:$0xff]  }
 0x13b   : > { %v6565_v8 = vpop.eup %6564  ;;  %1337 = vst.msk [vmem:[%s7664_s30 + $0x98] sm:$0xff] %vm1329_vm1, %v6563_v5  ;;  %6582 = vpow2.f32 %v5049_v53  ;;  %6136 = vmatmul.mubr.msk.bf16.gmra.mrb[28].mxu1 %vm927_vm0, %v6509_v58 }
 0x13c   : > { %v6567_v9 = vpop.eup %6566  ;;  %1335 = vst.msk [vmem:[%s7664_s30 + $0x88] sm:$0xff] %vm1329_vm1, %v6565_v8  ;;  %6584 = vpow2.f32 %v5047_v63  ;;  %v5873_v11 = vpop.f32.mrb[20].mxu0  ;;  %6139 = vmatprep.mubr.msk.bf16.mxu1 %vm927_vm0, %v6511_v2 }
 0x13d   : > { %v6569_v13 = vpop.eup %6568  ;;  %v1247_v14 = vadd.f32 1.0, %v6567_v9  ;;  %6586 = vpow2.f32 %v5050_v4  ;;  %v1099_v15 = vadd.f32 %v5873_v11, %v7574_v55  ;;  %v1090_v17 = vpop.f32.mrb[21].mxu0  ;;  %v6519_v9 = vld [vmem:[%s7320_s24 + $0x60] sm:$0xff]  }
 0x13e   : > { %v6571_v20 = vpop.eup %6570  ;;  %v1245_v22 = vadd.f32 1.0, %v6569_v13  ;;  %6588 = vpow2.f32 %v5048_v7  ;;  %v1091_v23 = vadd.f32 %v7574_v55, %v1090_v17  ;;  %v5874_v24 = vpop.f32.mrb[22].mxu0 }
 0x13f   : > { %v6573_v28 = vpop.eup %6572  ;;  %6590 = vrcp.f32 %v1247_v14  ;;  %v1248_v29 = vadd.f32 1.0, %v6571_v20  ;;  %v5053_v31 = vmul.f32 -1.442695, %v1099_v15  ;;  %v1102_v32 = vadd.f32 %v5874_v24, %v7574_v55  ;;  %v1093_v34 = vpop.f32.mrb[23].mxu0 }
 0x140   : > { %6592 = vrcp.f32 %v1245_v22  ;;  %v1246_v36 = vadd.f32 1.0, %v6573_v28  ;;  %v5051_v37 = vmul.f32 -1.442695, %v1091_v23  ;;  %v1094_v38 = vadd.f32 %v7574_v55, %v1093_v34 }
 0x141   : > { %v6575_v40 = vpop.eup %6574  ;;  %6594 = vrcp.f32 %v1248_v29  ;;  %v5054_v41 = vmul.f32 -1.442695, %v1102_v32  ;;  %6004 = vmatmul.mubr.msk.bf16.gmra.mrb[80].mxu0 %vm927_vm0, %v6512_v18  ;;  %v6520_v29 = vld [vmem:[%s7320_s24 + $0x168] sm:$0xff]  }
 0x142   : > { %v6577_v42 = vpop.eup %6576  ;;  %1340 = vst.msk [vmem:[%s7664_s30 + $0x110] sm:$0xff] %vm1329_vm1, %v6575_v40  ;;  %6596 = vrcp.f32 %v1246_v36  ;;  %v5052_v44 = vmul.f32 -1.442695, %v1094_v38  ;;  %6007 = vmatprep.mubr.msk.bf16.mxu0 %vm927_vm0, %v6514_v25  ;;  %v6522_v36 = vld [vmem:[%s7320_s24 + $0x170] sm:$0xff]  }
 0x143   : > { %v6579_v45 = vpop.eup %6578  ;;  %1338 = vst.msk [vmem:[%s7664_s30 + $0x100] sm:$0xff] %vm1329_vm1, %v6577_v42  ;;  %6598 = vpow2.f32 %v5053_v31  ;;  %6140 = vmatmul.mubr.msk.bf16.gmra.mrb[32].mxu1 %vm927_vm0, %v6513_v35 }
 0x144   : > { %v6581_v46 = vpop.eup %6580  ;;  %1341 = vst.msk [vmem:[%s7664_s30 + $0x118] sm:$0xff] %vm1329_vm1, %v6579_v45  ;;  %6600 = vpow2.f32 %v5051_v37  ;;  %v5877_v47 = vpop.f32.mrb[24].mxu0  ;;  %6143 = vmatprep.mubr.msk.bf16.mxu1 %vm927_vm0, %v6515_v39 }
 0x145   : > { %v6583_v48 = vpop.eup %6582  ;;  %1339 = vst.msk [vmem:[%s7664_s30 + $0x108] sm:$0xff] %vm1329_vm1, %v6581_v46  ;;  %6602 = vpow2.f32 %v5054_v41  ;;  %v1115_v50 = vadd.f32 %v5877_v47, %v7574_v55  ;;  %v1106_v51 = vpop.f32.mrb[25].mxu0  ;;  %v6521_v41 = vld [vmem:[%s7320_s24 + $0x68] sm:$0xff]   ;;  %v6523_v47 = vld [vmem:[%s7320_s24 + $0x70] sm:$0xff]  }
 0x146   : > { %v6585_v53 = vpop.eup %6584  ;;  %v1251_v56 = vadd.f32 1.0, %v6583_v48  ;;  %6604 = vpow2.f32 %v5052_v44  ;;  %v1107_v57 = vadd.f32 %v7574_v55, %v1106_v51  ;;  %v5878_v58 = vpop.f32.mrb[26].mxu0 }
 0x147   : > { %v6587_v62 = vpop.eup %6586  ;;  %v1249_v63 = vadd.f32 1.0, %v6585_v53  ;;  %v1118_v0 = vadd.f32 %v5878_v58, %v7574_v55  ;;  %v1109_v2 = vpop.f32.mrb[27].mxu0  ;;  %v5057_v7 = vmul.f32 -1.442695, %v1115_v50 }
 0x148   : > { %v6589_v4 = vpop.eup %6588  ;;  %6606 = vrcp.f32 %v1251_v56  ;;  %v1252_v5 = vadd.f32 1.0, %v6587_v62  ;;  %v1110_v8 = vadd.f32 %v7574_v55, %v1109_v2  ;;  %v5055_v14 = vmul.f32 -1.442695, %v1107_v57  ;;  %v6525_v2 = vld [vmem:[%s7320_s24 + $0x78] sm:$0xff]  }
 0x149   : > { %v6591_v11 = vpop.eup %6590  ;;  %6608 = vrcp.f32 %v1249_v63  ;;  %v1250_v13 = vadd.f32 1.0, %v6589_v4  ;;  %6008 = vmatmul.mubr.msk.bf16.gmra.mrb[84].mxu0 %vm927_vm0, %v6516_v52  ;;  %v5058_v17 = vmul.f32 -1.442695, %v1118_v0 }
 0x14a   : > { %v6593_v15 = vpop.eup %6592  ;;  %1344 = vst.msk [vmem:[%s7664_s30 + $0x190] sm:$0xff] %vm1329_vm1, %v6591_v11  ;;  %6610 = vrcp.f32 %v1252_v5  ;;  %6011 = vmatprep.mubr.msk.bf16.mxu0 %vm927_vm0, %v6518_v61  ;;  %v5056_v20 = vmul.f32 -1.442695, %v1110_v8  ;;  %v6524_v61 = vld [vmem:[%s7320_s24 + $0x178] sm:$0xff]  }
 0x14b   : > { %v6595_v18 = vpop.eup %6594  ;;  %1342 = vst.msk [vmem:[%s7664_s30 + $0x180] sm:$0xff] %vm1329_vm1, %v6593_v15  ;;  %6612 = vrcp.f32 %v1250_v13  ;;  %6144 = vmatmul.mubr.msk.bf16.gmra.mrb[36].mxu1 %vm927_vm0, %v6517_v3 }
 0x14c   : > { %v6597_v22 = vpop.eup %6596  ;;  %1345 = vst.msk [vmem:[%s7664_s30 + $0x198] sm:$0xff] %vm1329_vm1, %v6595_v18  ;;  %6614 = vpow2.f32 %v5057_v7  ;;  %v5881_v23 = vpop.f32.mrb[28].mxu0  ;;  %6147 = vmatprep.mubr.msk.bf16.mxu1 %vm927_vm0, %v6519_v9 }
 0x14d   : > { %v6599_v24 = vpop.eup %6598  ;;  %1343 = vst.msk [vmem:[%s7664_s30 + $0x188] sm:$0xff] %vm1329_vm1, %v6597_v22  ;;  %6616 = vpow2.f32 %v5055_v14  ;;  %v1131_v25 = vadd.f32 %v5881_v23, %v7574_v55  ;;  %v1122_v28 = vpop.f32.mrb[29].mxu0 }
 0x14e   : > { %v6601_v31 = vpop.eup %6600  ;;  %v1255_v32 = vadd.f32 1.0, %v6599_v24  ;;  %6618 = vpow2.f32 %v5058_v17  ;;  %v1123_v34 = vadd.f32 %v7574_v55, %v1122_v28  ;;  %v5882_v35 = vpop.f32.mrb[30].mxu0 }
 0x14f   : > { %v6603_v37 = vpop.eup %6602  ;;  %v1253_v38 = vadd.f32 1.0, %v6601_v31  ;;  %6620 = vpow2.f32 %v5056_v20  ;;  %v1134_v39 = vadd.f32 %v5882_v35, %v7574_v55  ;;  %v1125_v40 = vpop.f32.mrb[31].mxu0  ;;  %v5061_v45 = vmul.f32 -1.442695, %v1131_v25 }
 0x150   : > { %v6605_v42 = vpop.eup %6604  ;;  %6622 = vrcp.f32 %v1255_v32  ;;  %v1256_v44 = vadd.f32 1.0, %v6603_v37  ;;  %v1126_v46 = vadd.f32 %v7574_v55, %v1125_v40  ;;  %v5059_v50 = vmul.f32 -1.442695, %v1123_v34 }
 0x151   : > { %6624 = vrcp.f32 %v1253_v38  ;;  %v1254_v48 = vadd.f32 1.0, %v6605_v42  ;;  %6012 = vmatmul.mubr.msk.bf16.gmra.mrb[88].mxu0 %vm927_vm0, %v6520_v29  ;;  %v5062_v52 = vmul.f32 -1.442695, %v1134_v39 }
 0x152   : > { %v6607_v51 = vpop.eup %6606  ;;  %6626 = vrcp.f32 %v1256_v44  ;;  %6015 = vmatprep.mubr.msk.bf16.mxu0 %vm927_vm0, %v6522_v36  ;;  %v5060_v56 = vmul.f32 -1.442695, %v1126_v46 }
 0x153   : > { %v6609_v53 = vpop.eup %6608  ;;  %1348 = vst.msk [vmem:[%s7664_s30 + $0x210] sm:$0xff] %vm1329_vm1, %v6607_v51  ;;  %6628 = vrcp.f32 %v1254_v48  ;;  %6148 = vmatmul.mubr.msk.bf16.gmra.mrb[40].mxu1 %vm927_vm0, %v6521_v41 }
 0x154   : > { %v6611_v57 = vpop.eup %6610  ;;  %1346 = vst.msk [vmem:[%s7664_s30 + $0x200] sm:$0xff] %vm1329_vm1, %v6609_v53  ;;  %6630 = vpow2.f32 %v5061_v45  ;;  %6151 = vmatprep.mubr.msk.bf16.mxu1 %vm927_vm0, %v6523_v47 }
 0x155   : > { %v6613_v58 = vpop.eup %6612  ;;  %1349 = vst.msk [vmem:[%s7664_s30 + $0x218] sm:$0xff] %vm1329_vm1, %v6611_v57  ;;  %6632 = vpow2.f32 %v5059_v50 }
 0x156   : > { %v6615_v62 = vpop.eup %6614  ;;  %1347 = vst.msk [vmem:[%s7664_s30 + $0x208] sm:$0xff] %vm1329_vm1, %v6613_v58  ;;  %6634 = vpow2.f32 %v5062_v52 }
 0x157   : > { %v6617_v63 = vpop.eup %6616  ;;  %v1259_v0 = vadd.f32 1.0, %v6615_v62  ;;  %6636 = vpow2.f32 %v5060_v56 }
 0x158   : > { %v6619_v3 = vpop.eup %6618  ;;  %v1257_v4 = vadd.f32 1.0, %v6617_v63 }
 0x159   : > { %v6621_v5 = vpop.eup %6620  ;;  %6638 = vrcp.f32 %v1259_v0  ;;  %v1260_v7 = vadd.f32 1.0, %v6619_v3  ;;  %6016 = vmatmul.mubr.msk.bf16.gmra.mrb[92].mxu0 %vm927_vm0, %v6524_v61 }
 0x15a   : > { %v6623_v8 = vpop.eup %6622  ;;  %6640 = vrcp.f32 %v1257_v4  ;;  %v1258_v9 = vadd.f32 1.0, %v6621_v5 }
 0x15b   : > { %v6625_v11 = vpop.eup %6624  ;;  %1352 = vst.msk [vmem:[%s7664_s30 + $0x290] sm:$0xff] %vm1329_vm1, %v6623_v8  ;;  %6642 = vrcp.f32 %v1260_v7  ;;  %6152 = vmatmul.mubr.msk.bf16.gmra.mrb[44].mxu1 %vm927_vm0, %v6525_v2 }
 0x15c   : > { %v6627_v13 = vpop.eup %6626  ;;  %1350 = vst.msk [vmem:[%s7664_s30 + $0x280] sm:$0xff] %vm1329_vm1, %v6625_v11  ;;  %6644 = vrcp.f32 %v1258_v9 }
 0x15d   : > { %v6629_v14 = vpop.eup %6628  ;;  %1353 = vst.msk [vmem:[%s7664_s30 + $0x298] sm:$0xff] %vm1329_vm1, %v6627_v13 }
 0x15e   : > { %v6631_v15 = vpop.eup %6630  ;;  %1351 = vst.msk [vmem:[%s7664_s30 + $0x288] sm:$0xff] %vm1329_vm1, %v6629_v14 }
 0x15f   : > { %v6633_v17 = vpop.eup %6632  ;;  %v1263_v18 = vadd.f32 1.0, %v6631_v15 }
 0x160   : > { %v6635_v20 = vpop.eup %6634  ;;  %v1261_v22 = vadd.f32 1.0, %v6633_v17 }
 0x161   : > { %v6637_v23 = vpop.eup %6636  ;;  %6646 = vrcp.f32 %v1263_v18  ;;  %v1264_v24 = vadd.f32 1.0, %v6635_v20 }
 0x162   : > { %6648 = vrcp.f32 %v1261_v22  ;;  %v1262_v25 = vadd.f32 1.0, %v6637_v23 }
 0x163   : > { %v6639_v28 = vpop.eup %6638  ;;  %6650 = vrcp.f32 %v1264_v24 }
 0x164   : > { %v6641_v29 = vpop.eup %6640  ;;  %1356 = vst.msk [vmem:[%s7664_s30 + $0x310] sm:$0xff] %vm1329_vm1, %v6639_v28  ;;  %6652 = vrcp.f32 %v1262_v25 }
 0x165   : > { %v6643_v31 = vpop.eup %6642  ;;  %1354 = vst.msk [vmem:[%s7664_s30 + $0x300] sm:$0xff] %vm1329_vm1, %v6641_v29 }
 0x166   : > { %v6645_v32 = vpop.eup %6644  ;;  %1357 = vst.msk [vmem:[%s7664_s30 + $0x318] sm:$0xff] %vm1329_vm1, %v6643_v31 }
 0x167   : > { %1355 = vst.msk [vmem:[%s7664_s30 + $0x308] sm:$0xff] %vm1329_vm1, %v6645_v32 }
 0x16b   : > { %v6647_v34 = vpop.eup %6646 }
 0x16c   : > { %v6649_v35 = vpop.eup %6648  ;;  %1360 = vst.msk [vmem:[%s7664_s30 + $0x390] sm:$0xff] %vm1329_vm1, %v6647_v34 }
 0x16d   : > { %v6651_v36 = vpop.eup %6650  ;;  %1358 = vst.msk [vmem:[%s7664_s30 + $0x380] sm:$0xff] %vm1329_vm1, %v6649_v35 }
 0x16e   : > { %v6653_v37 = vpop.eup %6652  ;;  %1361 = vst.msk [vmem:[%s7664_s30 + $0x398] sm:$0xff] %vm1329_vm1, %v6651_v36 }
 0x16f   : > { %1359 = vst.msk [vmem:[%s7664_s30 + $0x388] sm:$0xff] %vm1329_vm1, %v6653_v37 }
 0x174   : > { %v5903_v38 = vpop.f32.mrb[48].mxu0 }
 0x175   : > { %v1969_v39 = vadd.f32 %v7581_v60, %v5903_v38  ;;  %v1665_v40 = vpop.f32.mrb[49].mxu0 }
 0x176   : > { %v1961_v41 = vadd.f32 %v7585_v1, %v1665_v40  ;;  %v5904_v42 = vpop.f32.mrb[50].mxu0 }
 0x177   : > { %v2041_v44 = vadd.f32 %v7574_v55, %v1969_v39  ;;  %v1972_v45 = vadd.f32 %v7589_v6, %v5904_v42  ;;  %v1668_v46 = vpop.f32.mrb[51].mxu0 }
 0x178   : > { %v2039_v47 = vadd.f32 %v7574_v55, %v1961_v41  ;;  %v1964_v48 = vadd.f32 %v7593_v10, %v1668_v46 }
 0x179   : > { %v5183_v50 = vmul.f32 -1.442695, %v2041_v44  ;;  %v2042_v51 = vadd.f32 %v7574_v55, %v1972_v45 }
 0x17a   : > { %v5181_v52 = vmul.f32 -1.442695, %v2039_v47  ;;  %v2040_v53 = vadd.f32 %v7574_v55, %v1964_v48 }
 0x17b   : > { %6654 = vpow2.f32 %v5183_v50  ;;  %v5184_v60 = vmul.f32 -1.442695, %v2042_v51 }
 0x17c   : > { %6656 = vpow2.f32 %v5181_v52  ;;  %v5182_v1 = vmul.f32 -1.442695, %v2040_v53  ;;  %v5907_v56 = vpop.f32.mrb[52].mxu0 }
 0x17d   : > { %6658 = vpow2.f32 %v5184_v60  ;;  %v1985_v57 = vadd.f32 %v7607_v16, %v5907_v56  ;;  %v1681_v6 = vpop.f32.mrb[53].mxu0 }
 0x17e   : > { %6660 = vpow2.f32 %v5182_v1  ;;  %v1977_v58 = vadd.f32 %v7611_v21, %v1681_v6  ;;  %v5908_v61 = vpop.f32.mrb[54].mxu0 }
 0x17f   : > { %v2045_v10 = vadd.f32 %v7574_v55, %v1985_v57  ;;  %v1988_v62 = vadd.f32 %v7620_v26, %v5908_v61  ;;  %v1684_v63 = vpop.f32.mrb[55].mxu0 }
 0x180   : > { %v2043_v0 = vadd.f32 %v7574_v55, %v1977_v58  ;;  %v1980_v2 = vadd.f32 %v7628_v30, %v1684_v63 }
 0x181   : > { %v5187_v3 = vmul.f32 -1.442695, %v2045_v10  ;;  %v2046_v4 = vadd.f32 %v7574_v55, %v1988_v62 }
 0x182   : > { %v5185_v5 = vmul.f32 -1.442695, %v2043_v0  ;;  %v2044_v16 = vadd.f32 %v7574_v55, %v1980_v2 }
 0x183   : > { %6662 = vpow2.f32 %v5187_v3  ;;  %v5188_v7 = vmul.f32 -1.442695, %v2046_v4 }
 0x184   : > { %6664 = vpow2.f32 %v5185_v5  ;;  %v5186_v21 = vmul.f32 -1.442695, %v2044_v16  ;;  %v5911_v8 = vpop.f32.mrb[56].mxu0 }
 0x185   : > { %v6655_v9 = vpop.eup %6654  ;;  %6666 = vpow2.f32 %v5188_v7  ;;  %v2001_v26 = vadd.f32 %v7638_v43, %v5911_v8  ;;  %v1697_v11 = vpop.f32.mrb[57].mxu0 }
 0x186   : > { %v6657_v13 = vpop.eup %6656  ;;  %v2169_v14 = vadd.f32 1.0, %v6655_v9  ;;  %6668 = vpow2.f32 %v5186_v21  ;;  %v1993_v30 = vadd.f32 %v7642_v49, %v1697_v11  ;;  %v5912_v15 = vpop.f32.mrb[58].mxu0 }
 0x187   : > { %v6659_v17 = vpop.eup %6658  ;;  %v2167_v18 = vadd.f32 1.0, %v6657_v13  ;;  %v2049_v20 = vadd.f32 %v7574_v55, %v2001_v26  ;;  %v2004_v22 = vadd.f32 %v7648_v54, %v5912_v15  ;;  %v1700_v23 = vpop.f32.mrb[59].mxu0 }
 0x188   : > { %v6661_v24 = vpop.eup %6660  ;;  %6670 = vrcp.f32 %v2169_v14  ;;  %v2170_v25 = vadd.f32 1.0, %v6659_v17  ;;  %v2047_v28 = vadd.f32 %v7574_v55, %v1993_v30  ;;  %v1996_v43 = vadd.f32 %v7652_v59, %v1700_v23 }
 0x189   : > { %6672 = vrcp.f32 %v2167_v18  ;;  %v2168_v29 = vadd.f32 1.0, %v6661_v24  ;;  %v5191_v31 = vmul.f32 -1.442695, %v2049_v20  ;;  %v2050_v49 = vadd.f32 %v7574_v55, %v2004_v22  ;;  %v7853_v24 = vld [vmem:[%s8257_s2] ss:$0 sm:$0xff] }
 0x18a   : > { %6674 = vrcp.f32 %v2170_v25  ;;  %v5189_v32 = vmul.f32 -1.442695, %v2047_v28  ;;  %v2048_v34 = vadd.f32 %v7574_v55, %v1996_v43 }
 0x18b   : > { %6676 = vrcp.f32 %v2168_v29  ;;  %v5192_v35 = vmul.f32 -1.442695, %v2050_v49 }
 0x18c   : > { %6678 = vpow2.f32 %v5191_v31  ;;  %v5190_v54 = vmul.f32 -1.442695, %v2048_v34  ;;  %v5915_v36 = vpop.f32.mrb[60].mxu0 }
 0x18d   : > { %v6663_v37 = vpop.eup %6662  ;;  %6680 = vpow2.f32 %v5189_v32  ;;  %v2017_v38 = vadd.f32 %v7666_v12, %v5915_v36  ;;  %v1713_v39 = vpop.f32.mrb[61].mxu0 }
 0x18e   : > { %v6665_v59 = vpop.eup %6664  ;;  %v2173_v40 = vadd.f32 1.0, %v6663_v37  ;;  %6682 = vpow2.f32 %v5192_v35  ;;  %v2009_v41 = vadd.f32 %v7670_v19, %v1713_v39  ;;  %v5916_v42 = vpop.f32.mrb[62].mxu0 }
 0x18f   : > { %v6667_v44 = vpop.eup %6666  ;;  %v2171_v45 = vadd.f32 1.0, %v6665_v59  ;;  %6684 = vpow2.f32 %v5190_v54  ;;  %v2053_v46 = vadd.f32 %v7574_v55, %v2017_v38  ;;  %v2020_v47 = vadd.f32 %v7674_v27, %v5916_v42  ;;  %v1716_v48 = vpop.f32.mrb[63].mxu0 }
 0x190   : > { %v6669_v50 = vpop.eup %6668  ;;  %6686 = vrcp.f32 %v2173_v40  ;;  %v2174_v51 = vadd.f32 1.0, %v6667_v44  ;;  %v2051_v12 = vadd.f32 %v7574_v55, %v2009_v41  ;;  %v2012_v52 = vadd.f32 %v7680_v33, %v1716_v48 }
 0x191   : > { %6688 = vrcp.f32 %v2171_v45  ;;  %v2172_v19 = vadd.f32 1.0, %v6669_v50  ;;  %v5195_v53 = vmul.f32 -1.442695, %v2053_v46  ;;  %v2054_v60 = vadd.f32 %v7574_v55, %v2020_v47 }
 0x192   : > { %v6671_v1 = vpop.eup %6670  ;;  %6690 = vrcp.f32 %v2174_v51  ;;  %v5193_v56 = vmul.f32 -1.442695, %v2051_v12  ;;  %v2052_v27 = vadd.f32 %v7574_v55, %v2012_v52 }
 0x193   : > { %v6673_v57 = vpop.eup %6672  ;;  %5215 = vst.msk [vmem:[%s7664_s30 + $0x230] sm:$0xff] %vm1329_vm1, %v6671_v1  ;;  %6692 = vrcp.f32 %v2172_v19  ;;  %v5196_v6 = vmul.f32 -1.442695, %v2054_v60 }
 0x194   : > { %v6675_v58 = vpop.eup %6674  ;;  %5213 = vst.msk [vmem:[%s7664_s30 + $0x220] sm:$0xff] %vm1329_vm1, %v6673_v57  ;;  %6694 = vpow2.f32 %v5195_v53  ;;  %v5194_v33 = vmul.f32 -1.442695, %v2052_v27  ;;  %v5921_v61 = vpop.f32.mrb[32].mxu0 }
 0x195   : > { %v6677_v10 = vpop.eup %6676  ;;  %5216 = vst.msk [vmem:[%s7664_s30 + $0x238] sm:$0xff] %vm1329_vm1, %v6675_v58  ;;  %6696 = vpow2.f32 %v5193_v56  ;;  %v2025_v62 = vadd.f32 %v5921_v61, %v7574_v55  ;;  %v1896_v63 = vpop.f32.mrb[33].mxu0 }
 0x196   : > { %v6679_v0 = vpop.eup %6678  ;;  %5214 = vst.msk [vmem:[%s7664_s30 + $0x228] sm:$0xff] %vm1329_vm1, %v6677_v10  ;;  %6698 = vpow2.f32 %v5196_v6  ;;  %v2023_v2 = vadd.f32 %v7574_v55, %v1896_v63  ;;  %v5922_v3 = vpop.f32.mrb[34].mxu0 }
 0x197   : > { %v6681_v4 = vpop.eup %6680  ;;  %v2177_v5 = vadd.f32 1.0, %v6679_v0  ;;  %6700 = vpow2.f32 %v5194_v33  ;;  %v2026_v16 = vadd.f32 %v5922_v3, %v7574_v55  ;;  %v1899_v7 = vpop.f32.mrb[35].mxu0  ;;  %v5167_v13 = vmul.f32 -1.442695, %v2025_v62 }
 0x198   : > { %v6683_v21 = vpop.eup %6682  ;;  %v2175_v8 = vadd.f32 1.0, %v6681_v4  ;;  %v2024_v9 = vadd.f32 %v7574_v55, %v1899_v7  ;;  %v5165_v15 = vmul.f32 -1.442695, %v2023_v2 }
 0x199   : > { %v6685_v26 = vpop.eup %6684  ;;  %6702 = vrcp.f32 %v2177_v5  ;;  %v2178_v11 = vadd.f32 1.0, %v6683_v21  ;;  %v5168_v18 = vmul.f32 -1.442695, %v2026_v16 }
 0x19a   : > { %v6687_v14 = vpop.eup %6686  ;;  %6704 = vrcp.f32 %v2175_v8  ;;  %v2176_v30 = vadd.f32 1.0, %v6685_v26  ;;  %v5166_v55 = vmul.f32 -1.442695, %v2024_v9 }
 0x19b   : > { %v6689_v17 = vpop.eup %6688  ;;  %5219 = vst.msk [vmem:[%s7664_s30 + $0x2b0] sm:$0xff] %vm1329_vm1, %v6687_v14  ;;  %6706 = vrcp.f32 %v2178_v11 }
 0x19c   : > { %v6691_v20 = vpop.eup %6690  ;;  %5217 = vst.msk [vmem:[%s7664_s30 + $0x2a0] sm:$0xff] %vm1329_vm1, %v6689_v17  ;;  %6708 = vrcp.f32 %v2176_v30  ;;  %v5925_v22 = vpop.f32.mrb[36].mxu0 }
 0x19d   : > { %v6693_v23 = vpop.eup %6692  ;;  %5220 = vst.msk [vmem:[%s7664_s30 + $0x2b8] sm:$0xff] %vm1329_vm1, %v6691_v20  ;;  %6710 = vpow2.f32 %v5167_v13  ;;  %v2029_v25 = vadd.f32 %v7853_v24, %v5925_v22  ;;  %v1912_v28 = vpop.f32.mrb[37].mxu0 }
 0x19e   : > { %v6695_v43 = vpop.eup %6694  ;;  %5218 = vst.msk [vmem:[%s7664_s30 + $0x2a8] sm:$0xff] %vm1329_vm1, %v6693_v23  ;;  %6712 = vpow2.f32 %v5165_v15  ;;  %v2027_v29 = vadd.f32 %v7853_v24, %v1912_v28  ;;  %v5926_v31 = vpop.f32.mrb[38].mxu0 }
 0x19f   : > { %v6697_v49 = vpop.eup %6696  ;;  %v2181_v32 = vadd.f32 1.0, %v6695_v43  ;;  %6714 = vpow2.f32 %v5168_v18  ;;  %v2030_v34 = vadd.f32 %v7853_v24, %v5926_v31  ;;  %v1915_v35 = vpop.f32.mrb[39].mxu0  ;;  %v5171_v59 = vmul.f32 -1.442695, %v2029_v25 }
 0x1a0   : > { %v6699_v54 = vpop.eup %6698  ;;  %v2179_v36 = vadd.f32 1.0, %v6697_v49  ;;  %6716 = vpow2.f32 %v5166_v55  ;;  %v2028_v37 = vadd.f32 %v7853_v24, %v1915_v35  ;;  %v5169_v41 = vmul.f32 -1.442695, %v2027_v29 }
 0x1a1   : > { %v6701_v38 = vpop.eup %6700  ;;  %6718 = vrcp.f32 %v2181_v32  ;;  %v2182_v39 = vadd.f32 1.0, %v6699_v54  ;;  %v5172_v44 = vmul.f32 -1.442695, %v2030_v34 }
 0x1a2   : > { %6720 = vrcp.f32 %v2179_v36  ;;  %v2180_v40 = vadd.f32 1.0, %v6701_v38  ;;  %v5170_v46 = vmul.f32 -1.442695, %v2028_v37 }
 0x1a3   : > { %v6703_v42 = vpop.eup %6702  ;;  %6722 = vrcp.f32 %v2182_v39 }
 0x1a4   : > { %v6705_v45 = vpop.eup %6704  ;;  %5223 = vst.msk [vmem:[%s7664_s30 + $0x330] sm:$0xff] %vm1329_vm1, %v6703_v42  ;;  %6724 = vrcp.f32 %v2180_v40  ;;  %v5929_v47 = vpop.f32.mrb[40].mxu0 }
 0x1a5   : > { %v6707_v48 = vpop.eup %6706  ;;  %5221 = vst.msk [vmem:[%s7664_s30 + $0x320] sm:$0xff] %vm1329_vm1, %v6705_v45  ;;  %6726 = vpow2.f32 %v5171_v59  ;;  %v2033_v50 = vadd.f32 %v7853_v24, %v5929_v47  ;;  %v1928_v51 = vpop.f32.mrb[41].mxu0 }
 0x1a6   : > { %v6709_v12 = vpop.eup %6708  ;;  %5224 = vst.msk [vmem:[%s7664_s30 + $0x338] sm:$0xff] %vm1329_vm1, %v6707_v48  ;;  %6728 = vpow2.f32 %v5169_v41  ;;  %v2031_v52 = vadd.f32 %v7853_v24, %v1928_v51  ;;  %v5930_v19 = vpop.f32.mrb[42].mxu0 }
 0x1a7   : > { %v6711_v53 = vpop.eup %6710  ;;  %5222 = vst.msk [vmem:[%s7664_s30 + $0x328] sm:$0xff] %vm1329_vm1, %v6709_v12  ;;  %6730 = vpow2.f32 %v5172_v44  ;;  %v5175_v60 = vmul.f32 -1.442695, %v2033_v50  ;;  %v2034_v1 = vadd.f32 %v7853_v24, %v5930_v19  ;;  %v1931_v56 = vpop.f32.mrb[43].mxu0 }
 0x1a8   : > { %v6713_v27 = vpop.eup %6712  ;;  %v2153_v57 = vadd.f32 1.0, %v6711_v53  ;;  %6732 = vpow2.f32 %v5170_v46  ;;  %v2032_v6 = vadd.f32 %v7853_v24, %v1931_v56  ;;  %v5173_v62 = vmul.f32 -1.442695, %v2031_v52 }
 0x1a9   : > { %v6715_v58 = vpop.eup %6714  ;;  %v2151_v33 = vadd.f32 1.0, %v6713_v27  ;;  %6734 = vpow2.f32 %v5175_v60  ;;  %v5176_v2 = vmul.f32 -1.442695, %v2034_v1 }
 0x1aa   : > { %v6717_v61 = vpop.eup %6716  ;;  %6736 = vrcp.f32 %v2153_v57  ;;  %v2154_v10 = vadd.f32 1.0, %v6715_v58  ;;  %v5174_v4 = vmul.f32 -1.442695, %v2032_v6 }
 0x1ab   : > { %v6719_v63 = vpop.eup %6718  ;;  %6738 = vrcp.f32 %v2151_v33  ;;  %v2152_v0 = vadd.f32 1.0, %v6717_v61 }
 0x1ac   : > { %v6721_v3 = vpop.eup %6720  ;;  %5227 = vst.msk [vmem:[%s7664_s30 + $0x3b0] sm:$0xff] %vm1329_vm1, %v6719_v63  ;;  %6740 = vrcp.f32 %v2154_v10  ;;  %v5933_v5 = vpop.f32.mrb[44].mxu0 }
 0x1ad   : > { %v6723_v16 = vpop.eup %6722  ;;  %5225 = vst.msk [vmem:[%s7664_s30 + $0x3a0] sm:$0xff] %vm1329_vm1, %v6721_v3  ;;  %6742 = vrcp.f32 %v2152_v0  ;;  %v2037_v7 = vadd.f32 %v7853_v24, %v5933_v5  ;;  %v1944_v21 = vpop.f32.mrb[45].mxu0 }
 0x1ae   : > { %v6725_v8 = vpop.eup %6724  ;;  %5228 = vst.msk [vmem:[%s7664_s30 + $0x3b8] sm:$0xff] %vm1329_vm1, %v6723_v16  ;;  %6744 = vpow2.f32 %v5173_v62  ;;  %v5934_v9 = vpop.f32.mrb[46].mxu0  ;;  %v2035_v13 = vadd.f32 %v7853_v24, %v1944_v21 }
 0x1af   : > { %v6727_v26 = vpop.eup %6726  ;;  %5226 = vst.msk [vmem:[%s7664_s30 + $0x3a8] sm:$0xff] %vm1329_vm1, %v6725_v8  ;;  %6746 = vpow2.f32 %v5176_v2  ;;  %v5179_v11 = vmul.f32 -1.442695, %v2037_v7  ;;  %v1947_v14 = vpop.f32.mrb[47].mxu0  ;;  %v2038_v17 = vadd.f32 %v7853_v24, %v5934_v9 }
 0x1b0   : > { %v6729_v30 = vpop.eup %6728  ;;  %v2157_v15 = vadd.f32 1.0, %v6727_v26  ;;  %6748 = vpow2.f32 %v5174_v4  ;;  %v2036_v55 = vadd.f32 %v7853_v24, %v1947_v14  ;;  %v5177_v43 = vmul.f32 -1.442695, %v2035_v13 }
 0x1b1   : > { %v6731_v18 = vpop.eup %6730  ;;  %v2155_v20 = vadd.f32 1.0, %v6729_v30  ;;  %6750 = vpow2.f32 %v5179_v11  ;;  %v5180_v49 = vmul.f32 -1.442695, %v2038_v17 }
 0x1b2   : > { %v6733_v22 = vpop.eup %6732  ;;  %6752 = vrcp.f32 %v2157_v15  ;;  %v2158_v23 = vadd.f32 1.0, %v6731_v18  ;;  %v5178_v34 = vmul.f32 -1.442695, %v2036_v55 }
 0x1b3   : > { %v6735_v25 = vpop.eup %6734  ;;  %6754 = vrcp.f32 %v2155_v20  ;;  %v2156_v28 = vadd.f32 1.0, %v6733_v22 }
 0x1b4   : > { %v6737_v29 = vpop.eup %6736  ;;  %6756 = vrcp.f32 %v2158_v23  ;;  %v2161_v31 = vadd.f32 1.0, %v6735_v25 }
 0x1b5   : > { %v6739_v32 = vpop.eup %6738  ;;  %5199 = vst.msk [vmem:[%s7664_s30 + $0x30] sm:$0xff] %vm1329_vm1, %v6737_v29  ;;  %6758 = vrcp.f32 %v2156_v28 }
 0x1b6   : > { %v6741_v35 = vpop.eup %6740  ;;  %5197 = vst.msk [vmem:[%s7664_s30 + $0x20] sm:$0xff] %vm1329_vm1, %v6739_v32  ;;  %6760 = vrcp.f32 %v2161_v31 }
 0x1b7   : > { %v6743_v54 = vpop.eup %6742  ;;  %5200 = vst.msk [vmem:[%s7664_s30 + $0x38] sm:$0xff] %vm1329_vm1, %v6741_v35  ;;  %6762 = vpow2.f32 %v5177_v43 }
 0x1b8   : > { %v6745_v36 = vpop.eup %6744  ;;  %5198 = vst.msk [vmem:[%s7664_s30 + $0x28] sm:$0xff] %vm1329_vm1, %v6743_v54  ;;  %6764 = vpow2.f32 %v5180_v49 }
 0x1b9   : > { %v6747_v37 = vpop.eup %6746  ;;  %v2159_v38 = vadd.f32 1.0, %v6745_v36  ;;  %6766 = vpow2.f32 %v5178_v34 }
 0x1ba   : > { %v6749_v39 = vpop.eup %6748  ;;  %v2162_v59 = vadd.f32 1.0, %v6747_v37 }
 0x1bb   : > { %v6751_v40 = vpop.eup %6750  ;;  %6768 = vrcp.f32 %v2159_v38  ;;  %v2160_v41 = vadd.f32 1.0, %v6749_v39 }
 0x1bc   : > { %v6753_v42 = vpop.eup %6752  ;;  %6770 = vrcp.f32 %v2162_v59  ;;  %v2165_v44 = vadd.f32 1.0, %v6751_v40 }
 0x1bd   : > { %v6755_v45 = vpop.eup %6754  ;;  %5203 = vst.msk [vmem:[%s7664_s30 + $0xb0] sm:$0xff] %vm1329_vm1, %v6753_v42  ;;  %6772 = vrcp.f32 %v2160_v41 }
 0x1be   : > { %v6757_v46 = vpop.eup %6756  ;;  %5201 = vst.msk [vmem:[%s7664_s30 + $0xa0] sm:$0xff] %vm1329_vm1, %v6755_v45  ;;  %6774 = vrcp.f32 %v2165_v44 }
 0x1bf   : > { %v6759_v47 = vpop.eup %6758  ;;  %5204 = vst.msk [vmem:[%s7664_s30 + $0xb8] sm:$0xff] %vm1329_vm1, %v6757_v46 }
 0x1c0   : > { %v6761_v48 = vpop.eup %6760  ;;  %5202 = vst.msk [vmem:[%s7664_s30 + $0xa8] sm:$0xff] %vm1329_vm1, %v6759_v47 }
 0x1c1   : > { %v6763_v50 = vpop.eup %6762  ;;  %5207 = vst.msk [vmem:[%s7664_s30 + $0x130] sm:$0xff] %vm1329_vm1, %v6761_v48 }
 0x1c2   : > { %v6765_v51 = vpop.eup %6764  ;;  %v2163_v12 = vadd.f32 1.0, %v6763_v50 }
 0x1c3   : > { %v6767_v52 = vpop.eup %6766  ;;  %v2166_v19 = vadd.f32 1.0, %v6765_v51 }
 0x1c4   : > { %6776 = vrcp.f32 %v2163_v12  ;;  %v2164_v53 = vadd.f32 1.0, %v6767_v52 }
 0x1c5   : > { %v6769_v60 = vpop.eup %6768  ;;  %6778 = vrcp.f32 %v2166_v19 }
 0x1c6   : > { %v6771_v1 = vpop.eup %6770  ;;  %5205 = vst.msk [vmem:[%s7664_s30 + $0x120] sm:$0xff] %vm1329_vm1, %v6769_v60  ;;  %6780 = vrcp.f32 %v2164_v53 }
 0x1c7   : > { %v6773_v56 = vpop.eup %6772  ;;  %5208 = vst.msk [vmem:[%s7664_s30 + $0x138] sm:$0xff] %vm1329_vm1, %v6771_v1 }
 0x1c8   : > { %v6775_v27 = vpop.eup %6774  ;;  %5206 = vst.msk [vmem:[%s7664_s30 + $0x128] sm:$0xff] %vm1329_vm1, %v6773_v56 }
 0x1c9   : > { %5211 = vst.msk [vmem:[%s7664_s30 + $0x1b0] sm:$0xff] %vm1329_vm1, %v6775_v27 }
 0x1ce   : > { %v6777_v57 = vpop.eup %6776 }
 0x1cf   : > { %v6779_v6 = vpop.eup %6778  ;;  %5209 = vst.msk [vmem:[%s7664_s30 + $0x1a0] sm:$0xff] %vm1329_vm1, %v6777_v57 }
 0x1d0   : > { %v6781_v58 = vpop.eup %6780  ;;  %5212 = vst.msk [vmem:[%s7664_s30 + $0x1b8] sm:$0xff] %vm1329_vm1, %v6779_v6 }
 0x1d1   : > { %5210 = vst.msk [vmem:[%s7664_s30 + $0x1a8] sm:$0xff] %vm1329_vm1, %v6781_v58 }
 0x1f4   : > { %v5989_v33 = vpop.f32.mrb[64].mxu0 }
 0x1f5   : > { %v2943_v61 = vadd.f32 %v7853_v24, %v5989_v33  ;;  %v2814_v10 = vpop.f32.mrb[65].mxu0 }
 0x1f6   : > { %v6125_v62 = vpop.f32.mrb[16].mxu1  ;;  %v2941_v63 = vadd.f32 %v7853_v24, %v2814_v10  ;;  %v5990_v0 = vpop.f32.mrb[66].mxu0 }
 0x1f7   : > { %v5333_v2 = vmul.f32 -1.442695, %v2943_v61  ;;  %v4584_v3 = vadd.f32 %v7853_v24, %v6125_v62  ;;  %v4423_v4 = vpop.f32.mrb[17].mxu1  ;;  %v2944_v5 = vadd.f32 %v7853_v24, %v5990_v0  ;;  %v2817_v16 = vpop.f32.mrb[67].mxu0 }
 0x1f8   : > { %v5331_v7 = vmul.f32 -1.442695, %v2941_v63  ;;  %v4582_v21 = vadd.f32 %v7853_v24, %v4423_v4  ;;  %v6126_v8 = vpop.f32.mrb[18].mxu1  ;;  %v2942_v9 = vadd.f32 %v7853_v24, %v2817_v16 }
 0x1f9   : > { %6782 = vpow2.f32 %v5333_v2  ;;  %v5631_v26 = vmul.f32 -1.442695, %v4584_v3  ;;  %v5334_v11 = vmul.f32 -1.442695, %v2944_v5  ;;  %v4585_v13 = vadd.f32 %v7853_v24, %v6126_v8  ;;  %v4426_v14 = vpop.f32.mrb[19].mxu1 }
 0x1fa   : > { %6784 = vpow2.f32 %v5331_v7  ;;  %v5629_v30 = vmul.f32 -1.442695, %v4582_v21  ;;  %v4583_v15 = vadd.f32 %v7853_v24, %v4426_v14  ;;  %v5332_v18 = vmul.f32 -1.442695, %v2942_v9 }
 0x1fb   : > { %6786 = vpow2.f32 %v5631_v26  ;;  %v5632_v17 = vmul.f32 -1.442695, %v4585_v13 }
 0x1fc   : > { %6788 = vpow2.f32 %v5629_v30  ;;  %v5630_v20 = vmul.f32 -1.442695, %v4583_v15  ;;  %v5993_v55 = vpop.f32.mrb[68].mxu0 }
 0x1fd   : > { %6790 = vpow2.f32 %v5334_v11  ;;  %v2947_v22 = vadd.f32 %v7853_v24, %v5993_v55  ;;  %v2830_v23 = vpop.f32.mrb[69].mxu0 }
 0x1fe   : > { %6792 = vpow2.f32 %v5632_v17  ;;  %v6129_v25 = vpop.f32.mrb[20].mxu1  ;;  %v2945_v28 = vadd.f32 %v7853_v24, %v2830_v23  ;;  %v5994_v43 = vpop.f32.mrb[70].mxu0 }
 0x1ff   : > { %6794 = vpow2.f32 %v5332_v18  ;;  %v5337_v29 = vmul.f32 -1.442695, %v2947_v22  ;;  %v4588_v31 = vadd.f32 %v7853_v24, %v6129_v25  ;;  %v4439_v49 = vpop.f32.mrb[21].mxu1  ;;  %v2948_v32 = vadd.f32 %v7853_v24, %v5994_v43  ;;  %v2833_v34 = vpop.f32.mrb[71].mxu0 }
 0x200   : > { %6796 = vpow2.f32 %v5630_v20  ;;  %v5335_v35 = vmul.f32 -1.442695, %v2945_v28  ;;  %v4586_v54 = vadd.f32 %v7853_v24, %v4439_v49  ;;  %v6130_v36 = vpop.f32.mrb[22].mxu1  ;;  %v2946_v3 = vadd.f32 %v7853_v24, %v2833_v34 }
 0x201   : > { %6798 = vpow2.f32 %v5337_v29  ;;  %v5635_v37 = vmul.f32 -1.442695, %v4588_v31  ;;  %v5338_v38 = vmul.f32 -1.442695, %v2948_v32  ;;  %v4442_v39 = vpop.f32.mrb[23].mxu1  ;;  %v4589_v63 = vadd.f32 %v7853_v24, %v6130_v36 }
 0x202   : > { %6800 = vpow2.f32 %v5335_v35  ;;  %v5633_v59 = vmul.f32 -1.442695, %v4586_v54  ;;  %v4587_v7 = vadd.f32 %v7853_v24, %v4442_v39  ;;  %v5336_v23 = vmul.f32 -1.442695, %v2946_v3 }
 0x203   : > { %v6783_v40 = vpop.eup %6782  ;;  %6802 = vpow2.f32 %v5635_v37  ;;  %v5636_v15 = vmul.f32 -1.442695, %v4589_v63 }
 0x204   : > { %v6785_v41 = vpop.eup %6784  ;;  %v3071_v42 = vadd.f32 1.0, %v6783_v40  ;;  %6804 = vpow2.f32 %v5633_v59  ;;  %v5997_v44 = vpop.f32.mrb[72].mxu0  ;;  %v5634_v29 = vmul.f32 -1.442695, %v4587_v7 }
 0x205   : > { %v6787_v45 = vpop.eup %6786  ;;  %v3069_v46 = vadd.f32 1.0, %v6785_v41  ;;  %6806 = vpow2.f32 %v5338_v38  ;;  %v2846_v47 = vpop.f32.mrb[73].mxu0  ;;  %v2951_v26 = vadd.f32 %v7853_v24, %v5997_v44 }
 0x206   : > { %v6789_v48 = vpop.eup %6788  ;;  %6808 = vrcp.f32 %v3071_v42  ;;  %v4712_v50 = vadd.f32 1.0, %v6787_v45  ;;  %v6133_v51 = vpop.f32.mrb[24].mxu1  ;;  %v2949_v25 = vadd.f32 %v7853_v24, %v2846_v47 }
 0x207   : > { %v5998_v12 = vpop.f32.mrb[74].mxu0  ;;  %v6791_v52 = vpop.eup %6790  ;;  %6810 = vrcp.f32 %v3069_v46  ;;  %v4710_v19 = vadd.f32 1.0, %v6789_v48  ;;  %v4592_v17 = vadd.f32 %v7853_v24, %v6133_v51  ;;  %v5341_v34 = vmul.f32 -1.442695, %v2951_v26 }
 0x208   : > { %v4455_v53 = vpop.f32.mrb[25].mxu1  ;;  %v7930_v60 = vpop.f32.mrb[75].mxu0  ;;  %6812 = vrcp.f32 %v4712_v50  ;;  %v3072_v56 = vadd.f32 1.0, %v6791_v52  ;;  %v2952_v35 = vadd.f32 %v7853_v24, %v5998_v12  ;;  %v5339_v39 = vmul.f32 -1.442695, %v2949_v25 }
 0x209   : > { %v6793_v1 = vpop.eup %6792  ;;  %v6134_v27 = vpop.f32.mrb[26].mxu1  ;;  %6814 = vrcp.f32 %v4710_v19  ;;  %v4590_v31 = vadd.f32 %v7853_v24, %v4455_v53  ;;  %v5639_v36 = vmul.f32 -1.442695, %v4592_v17  ;;  %v2950_v59 = vadd.f32 %v7853_v24, %v7930_v60 }
 0x20a   : > { %v6795_v57 = vpop.eup %6794  ;;  %v4713_v6 = vadd.f32 1.0, %v6793_v1  ;;  %v7932_v58 = vpop.f32.mrb[27].mxu1  ;;  %6816 = vrcp.f32 %v3072_v56  ;;  %v4593_v37 = vadd.f32 %v7853_v24, %v6134_v27  ;;  %v5342_v47 = vmul.f32 -1.442695, %v2952_v35 }
 0x20b   : > { %v6797_v33 = vpop.eup %6796  ;;  %v3070_v61 = vadd.f32 1.0, %v6795_v57  ;;  %v5637_v42 = vmul.f32 -1.442695, %v4590_v31  ;;  %v4591_v44 = vadd.f32 %v7853_v24, %v7932_v58  ;;  %v5340_v56 = vmul.f32 -1.442695, %v2950_v59 }
 0x20c   : > { %v6799_v10 = vpop.eup %6798  ;;  %6818 = vrcp.f32 %v4713_v6  ;;  %v4711_v62 = vadd.f32 1.0, %v6797_v33  ;;  %v6001_v4 = vpop.f32.mrb[76].mxu0  ;;  %v5640_v52 = vmul.f32 -1.442695, %v4593_v37 }
 0x20d   : > { %v6801_v0 = vpop.eup %6800  ;;  %6820 = vrcp.f32 %v3070_v61  ;;  %v3075_v2 = vadd.f32 1.0, %v6799_v10  ;;  %v7937_v21 = vpop.f32.mrb[77].mxu0  ;;  %v2955_v48 = vadd.f32 %v7853_v24, %v6001_v4  ;;  %v5638_v6 = vmul.f32 -1.442695, %v4591_v44 }
 0x20e   : > { %v6803_v5 = vpop.eup %6802  ;;  %6822 = vrcp.f32 %v4711_v62  ;;  %v3073_v16 = vadd.f32 1.0, %v6801_v0  ;;  %v6137_v11 = vpop.f32.mrb[28].mxu1 }
 0x20f   : > { %v6805_v8 = vpop.eup %6804  ;;  %6824 = vrcp.f32 %v3075_v2  ;;  %v4716_v9 = vadd.f32 1.0, %v6803_v5  ;;  %v7940_v13 = vpop.f32.mrb[78].mxu0  ;;  %v4596_v19 = vadd.f32 %v7853_v24, %v6137_v11  ;;  %v5345_v61 = vmul.f32 -1.442695, %v2955_v48 }
 0x210   : > { %v6807_v14 = vpop.eup %6806  ;;  %6826 = vrcp.f32 %v3073_v16  ;;  %v4714_v30 = vadd.f32 1.0, %v6805_v8  ;;  %v7943_v18 = vpop.f32.mrb[29].mxu1 }
 0x211   : > { %v7945_v20 = vpop.f32.mrb[79].mxu0  ;;  %v6809_v55 = vpop.eup %6808  ;;  %6828 = vrcp.f32 %v4716_v9  ;;  %v3076_v22 = vadd.f32 1.0, %v6807_v14  ;;  %v5643_v62 = vmul.f32 -1.442695, %v4596_v19  ;;  %v4594_v59 = vadd.f32 %v7853_v24, %v7943_v18 }
 0x212   : > { %v7948_v28 = vpop.f32.mrb[30].mxu1  ;;  %v6811_v43 = vpop.eup %6810  ;;  %5365 = vst.msk [vmem:[%s7664_s30 + $0x50] sm:$0xff] %vm1329_vm1, %v6809_v55  ;;  %6830 = vrcp.f32 %v4714_v30 }
 0x213   : > { %v7953_v49 = vpop.f32.mrb[31].mxu1  ;;  %v6813_v32 = vpop.eup %6812  ;;  %5363 = vst.msk [vmem:[%s7664_s30 + $0x40] sm:$0xff] %vm1329_vm1, %v6811_v43  ;;  %6832 = vrcp.f32 %v3076_v22  ;;  %v4597_v18 = vadd.f32 %v7853_v24, %v7948_v28 }
 0x214   : > { %v6815_v54 = vpop.eup %6814  ;;  %5663 = vst.msk [vmem:[%s7664_s30 + $0x70] sm:$0xff] %vm1329_vm1, %v6813_v32  ;;  %6834 = vpow2.f32 %v5636_v15  ;;  %v7965_v40 = vpop.f32.mrb[80].mxu0  ;;  %v4595_v28 = vadd.f32 %v7853_v24, %v7953_v49 }
 0x215   : > { %v6817_v38 = vpop.eup %6816  ;;  %5661 = vst.msk [vmem:[%s7664_s30 + $0x60] sm:$0xff] %vm1329_vm1, %v6815_v54  ;;  %6836 = vpow2.f32 %v5336_v23  ;;  %v7971_v45 = vpop.f32.mrb[81].mxu0 }
 0x216   : > { %v6819_v41 = vpop.eup %6818  ;;  %5366 = vst.msk [vmem:[%s7664_s30 + $0x58] sm:$0xff] %vm1329_vm1, %v6817_v38  ;;  %6838 = vpow2.f32 %v5634_v29  ;;  %v7976_v50 = vpop.f32.mrb[32].mxu1 }
 0x217   : > { %v6821_v46 = vpop.eup %6820  ;;  %5664 = vst.msk [vmem:[%s7664_s30 + $0x78] sm:$0xff] %vm1329_vm1, %v6819_v41  ;;  %6840 = vpow2.f32 %v5341_v34  ;;  %v7978_v51 = vpop.f32.mrb[82].mxu0 }
 0x218   : > { %v6823_v12 = vpop.eup %6822  ;;  %5364 = vst.msk [vmem:[%s7664_s30 + $0x48] sm:$0xff] %vm1329_vm1, %v6821_v46  ;;  %6842 = vpow2.f32 %v5639_v36  ;;  %v7983_v53 = vpop.f32.mrb[33].mxu1  ;;  %v2953_v36 = vadd.f32 %v7853_v24, %v7937_v21 }
 0x219   : > { %v7985_v60 = vpop.f32.mrb[83].mxu0  ;;  %v6825_v1 = vpop.eup %6824  ;;  %5662 = vst.msk [vmem:[%s7664_s30 + $0x68] sm:$0xff] %vm1329_vm1, %v6823_v12  ;;  %6844 = vpow2.f32 %v5339_v39 }
 0x21a   : > { %v7989_v27 = vpop.f32.mrb[34].mxu1  ;;  %v6827_v57 = vpop.eup %6826  ;;  %5369 = vst.msk [vmem:[%s7664_s30 + $0xd0] sm:$0xff] %vm1329_vm1, %v6825_v1  ;;  %6846 = vpow2.f32 %v5637_v42 }
 0x21b   : > { %v7993_v58 = vpop.f32.mrb[35].mxu1  ;;  %v6829_v33 = vpop.eup %6828  ;;  %5367 = vst.msk [vmem:[%s7664_s30 + $0xc0] sm:$0xff] %vm1329_vm1, %v6827_v57  ;;  %6848 = vpow2.f32 %v5342_v47  ;;  %v2956_v47 = vadd.f32 %v7853_v24, %v7940_v13  ;;  %v5343_v57 = vmul.f32 -1.442695, %v2953_v36  ;;  %v2954_v13 = vadd.f32 %v7853_v24, %v7945_v20 }
 0x21c   : > { %v6831_v10 = vpop.eup %6830  ;;  %5667 = vst.msk [vmem:[%s7664_s30 + $0xf0] sm:$0xff] %vm1329_vm1, %v6829_v33  ;;  %6850 = vpow2.f32 %v5640_v52  ;;  %v8001_v0 = vpop.f32.mrb[84].mxu0 }
 0x21d   : > { %v6833_v63 = vpop.eup %6832  ;;  %5665 = vst.msk [vmem:[%s7664_s30 + $0xe0] sm:$0xff] %vm1329_vm1, %v6831_v10  ;;  %6852 = vpow2.f32 %v5340_v56  ;;  %v8005_v3 = vpop.f32.mrb[85].mxu0  ;;  %v5641_v10 = vmul.f32 -1.442695, %v4594_v59 }
 0x21e   : > { %v6835_v2 = vpop.eup %6834  ;;  %5370 = vst.msk [vmem:[%s7664_s30 + $0xd8] sm:$0xff] %vm1329_vm1, %v6833_v63  ;;  %6854 = vpow2.f32 %v5638_v6  ;;  %v8007_v16 = vpop.f32.mrb[36].mxu1  ;;  %v5346_v63 = vmul.f32 -1.442695, %v2956_v47 }
 0x21f   : > { %v6837_v4 = vpop.eup %6836  ;;  %v4717_v5 = vadd.f32 1.0, %v6835_v2  ;;  %6856 = vpow2.f32 %v5345_v61  ;;  %v8009_v7 = vpop.f32.mrb[86].mxu0  ;;  %v2959_v2 = vadd.f32 %v7853_v24, %v7965_v40 }
 0x220   : > { %v6839_v8 = vpop.eup %6838  ;;  %v3074_v9 = vadd.f32 1.0, %v6837_v4  ;;  %6858 = vpow2.f32 %v5643_v62  ;;  %v8011_v26 = vpop.f32.mrb[37].mxu1  ;;  %v5644_v4 = vmul.f32 -1.442695, %v4597_v18 }
 0x221   : > { %v8013_v11 = vpop.f32.mrb[87].mxu0  ;;  %v6841_v14 = vpop.eup %6840  ;;  %6860 = vrcp.f32 %v4717_v5  ;;  %v4715_v30 = vadd.f32 1.0, %v6839_v8  ;;  %v4600_v5 = vadd.f32 %v7853_v24, %v7976_v50  ;;  %v4598_v50 = vadd.f32 %v7853_v24, %v7983_v53 }
 0x222   : > { %v8015_v15 = vpop.f32.mrb[38].mxu1  ;;  %v6843_v17 = vpop.eup %6842  ;;  %6862 = vrcp.f32 %v3074_v9  ;;  %v3079_v55 = vadd.f32 1.0, %v6841_v14  ;;  %v5344_v9 = vmul.f32 -1.442695, %v2954_v13  ;;  %v2957_v14 = vadd.f32 %v7853_v24, %v7971_v45 }
 0x223   : > { %v8017_v22 = vpop.f32.mrb[39].mxu1  ;;  %v6845_v23 = vpop.eup %6844  ;;  %6864 = vrcp.f32 %v4715_v30  ;;  %v4720_v25 = vadd.f32 1.0, %v6843_v17  ;;  %v5642_v17 = vmul.f32 -1.442695, %v4595_v28  ;;  %v5349_v45 = vmul.f32 -1.442695, %v2959_v2 }
 0x224   : > { %v6847_v43 = vpop.eup %6846  ;;  %6866 = vrcp.f32 %v3079_v55  ;;  %v3077_v29 = vadd.f32 1.0, %v6845_v23  ;;  %v8019_v34 = vpop.f32.mrb[88].mxu0  ;;  %v5647_v53 = vmul.f32 -1.442695, %v4600_v5 }
 0x225   : > { %v6849_v31 = vpop.eup %6848  ;;  %6868 = vrcp.f32 %v4720_v25  ;;  %v4718_v32 = vadd.f32 1.0, %v6847_v43  ;;  %v8023_v37 = vpop.f32.mrb[89].mxu0  ;;  %v2960_v43 = vadd.f32 %v7853_v24, %v7978_v51  ;;  %v5347_v51 = vmul.f32 -1.442695, %v2957_v14 }
 0x226   : > { %v6851_v35 = vpop.eup %6850  ;;  %6870 = vrcp.f32 %v3077_v29  ;;  %v3080_v54 = vadd.f32 1.0, %v6849_v31  ;;  %v8027_v41 = vpop.f32.mrb[40].mxu1 }
 0x227   : > { %v6853_v38 = vpop.eup %6852  ;;  %6872 = vrcp.f32 %v4718_v32  ;;  %v4721_v39 = vadd.f32 1.0, %v6851_v35  ;;  %v8029_v42 = vpop.f32.mrb[90].mxu0  ;;  %v4601_v35 = vadd.f32 %v7853_v24, %v7989_v27  ;;  %v5645_v27 = vmul.f32 -1.442695, %v4598_v50 }
 0x228   : > { %v6855_v44 = vpop.eup %6854  ;;  %6874 = vrcp.f32 %v3080_v54  ;;  %v3078_v46 = vadd.f32 1.0, %v6853_v38  ;;  %v8033_v48 = vpop.f32.mrb[41].mxu1  ;;  %v2958_v38 = vadd.f32 %v7853_v24, %v7985_v60 }
 0x229   : > { %v8035_v21 = vpop.f32.mrb[91].mxu0  ;;  %v6857_v12 = vpop.eup %6856  ;;  %6876 = vrcp.f32 %v4721_v39  ;;  %v4719_v52 = vadd.f32 1.0, %v6855_v44 }
 0x22a   : > { %v8039_v19 = vpop.f32.mrb[42].mxu1  ;;  %v6859_v1 = vpop.eup %6858  ;;  %6878 = vrcp.f32 %v3078_v46  ;;  %v3083_v56 = vadd.f32 1.0, %v6857_v12  ;;  %v5350_v46 = vmul.f32 -1.442695, %v2960_v43  ;;  %v5648_v12 = vmul.f32 -1.442695, %v4601_v35 }
 0x22b   : > { %v8043_v6 = vpop.f32.mrb[43].mxu1  ;;  %v6861_v33 = vpop.eup %6860  ;;  %6880 = vrcp.f32 %v4719_v52  ;;  %v4724_v61 = vadd.f32 1.0, %v6859_v1  ;;  %v5348_v52 = vmul.f32 -1.442695, %v2958_v38 }
 0x22c   : > { %v6863_v62 = vpop.eup %6862  ;;  %5668 = vst.msk [vmem:[%s7664_s30 + $0xf8] sm:$0xff] %vm1329_vm1, %v6861_v33  ;;  %6882 = vrcp.f32 %v3083_v56  ;;  %v8055_v8 = vpop.f32.mrb[92].mxu0 }
 0x22d   : > { %v6865_v20 = vpop.eup %6864  ;;  %5368 = vst.msk [vmem:[%s7664_s30 + $0xc8] sm:$0xff] %vm1329_vm1, %v6863_v62  ;;  %6884 = vrcp.f32 %v4724_v61  ;;  %v8061_v40 = vpop.f32.mrb[93].mxu0 }
 0x22e   : > { %v6867_v49 = vpop.eup %6866  ;;  %5666 = vst.msk [vmem:[%s7664_s30 + $0xe8] sm:$0xff] %vm1329_vm1, %v6865_v20  ;;  %6886 = vpow2.f32 %v5343_v57  ;;  %v8067_v55 = vpop.f32.mrb[44].mxu1 }
 0x22f   : > { %v6869_v30 = vpop.eup %6868  ;;  %5373 = vst.msk [vmem:[%s7664_s30 + $0x150] sm:$0xff] %vm1329_vm1, %v6867_v49  ;;  %6888 = vpow2.f32 %v5641_v10  ;;  %v8069_v23 = vpop.f32.mrb[94].mxu0 }
 0x230   : > { %v6871_v25 = vpop.eup %6870  ;;  %5671 = vst.msk [vmem:[%s7664_s30 + $0x170] sm:$0xff] %vm1329_vm1, %v6869_v30  ;;  %6890 = vpow2.f32 %v5346_v63  ;;  %v8075_v29 = vpop.f32.mrb[45].mxu1  ;;  %v4599_v30 = vadd.f32 %v7853_v24, %v7993_v58 }
 0x231   : > { %v8077_v31 = vpop.f32.mrb[95].mxu0  ;;  %v6873_v32 = vpop.eup %6872  ;;  %5371 = vst.msk [vmem:[%s7664_s30 + $0x140] sm:$0xff] %vm1329_vm1, %v6871_v25  ;;  %6892 = vpow2.f32 %v5644_v4  ;;  %v2963_v25 = vadd.f32 %v7853_v24, %v8001_v0  ;;  %v4602_v0 = vadd.f32 %v7853_v24, %v8011_v26 }
 0x232   : > { %v8083_v54 = vpop.f32.mrb[46].mxu1  ;;  %v6875_v36 = vpop.eup %6874  ;;  %5669 = vst.msk [vmem:[%s7664_s30 + $0x160] sm:$0xff] %vm1329_vm1, %v6873_v32  ;;  %6894 = vpow2.f32 %v5344_v9  ;;  %v4604_v32 = vadd.f32 %v7853_v24, %v8007_v16  ;;  %v5646_v38 = vmul.f32 -1.442695, %v4599_v30 }
 0x233   : > { %v8089_v39 = vpop.f32.mrb[47].mxu1  ;;  %v6877_v59 = vpop.eup %6876  ;;  %5374 = vst.msk [vmem:[%s7664_s30 + $0x158] sm:$0xff] %vm1329_vm1, %v6875_v36  ;;  %6896 = vpow2.f32 %v5642_v17  ;;  %v2961_v36 = vadd.f32 %v7853_v24, %v8005_v3  ;;  %v5353_v16 = vmul.f32 -1.442695, %v2963_v25 }
 0x234   : > { %v6879_v44 = vpop.eup %6878  ;;  %5672 = vst.msk [vmem:[%s7664_s30 + $0x178] sm:$0xff] %vm1329_vm1, %v6877_v59  ;;  %6898 = vpow2.f32 %v5349_v45 }
 0x235   : > { %v6881_v47 = vpop.eup %6880  ;;  %5372 = vst.msk [vmem:[%s7664_s30 + $0x148] sm:$0xff] %vm1329_vm1, %v6879_v44  ;;  %6900 = vpow2.f32 %v5647_v53  ;;  %v8116_v44 = vld [vmem:[%s8257_s2] ss:$0 sm:$0xff] }
 0x236   : > { %v6883_v60 = vpop.eup %6882  ;;  %5670 = vst.msk [vmem:[%s7664_s30 + $0x168] sm:$0xff] %vm1329_vm1, %v6881_v47  ;;  %6902 = vpow2.f32 %v5347_v51  ;;  %v2964_v3 = vadd.f32 %v8116_v44, %v8009_v7  ;;  %v5651_v47 = vmul.f32 -1.442695, %v4604_v32  ;;  %v4605_v24 = vadd.f32 %v8116_v44, %v8015_v15 }
 0x237   : > { %v6885_v18 = vpop.eup %6884  ;;  %5377 = vst.msk [vmem:[%s7664_s30 + $0x1d0] sm:$0xff] %vm1329_vm1, %v6883_v60  ;;  %6904 = vpow2.f32 %v5645_v27  ;;  %v2962_v60 = vadd.f32 %v8116_v44, %v8013_v11  ;;  %v5649_v7 = vmul.f32 -1.442695, %v4602_v0 }
 0x238   : > { %v6887_v1 = vpop.eup %6886  ;;  %5675 = vst.msk [vmem:[%s7664_s30 + $0x1f0] sm:$0xff] %vm1329_vm1, %v6885_v18  ;;  %6906 = vpow2.f32 %v5350_v46  ;;  %v4603_v18 = vadd.f32 %v8116_v44, %v8017_v22  ;;  %v5354_v15 = vmul.f32 -1.442695, %v2964_v3  ;;  %v5652_v11 = vmul.f32 -1.442695, %v4605_v24 }
 0x239   : > { %v6889_v56 = vpop.eup %6888  ;;  %v3081_v57 = vadd.f32 1.0, %v6887_v1  ;;  %6908 = vpow2.f32 %v5648_v12  ;;  %v5351_v12 = vmul.f32 -1.442695, %v2961_v36  ;;  %v4609_v3 = vadd.f32 %v8116_v44, %v8039_v19 }
 0x23a   : > { %v6891_v13 = vpop.eup %6890  ;;  %v4722_v33 = vadd.f32 1.0, %v6889_v56  ;;  %6910 = vpow2.f32 %v5348_v52  ;;  %v2967_v56 = vadd.f32 %v8116_v44, %v8019_v34  ;;  %v2966_v24 = vadd.f32 %v8116_v44, %v8035_v21 }
 0x23b   : > { %v6893_v61 = vpop.eup %6892  ;;  %6912 = vrcp.f32 %v3081_v57  ;;  %v3084_v10 = vadd.f32 1.0, %v6891_v13  ;;  %v4608_v13 = vadd.f32 %v8116_v44, %v8027_v41  ;;  %v2971_v19 = vadd.f32 %v8116_v44, %v8055_v8 }
 0x23c   : > { %v6895_v28 = vpop.eup %6894  ;;  %6914 = vrcp.f32 %v4722_v33  ;;  %v4725_v62 = vadd.f32 1.0, %v6893_v61  ;;  %v5352_v33 = vmul.f32 -1.442695, %v2962_v60  ;;  %v2965_v61 = vadd.f32 %v8116_v44, %v8023_v37 }
 0x23d   : > { %v6897_v63 = vpop.eup %6896  ;;  %6916 = vrcp.f32 %v3084_v10  ;;  %v3082_v2 = vadd.f32 1.0, %v6895_v28  ;;  %v5650_v10 = vmul.f32 -1.442695, %v4603_v18  ;;  %v4606_v28 = vadd.f32 %v8116_v44, %v8033_v48 }
 0x23e   : > { %v6899_v20 = vpop.eup %6898  ;;  %6918 = vrcp.f32 %v4725_v62  ;;  %v4723_v4 = vadd.f32 1.0, %v6897_v63  ;;  %v5357_v62 = vmul.f32 -1.442695, %v2967_v56  ;;  %v5655_v37 = vmul.f32 -1.442695, %v4608_v13 }
 0x23f   : > { %v6901_v5 = vpop.eup %6900  ;;  %6920 = vrcp.f32 %v3082_v2  ;;  %v3087_v49 = vadd.f32 1.0, %v6899_v20  ;;  %v5355_v20 = vmul.f32 -1.442695, %v2965_v61  ;;  %v5653_v48 = vmul.f32 -1.442695, %v4606_v28 }
 0x240   : > { %v6903_v9 = vpop.eup %6902  ;;  %6922 = vrcp.f32 %v4723_v4  ;;  %v4728_v14 = vadd.f32 1.0, %v6901_v5  ;;  %v4607_v60 = vadd.f32 %v8116_v44, %v8043_v6  ;;  %v5656_v21 = vmul.f32 -1.442695, %v4609_v3 }
 0x241   : > { %v6905_v17 = vpop.eup %6904  ;;  %6924 = vrcp.f32 %v3087_v49  ;;  %v3085_v50 = vadd.f32 1.0, %v6903_v9  ;;  %v5356_v6 = vmul.f32 -1.442695, %v2966_v24  ;;  %v4610_v13 = vadd.f32 %v8116_v44, %v8075_v29 }
 0x242   : > { %v6907_v45 = vpop.eup %6906  ;;  %6926 = vrcp.f32 %v4728_v14  ;;  %v4726_v43 = vadd.f32 1.0, %v6905_v17  ;;  %v5654_v8 = vmul.f32 -1.442695, %v4607_v60  ;;  %v2970_v28 = vadd.f32 %v8116_v44, %v8077_v31 }
 0x243   : > { %v6909_v53 = vpop.eup %6908  ;;  %6928 = vrcp.f32 %v3085_v50  ;;  %v3088_v35 = vadd.f32 1.0, %v6907_v45 }
 0x244   : > { %v6911_v58 = vpop.eup %6910  ;;  %6930 = vrcp.f32 %v4726_v43  ;;  %v4729_v51 = vadd.f32 1.0, %v6909_v53 }
 0x245   : > { %v6913_v59 = vpop.eup %6912  ;;  %6932 = vrcp.f32 %v3088_v35  ;;  %v3086_v27 = vadd.f32 1.0, %v6911_v58 }
 0x246   : > { %v6915_v46 = vpop.eup %6914  ;;  %5375 = vst.msk [vmem:[%s7664_s30 + $0x1c0] sm:$0xff] %vm1329_vm1, %v6913_v59  ;;  %6934 = vrcp.f32 %v4729_v51  ;;  %v2968_v59 = vadd.f32 %v8116_v44, %v8029_v42 }
 0x247   : > { %v6917_v26 = vpop.eup %6916  ;;  %5673 = vst.msk [vmem:[%s7664_s30 + $0x1e0] sm:$0xff] %vm1329_vm1, %v6915_v46  ;;  %6936 = vrcp.f32 %v3086_v27 }
 0x248   : > { %v6919_v52 = vpop.eup %6918  ;;  %5378 = vst.msk [vmem:[%s7664_s30 + $0x1d8] sm:$0xff] %vm1329_vm1, %v6917_v26  ;;  %6938 = vpow2.f32 %v5646_v38 }
 0x249   : > { %v6921_v1 = vpop.eup %6920  ;;  %5676 = vst.msk [vmem:[%s7664_s30 + $0x1f8] sm:$0xff] %vm1329_vm1, %v6919_v52  ;;  %6940 = vpow2.f32 %v5353_v16 }
 0x24a   : > { %v6923_v57 = vpop.eup %6922  ;;  %5376 = vst.msk [vmem:[%s7664_s30 + $0x1c8] sm:$0xff] %vm1329_vm1, %v6921_v1  ;;  %6942 = vpow2.f32 %v5651_v47 }
 0x24b   : > { %v6925_v22 = vpop.eup %6924  ;;  %5674 = vst.msk [vmem:[%s7664_s30 + $0x1e8] sm:$0xff] %vm1329_vm1, %v6923_v57  ;;  %6944 = vpow2.f32 %v5351_v12  ;;  %v2969_v57 = vadd.f32 %v8116_v44, %v8061_v40 }
 0x24c   : > { %v6927_v34 = vpop.eup %6926  ;;  %5381 = vst.msk [vmem:[%s7664_s30 + $0x250] sm:$0xff] %vm1329_vm1, %v6925_v22  ;;  %6946 = vpow2.f32 %v5649_v7  ;;  %v5358_v7 = vmul.f32 -1.442695, %v2968_v59 }
 0x24d   : > { %v6929_v41 = vpop.eup %6928  ;;  %5679 = vst.msk [vmem:[%s7664_s30 + $0x270] sm:$0xff] %vm1329_vm1, %v6927_v34  ;;  %6948 = vpow2.f32 %v5354_v15  ;;  %v4612_v15 = vadd.f32 %v8116_v44, %v8067_v55  ;;  %v5361_v55 = vmul.f32 -1.442695, %v2971_v19  ;;  %v4613_v34 = vadd.f32 %v8116_v44, %v8083_v54 }
 0x24e   : > { %v6931_v63 = vpop.eup %6930  ;;  %5379 = vst.msk [vmem:[%s7664_s30 + $0x240] sm:$0xff] %vm1329_vm1, %v6929_v41  ;;  %6950 = vpow2.f32 %v5652_v11  ;;  %v5657_v41 = vmul.f32 -1.442695, %v4610_v13 }
 0x24f   : > { %v6933_v2 = vpop.eup %6932  ;;  %5677 = vst.msk [vmem:[%s7664_s30 + $0x260] sm:$0xff] %vm1329_vm1, %v6931_v63  ;;  %6952 = vpow2.f32 %v5352_v33  ;;  %v2972_v33 = vadd.f32 %v8116_v44, %v8069_v23  ;;  %v5659_v40 = vmul.f32 -1.442695, %v4612_v15  ;;  %v5660_v31 = vmul.f32 -1.442695, %v4613_v34 }
 0x250   : > { %v6935_v4 = vpop.eup %6934  ;;  %5382 = vst.msk [vmem:[%s7664_s30 + $0x258] sm:$0xff] %vm1329_vm1, %v6933_v2  ;;  %6954 = vpow2.f32 %v5650_v10  ;;  %v5359_v10 = vmul.f32 -1.442695, %v2969_v57 }
 0x251   : > { %v6937_v5 = vpop.eup %6936  ;;  %5680 = vst.msk [vmem:[%s7664_s30 + $0x278] sm:$0xff] %vm1329_vm1, %v6935_v4  ;;  %6956 = vpow2.f32 %v5357_v62  ;;  %v4611_v62 = vadd.f32 %v8116_v44, %v8089_v39  ;;  %v5362_v63 = vmul.f32 -1.442695, %v2972_v33 }
 0x252   : > { %v6939_v49 = vpop.eup %6938  ;;  %5380 = vst.msk [vmem:[%s7664_s30 + $0x248] sm:$0xff] %vm1329_vm1, %v6937_v5  ;;  %6958 = vpow2.f32 %v5655_v37 }
 0x253   : > { %v6941_v9 = vpop.eup %6940  ;;  %v4727_v14 = vadd.f32 1.0, %v6939_v49  ;;  %6960 = vpow2.f32 %v5355_v20  ;;  %v5360_v20 = vmul.f32 -1.442695, %v2970_v28  ;;  %v5658_v39 = vmul.f32 -1.442695, %v4611_v62 }
 0x254   : > { %v6943_v30 = vpop.eup %6942  ;;  %v3091_v17 = vadd.f32 1.0, %v6941_v9  ;;  %6962 = vpow2.f32 %v5653_v48 }
 0x255   : > { %v6945_v50 = vpop.eup %6944  ;;  %6964 = vrcp.f32 %v4727_v14  ;;  %v4732_v25 = vadd.f32 1.0, %v6943_v30 }
 0x256   : > { %v6947_v45 = vpop.eup %6946  ;;  %6966 = vrcp.f32 %v3091_v17  ;;  %v3089_v43 = vadd.f32 1.0, %v6945_v50 }
 0x257   : > { %v6949_v32 = vpop.eup %6948  ;;  %6968 = vrcp.f32 %v4732_v25  ;;  %v4730_v53 = vadd.f32 1.0, %v6947_v45 }
 0x258   : > { %v6951_v35 = vpop.eup %6950  ;;  %6970 = vrcp.f32 %v3089_v43  ;;  %v3092_v36 = vadd.f32 1.0, %v6949_v32 }
 0x259   : > { %v6953_v58 = vpop.eup %6952  ;;  %6972 = vrcp.f32 %v4730_v53  ;;  %v4733_v51 = vadd.f32 1.0, %v6951_v35 }
 0x25a   : > { %v6955_v38 = vpop.eup %6954  ;;  %6974 = vrcp.f32 %v3092_v36  ;;  %v3090_v0 = vadd.f32 1.0, %v6953_v58 }
 0x25b   : > { %v6957_v27 = vpop.eup %6956  ;;  %6976 = vrcp.f32 %v4733_v51  ;;  %v4731_v16 = vadd.f32 1.0, %v6955_v38 }
 0x25c   : > { %v6959_v46 = vpop.eup %6958  ;;  %6978 = vrcp.f32 %v3090_v0  ;;  %v3095_v47 = vadd.f32 1.0, %v6957_v27 }
 0x25d   : > { %v6961_v26 = vpop.eup %6960  ;;  %6980 = vrcp.f32 %v4731_v16  ;;  %v4736_v12 = vadd.f32 1.0, %v6959_v46 }
 0x25e   : > { %v6963_v42 = vpop.eup %6962  ;;  %6982 = vrcp.f32 %v3095_v47  ;;  %v3093_v52 = vadd.f32 1.0, %v6961_v26 }
 0x25f   : > { %v6965_v18 = vpop.eup %6964  ;;  %6984 = vrcp.f32 %v4736_v12  ;;  %v4734_v1 = vadd.f32 1.0, %v6963_v42 }
 0x260   : > { %v6967_v56 = vpop.eup %6966  ;;  %5678 = vst.msk [vmem:[%s7664_s30 + $0x268] sm:$0xff] %vm1329_vm1, %v6965_v18  ;;  %6986 = vrcp.f32 %v3093_v52 }
 0x261   : > { %v6969_v11 = vpop.eup %6968  ;;  %5385 = vst.msk [vmem:[%s7664_s30 + $0x2d0] sm:$0xff] %vm1329_vm1, %v6967_v56  ;;  %6988 = vrcp.f32 %v4734_v1 }
 0x262   : > { %v6971_v22 = vpop.eup %6970  ;;  %5683 = vst.msk [vmem:[%s7664_s30 + $0x2f0] sm:$0xff] %vm1329_vm1, %v6969_v11  ;;  %6990 = vpow2.f32 %v5358_v7 }
 0x263   : > { %v6973_v61 = vpop.eup %6972  ;;  %5383 = vst.msk [vmem:[%s7664_s30 + $0x2c0] sm:$0xff] %vm1329_vm1, %v6971_v22  ;;  %6992 = vpow2.f32 %v5656_v21 }
 0x264   : > { %v6975_v29 = vpop.eup %6974  ;;  %5681 = vst.msk [vmem:[%s7664_s30 + $0x2e0] sm:$0xff] %vm1329_vm1, %v6973_v61  ;;  %6994 = vpow2.f32 %v5356_v6 }
 0x265   : > { %v6977_v23 = vpop.eup %6976  ;;  %5386 = vst.msk [vmem:[%s7664_s30 + $0x2d8] sm:$0xff] %vm1329_vm1, %v6975_v29  ;;  %6996 = vpow2.f32 %v5654_v8 }
 0x266   : > { %v6979_v54 = vpop.eup %6978  ;;  %5684 = vst.msk [vmem:[%s7664_s30 + $0x2f8] sm:$0xff] %vm1329_vm1, %v6977_v23  ;;  %6998 = vpow2.f32 %v5361_v55 }
 0x267   : > { %v6981_v37 = vpop.eup %6980  ;;  %5384 = vst.msk [vmem:[%s7664_s30 + $0x2c8] sm:$0xff] %vm1329_vm1, %v6979_v54  ;;  %7000 = vpow2.f32 %v5659_v40 }
 0x268   : > { %v6983_v2 = vpop.eup %6982  ;;  %5682 = vst.msk [vmem:[%s7664_s30 + $0x2e8] sm:$0xff] %vm1329_vm1, %v6981_v37  ;;  %7002 = vpow2.f32 %v5359_v10 }
 0x269   : > { %v6985_v4 = vpop.eup %6984  ;;  %5389 = vst.msk [vmem:[%s7664_s30 + $0x350] sm:$0xff] %vm1329_vm1, %v6983_v2  ;;  %7004 = vpow2.f32 %v5657_v41 }
 0x26a   : > { %v6987_v44 = vpop.eup %6986  ;;  %5687 = vst.msk [vmem:[%s7664_s30 + $0x370] sm:$0xff] %vm1329_vm1, %v6985_v4  ;;  %7006 = vpow2.f32 %v5362_v63 }
 0x26b   : > { %v6989_v48 = vpop.eup %6988  ;;  %5387 = vst.msk [vmem:[%s7664_s30 + $0x340] sm:$0xff] %vm1329_vm1, %v6987_v44  ;;  %7008 = vpow2.f32 %v5660_v31 }
 0x26c   : > { %v6991_v5 = vpop.eup %6990  ;;  %5685 = vst.msk [vmem:[%s7664_s30 + $0x360] sm:$0xff] %vm1329_vm1, %v6989_v48  ;;  %7010 = vpow2.f32 %v5360_v20 }
 0x26d   : > { %v6993_v49 = vpop.eup %6992  ;;  %v3096_v9 = vadd.f32 1.0, %v6991_v5  ;;  %7012 = vpow2.f32 %v5658_v39 }
 0x26e   : > { %v6995_v14 = vpop.eup %6994  ;;  %v4737_v30 = vadd.f32 1.0, %v6993_v49 }
 0x26f   : > { %v6997_v17 = vpop.eup %6996  ;;  %7014 = vrcp.f32 %v3096_v9  ;;  %v3094_v50 = vadd.f32 1.0, %v6995_v14 }
 0x270   : > { %v6999_v25 = vpop.eup %6998  ;;  %7016 = vrcp.f32 %v4737_v30  ;;  %v4735_v45 = vadd.f32 1.0, %v6997_v17 }
 0x271   : > { %v7001_v43 = vpop.eup %7000  ;;  %7018 = vrcp.f32 %v3094_v50  ;;  %v3099_v32 = vadd.f32 1.0, %v6999_v25 }
 0x272   : > { %v7003_v53 = vpop.eup %7002  ;;  %7020 = vrcp.f32 %v4735_v45  ;;  %v4740_v35 = vadd.f32 1.0, %v7001_v43 }
 0x273   : > { %v7005_v36 = vpop.eup %7004  ;;  %7022 = vrcp.f32 %v3099_v32  ;;  %v3097_v58 = vadd.f32 1.0, %v7003_v53 }
 0x274   : > { %v7007_v51 = vpop.eup %7006  ;;  %7024 = vrcp.f32 %v4740_v35  ;;  %v4738_v38 = vadd.f32 1.0, %v7005_v36 }
 0x275   : > { %v7009_v0 = vpop.eup %7008  ;;  %7026 = vrcp.f32 %v3097_v58  ;;  %v3100_v59 = vadd.f32 1.0, %v7007_v51 }
 0x276   : > { %v7011_v27 = vpop.eup %7010  ;;  %7028 = vrcp.f32 %v4738_v38  ;;  %v4741_v16 = vadd.f32 1.0, %v7009_v0 }
 0x277   : > { %v7013_v3 = vpop.eup %7012  ;;  %7030 = vrcp.f32 %v3100_v59  ;;  %v3098_v46 = vadd.f32 1.0, %v7011_v27 }
 0x278   : > { %7032 = vrcp.f32 %v4741_v16  ;;  %v4739_v47 = vadd.f32 1.0, %v7013_v3 }
 0x279   : > { %v7015_v24 = vpop.eup %7014  ;;  %7034 = vrcp.f32 %v3098_v46 }
 0x27a   : > { %v7017_v26 = vpop.eup %7016  ;;  %5390 = vst.msk [vmem:[%s7664_s30 + $0x358] sm:$0xff] %vm1329_vm1, %v7015_v24  ;;  %7036 = vrcp.f32 %v4739_v47 }
 0x27b   : > { %v7019_v12 = vpop.eup %7018  ;;  %5688 = vst.msk [vmem:[%s7664_s30 + $0x378] sm:$0xff] %vm1329_vm1, %v7017_v26 }
 0x27c   : > { %v7021_v60 = vpop.eup %7020  ;;  %5388 = vst.msk [vmem:[%s7664_s30 + $0x348] sm:$0xff] %vm1329_vm1, %v7019_v12 }
 0x27d   : > { %v7023_v42 = vpop.eup %7022  ;;  %5686 = vst.msk [vmem:[%s7664_s30 + $0x368] sm:$0xff] %vm1329_vm1, %v7021_v60 }
 0x27e   : > { %v7025_v52 = vpop.eup %7024  ;;  %5393 = vst.msk [vmem:[%s7664_s30 + $0x3d0] sm:$0xff] %vm1329_vm1, %v7023_v42 }
 0x27f   : > { %v7027_v7 = vpop.eup %7026  ;;  %5691 = vst.msk [vmem:[%s7664_s30 + $0x3f0] sm:$0xff] %vm1329_vm1, %v7025_v52 }
 0x280   : > { %v7029_v19 = vpop.eup %7028  ;;  %5391 = vst.msk [vmem:[%s7664_s30 + $0x3c0] sm:$0xff] %vm1329_vm1, %v7027_v7 }
 0x281   : > { %v7031_v18 = vpop.eup %7030  ;;  %5689 = vst.msk [vmem:[%s7664_s30 + $0x3e0] sm:$0xff] %vm1329_vm1, %v7029_v19 }
 0x282   : > { %v7033_v1 = vpop.eup %7032  ;;  %5394 = vst.msk [vmem:[%s7664_s30 + $0x3d8] sm:$0xff] %vm1329_vm1, %v7031_v18 }
 0x283   : > { %v7035_v21 = vpop.eup %7034  ;;  %5692 = vst.msk [vmem:[%s7664_s30 + $0x3f8] sm:$0xff] %vm1329_vm1, %v7033_v1 }
 0x284   : > { %v7037_v15 = vpop.eup %7036  ;;  %5392 = vst.msk [vmem:[%s7664_s30 + $0x3c8] sm:$0xff] %vm1329_vm1, %v7035_v21 }
 0x285   : > { %5690 = vst.msk [vmem:[%s7664_s30 + $0x3e8] sm:$0xff] %vm1329_vm1, %v7037_v15 }
 0x286 PF: > { %s13_s18 = sadd.s32 1, %s7094_s18   ;;  %s8260_s12 = smov %s7074_s13 }
 0x287   : > { %p10_p12 = scmp.ge.s32.totalorder %s13_s18, 10   ;;  %s8261_s13 = smov %s7167_s25 }
 0x288   : > { %s8262_s14 = smov %s7086_s16  ;;  %s8263_s15 = smov %s7090_s17 }
 0x289   : > { %s8264_s16 = smov %s8267_s19  ;;  %s8265_s17 = smov %s8271_s20 }
 0x28a   :  { %12 = sbr.rel (!%p10_p12) target bundleno = 4 (0x4), region = 128 }

</bundles_post_ra>
